<compile_context>
chip_gen: v5e
topology: v5e:2x2
jax: 0.10.0
libtpu: 0.0.40
codegen_flags: <defaults>
</compile_context>

<pallas_src>
import functools

import jax
import jax.numpy as jnp
from jax.experimental import pallas as pl
from jax.experimental.pallas import tpu as pltpu

INPUT_DIM = (1, 28, 28)
LATENT_DIM = 20
INPUT_DIM_FLAT = 1 * 28 * 28


# ----------------------------------------------------------------------------
# Pallas kernel 1: K-tiled GEMM + bias + ReLU (conv layers via im2col).
# Grid = (K // tk,), accumulator kept in f32 VMEM scratch.
# ----------------------------------------------------------------------------
def _gemm_bias_relu_kernel(x_ref, w_ref, b_ref, o_ref, acc_ref, *, relu):
    k = pl.program_id(0)

    @pl.when(k == 0)
    def _():
        acc_ref[...] = jnp.zeros_like(acc_ref)

    acc_ref[...] += jnp.dot(x_ref[...], w_ref[...],
                            preferred_element_type=jnp.float32)

    @pl.when(k == pl.num_programs(0) - 1)
    def _():
        out = acc_ref[...] + b_ref[...]          # f32 epilogue
        if relu:
            out = jnp.maximum(out, 0.0)
        o_ref[...] = out.astype(o_ref.dtype)


def _pick_tk(K, cap=1024):
    """Largest multiple of 128 that divides K and is <= cap (else full K)."""
    if K % 128 != 0:
        return K
    tk = 128
    cand = 128
    while cand <= min(cap, K):
        if K % cand == 0:
            tk = cand
        cand += 128
    return tk


def gemm_bias_relu_pallas(x, w, b, relu, out_dtype):
    """x: (M, K) bf16, w: (K, N) bf16, b: (N,) f32  ->  (M, N) = relu?(x@w + b)."""
    M, K = x.shape
    N = w.shape[1]
    tk = _pick_tk(K)
    nk = K // tk
    b2 = b.reshape(1, N).astype(jnp.float32)
    return pl.pallas_call(
        functools.partial(_gemm_bias_relu_kernel, relu=relu),
        out_shape=jax.ShapeDtypeStruct((M, N), out_dtype),
        grid=(nk,),
        in_specs=[
            pl.BlockSpec((M, tk), lambda k: (0, k)),
            pl.BlockSpec((tk, N), lambda k: (k, 0)),
            pl.BlockSpec((1, N), lambda k: (0, 0)),
        ],
        out_specs=pl.BlockSpec((M, N), lambda k: (0, 0)),
        scratch_shapes=[pltpu.VMEM((M, N), jnp.float32)],
        compiler_params=pltpu.CompilerParams(
            dimension_semantics=("arbitrary",)),
    )(x, w, b2)


# ----------------------------------------------------------------------------
# Pallas kernel 2: the whole FC chain fused (fc -> latent -> de_fc1 -> de_fc2).
# All weights live in VMEM for the call; intermediates never touch HBM.
# ----------------------------------------------------------------------------
def _fc_fused_kernel(h_ref, wfc_ref, bfc_ref, wlt_ref, blt_ref,
                     wd1_ref, bd1_ref, wd2_ref, bd2_ref, z_ref, r_ref):
    h = h_ref[...]                                                 # (M, 2048) bf16
    a = jnp.dot(h, wfc_ref[...], preferred_element_type=jnp.float32) + bfc_ref[...]
    a = jnp.maximum(a, 0.0).astype(jnp.bfloat16)                   # (M, 400)
    z = jnp.dot(a, wlt_ref[...], preferred_element_type=jnp.float32) + blt_ref[...]
    d = jnp.dot(z.astype(jnp.bfloat16), wd1_ref[...],
                preferred_element_type=jnp.float32) + bd1_ref[...]
    d = jnp.maximum(d, 0.0).astype(jnp.bfloat16)                   # (M, 400)
    r = jnp.dot(d, wd2_ref[...], preferred_element_type=jnp.float32) + bd2_ref[...]
    z_ref[...] = z.astype(z_ref.dtype)
    r_ref[...] = r.astype(r_ref.dtype)


def _full_spec(shape):
    n = len(shape)

    def idx(i):
        return (0,) * n

    return pl.BlockSpec(tuple(shape), idx)


def fc_fused_pallas(h, kp):
    M = h.shape[0]
    args = (h,
            kp['fc_w'], kp['fc_b'].reshape(1, -1),
            kp['latent_w'], kp['latent_b'].reshape(1, -1),
            kp['de_fc1_w'], kp['de_fc1_b'].reshape(1, -1),
            kp['de_fc2_w'], kp['de_fc2_b'].reshape(1, -1))
    return pl.pallas_call(
        _fc_fused_kernel,
        out_shape=(jax.ShapeDtypeStruct((M, LATENT_DIM), jnp.float32),
                   jax.ShapeDtypeStruct((M, INPUT_DIM_FLAT), jnp.float32)),
        grid=(1,),
        in_specs=[_full_spec(a.shape) for a in args],
        out_specs=(_full_spec((M, LATENT_DIM)),
                   _full_spec((M, INPUT_DIM_FLAT))),
        compiler_params=pltpu.CompilerParams(
            dimension_semantics=("arbitrary",)),
    )(*args)


# ----------------------------------------------------------------------------
# Plain-JAX glue: patch extraction (one XLA op) and the jnp reference GEMM.
# ----------------------------------------------------------------------------
def extract_patches(x_nhwc, ksz, stride, pad):
    """NHWC input -> (N*OH*OW, Cin*KH*KW) patches, channel-major feature order."""
    patches = jax.lax.conv_general_dilated_patches(
        x_nhwc,
        filter_shape=(ksz, ksz),
        window_strides=(stride, stride),
        padding=((pad, pad), (pad, pad)),
        dimension_numbers=("NHWC", "HWIO", "NHWC"))
    n, oh, ow, k = patches.shape
    return patches.reshape(n * oh * ow, k), oh, ow


def gemm_bias_act_ref(x, w, b, relu):
    out = jnp.dot(x, w, preferred_element_type=jnp.float32) + b[None, :].astype(jnp.float32)
    if relu:
        out = jnp.maximum(out, 0.0)
    return out


def conv2d_relu(x_nhwc, wmat, b, ksz, stride, pad, use_pallas=True):
    n = x_nhwc.shape[0]
    patches, oh, ow = extract_patches(x_nhwc, ksz, stride, pad)
    if use_pallas:
        out = gemm_bias_relu_pallas(patches, wmat, b, relu=True,
                                    out_dtype=jnp.bfloat16)
    else:
        out = gemm_bias_act_ref(patches, wmat, b, True).astype(jnp.bfloat16)
    return out.reshape(n, oh, ow, wmat.shape[1])


# ----------------------------------------------------------------------------
# Parameter init (PyTorch layout, f32) and conversion to kernel-ready layout.
# ----------------------------------------------------------------------------
def init_params(key):
    ks = jax.random.split(key, 14)

    def conv_init(kw_, kb_, cout, cin, kh, kwid):
        fan_out = cout * kh * kwid
        std = (2.0 / fan_out) ** 0.5
        w = std * jax.random.normal(kw_, (cout, cin, kh, kwid), jnp.float32)
        bound = 1.0 / (cin * kh * kwid) ** 0.5
        b = jax.random.uniform(kb_, (cout,), jnp.float32, -bound, bound)
        return w, b

    def lin_init(kw_, kb_, fout, fin):
        bound = 1.0 / fin ** 0.5
        w = jax.random.uniform(kw_, (fout, fin), jnp.float32, -bound, bound)
        b = jax.random.uniform(kb_, (fout,), jnp.float32, -bound, bound)
        return w, b

    p = {}
    p['conv1_w'], p['conv1_b'] = conv_init(ks[0], ks[1], 64, 1, 8, 8)
    p['conv2_w'], p['conv2_b'] = conv_init(ks[2], ks[3], 128, 64, 6, 6)
    p['conv3_w'], p['conv3_b'] = conv_init(ks[4], ks[5], 128, 128, 5, 5)
    p['fc_w'], p['fc_b'] = lin_init(ks[6], ks[7], 400, 2048)
    p['latent_w'], p['latent_b'] = lin_init(ks[8], ks[9], LATENT_DIM, 400)
    p['de_fc1_w'], p['de_fc1_b'] = lin_init(ks[10], ks[11], 400, LATENT_DIM)
    p['de_fc2_w'], p['de_fc2_b'] = lin_init(ks[12], ks[13], INPUT_DIM_FLAT, 400)
    return p


def prepare_params(p):
    """PyTorch-layout f32 params -> bf16 GEMM matrices + f32 biases."""
    def conv_w(w):                       # (Cout,Cin,KH,KW) -> (Cin*KH*KW, Cout)
        cout = w.shape[0]
        return w.reshape(cout, -1).T.astype(jnp.bfloat16)

    kp = {
        'conv1_w': conv_w(p['conv1_w']), 'conv1_b': p['conv1_b'].astype(jnp.float32),
        'conv2_w': conv_w(p['conv2_w']), 'conv2_b': p['conv2_b'].astype(jnp.float32),
        'conv3_w': conv_w(p['conv3_w']), 'conv3_b': p['conv3_b'].astype(jnp.float32),
    }
    # fc weight: PyTorch (400, 2048) where the 2048 axis is NCHW-flat (C=128,H=4,W=4).
    # Our activations are NHWC-flattened, so permute the input axis accordingly.
    C, H, W = 128, 4, 4
    wfc = p['fc_w'].reshape(400, C, H, W).transpose(0, 2, 3, 1).reshape(400, C * H * W)
    kp['fc_w'] = wfc.T.astype(jnp.bfloat16)
    kp['fc_b'] = p['fc_b'].astype(jnp.float32)
    kp['latent_w'] = p['latent_w'].T.astype(jnp.bfloat16)
    kp['latent_b'] = p['latent_b'].astype(jnp.float32)
    kp['de_fc1_w'] = p['de_fc1_w'].T.astype(jnp.bfloat16)
    kp['de_fc1_b'] = p['de_fc1_b'].astype(jnp.float32)
    kp['de_fc2_w'] = p['de_fc2_w'].T.astype(jnp.bfloat16)
    kp['de_fc2_b'] = p['de_fc2_b'].astype(jnp.float32)
    return kp


# ----------------------------------------------------------------------------
# Forward pass (matches Autoencoder.forward -> (z, out)).
# ----------------------------------------------------------------------------
def autoencoder_forward(kp, x, use_pallas=True):
    n = x.shape[0]
    h = jnp.transpose(x, (0, 2, 3, 1)).astype(jnp.bfloat16)      # NCHW -> NHWC
    h = conv2d_relu(h, kp['conv1_w'], kp['conv1_b'], 8, 2, 3, use_pallas)  # 28 -> 14
    h = conv2d_relu(h, kp['conv2_w'], kp['conv2_b'], 6, 2, 3, use_pallas)  # 14 -> 8
    h = conv2d_relu(h, kp['conv3_w'], kp['conv3_b'], 5, 1, 0, use_pallas)  # 8 -> 4
    h = h.reshape(n, -1)                           # NHWC flatten (fc_w pre-permuted)
    if use_pallas:
        z, r = fc_fused_pallas(h, kp)
    else:
        a = gemm_bias_act_ref(h, kp['fc_w'], kp['fc_b'], True).astype(jnp.bfloat16)
        z = gemm_bias_act_ref(a, kp['latent_w'], kp['latent_b'], False)
        d = gemm_bias_act_ref(z.astype(jnp.bfloat16), kp['de_fc1_w'],
                              kp['de_fc1_b'], True).astype(jnp.bfloat16)
        r = gemm_bias_act_ref(d, kp['de_fc2_w'], kp['de_fc2_b'], False)
    out = r.reshape((n,) + INPUT_DIM)
    return z, out


if __name__ == "__main__":
    key = jax.random.PRNGKey(0)
    k_params, k_x = jax.random.split(key)
    params = init_params(k_params)          # PyTorch-layout f32 params
    kparams = prepare_params(params)        # kernel-ready bf16 mats / f32 biases

    # Batch=2, NCHW input fixed at (1, 28, 28) by the architecture (fc expects 2048).
    x = jax.random.normal(k_x, (2,) + INPUT_DIM, jnp.float32)

    fwd = jax.jit(functools.partial(autoencoder_forward, use_pallas=True))
    z, out = fwd(kparams, x)
    jax.block_until_ready((z, out))

    assert z.shape == (2, LATENT_DIM)
    assert out.shape == (2,) + INPUT_DIM

    # Cross-check the Pallas path against a pure-jnp reference that uses the
    # same bf16 operands / f32 accumulation.
    ref_fwd = jax.jit(functools.partial(autoencoder_forward, use_pallas=False))
    z_ref, out_ref = ref_fwd(kparams, x)
    assert jnp.allclose(z, z_ref, atol=3e-2, rtol=3e-2), "latent mismatch"
    assert jnp.allclose(out, out_ref, atol=3e-2, rtol=3e-2), "recon mismatch"

    print("KERNEL_OK")
</pallas_src>

<mosaic_0001>
module attributes {stable_mosaic.version = 11 : i64} {
  func.func @_gemm_bias_relu_kernel(%arg0: i32, %arg1: memref<392x64xbf16, #tpu.memory_space<vmem>>, %arg2: memref<64x64xbf16, #tpu.memory_space<vmem>>, %arg3: memref<1x64xf32, #tpu.memory_space<vmem>>, %arg4: memref<392x64xbf16, #tpu.memory_space<vmem>>, %arg5: memref<392x64xf32, #tpu.memory_space<vmem>>) attributes {dimension_semantics = [#tpu.dimension_semantics<arbitrary>], iteration_bounds = array<i64: 1>, scalar_prefetch = 0 : i64, scratch_operands = 1 : i64, tpu.core_type = #tpu.core_type<tc>, window_params = [{transform_indices = @transform_0, window_bounds = array<i64: 392, 64>}, {transform_indices = @transform_1, window_bounds = array<i64: 64, 64>}, {pipeline_mode = #tpu.pipeline_mode<synchronous>, transform_indices = @transform_2, window_bounds = array<i64: 1, 64>}, {pipeline_mode = #tpu.pipeline_mode<synchronous>, transform_indices = @transform_3, window_bounds = array<i64: 392, 64>}]} {
    %c0_i32 = arith.constant 0 : i32
    %0 = arith.cmpi eq, %arg0, %c0_i32 : i32
    %1 = arith.extui %0 : i1 to i32
    %c0_i32_0 = arith.constant 0 : i32
    %2 = arith.cmpi ne, %1, %c0_i32_0 : i32
    scf.if %2 {
      %cst_10 = arith.constant 0.000000e+00 : f32
      %12 = vector.broadcast %cst_10 : f32 to vector<392x64xf32>
      %c0_11 = arith.constant 0 : index
      %c0_12 = arith.constant 0 : index
      %13 = vector.load %arg5[%c0_11, %c0_12] : memref<392x64xf32, #tpu.memory_space<vmem>>, vector<392x64xf32>
      tpu.vector_store %arg5[%c0_11, %c0_12], %12 {strides = array<i32>} : memref<392x64xf32, #tpu.memory_space<vmem>>, vector<392x64xf32>,
    } else {
    }
    %c0 = arith.constant 0 : index
    %c0_1 = arith.constant 0 : index
    %3 = vector.load %arg5[%c0, %c0_1] : memref<392x64xf32, #tpu.memory_space<vmem>>, vector<392x64xf32>
    %c0_2 = arith.constant 0 : index
    %c0_3 = arith.constant 0 : index
    %4 = vector.load %arg1[%c0_2, %c0_3] : memref<392x64xbf16, #tpu.memory_space<vmem>>, vector<392x64xbf16>
    %c0_4 = arith.constant 0 : index
    %c0_5 = arith.constant 0 : index
    %5 = vector.load %arg2[%c0_4, %c0_5] : memref<64x64xbf16, #tpu.memory_space<vmem>>, vector<64x64xbf16>
    %cst = arith.constant dense<0.000000e+00> : vector<392x64xf32>
    %6 = tpu.matmul %4, %5, %cst {dimension_numbers = #tpu.dot_dimension_numbers<[1], [0], [0], [1], [0, 0, 1, 1], [], []>} : vector<392x64xbf16>, vector<64x64xbf16>, vector<392x64xf32> -> vector<392x64xf32>
    %7 = arith.addf %3, %6 : vector<392x64xf32>
    %c0_6 = arith.constant 0 : index
    %c0_7 = arith.constant 0 : index
    %8 = vector.load %arg5[%c0_6, %c0_7] : memref<392x64xf32, #tpu.memory_space<vmem>>, vector<392x64xf32>
    tpu.vector_store %arg5[%c0_6, %c0_7], %7 {strides = array<i32>} : memref<392x64xf32, #tpu.memory_space<vmem>>, vector<392x64xf32>,
    %c0_i32_8 = arith.constant 0 : i32
    %9 = arith.cmpi eq, %arg0, %c0_i32_8 : i32
    %10 = arith.extui %9 : i1 to i32
    %c0_i32_9 = arith.constant 0 : i32
    %11 = arith.cmpi ne, %10, %c0_i32_9 : i32
    scf.if %11 {
      %c0_10 = arith.constant 0 : index
      %c0_11 = arith.constant 0 : index
      %12 = vector.load %arg5[%c0_10, %c0_11] : memref<392x64xf32, #tpu.memory_space<vmem>>, vector<392x64xf32>
      %c0_12 = arith.constant 0 : index
      %c0_13 = arith.constant 0 : index
      %13 = vector.load %arg3[%c0_12, %c0_13] : memref<1x64xf32, #tpu.memory_space<vmem>>, vector<1x64xf32>
      %14 = vector.broadcast %13 : vector<1x64xf32> to vector<392x64xf32>
      %15 = arith.addf %12, %14 : vector<392x64xf32>
      %cst_14 = arith.constant 0.000000e+00 : f32
      %16 = vector.broadcast %cst_14 : f32 to vector<392x64xf32>
      %17 = arith.maximumf %15, %16 : vector<392x64xf32>
      %18 = arith.truncf %17 : vector<392x64xf32> to vector<392x64xbf16>
      %c0_15 = arith.constant 0 : index
      %c0_16 = arith.constant 0 : index
      %19 = vector.load %arg4[%c0_15, %c0_16] : memref<392x64xbf16, #tpu.memory_space<vmem>>, vector<392x64xbf16>
      tpu.vector_store %arg4[%c0_15, %c0_16], %18 {strides = array<i32>} : memref<392x64xbf16, #tpu.memory_space<vmem>>, vector<392x64xbf16>,
    } else {
    }
    return
  }
  func.func @transform_0(%arg0: i32) -> (i32, i32) {
    %c0_i32 = arith.constant 0 : i32
    %c0_i32_0 = arith.constant 0 : i32
    return %c0_i32, %arg0 : i32, i32
  }
  func.func @transform_1(%arg0: i32) -> (i32, i32) {
    %c0_i32 = arith.constant 0 : i32
    %c0_i32_0 = arith.constant 0 : i32
    return %arg0, %c0_i32 : i32, i32
  }
  func.func @transform_2(%arg0: i32) -> (i32, i32) {
    %c0_i32 = arith.constant 0 : i32
    %c0_i32_0 = arith.constant 0 : i32
    %c0_i32_1 = arith.constant 0 : i32
    return %c0_i32, %c0_i32_0 : i32, i32
  }
  func.func @transform_3(%arg0: i32) -> (i32, i32) {
    %c0_i32 = arith.constant 0 : i32
    %c0_i32_0 = arith.constant 0 : i32
    %c0_i32_1 = arith.constant 0 : i32
    return %c0_i32, %c0_i32_0 : i32, i32
  }
}

module attributes {stable_mosaic.version = 11 : i64} {
  func.func @_gemm_bias_relu_kernel(%arg0: i32, %arg1: memref<128x768xbf16, #tpu.memory_space<vmem>>, %arg2: memref<768x128xbf16, #tpu.memory_space<vmem>>, %arg3: memref<1x128xf32, #tpu.memory_space<vmem>>, %arg4: memref<128x128xbf16, #tpu.memory_space<vmem>>, %arg5: memref<128x128xf32, #tpu.memory_space<vmem>>) attributes {dimension_semantics = [#tpu.dimension_semantics<arbitrary>], iteration_bounds = array<i64: 3>, scalar_prefetch = 0 : i64, scratch_operands = 1 : i64, tpu.core_type = #tpu.core_type<tc>, window_params = [{transform_indices = @transform_0, window_bounds = array<i64: 128, 768>}, {transform_indices = @transform_1, window_bounds = array<i64: 768, 128>}, {pipeline_mode = #tpu.pipeline_mode<synchronous>, transform_indices = @transform_2, window_bounds = array<i64: 1, 128>}, {pipeline_mode = #tpu.pipeline_mode<synchronous>, transform_indices = @transform_3, window_bounds = array<i64: 128, 128>}]} {
    %c0_i32 = arith.constant 0 : i32
    %0 = arith.cmpi eq, %arg0, %c0_i32 : i32
    %1 = arith.extui %0 : i1 to i32
    %c0_i32_0 = arith.constant 0 : i32
    %2 = arith.cmpi ne, %1, %c0_i32_0 : i32
    scf.if %2 {
      %cst_9 = arith.constant 0.000000e+00 : f32
      %12 = vector.broadcast %cst_9 : f32 to vector<128x128xf32>
      %c0_10 = arith.constant 0 : index
      %c0_11 = arith.constant 0 : index
      %13 = vector.load %arg5[%c0_10, %c0_11] : memref<128x128xf32, #tpu.memory_space<vmem>>, vector<128x128xf32>
      tpu.vector_store %arg5[%c0_10, %c0_11], %12 {strides = array<i32>} : memref<128x128xf32, #tpu.memory_space<vmem>>, vector<128x128xf32>,
    } else {
    }
    %c0 = arith.constant 0 : index
    %c0_1 = arith.constant 0 : index
    %3 = vector.load %arg5[%c0, %c0_1] : memref<128x128xf32, #tpu.memory_space<vmem>>, vector<128x128xf32>
    %c0_2 = arith.constant 0 : index
    %c0_3 = arith.constant 0 : index
    %4 = vector.load %arg1[%c0_2, %c0_3] : memref<128x768xbf16, #tpu.memory_space<vmem>>, vector<128x768xbf16>
    %c0_4 = arith.constant 0 : index
    %c0_5 = arith.constant 0 : index
    %5 = vector.load %arg2[%c0_4, %c0_5] : memref<768x128xbf16, #tpu.memory_space<vmem>>, vector<768x128xbf16>
    %cst = arith.constant dense<0.000000e+00> : vector<128x128xf32>
    %6 = tpu.matmul %4, %5, %cst {dimension_numbers = #tpu.dot_dimension_numbers<[1], [0], [0], [1], [0, 0, 1, 1], [], []>} : vector<128x768xbf16>, vector<768x128xbf16>, vector<128x128xf32> -> vector<128x128xf32>
    %7 = arith.addf %3, %6 : vector<128x128xf32>
    %c0_6 = arith.constant 0 : index
    %c0_7 = arith.constant 0 : index
    %8 = vector.load %arg5[%c0_6, %c0_7] : memref<128x128xf32, #tpu.memory_space<vmem>>, vector<128x128xf32>
    tpu.vector_store %arg5[%c0_6, %c0_7], %7 {strides = array<i32>} : memref<128x128xf32, #tpu.memory_space<vmem>>, vector<128x128xf32>,
    %c2_i32 = arith.constant 2 : i32
    %9 = arith.cmpi eq, %arg0, %c2_i32 : i32
    %10 = arith.extui %9 : i1 to i32
    %c0_i32_8 = arith.constant 0 : i32
    %11 = arith.cmpi ne, %10, %c0_i32_8 : i32
    scf.if %11 {
      %c0_9 = arith.constant 0 : index
      %c0_10 = arith.constant 0 : index
      %12 = vector.load %arg5[%c0_9, %c0_10] : memref<128x128xf32, #tpu.memory_space<vmem>>, vector<128x128xf32>
      %c0_11 = arith.constant 0 : index
      %c0_12 = arith.constant 0 : index
      %13 = vector.load %arg3[%c0_11, %c0_12] : memref<1x128xf32, #tpu.memory_space<vmem>>, vector<1x128xf32>
      %14 = vector.broadcast %13 : vector<1x128xf32> to vector<128x128xf32>
      %15 = arith.addf %12, %14 : vector<128x128xf32>
      %cst_13 = arith.constant 0.000000e+00 : f32
      %16 = vector.broadcast %cst_13 : f32 to vector<128x128xf32>
      %17 = arith.maximumf %15, %16 : vector<128x128xf32>
      %18 = arith.truncf %17 : vector<128x128xf32> to vector<128x128xbf16>
      %c0_14 = arith.constant 0 : index
      %c0_15 = arith.constant 0 : index
      %19 = vector.load %arg4[%c0_14, %c0_15] : memref<128x128xbf16, #tpu.memory_space<vmem>>, vector<128x128xbf16>
      tpu.vector_store %arg4[%c0_14, %c0_15], %18 {strides = array<i32>} : memref<128x128xbf16, #tpu.memory_space<vmem>>, vector<128x128xbf16>,
    } else {
    }
    return
  }
  func.func @transform_0(%arg0: i32) -> (i32, i32) {
    %c0_i32 = arith.constant 0 : i32
    %c0_i32_0 = arith.constant 0 : i32
    return %c0_i32, %arg0 : i32, i32
  }
  func.func @transform_1(%arg0: i32) -> (i32, i32) {
    %c0_i32 = arith.constant 0 : i32
    %c0_i32_0 = arith.constant 0 : i32
    return %arg0, %c0_i32 : i32, i32
  }
  func.func @transform_2(%arg0: i32) -> (i32, i32) {
    %c0_i32 = arith.constant 0 : i32
    %c0_i32_0 = arith.constant 0 : i32
    %c0_i32_1 = arith.constant 0 : i32
    return %c0_i32, %c0_i32_0 : i32, i32
  }
  func.func @transform_3(%arg0: i32) -> (i32, i32) {
    %c0_i32 = arith.constant 0 : i32
    %c0_i32_0 = arith.constant 0 : i32
    %c0_i32_1 = arith.constant 0 : i32
    return %c0_i32, %c0_i32_0 : i32, i32
  }
}

module attributes {stable_mosaic.version = 11 : i64} {
  func.func @_gemm_bias_relu_kernel(%arg0: i32, %arg1: memref<32x640xbf16, #tpu.memory_space<vmem>>, %arg2: memref<640x128xbf16, #tpu.memory_space<vmem>>, %arg3: memref<1x128xf32, #tpu.memory_space<vmem>>, %arg4: memref<32x128xbf16, #tpu.memory_space<vmem>>, %arg5: memref<32x128xf32, #tpu.memory_space<vmem>>) attributes {dimension_semantics = [#tpu.dimension_semantics<arbitrary>], iteration_bounds = array<i64: 5>, scalar_prefetch = 0 : i64, scratch_operands = 1 : i64, tpu.core_type = #tpu.core_type<tc>, window_params = [{transform_indices = @transform_0, window_bounds = array<i64: 32, 640>}, {transform_indices = @transform_1, window_bounds = array<i64: 640, 128>}, {pipeline_mode = #tpu.pipeline_mode<synchronous>, transform_indices = @transform_2, window_bounds = array<i64: 1, 128>}, {pipeline_mode = #tpu.pipeline_mode<synchronous>, transform_indices = @transform_3, window_bounds = array<i64: 32, 128>}]} {
    %c0_i32 = arith.constant 0 : i32
    %0 = arith.cmpi eq, %arg0, %c0_i32 : i32
    %1 = arith.extui %0 : i1 to i32
    %c0_i32_0 = arith.constant 0 : i32
    %2 = arith.cmpi ne, %1, %c0_i32_0 : i32
    scf.if %2 {
      %cst_9 = arith.constant 0.000000e+00 : f32
      %12 = vector.broadcast %cst_9 : f32 to vector<32x128xf32>
      %c0_10 = arith.constant 0 : index
      %c0_11 = arith.constant 0 : index
      %13 = vector.load %arg5[%c0_10, %c0_11] : memref<32x128xf32, #tpu.memory_space<vmem>>, vector<32x128xf32>
      tpu.vector_store %arg5[%c0_10, %c0_11], %12 {strides = array<i32>} : memref<32x128xf32, #tpu.memory_space<vmem>>, vector<32x128xf32>,
    } else {
    }
    %c0 = arith.constant 0 : index
    %c0_1 = arith.constant 0 : index
    %3 = vector.load %arg5[%c0, %c0_1] : memref<32x128xf32, #tpu.memory_space<vmem>>, vector<32x128xf32>
    %c0_2 = arith.constant 0 : index
    %c0_3 = arith.constant 0 : index
    %4 = vector.load %arg1[%c0_2, %c0_3] : memref<32x640xbf16, #tpu.memory_space<vmem>>, vector<32x640xbf16>
    %c0_4 = arith.constant 0 : index
    %c0_5 = arith.constant 0 : index
    %5 = vector.load %arg2[%c0_4, %c0_5] : memref<640x128xbf16, #tpu.memory_space<vmem>>, vector<640x128xbf16>
    %cst = arith.constant dense<0.000000e+00> : vector<32x128xf32>
    %6 = tpu.matmul %4, %5, %cst {dimension_numbers = #tpu.dot_dimension_numbers<[1], [0], [0], [1], [0, 0, 1, 1], [], []>} : vector<32x640xbf16>, vector<640x128xbf16>, vector<32x128xf32> -> vector<32x128xf32>
    %7 = arith.addf %3, %6 : vector<32x128xf32>
    %c0_6 = arith.constant 0 : index
    %c0_7 = arith.constant 0 : index
    %8 = vector.load %arg5[%c0_6, %c0_7] : memref<32x128xf32, #tpu.memory_space<vmem>>, vector<32x128xf32>
    tpu.vector_store %arg5[%c0_6, %c0_7], %7 {strides = array<i32>} : memref<32x128xf32, #tpu.memory_space<vmem>>, vector<32x128xf32>,
    %c4_i32 = arith.constant 4 : i32
    %9 = arith.cmpi eq, %arg0, %c4_i32 : i32
    %10 = arith.extui %9 : i1 to i32
    %c0_i32_8 = arith.constant 0 : i32
    %11 = arith.cmpi ne, %10, %c0_i32_8 : i32
    scf.if %11 {
      %c0_9 = arith.constant 0 : index
      %c0_10 = arith.constant 0 : index
      %12 = vector.load %arg5[%c0_9, %c0_10] : memref<32x128xf32, #tpu.memory_space<vmem>>, vector<32x128xf32>
      %c0_11 = arith.constant 0 : index
      %c0_12 = arith.constant 0 : index
      %13 = vector.load %arg3[%c0_11, %c0_12] : memref<1x128xf32, #tpu.memory_space<vmem>>, vector<1x128xf32>
      %14 = vector.broadcast %13 : vector<1x128xf32> to vector<32x128xf32>
      %15 = arith.addf %12, %14 : vector<32x128xf32>
      %cst_13 = arith.constant 0.000000e+00 : f32
      %16 = vector.broadcast %cst_13 : f32 to vector<32x128xf32>
      %17 = arith.maximumf %15, %16 : vector<32x128xf32>
      %18 = arith.truncf %17 : vector<32x128xf32> to vector<32x128xbf16>
      %c0_14 = arith.constant 0 : index
      %c0_15 = arith.constant 0 : index
      %19 = vector.load %arg4[%c0_14, %c0_15] : memref<32x128xbf16, #tpu.memory_space<vmem>>, vector<32x128xbf16>
      tpu.vector_store %arg4[%c0_14, %c0_15], %18 {strides = array<i32>} : memref<32x128xbf16, #tpu.memory_space<vmem>>, vector<32x128xbf16>,
    } else {
    }
    return
  }
  func.func @transform_0(%arg0: i32) -> (i32, i32) {
    %c0_i32 = arith.constant 0 : i32
    %c0_i32_0 = arith.constant 0 : i32
    return %c0_i32, %arg0 : i32, i32
  }
  func.func @transform_1(%arg0: i32) -> (i32, i32) {
    %c0_i32 = arith.constant 0 : i32
    %c0_i32_0 = arith.constant 0 : i32
    return %arg0, %c0_i32 : i32, i32
  }
  func.func @transform_2(%arg0: i32) -> (i32, i32) {
    %c0_i32 = arith.constant 0 : i32
    %c0_i32_0 = arith.constant 0 : i32
    %c0_i32_1 = arith.constant 0 : i32
    return %c0_i32, %c0_i32_0 : i32, i32
  }
  func.func @transform_3(%arg0: i32) -> (i32, i32) {
    %c0_i32 = arith.constant 0 : i32
    %c0_i32_0 = arith.constant 0 : i32
    %c0_i32_1 = arith.constant 0 : i32
    return %c0_i32, %c0_i32_0 : i32, i32
  }
}

module attributes {stable_mosaic.version = 11 : i64} {
  func.func @_fc_fused_kernel(%arg0: i32, %arg1: memref<2x2048xbf16, #tpu.memory_space<vmem>>, %arg2: memref<2048x400xbf16, #tpu.memory_space<vmem>>, %arg3: memref<1x400xf32, #tpu.memory_space<vmem>>, %arg4: memref<400x20xbf16, #tpu.memory_space<vmem>>, %arg5: memref<1x20xf32, #tpu.memory_space<vmem>>, %arg6: memref<20x400xbf16, #tpu.memory_space<vmem>>, %arg7: memref<1x400xf32, #tpu.memory_space<vmem>>, %arg8: memref<400x784xbf16, #tpu.memory_space<vmem>>, %arg9: memref<1x784xf32, #tpu.memory_space<vmem>>, %arg10: memref<2x20xf32, #tpu.memory_space<vmem>>, %arg11: memref<2x784xf32, #tpu.memory_space<vmem>>) attributes {dimension_semantics = [#tpu.dimension_semantics<arbitrary>], iteration_bounds = array<i64: 1>, scalar_prefetch = 0 : i64, scratch_operands = 0 : i64, tpu.core_type = #tpu.core_type<tc>, window_params = [{pipeline_mode = #tpu.pipeline_mode<synchronous>, transform_indices = @transform_0, window_bounds = array<i64: 2, 2048>}, {pipeline_mode = #tpu.pipeline_mode<synchronous>, transform_indices = @transform_1, window_bounds = array<i64: 2048, 400>}, {pipeline_mode = #tpu.pipeline_mode<synchronous>, transform_indices = @transform_2, window_bounds = array<i64: 1, 400>}, {pipeline_mode = #tpu.pipeline_mode<synchronous>, transform_indices = @transform_3, window_bounds = array<i64: 400, 20>}, {pipeline_mode = #tpu.pipeline_mode<synchronous>, transform_indices = @transform_4, window_bounds = array<i64: 1, 20>}, {pipeline_mode = #tpu.pipeline_mode<synchronous>, transform_indices = @transform_5, window_bounds = array<i64: 20, 400>}, {pipeline_mode = #tpu.pipeline_mode<synchronous>, transform_indices = @transform_6, window_bounds = array<i64: 1, 400>}, {pipeline_mode = #tpu.pipeline_mode<synchronous>, transform_indices = @transform_7, window_bounds = array<i64: 400, 784>}, {pipeline_mode = #tpu.pipeline_mode<synchronous>, transform_indices = @transform_8, window_bounds = array<i64: 1, 784>}, {pipeline_mode = #tpu.pipeline_mode<synchronous>, transform_indices = @transform_9, window_bounds = array<i64: 2, 20>}, {pipeline_mode = #tpu.pipeline_mode<synchronous>, transform_indices = @transform_10, window_bounds = array<i64: 2, 784>}]} {
    %c0 = arith.constant 0 : index
    %c0_0 = arith.constant 0 : index
    %0 = vector.load %arg1[%c0, %c0_0] : memref<2x2048xbf16, #tpu.memory_space<vmem>>, vector<2x2048xbf16>
    %c0_1 = arith.constant 0 : index
    %c0_2 = arith.constant 0 : index
    %1 = vector.load %arg2[%c0_1, %c0_2] : memref<2048x400xbf16, #tpu.memory_space<vmem>>, vector<2048x400xbf16>
    %cst = arith.constant dense<0.000000e+00> : vector<2x400xf32>
    %2 = tpu.matmul %0, %1, %cst {dimension_numbers = #tpu.dot_dimension_numbers<[1], [0], [0], [1], [0, 0, 1, 1], [], []>} : vector<2x2048xbf16>, vector<2048x400xbf16>, vector<2x400xf32> -> vector<2x400xf32>
    %c0_3 = arith.constant 0 : index
    %c0_4 = arith.constant 0 : index
    %3 = vector.load %arg3[%c0_3, %c0_4] : memref<1x400xf32, #tpu.memory_space<vmem>>, vector<1x400xf32>
    %4 = vector.broadcast %3 : vector<1x400xf32> to vector<2x400xf32>
    %5 = arith.addf %2, %4 : vector<2x400xf32>
    %cst_5 = arith.constant 0.000000e+00 : f32
    %6 = vector.broadcast %cst_5 : f32 to vector<2x400xf32>
    %7 = arith.maximumf %5, %6 : vector<2x400xf32>
    %8 = arith.truncf %7 : vector<2x400xf32> to vector<2x400xbf16>
    %c0_6 = arith.constant 0 : index
    %c0_7 = arith.constant 0 : index
    %9 = vector.load %arg4[%c0_6, %c0_7] : memref<400x20xbf16, #tpu.memory_space<vmem>>, vector<400x20xbf16>
    %cst_8 = arith.constant dense<0.000000e+00> : vector<2x20xf32>
    %10 = tpu.matmul %8, %9, %cst_8 {dimension_numbers = #tpu.dot_dimension_numbers<[1], [0], [0], [1], [0, 0, 1, 1], [], []>} : vector<2x400xbf16>, vector<400x20xbf16>, vector<2x20xf32> -> vector<2x20xf32>
    %c0_9 = arith.constant 0 : index
    %c0_10 = arith.constant 0 : index
    %11 = vector.load %arg5[%c0_9, %c0_10] : memref<1x20xf32, #tpu.memory_space<vmem>>, vector<1x20xf32>
    %12 = vector.broadcast %11 : vector<1x20xf32> to vector<2x20xf32>
    %13 = arith.addf %10, %12 : vector<2x20xf32>
    %14 = arith.truncf %13 : vector<2x20xf32> to vector<2x20xbf16>
    %c0_11 = arith.constant 0 : index
    %c0_12 = arith.constant 0 : index
    %15 = vector.load %arg6[%c0_11, %c0_12] : memref<20x400xbf16, #tpu.memory_space<vmem>>, vector<20x400xbf16>
    %cst_13 = arith.constant dense<0.000000e+00> : vector<2x400xf32>
    %16 = tpu.matmul %14, %15, %cst_13 {dimension_numbers = #tpu.dot_dimension_numbers<[1], [0], [0], [1], [0, 0, 1, 1], [], []>} : vector<2x20xbf16>, vector<20x400xbf16>, vector<2x400xf32> -> vector<2x400xf32>
    %c0_14 = arith.constant 0 : index
    %c0_15 = arith.constant 0 : index
    %17 = vector.load %arg7[%c0_14, %c0_15] : memref<1x400xf32, #tpu.memory_space<vmem>>, vector<1x400xf32>
    %18 = vector.broadcast %17 : vector<1x400xf32> to vector<2x400xf32>
    %19 = arith.addf %16, %18 : vector<2x400xf32>
    %cst_16 = arith.constant 0.000000e+00 : f32
    %20 = vector.broadcast %cst_16 : f32 to vector<2x400xf32>
    %21 = arith.maximumf %19, %20 : vector<2x400xf32>
    %22 = arith.truncf %21 : vector<2x400xf32> to vector<2x400xbf16>
    %c0_17 = arith.constant 0 : index
    %c0_18 = arith.constant 0 : index
    %23 = vector.load %arg8[%c0_17, %c0_18] : memref<400x784xbf16, #tpu.memory_space<vmem>>, vector<400x784xbf16>
    %cst_19 = arith.constant dense<0.000000e+00> : vector<2x784xf32>
    %24 = tpu.matmul %22, %23, %cst_19 {dimension_numbers = #tpu.dot_dimension_numbers<[1], [0], [0], [1], [0, 0, 1, 1], [], []>} : vector<2x400xbf16>, vector<400x784xbf16>, vector<2x784xf32> -> vector<2x784xf32>
    %c0_20 = arith.constant 0 : index
    %c0_21 = arith.constant 0 : index
    %25 = vector.load %arg9[%c0_20, %c0_21] : memref<1x784xf32, #tpu.memory_space<vmem>>, vector<1x784xf32>
    %26 = vector.broadcast %25 : vector<1x784xf32> to vector<2x784xf32>
    %27 = arith.addf %24, %26 : vector<2x784xf32>
    %c0_22 = arith.constant 0 : index
    %c0_23 = arith.constant 0 : index
    %28 = vector.load %arg10[%c0_22, %c0_23] : memref<2x20xf32, #tpu.memory_space<vmem>>, vector<2x20xf32>
    tpu.vector_store %arg10[%c0_22, %c0_23], %13 {strides = array<i32>} : memref<2x20xf32, #tpu.memory_space<vmem>>, vector<2x20xf32>,
    %c0_24 = arith.constant 0 : index
    %c0_25 = arith.constant 0 : index
    %29 = vector.load %arg11[%c0_24, %c0_25] : memref<2x784xf32, #tpu.memory_space<vmem>>, vector<2x784xf32>
    tpu.vector_store %arg11[%c0_24, %c0_25], %27 {strides = array<i32>} : memref<2x784xf32, #tpu.memory_space<vmem>>, vector<2x784xf32>,
    return
  }
  func.func @transform_0(%arg0: i32) -> (i32, i32) {
    %c0_i32 = arith.constant 0 : i32
    %c0_i32_0 = arith.constant 0 : i32
    %c0_i32_1 = arith.constant 0 : i32
    return %c0_i32, %c0_i32_0 : i32, i32
  }
  func.func @transform_1(%arg0: i32) -> (i32, i32) {
    %c0_i32 = arith.constant 0 : i32
    %c0_i32_0 = arith.constant 0 : i32
    %c0_i32_1 = arith.constant 0 : i32
    return %c0_i32, %c0_i32_0 : i32, i32
  }
  func.func @transform_2(%arg0: i32) -> (i32, i32) {
    %c0_i32 = arith.constant 0 : i32
    %c0_i32_0 = arith.constant 0 : i32
    %c0_i32_1 = arith.constant 0 : i32
    return %c0_i32, %c0_i32_0 : i32, i32
  }
  func.func @transform_3(%arg0: i32) -> (i32, i32) {
    %c0_i32 = arith.constant 0 : i32
    %c0_i32_0 = arith.constant 0 : i32
    %c0_i32_1 = arith.constant 0 : i32
    return %c0_i32, %c0_i32_0 : i32, i32
  }
  func.func @transform_4(%arg0: i32) -> (i32, i32) {
    %c0_i32 = arith.constant 0 : i32
    %c0_i32_0 = arith.constant 0 : i32
    %c0_i32_1 = arith.constant 0 : i32
    return %c0_i32, %c0_i32_0 : i32, i32
  }
  func.func @transform_5(%arg0: i32) -> (i32, i32) {
    %c0_i32 = arith.constant 0 : i32
    %c0_i32_0 = arith.constant 0 : i32
    %c0_i32_1 = arith.constant 0 : i32
    return %c0_i32, %c0_i32_0 : i32, i32
  }
  func.func @transform_6(%arg0: i32) -> (i32, i32) {
    %c0_i32 = arith.constant 0 : i32
    %c0_i32_0 = arith.constant 0 : i32
    %c0_i32_1 = arith.constant 0 : i32
    return %c0_i32, %c0_i32_0 : i32, i32
  }
  func.func @transform_7(%arg0: i32) -> (i32, i32) {
    %c0_i32 = arith.constant 0 : i32
    %c0_i32_0 = arith.constant 0 : i32
    %c0_i32_1 = arith.constant 0 : i32
    return %c0_i32, %c0_i32_0 : i32, i32
  }
  func.func @transform_8(%arg0: i32) -> (i32, i32) {
    %c0_i32 = arith.constant 0 : i32
    %c0_i32_0 = arith.constant 0 : i32
    %c0_i32_1 = arith.constant 0 : i32
    return %c0_i32, %c0_i32_0 : i32, i32
  }
  func.func @transform_9(%arg0: i32) -> (i32, i32) {
    %c0_i32 = arith.constant 0 : i32
    %c0_i32_0 = arith.constant 0 : i32
    %c0_i32_1 = arith.constant 0 : i32
    return %c0_i32, %c0_i32_0 : i32, i32
  }
  func.func @transform_10(%arg0: i32) -> (i32, i32) {
    %c0_i32 = arith.constant 0 : i32
    %c0_i32_0 = arith.constant 0 : i32
    %c0_i32_1 = arith.constant 0 : i32
    return %c0_i32, %c0_i32_0 : i32, i32
  }
}

</mosaic_0001>

<bundles_post_ra>
// kernel: autoencoder_forward.4
= control target key start
LH: loop header
LB: loop body
LE: loop exit
PB: predicated region body
PF: predicated region fallthrough
CT: control target
= control target key end

     0   :  { %8 = vsyncpa [#allocation4], 0  ;;  %s1629_s0 = inlined_call_operand.vmem [shape: bf16[392,64], index: 0, kind: input, shape index: {}]   ;;  %s1630_s1 = inlined_call_operand.hbm [shape: bf16[64,64], index: 1, kind: input, shape index: {}]   ;;  %s1631_s2 = inlined_call_operand.hbm [shape: f32[1,64], index: 2, kind: input, shape index: {}]   ;;  %s1632_s3 = inlined_call_operand.vmem [shape: bf16[392,64], index: 3, kind: output, shape index: {}]  }
   0x1   :  { %s16_s14 = sshll.u32 %s1630_s1, 4  ;;  %s17_s14 = int_to_ptr.hbm [resolvable:$true] %s16_s14 }
   0x2   :  { %9 = vsyncpa [#allocation6], 0  ;;  %s1153_s15 = smov [#allocation3]   ;;  %s30_s19 = sshll.u32 %s1631_s2, 4  ;;  %s31_s19 = int_to_ptr.hbm [resolvable:$true] %s30_s19 }
   0x3   :  { %s18_s16 = sshll.u32 %s1153_s15, 4  ;;  %s1154_s20 = smov 64   ;;  %s19_s16 = int_to_ptr.vmem [resolvable:$true] %s18_s16 }
   0x4   :  { %s1155_s21 = smov 4   ;;  %s1156_s22 = smov [#allocation5]  }
   0x5   :  { %24 = dma.hbm_to_vmem [thread:$0]  %s17_s14, 512, %s19_s16, [#allocation4], %s1154_s20, %s1154_s20, %s1155_s21  }
   0x6   :  { %s32_s23 = sshll.u32 %s1156_s22, 4  ;;  %s33_s23 = int_to_ptr.vmem [resolvable:$true] %s32_s23 }
   0x7   :  { %35 = dma.hbm_to_vmem [thread:$0]  %s31_s19, 16, %s33_s23, [#allocation6]  }
   0x8   :  { %1149 = dma.done.wait [#allocation4], 512  }
   0x9   :  { %1150 = vsyncadd [#allocation4], 4294966784 }
   0xa   :  { %1151 = dma.done.wait [#allocation6], 16  }
   0xb   :  { %1152 = vsyncadd [#allocation6], 4294967280  ;;  %v1082_v0 = vld [vmem:[#allocation3 + $0x18] sm:$0xff]  ;;  %v1081_v1 = vld [vmem:[#allocation3 + $0x10] sm:$0xff]  ;;  %vm49_vm0 = vcmask 523264   ;;  %v1157_v24 = vmov 0.0  }
   0xc   :  { %1084 = vmatpush.bf16.msra.mxu2 %v1082_v0  ;;  %432 = vmatpush.bf16.msra.mxu0 %v1082_v0  ;;  %v1080_v2 = vld [vmem:[#allocation3 + $0x8] sm:$0xff]  ;;  %v1079_v3 = vld [vmem:[#allocation3] sm:$0xff]  ;;  %v1067_v4 = vld [vmem:[%s1629_s0 + $0x60] sm:$0xff]  ;;  %74 = vst.msk [vmem:[#allocation2 + $0xc0] sm:$0xff] %vm49_vm0, %v1157_v24  ;;  %vm862_vm1 = vcmask 519168  }
   0xd   :  { %1083 = vmatpush.bf16.msra.mxu1 %v1082_v0  ;;  %1085 = vmatpush.bf16.msra.mxu3 %v1082_v0  ;;  %v1055_v5 = vld [vmem:[%s1629_s0] sm:$0xff]  ;;  %v1061_v6 = vld [vmem:[%s1629_s0 + $0x30] sm:$0xff]  ;;  %v1074_v7 = vld [vmem:[%s1629_s0 + $0x98] sm:$0xff]  ;;  %50 = vst.msk [vmem:[#allocation2] sm:$0xff] %vm49_vm0, %v1157_v24 }
   0xe   :  { %v1068_v8 = vld [vmem:[%s1629_s0 + $0x68] sm:$0xff]  ;;  %v1062_v10 = vld [vmem:[%s1629_s0 + $0x38] sm:$0xff]  ;;  %v1075_v11 = vld [vmem:[%s1629_s0 + $0xa0] sm:$0xff]  ;;  %51 = vst.msk [vmem:[#allocation2 + $0x8] sm:$0xff] %vm49_vm0, %v1157_v24 }
   0xf   :  { %v1056_v9 = vld [vmem:[%s1629_s0 + $0x8] sm:$0xff]  ;;  %v1069_v12 = vld [vmem:[%s1629_s0 + $0x70] sm:$0xff]  ;;  %v1063_v14 = vld [vmem:[%s1629_s0 + $0x40] sm:$0xff]  ;;  %52 = vst.msk [vmem:[#allocation2 + $0x10] sm:$0xff] %vm49_vm0, %v1157_v24 }
  0x10   :  { %1087 = vmatpush.bf16.msra.mxu2 %v1081_v1  ;;  %433 = vmatpush.bf16.msra.mxu0 %v1081_v1  ;;  %v1057_v13 = vld [vmem:[%s1629_s0 + $0x10] sm:$0xff]  ;;  %v1076_v15 = vld [vmem:[%s1629_s0 + $0xa8] sm:$0xff]  ;;  %v1070_v16 = vld [vmem:[%s1629_s0 + $0x78] sm:$0xff]  ;;  %53 = vst.msk [vmem:[#allocation2 + $0x18] sm:$0xff] %vm49_vm0, %v1157_v24 }
  0x11   :  { %1086 = vmatpush.bf16.msra.mxu1 %v1081_v1  ;;  %1088 = vmatpush.bf16.msra.mxu3 %v1081_v1  ;;  %v1058_v17 = vld [vmem:[%s1629_s0 + $0x18] sm:$0xff]  ;;  %v1064_v18 = vld [vmem:[%s1629_s0 + $0x48] sm:$0xff]  ;;  %v1077_v19 = vld [vmem:[%s1629_s0 + $0xb0] sm:$0xff]  ;;  %54 = vst.msk [vmem:[#allocation2 + $0x20] sm:$0xff] %vm49_vm0, %v1157_v24 }
  0x12   :  { %v1071_v20 = vld [vmem:[%s1629_s0 + $0x80] sm:$0xff]  ;;  %v1065_v22 = vld [vmem:[%s1629_s0 + $0x50] sm:$0xff]  ;;  %v1078_v23 = vld [vmem:[%s1629_s0 + $0xb8] sm:$0xff]  ;;  %55 = vst.msk [vmem:[#allocation2 + $0x28] sm:$0xff] %vm49_vm0, %v1157_v24 }
  0x13   :  { %v1059_v21 = vld [vmem:[%s1629_s0 + $0x20] sm:$0xff]  ;;  %56 = vst.msk [vmem:[#allocation2 + $0x30] sm:$0xff] %vm49_vm0, %v1157_v24  ;;  %v1072_v27 = vld [vmem:[%s1629_s0 + $0x88] sm:$0xff]  ;;  %v1066_v29 = vld [vmem:[%s1629_s0 + $0x58] sm:$0xff] }
  0x14   :  { %1090 = vmatpush.bf16.msra.mxu2 %v1080_v2  ;;  %434 = vmatpush.bf16.msra.mxu0 %v1080_v2  ;;  %v196_v25 = vld [vmem:[%s1629_s0 + $0xc0] sm:$0xf]  ;;  %57 = vst.msk [vmem:[#allocation2 + $0x38] sm:$0xff] %vm49_vm0, %v1157_v24  ;;  %v1060_v28 = vld [vmem:[%s1629_s0 + $0x28] sm:$0xff]  ;;  %v1073_v31 = vld [vmem:[%s1629_s0 + $0x90] sm:$0xff] }
  0x15   :  { %1089 = vmatpush.bf16.msra.mxu1 %v1080_v2  ;;  %1091 = vmatpush.bf16.msra.mxu3 %v1080_v2  ;;  %v302_v26 = vunpack.c.l.b16 %v196_v25  ;;  %58 = vst.msk [vmem:[#allocation2 + $0x40] sm:$0xff] %vm49_vm0, %v1157_v24  ;;  %v99_v32 = vld [vmem:[#allocation2] sm:$0xff]  ;;  %v100_v41 = vld [vmem:[#allocation2 + $0x8] sm:$0xff] }
  0x16   :  { %59 = vst.msk [vmem:[#allocation2 + $0x48] sm:$0xff] %vm49_vm0, %v1157_v24  ;;  %v123_v38 = vld [vmem:[#allocation2 + $0xc0] sm:$0xff]  ;;  %v1336_v47 = vld [vmem:[#allocation5] ss:$0 sm:$0xff]  ;;  %v101_v59 = vld [vmem:[#allocation2 + $0x10] sm:$0xff] }
  0x17   :  { %60 = vst.msk [vmem:[#allocation2 + $0x50] sm:$0xff] %vm49_vm0, %v1157_v24  ;;  %v327_v30 = vpack.c.b16 %v302_v26, %v302_v26 }
  0x18   :  { %1093 = vmatpush.bf16.msra.mxu2 %v1079_v3  ;;  %435 = vmatpush.bf16.msra.mxu0 %v1079_v3  ;;  %61 = vst.msk [vmem:[#allocation2 + $0x58] sm:$0xff] %vm49_vm0, %v1157_v24 }
  0x19   :  { %1092 = vmatpush.bf16.msra.mxu1 %v1079_v3  ;;  %1094 = vmatpush.bf16.msra.mxu3 %v1079_v3  ;;  %62 = vst.msk [vmem:[#allocation2 + $0x60] sm:$0xff] %vm49_vm0, %v1157_v24 }
  0x1a   :  { %63 = vst.msk [vmem:[#allocation2 + $0x68] sm:$0xff] %vm49_vm0, %v1157_v24 }
  0x1b   :  { %1042 = vmatmul.msk.bf16.vlgmr.msra.gmra.mxu2 %vm49_vm0, %v1067_v4  ;;  %1030 = vmatmul.msk.bf16.vlgmr.msra.gmra.mxu0 %vm49_vm0, %v1055_v5  ;;  %64 = vst.msk [vmem:[#allocation2 + $0x70] sm:$0xff] %vm49_vm0, %v1157_v24 }
  0x1c   :  { %1036 = vmatmul.msk.bf16.vlgmr.msra.gmra.mxu1 %vm49_vm0, %v1061_v6  ;;  %1049 = vmatmul.msk.bf16.vlgmr.msra.gmra.mxu3 %vm49_vm0, %v1074_v7  ;;  %65 = vst.msk [vmem:[#allocation2 + $0x78] sm:$0xff] %vm49_vm0, %v1157_v24 }
  0x1d   :  { %66 = vst.msk [vmem:[#allocation2 + $0x80] sm:$0xff] %vm49_vm0, %v1157_v24 }
  0x1e   :  { %67 = vst.msk [vmem:[#allocation2 + $0x88] sm:$0xff] %vm49_vm0, %v1157_v24 }
  0x1f   :  { %68 = vst.msk [vmem:[#allocation2 + $0x90] sm:$0xff] %vm49_vm0, %v1157_v24 }
  0x20   :  { %69 = vst.msk [vmem:[#allocation2 + $0x98] sm:$0xff] %vm49_vm0, %v1157_v24  ;;  %v111_v33 = vld [vmem:[#allocation2 + $0x60] sm:$0xff] }
  0x21   :  { %70 = vst.msk [vmem:[#allocation2 + $0xa0] sm:$0xff] %vm49_vm0, %v1157_v24  ;;  %v112_v43 = vld [vmem:[#allocation2 + $0x68] sm:$0xff] }
  0x22   :  { %71 = vst.msk [vmem:[#allocation2 + $0xa8] sm:$0xff] %vm49_vm0, %v1157_v24  ;;  %v113_v62 = vld [vmem:[#allocation2 + $0x70] sm:$0xff] }
  0x23   :  { %72 = vst.msk [vmem:[#allocation2 + $0xb0] sm:$0xff] %vm49_vm0, %v1157_v24  ;;  %v114_v26 = vld [vmem:[#allocation2 + $0x78] sm:$0xff] }
  0x24   :  { %73 = vst.msk [vmem:[#allocation2 + $0xb8] sm:$0xff] %vm49_vm0, %v1157_v24 }
  0x25   :  { %75 = vst.msk [vmem:[#allocation2 + $0xc8] sm:$0xff] %vm49_vm0, %v1157_v24 }
  0x26   :  { %76 = vst.msk [vmem:[#allocation2 + $0xd0] sm:$0xff] %vm49_vm0, %v1157_v24 }
  0x27   :  { %77 = vst.msk [vmem:[#allocation2 + $0xd8] sm:$0xff] %vm49_vm0, %v1157_v24 }
  0x28   :  { %78 = vst.msk [vmem:[#allocation2 + $0xe0] sm:$0xff] %vm49_vm0, %v1157_v24 }
  0x29   :  { %79 = vst.msk [vmem:[#allocation2 + $0xe8] sm:$0xff] %vm49_vm0, %v1157_v24 }
  0x2a   :  { %80 = vst.msk [vmem:[#allocation2 + $0xf0] sm:$0xff] %vm49_vm0, %v1157_v24 }
  0x2b   :  { %1043 = vmatmul.msk.bf16.gmra.mxu2 %vm49_vm0, %v1068_v8  ;;  %1031 = vmatmul.msk.bf16.gmra.mxu0 %vm49_vm0, %v1056_v9  ;;  %81 = vst.msk [vmem:[#allocation2 + $0xf8] sm:$0xff] %vm49_vm0, %v1157_v24 }
  0x2c   :  { %1037 = vmatmul.msk.bf16.gmra.mxu1 %vm49_vm0, %v1062_v10  ;;  %1050 = vmatmul.msk.bf16.gmra.mxu3 %vm49_vm0, %v1075_v11  ;;  %82 = vst.msk [vmem:[#allocation2 + $0x100] sm:$0xff] %vm49_vm0, %v1157_v24  ;;  %v124_v55 = vld [vmem:[#allocation2 + $0xc8] sm:$0xff] }
  0x2d   :  { %83 = vst.msk [vmem:[#allocation2 + $0x108] sm:$0xff] %vm49_vm0, %v1157_v24 }
  0x2e   :  { %84 = vst.msk [vmem:[#allocation2 + $0x110] sm:$0xff] %vm49_vm0, %v1157_v24 }
  0x2f   :  { %85 = vst.msk [vmem:[#allocation2 + $0x118] sm:$0xff] %vm49_vm0, %v1157_v24 }
  0x30   :  { %86 = vst.msk [vmem:[#allocation2 + $0x120] sm:$0xff] %vm49_vm0, %v1157_v24 }
  0x31   :  { %87 = vst.msk [vmem:[#allocation2 + $0x128] sm:$0xff] %vm49_vm0, %v1157_v24 }
  0x32   :  { %88 = vst.msk [vmem:[#allocation2 + $0x130] sm:$0xff] %vm49_vm0, %v1157_v24 }
  0x33   :  { %89 = vst.msk [vmem:[#allocation2 + $0x138] sm:$0xff] %vm49_vm0, %v1157_v24 }
  0x34   :  { %90 = vst.msk [vmem:[#allocation2 + $0x140] sm:$0xff] %vm49_vm0, %v1157_v24 }
  0x35   :  { %91 = vst.msk [vmem:[#allocation2 + $0x148] sm:$0xff] %vm49_vm0, %v1157_v24 }
  0x36   :  { %92 = vst.msk [vmem:[#allocation2 + $0x150] sm:$0xff] %vm49_vm0, %v1157_v24 }
  0x37   :  { %93 = vst.msk [vmem:[#allocation2 + $0x158] sm:$0xff] %vm49_vm0, %v1157_v24 }
  0x38   :  { %94 = vst.msk [vmem:[#allocation2 + $0x160] sm:$0xff] %vm49_vm0, %v1157_v24 }
  0x39   :  { %95 = vst.msk [vmem:[#allocation2 + $0x168] sm:$0xff] %vm49_vm0, %v1157_v24  ;;  %v137_v39 = vld [vmem:[#allocation2 + $0x130] sm:$0xff] }
  0x3a   :  { %96 = vst.msk [vmem:[#allocation2 + $0x170] sm:$0xff] %vm49_vm0, %v1157_v24  ;;  %v138_v63 = vld [vmem:[#allocation2 + $0x138] sm:$0xff] }
  0x3b   :  { %1044 = vmatmul.msk.bf16.gmra.mxu2 %vm49_vm0, %v1069_v12  ;;  %1032 = vmatmul.msk.bf16.gmra.mxu0 %vm49_vm0, %v1057_v13  ;;  %97 = vst.msk [vmem:[#allocation2 + $0x178] sm:$0xff] %vm49_vm0, %v1157_v24 }
  0x3c   :  { %1038 = vmatmul.msk.bf16.gmra.mxu1 %vm49_vm0, %v1063_v14  ;;  %1051 = vmatmul.msk.bf16.gmra.mxu3 %vm49_vm0, %v1076_v15  ;;  %98 = vst.msk [vmem:[#allocation2 + $0x180] sm:$0xff] %vm49_vm0, %v1157_v24 }
  0x4b   :  { %1045 = vmatmul.msk.bf16.gmra.mxu2 %vm49_vm0, %v1070_v16  ;;  %1033 = vmatmul.msk.bf16.gmra.mxu0 %vm49_vm0, %v1058_v17  ;;  %v125_v16 = vld [vmem:[#allocation2 + $0xd0] sm:$0xff] }
  0x4c   :  { %1039 = vmatmul.msk.bf16.gmra.mxu1 %vm49_vm0, %v1064_v18  ;;  %1052 = vmatmul.msk.bf16.gmra.mxu3 %vm49_vm0, %v1077_v19 }
  0x5b   :  { %1046 = vmatmul.msk.bf16.gmra.mxu2 %vm49_vm0, %v1071_v20  ;;  %1034 = vmatmul.msk.bf16.gmra.mxu0 %vm49_vm0, %v1059_v21 }
  0x5c   :  { %1040 = vmatmul.msk.bf16.gmra.mxu1 %vm49_vm0, %v1065_v22  ;;  %1053 = vmatmul.msk.bf16.gmra.mxu3 %vm49_vm0, %v1078_v23  ;;  %v102_v23 = vld [vmem:[#allocation2 + $0x18] sm:$0xff] }
  0x6b   :  { %1047 = vmatmul.msk.bf16.gmra.mxu2 %vm49_vm0, %v1072_v27  ;;  %1035 = vmatmul.msk.bf16.gmra.mxu0 %vm49_vm0, %v1060_v28  ;;  %v139_v27 = vld [vmem:[#allocation2 + $0x140] sm:$0xff] }
  0x6c   :  { %1041 = vmatmul.msk.bf16.gmra.mxu1 %vm49_vm0, %v1066_v29  ;;  %1054 = vmatmul.msk.bf16.gmra.mxu3 %vm49_vm0, %v327_v30 }
  0x7b   :  { %1048 = vmatmul.msk.bf16.gmra.mxu2 %vm49_vm0, %v1073_v31 }
  0x98   :  { %v437_v34 = vpop.f32.mrf.mxu0 }
  0x99   :  { %v561_v35 = vadd.f32 %v437_v34, %v99_v32  ;;  %v467_v36 = vpop.f32.mrf.mxu1 }
  0x9a   :  { %v573_v37 = vadd.f32 %v467_v36, %v111_v33 }
  0x9b   :  { %610 = vst.msk [vmem:[#allocation2] sm:$0xff] %vm49_vm0, %v561_v35 }
  0x9c   :  { %622 = vst.msk [vmem:[#allocation2 + $0x60] sm:$0xff] %vm49_vm0, %v573_v37 }
  0x9e   :  { %v497_v40 = vpop.f32.mrf.mxu2 }
  0x9f   :  { %v585_v42 = vadd.f32 %v497_v40, %v123_v38  ;;  %v532_v44 = vpop.f32.mrf.mxu3 }
  0xa0   :  { %v439_v45 = vpop.f32.mrf.mxu0  ;;  %v599_v46 = vadd.f32 %v532_v44, %v137_v39 }
  0xa1   :  { %634 = vst.msk [vmem:[#allocation2 + $0xc0] sm:$0xff] %vm49_vm0, %v585_v42  ;;  %v562_v48 = vadd.f32 %v439_v45, %v100_v41  ;;  %v469_v49 = vpop.f32.mrf.mxu1  ;;  %v126_v42 = vld [vmem:[#allocation2 + $0xd8] sm:$0xff] }
  0xa2   :  { %v662_v50 = vld [vmem:[#allocation2] sm:$0xff]  ;;  %v574_v51 = vadd.f32 %v469_v49, %v112_v43  ;;  %648 = vst.msk [vmem:[#allocation2 + $0x130] sm:$0xff] %vm49_vm0, %v599_v46 }
  0xa3   :  { %v715_v52 = vadd.f32 %v1336_v47, %v662_v50  ;;  %v674_v53 = vld [vmem:[#allocation2 + $0x60] sm:$0xff]  ;;  %611 = vst.msk [vmem:[#allocation2 + $0x8] sm:$0xff] %vm49_vm0, %v562_v48 }
  0xa4   :  { %v727_v54 = vadd.f32 %v1336_v47, %v674_v53  ;;  %623 = vst.msk [vmem:[#allocation2 + $0x68] sm:$0xff] %vm49_vm0, %v574_v51  ;;  %v103_v50 = vld [vmem:[#allocation2 + $0x20] sm:$0xff] }
  0xa5   :  { %v764_v56 = vmax.f32 %v715_v52, 0.0 }
  0xa6   :  { %v776_v57 = vmax.f32 %v727_v54, 0.0  ;;  %v499_v58 = vpop.f32.mrf.mxu2 }
  0xa7   :  { %v813_v60 = vpack.c.bf16 %v764_v56, %v764_v56  ;;  %v586_v61 = vadd.f32 %v499_v58, %v124_v55  ;;  %v534_v0 = vpop.f32.mrf.mxu3  ;;  %v115_v56 = vld [vmem:[#allocation2 + $0x80] sm:$0xff] }
  0xa8   :  { %v686_v1 = vld [vmem:[#allocation2 + $0xc0] sm:$0xff]  ;;  %v825_v2 = vpack.c.bf16 %v776_v57, %v776_v57  ;;  %v442_v3 = vpop.f32.mrf.mxu0  ;;  %v600_v11 = vadd.f32 %v534_v0, %v138_v63 }
  0xa9   :  { %v739_v4 = vadd.f32 %v1336_v47, %v686_v1  ;;  %863 = vst.msk [vmem:[%s1632_s3] sm:$0xf] %vm862_vm1, %v813_v60  ;;  %v700_v5 = vld [vmem:[#allocation2 + $0x130] sm:$0xff]  ;;  %v563_v6 = vadd.f32 %v442_v3, %v101_v59  ;;  %v472_v7 = vpop.f32.mrf.mxu1  ;;  %v140_v59 = vld [vmem:[#allocation2 + $0x148] sm:$0xff] }
  0xaa   :  { %875 = vst.msk [vmem:[%s1632_s3 + $0x30] sm:$0xf] %vm862_vm1, %v825_v2  ;;  %v663_v8 = vld [vmem:[#allocation2 + $0x8] sm:$0xff]  ;;  %v753_v9 = vadd.f32 %v1336_v47, %v700_v5  ;;  %v575_v10 = vadd.f32 %v472_v7, %v113_v62  ;;  %v127_v7 = vld [vmem:[#allocation2 + $0xe0] sm:$0xff] }
  0xab   :  { %v788_v12 = vmax.f32 %v739_v4, 0.0  ;;  %635 = vst.msk [vmem:[#allocation2 + $0xc8] sm:$0xff] %vm49_vm0, %v586_v61  ;;  %v716_v13 = vadd.f32 %v1336_v47, %v663_v8  ;;  %v675_v14 = vld [vmem:[#allocation2 + $0x68] sm:$0xff] }
  0xac   :  { %v728_v15 = vadd.f32 %v1336_v47, %v675_v14  ;;  %v802_v17 = vmax.f32 %v753_v9, 0.0  ;;  %612 = vst.msk [vmem:[#allocation2 + $0x10] sm:$0xff] %vm49_vm0, %v563_v6  ;;  %v104_v14 = vld [vmem:[#allocation2 + $0x28] sm:$0xff] }
  0xad   :  { %v837_v18 = vpack.c.bf16 %v788_v12, %v788_v12  ;;  %v765_v19 = vmax.f32 %v716_v13, 0.0  ;;  %624 = vst.msk [vmem:[#allocation2 + $0x70] sm:$0xff] %vm49_vm0, %v575_v10 }
  0xae   :  { %v777_v20 = vmax.f32 %v728_v15, 0.0  ;;  %v502_v21 = vpop.f32.mrf.mxu2  ;;  %v851_v22 = vpack.c.bf16 %v802_v17, %v802_v17  ;;  %649 = vst.msk [vmem:[#allocation2 + $0x138] sm:$0xff] %vm49_vm0, %v600_v11 }
  0xaf   :  { %887 = vst.msk [vmem:[%s1632_s3 + $0x60] sm:$0xf] %vm862_vm1, %v837_v18  ;;  %v814_v24 = vpack.c.bf16 %v765_v19, %v765_v19  ;;  %v587_v25 = vadd.f32 %v502_v21, %v125_v16  ;;  %v537_v28 = vpop.f32.mrf.mxu3 }
  0xb0   :  { %v826_v29 = vpack.c.bf16 %v777_v20, %v777_v20  ;;  %901 = vst.msk [vmem:[%s1632_s3 + $0x98] sm:$0xf] %vm862_vm1, %v851_v22  ;;  %v444_v30 = vpop.f32.mrf.mxu0  ;;  %v601_v35 = vadd.f32 %v537_v28, %v139_v27  ;;  %v116_v20 = vld [vmem:[#allocation2 + $0x88] sm:$0xff] }
  0xb1   :  { %864 = vst.msk [vmem:[%s1632_s3 + $0x4] sm:$0xf] %vm862_vm1, %v814_v24  ;;  %v564_v31 = vadd.f32 %v444_v30, %v102_v23  ;;  %v474_v32 = vpop.f32.mrf.mxu1  ;;  %v141_v23 = vld [vmem:[#allocation2 + $0x150] sm:$0xff] }
  0xb2   :  { %v687_v33 = vld [vmem:[#allocation2 + $0xc8] sm:$0xff]  ;;  %876 = vst.msk [vmem:[%s1632_s3 + $0x34] sm:$0xf] %vm862_vm1, %v826_v29  ;;  %v576_v34 = vadd.f32 %v474_v32, %v114_v26 }
  0xb3   :  { %v740_v36 = vadd.f32 %v1336_v47, %v687_v33  ;;  %636 = vst.msk [vmem:[#allocation2 + $0xd0] sm:$0xff] %vm49_vm0, %v587_v25  ;;  %v664_v37 = vld [vmem:[#allocation2 + $0x10] sm:$0xff]  ;;  %v128_v29 = vld [vmem:[#allocation2 + $0xe8] sm:$0xff] }
  0xb4   :  { %v717_v38 = vadd.f32 %v1336_v47, %v664_v37  ;;  %v676_v39 = vld [vmem:[#allocation2 + $0x70] sm:$0xff]  ;;  %613 = vst.msk [vmem:[#allocation2 + $0x18] sm:$0xff] %vm49_vm0, %v564_v31 }
  0xb5   :  { %v789_v40 = vmax.f32 %v740_v36, 0.0  ;;  %v729_v41 = vadd.f32 %v1336_v47, %v676_v39  ;;  %v701_v43 = vld [vmem:[#allocation2 + $0x138] sm:$0xff]  ;;  %625 = vst.msk [vmem:[#allocation2 + $0x78] sm:$0xff] %vm49_vm0, %v576_v34  ;;  %v105_v36 = vld [vmem:[#allocation2 + $0x30] sm:$0xff] }
  0xb6   :  { %v766_v44 = vmax.f32 %v717_v38, 0.0  ;;  %v504_v45 = vpop.f32.mrf.mxu2  ;;  %v754_v46 = vadd.f32 %v1336_v47, %v701_v43  ;;  %650 = vst.msk [vmem:[#allocation2 + $0x140] sm:$0xff] %vm49_vm0, %v601_v35 }
  0xb7   :  { %v838_v48 = vpack.c.bf16 %v789_v40, %v789_v40  ;;  %v778_v49 = vmax.f32 %v729_v41, 0.0  ;;  %v539_v51 = vpop.f32.mrf.mxu3  ;;  %v588_v53 = vadd.f32 %v504_v45, %v126_v42  ;;  %v117_v45 = vld [vmem:[#allocation2 + $0x90] sm:$0xff] }
  0xb8   :  { %v815_v52 = vpack.c.bf16 %v766_v44, %v766_v44  ;;  %v803_v54 = vmax.f32 %v754_v46, 0.0  ;;  %v447_v55 = vpop.f32.mrf.mxu0  ;;  %v602_v4 = vadd.f32 %v539_v51, %v140_v59 }
  0xb9   :  { %888 = vst.msk [vmem:[%s1632_s3 + $0x64] sm:$0xf] %vm862_vm1, %v838_v48  ;;  %v827_v57 = vpack.c.bf16 %v778_v49, %v778_v49  ;;  %v477_v58 = vpop.f32.mrf.mxu1  ;;  %v565_v62 = vadd.f32 %v447_v55, %v103_v50  ;;  %v142_v50 = vld [vmem:[#allocation2 + $0x158] sm:$0xff] }
  0xba   :  { %v688_v60 = vld [vmem:[#allocation2 + $0xd0] sm:$0xff]  ;;  %865 = vst.msk [vmem:[%s1632_s3 + $0x8] sm:$0xf] %vm862_vm1, %v815_v52  ;;  %v852_v61 = vpack.c.bf16 %v803_v54, %v803_v54  ;;  %v577_v1 = vadd.f32 %v477_v58, %v115_v56 }
  0xbb   :  { %v741_v63 = vadd.f32 %v1336_v47, %v688_v60  ;;  %877 = vst.msk [vmem:[%s1632_s3 + $0x38] sm:$0xf] %vm862_vm1, %v827_v57  ;;  %v665_v0 = vld [vmem:[#allocation2 + $0x18] sm:$0xff]  ;;  %v129_v58 = vld [vmem:[#allocation2 + $0xf0] sm:$0xff] }
  0xbc   :  { %637 = vst.msk [vmem:[#allocation2 + $0xd8] sm:$0xff] %vm49_vm0, %v588_v53  ;;  %v718_v2 = vadd.f32 %v1336_v47, %v665_v0  ;;  %v677_v3 = vld [vmem:[#allocation2 + $0x78] sm:$0xff] }
  0xbd   :  { %v790_v5 = vmax.f32 %v741_v63, 0.0  ;;  %902 = vst.msk [vmem:[%s1632_s3 + $0x9c] sm:$0xf] %vm862_vm1, %v852_v61  ;;  %v730_v6 = vadd.f32 %v1336_v47, %v677_v3  ;;  %v702_v8 = vld [vmem:[#allocation2 + $0x140] sm:$0xff] }
  0xbe   :  { %v767_v9 = vmax.f32 %v718_v2, 0.0  ;;  %v507_v10 = vpop.f32.mrf.mxu2  ;;  %v755_v11 = vadd.f32 %v1336_v47, %v702_v8  ;;  %614 = vst.msk [vmem:[#allocation2 + $0x20] sm:$0xff] %vm49_vm0, %v565_v62 }
  0xbf   :  { %v839_v12 = vpack.c.bf16 %v790_v5, %v790_v5  ;;  %v779_v13 = vmax.f32 %v730_v6, 0.0  ;;  %626 = vst.msk [vmem:[#allocation2 + $0x80] sm:$0xff] %vm49_vm0, %v577_v1  ;;  %v542_v15 = vpop.f32.mrf.mxu3  ;;  %v589_v17 = vadd.f32 %v507_v10, %v127_v7  ;;  %v106_v1 = vld [vmem:[#allocation2 + $0x38] sm:$0xff] }
  0xc0   :  { %v816_v16 = vpack.c.bf16 %v767_v9, %v767_v9  ;;  %v804_v18 = vmax.f32 %v755_v11, 0.0  ;;  %651 = vst.msk [vmem:[#allocation2 + $0x148] sm:$0xff] %vm49_vm0, %v602_v4  ;;  %v449_v19 = vpop.f32.mrf.mxu0  ;;  %v603_v30 = vadd.f32 %v542_v15, %v141_v23  ;;  %v130_v23 = vld [vmem:[#allocation2 + $0xf8] sm:$0xff] }
  0xc1   :  { %889 = vst.msk [vmem:[%s1632_s3 + $0x68] sm:$0xf] %vm862_vm1, %v839_v12  ;;  %v828_v21 = vpack.c.bf16 %v779_v13, %v779_v13  ;;  %v479_v22 = vpop.f32.mrf.mxu1  ;;  %v566_v25 = vadd.f32 %v449_v19, %v104_v14  ;;  %v118_v14 = vld [vmem:[#allocation2 + $0x98] sm:$0xff] }
  0xc2   :  { %866 = vst.msk [vmem:[%s1632_s3 + $0xc] sm:$0xf] %vm862_vm1, %v816_v16  ;;  %v853_v24 = vpack.c.bf16 %v804_v18, %v804_v18  ;;  %v578_v27 = vadd.f32 %v479_v22, %v116_v20 }
  0xc3   :  { %v689_v26 = vld [vmem:[#allocation2 + $0xd8] sm:$0xff]  ;;  %878 = vst.msk [vmem:[%s1632_s3 + $0x3c] sm:$0xf] %vm862_vm1, %v828_v21 }
  0xc4   :  { %v742_v28 = vadd.f32 %v1336_v47, %v689_v26  ;;  %638 = vst.msk [vmem:[#allocation2 + $0xe0] sm:$0xff] %vm49_vm0, %v589_v17 }
  0xc5   :  { %903 = vst.msk [vmem:[%s1632_s3 + $0xa0] sm:$0xf] %vm862_vm1, %v853_v24  ;;  %v666_v31 = vld [vmem:[#allocation2 + $0x20] sm:$0xff] }
  0xc6   :  { %v791_v32 = vmax.f32 %v742_v28, 0.0  ;;  %v719_v33 = vadd.f32 %v1336_v47, %v666_v31  ;;  %v678_v34 = vld [vmem:[#allocation2 + $0x80] sm:$0xff]  ;;  %v509_v35 = vpop.f32.mrf.mxu2  ;;  %615 = vst.msk [vmem:[#allocation2 + $0x28] sm:$0xff] %vm49_vm0, %v566_v25 }
  0xc7   :  { %v731_v37 = vadd.f32 %v1336_v47, %v678_v34  ;;  %v590_v38 = vadd.f32 %v509_v35, %v128_v29  ;;  %v703_v39 = vld [vmem:[#allocation2 + $0x148] sm:$0xff]  ;;  %627 = vst.msk [vmem:[#allocation2 + $0x88] sm:$0xff] %vm49_vm0, %v578_v27  ;;  %v544_v40 = vpop.f32.mrf.mxu3  ;;  %v143_v25 = vld [vmem:[#allocation2 + $0x160] sm:$0xff] }
  0xc8   :  { %v840_v41 = vpack.c.bf16 %v791_v32, %v791_v32  ;;  %v768_v42 = vmax.f32 %v719_v33, 0.0  ;;  %v756_v43 = vadd.f32 %v1336_v47, %v703_v39  ;;  %652 = vst.msk [vmem:[#allocation2 + $0x150] sm:$0xff] %vm49_vm0, %v603_v30  ;;  %v452_v44 = vpop.f32.mrf.mxu0  ;;  %v604_v59 = vadd.f32 %v544_v40, %v142_v50  ;;  %v107_v30 = vld [vmem:[#allocation2 + $0x40] sm:$0xff] }
  0xc9   :  { %v780_v46 = vmax.f32 %v731_v37, 0.0  ;;  %639 = vst.msk [vmem:[#allocation2 + $0xe8] sm:$0xff] %vm49_vm0, %v590_v38  ;;  %v567_v48 = vadd.f32 %v452_v44, %v105_v36  ;;  %v482_v49 = vpop.f32.mrf.mxu1 }
  0xca   :  { %890 = vst.msk [vmem:[%s1632_s3 + $0x6c] sm:$0xf] %vm862_vm1, %v840_v41  ;;  %v817_v51 = vpack.c.bf16 %v768_v42, %v768_v42  ;;  %v805_v52 = vmax.f32 %v756_v43, 0.0  ;;  %v579_v55 = vadd.f32 %v482_v49, %v117_v45  ;;  %v119_v43 = vld [vmem:[#allocation2 + $0xa0] sm:$0xff] }
  0xcb   :  { %v690_v53 = vld [vmem:[#allocation2 + $0xe0] sm:$0xff]  ;;  %v829_v54 = vpack.c.bf16 %v780_v46, %v780_v46  ;;  %616 = vst.msk [vmem:[#allocation2 + $0x30] sm:$0xff] %vm49_vm0, %v567_v48 }
  0xcc   :  { %v743_v56 = vadd.f32 %v1336_v47, %v690_v53  ;;  %867 = vst.msk [vmem:[%s1632_s3 + $0x10] sm:$0xf] %vm862_vm1, %v817_v51  ;;  %v854_v57 = vpack.c.bf16 %v805_v52, %v805_v52  ;;  %v131_v52 = vld [vmem:[#allocation2 + $0x100] sm:$0xff] }
  0xcd   :  { %879 = vst.msk [vmem:[%s1632_s3 + $0x40] sm:$0xf] %vm862_vm1, %v829_v54  ;;  %v667_v60 = vld [vmem:[#allocation2 + $0x28] sm:$0xff] }
  0xce   :  { %v792_v61 = vmax.f32 %v743_v56, 0.0  ;;  %904 = vst.msk [vmem:[%s1632_s3 + $0xa4] sm:$0xf] %vm862_vm1, %v854_v57  ;;  %v720_v62 = vadd.f32 %v1336_v47, %v667_v60  ;;  %v679_v63 = vld [vmem:[#allocation2 + $0x88] sm:$0xff]  ;;  %v512_v0 = vpop.f32.mrf.mxu2 }
  0xcf   :  { %v732_v2 = vadd.f32 %v1336_v47, %v679_v63  ;;  %v591_v3 = vadd.f32 %v512_v0, %v129_v58  ;;  %v704_v4 = vld [vmem:[#allocation2 + $0x150] sm:$0xff]  ;;  %628 = vst.msk [vmem:[#allocation2 + $0x90] sm:$0xff] %vm49_vm0, %v579_v55  ;;  %v547_v5 = vpop.f32.mrf.mxu3  ;;  %v144_v54 = vld [vmem:[#allocation2 + $0x168] sm:$0xff] }
  0xd0   :  { %v841_v6 = vpack.c.bf16 %v792_v61, %v792_v61  ;;  %v691_v7 = vld [vmem:[#allocation2 + $0xe8] sm:$0xff]  ;;  %v769_v8 = vmax.f32 %v720_v62, 0.0  ;;  %v757_v9 = vadd.f32 %v1336_v47, %v704_v4  ;;  %653 = vst.msk [vmem:[#allocation2 + $0x158] sm:$0xff] %vm49_vm0, %v604_v59  ;;  %v454_v10 = vpop.f32.mrf.mxu0  ;;  %v605_v35 = vadd.f32 %v547_v5, %v143_v25 }
  0xd1   :  { %v744_v11 = vadd.f32 %v1336_v47, %v691_v7  ;;  %v781_v12 = vmax.f32 %v732_v2, 0.0  ;;  %640 = vst.msk [vmem:[#allocation2 + $0xf0] sm:$0xff] %vm49_vm0, %v591_v3  ;;  %v568_v13 = vadd.f32 %v454_v10, %v106_v1  ;;  %v484_v15 = vpop.f32.mrf.mxu1  ;;  %v108_v58 = vld [vmem:[#allocation2 + $0x48] sm:$0xff]  ;;  %v145_v3 = vld [vmem:[#allocation2 + $0x170] sm:$0xff] }
  0xd2   :  { %891 = vst.msk [vmem:[%s1632_s3 + $0x70] sm:$0xf] %vm862_vm1, %v841_v6  ;;  %v818_v16 = vpack.c.bf16 %v769_v8, %v769_v8  ;;  %v806_v17 = vmax.f32 %v757_v9, 0.0  ;;  %v668_v18 = vld [vmem:[#allocation2 + $0x30] sm:$0xff]  ;;  %v580_v24 = vadd.f32 %v484_v15, %v118_v14  ;;  %v120_v63 = vld [vmem:[#allocation2 + $0xa8] sm:$0xff] }
  0xd3   :  { %v793_v19 = vmax.f32 %v744_v11, 0.0  ;;  %v830_v20 = vpack.c.bf16 %v781_v12, %v781_v12  ;;  %v721_v21 = vadd.f32 %v1336_v47, %v668_v18  ;;  %617 = vst.msk [vmem:[#allocation2 + $0x38] sm:$0xff] %vm49_vm0, %v568_v13 }
  0xd4   :  { %868 = vst.msk [vmem:[%s1632_s3 + $0x14] sm:$0xf] %vm862_vm1, %v818_v16  ;;  %v855_v22 = vpack.c.bf16 %v806_v17, %v806_v17  ;;  %v132_v17 = vld [vmem:[#allocation2 + $0x108] sm:$0xff] }
  0xd5   :  { %v842_v26 = vpack.c.bf16 %v793_v19, %v793_v19  ;;  %880 = vst.msk [vmem:[%s1632_s3 + $0x44] sm:$0xf] %vm862_vm1, %v830_v20  ;;  %v770_v27 = vmax.f32 %v721_v21, 0.0 }
  0xd6   :  { %905 = vst.msk [vmem:[%s1632_s3 + $0xa8] sm:$0xf] %vm862_vm1, %v855_v22  ;;  %v680_v28 = vld [vmem:[#allocation2 + $0x90] sm:$0xff]  ;;  %v514_v29 = vpop.f32.mrf.mxu2 }
  0xd7   :  { %892 = vst.msk [vmem:[%s1632_s3 + $0x74] sm:$0xf] %vm862_vm1, %v842_v26  ;;  %v819_v31 = vpack.c.bf16 %v770_v27, %v770_v27  ;;  %v733_v32 = vadd.f32 %v1336_v47, %v680_v28  ;;  %v592_v33 = vadd.f32 %v514_v29, %v130_v23  ;;  %v705_v34 = vld [vmem:[#allocation2 + $0x158] sm:$0xff]  ;;  %v549_v36 = vpop.f32.mrf.mxu3  ;;  %v109_v22 = vld [vmem:[#allocation2 + $0x50] sm:$0xff] }
  0xd8   :  { %v692_v37 = vld [vmem:[#allocation2 + $0xf0] sm:$0xff]  ;;  %v758_v38 = vadd.f32 %v1336_v47, %v705_v34  ;;  %629 = vst.msk [vmem:[#allocation2 + $0x98] sm:$0xff] %vm49_vm0, %v580_v24  ;;  %v457_v39 = vpop.f32.mrf.mxu0  ;;  %v606_v62 = vadd.f32 %v549_v36, %v144_v54 }
  0xd9   :  { %v745_v40 = vadd.f32 %v1336_v47, %v692_v37  ;;  %869 = vst.msk [vmem:[%s1632_s3 + $0x18] sm:$0xf] %vm862_vm1, %v819_v31  ;;  %v782_v41 = vmax.f32 %v733_v32, 0.0  ;;  %v569_v42 = vadd.f32 %v457_v39, %v107_v30  ;;  %v487_v44 = vpop.f32.mrf.mxu1  ;;  %v121_v26 = vld [vmem:[#allocation2 + $0xb0] sm:$0xff]  ;;  %v146_v31 = vld [vmem:[#allocation2 + $0x178] sm:$0xff] }
  0xda   :  { %641 = vst.msk [vmem:[#allocation2 + $0xf8] sm:$0xff] %vm49_vm0, %v592_v33  ;;  %v807_v45 = vmax.f32 %v758_v38, 0.0  ;;  %v669_v46 = vld [vmem:[#allocation2 + $0x38] sm:$0xff]  ;;  %v581_v53 = vadd.f32 %v487_v44, %v119_v43 }
  0xdb   :  { %v794_v48 = vmax.f32 %v745_v40, 0.0  ;;  %v831_v49 = vpack.c.bf16 %v782_v41, %v782_v41  ;;  %v722_v50 = vadd.f32 %v1336_v47, %v669_v46  ;;  %654 = vst.msk [vmem:[#allocation2 + $0x160] sm:$0xff] %vm49_vm0, %v605_v35 }
  0xdc   :  { %v856_v51 = vpack.c.bf16 %v807_v45, %v807_v45  ;;  %618 = vst.msk [vmem:[#allocation2 + $0x40] sm:$0xff] %vm49_vm0, %v569_v42 }
  0xdd   :  { %v843_v55 = vpack.c.bf16 %v794_v48, %v794_v48  ;;  %881 = vst.msk [vmem:[%s1632_s3 + $0x48] sm:$0xf] %vm862_vm1, %v831_v49  ;;  %v771_v56 = vmax.f32 %v722_v50, 0.0  ;;  %v133_v49 = vld [vmem:[#allocation2 + $0x110] sm:$0xff] }
  0xde   :  { %906 = vst.msk [vmem:[%s1632_s3 + $0xac] sm:$0xf] %vm862_vm1, %v856_v51  ;;  %v517_v57 = vpop.f32.mrf.mxu2 }
  0xdf   :  { %893 = vst.msk [vmem:[%s1632_s3 + $0x78] sm:$0xf] %vm862_vm1, %v843_v55  ;;  %v820_v59 = vpack.c.bf16 %v771_v56, %v771_v56  ;;  %v681_v60 = vld [vmem:[#allocation2 + $0x98] sm:$0xff]  ;;  %v593_v61 = vadd.f32 %v517_v57, %v131_v52  ;;  %v552_v0 = vpop.f32.mrf.mxu3 }
  0xe0   :  { %v734_v1 = vadd.f32 %v1336_v47, %v681_v60  ;;  %630 = vst.msk [vmem:[#allocation2 + $0xa0] sm:$0xff] %vm49_vm0, %v581_v53  ;;  %v459_v2 = vpop.f32.mrf.mxu0  ;;  %v607_v13 = vadd.f32 %v552_v0, %v145_v3  ;;  %v110_v57 = vld [vmem:[#allocation2 + $0x58] sm:$0xff] }
  0xe1   :  { %v693_v4 = vld [vmem:[#allocation2 + $0xf8] sm:$0xff]  ;;  %870 = vst.msk [vmem:[%s1632_s3 + $0x1c] sm:$0xf] %vm862_vm1, %v820_v59  ;;  %v570_v5 = vadd.f32 %v459_v2, %v108_v58  ;;  %v489_v6 = vpop.f32.mrf.mxu1  ;;  %v147_v2 = vld [vmem:[#allocation2 + $0x180] sm:$0xff] }
  0xe2   :  { %v746_v7 = vadd.f32 %v1336_v47, %v693_v4  ;;  %v783_v8 = vmax.f32 %v734_v1, 0.0  ;;  %642 = vst.msk [vmem:[#allocation2 + $0x100] sm:$0xff] %vm49_vm0, %v593_v61  ;;  %v706_v9 = vld [vmem:[#allocation2 + $0x160] sm:$0xff]  ;;  %v582_v10 = vadd.f32 %v489_v6, %v120_v63 }
  0xe3   :  { %v759_v11 = vadd.f32 %v1336_v47, %v706_v9  ;;  %v670_v12 = vld [vmem:[#allocation2 + $0x40] sm:$0xff]  ;;  %655 = vst.msk [vmem:[#allocation2 + $0x168] sm:$0xff] %vm49_vm0, %v606_v62  ;;  %v122_v62 = vld [vmem:[#allocation2 + $0xb8] sm:$0xff] }
  0xe4   :  { %v795_v14 = vmax.f32 %v746_v7, 0.0  ;;  %v832_v15 = vpack.c.bf16 %v783_v8, %v783_v8  ;;  %v723_v16 = vadd.f32 %v1336_v47, %v670_v12  ;;  %619 = vst.msk [vmem:[#allocation2 + $0x48] sm:$0xff] %vm49_vm0, %v570_v5 }
  0xe5   :  { %v808_v18 = vmax.f32 %v759_v11, 0.0  ;;  %631 = vst.msk [vmem:[#allocation2 + $0xa8] sm:$0xff] %vm49_vm0, %v582_v10 }
  0xe6   :  { %v844_v19 = vpack.c.bf16 %v795_v14, %v795_v14  ;;  %882 = vst.msk [vmem:[%s1632_s3 + $0x4c] sm:$0xf] %vm862_vm1, %v832_v15  ;;  %v772_v20 = vmax.f32 %v723_v16, 0.0  ;;  %v519_v21 = vpop.f32.mrf.mxu2  ;;  %v134_v14 = vld [vmem:[#allocation2 + $0x118] sm:$0xff] }
  0xe7   :  { %v857_v23 = vpack.c.bf16 %v808_v18, %v808_v18  ;;  %v682_v24 = vld [vmem:[#allocation2 + $0xa0] sm:$0xff]  ;;  %v594_v25 = vadd.f32 %v519_v21, %v132_v17  ;;  %656 = vst.msk [vmem:[#allocation2 + $0x170] sm:$0xff] %vm49_vm0, %v607_v13  ;;  %v554_v27 = vpop.f32.mrf.mxu3 }
  0xe8   :  { %894 = vst.msk [vmem:[%s1632_s3 + $0x7c] sm:$0xf] %vm862_vm1, %v844_v19  ;;  %v821_v28 = vpack.c.bf16 %v772_v20, %v772_v20  ;;  %v735_v29 = vadd.f32 %v1336_v47, %v682_v24  ;;  %v462_v30 = vpop.f32.mrf.mxu0  ;;  %v608_v41 = vadd.f32 %v554_v27, %v146_v31 }
  0xe9   :  { %v694_v32 = vld [vmem:[#allocation2 + $0x100] sm:$0xff]  ;;  %907 = vst.msk [vmem:[%s1632_s3 + $0xb0] sm:$0xf] %vm862_vm1, %v857_v23  ;;  %v571_v33 = vadd.f32 %v462_v30, %v109_v22  ;;  %v492_v34 = vpop.f32.mrf.mxu1 }
  0xea   :  { %v747_v35 = vadd.f32 %v1336_v47, %v694_v32  ;;  %871 = vst.msk [vmem:[%s1632_s3 + $0x20] sm:$0xf] %vm862_vm1, %v821_v28  ;;  %v784_v36 = vmax.f32 %v735_v29, 0.0  ;;  %v707_v37 = vld [vmem:[#allocation2 + $0x168] sm:$0xff]  ;;  %v583_v38 = vadd.f32 %v492_v34, %v121_v26  ;;  %v135_v29 = vld [vmem:[#allocation2 + $0x120] sm:$0xff] }
  0xeb   :  { %643 = vst.msk [vmem:[#allocation2 + $0x108] sm:$0xff] %vm49_vm0, %v594_v25  ;;  %v760_v39 = vadd.f32 %v1336_v47, %v707_v37  ;;  %v671_v40 = vld [vmem:[#allocation2 + $0x48] sm:$0xff] }
  0xec   :  { %v796_v42 = vmax.f32 %v747_v35, 0.0  ;;  %v833_v43 = vpack.c.bf16 %v784_v36, %v784_v36  ;;  %v724_v44 = vadd.f32 %v1336_v47, %v671_v40  ;;  %v683_v45 = vld [vmem:[#allocation2 + $0xa8] sm:$0xff]  ;;  %620 = vst.msk [vmem:[#allocation2 + $0x50] sm:$0xff] %vm49_vm0, %v571_v33 }
  0xed   :  { %v809_v46 = vmax.f32 %v760_v39, 0.0  ;;  %v736_v48 = vadd.f32 %v1336_v47, %v683_v45  ;;  %632 = vst.msk [vmem:[#allocation2 + $0xb0] sm:$0xff] %vm49_vm0, %v583_v38 }
  0xee   :  { %v845_v50 = vpack.c.bf16 %v796_v42, %v796_v42  ;;  %883 = vst.msk [vmem:[%s1632_s3 + $0x50] sm:$0xf] %vm862_vm1, %v833_v43  ;;  %v773_v51 = vmax.f32 %v724_v44, 0.0  ;;  %v522_v52 = vpop.f32.mrf.mxu2  ;;  %v708_v53 = vld [vmem:[#allocation2 + $0x170] sm:$0xff] }
  0xef   :  { %v858_v54 = vpack.c.bf16 %v809_v46, %v809_v46  ;;  %v785_v55 = vmax.f32 %v736_v48, 0.0  ;;  %v761_v56 = vadd.f32 %v1336_v47, %v708_v53  ;;  %657 = vst.msk [vmem:[#allocation2 + $0x178] sm:$0xff] %vm49_vm0, %v608_v41  ;;  %v557_v58 = vpop.f32.mrf.mxu3  ;;  %v595_v60 = vadd.f32 %v522_v52, %v133_v49  ;;  %v136_v49 = vld [vmem:[#allocation2 + $0x128] sm:$0xff] }
  0xf0   :  { %895 = vst.msk [vmem:[%s1632_s3 + $0x80] sm:$0xf] %vm862_vm1, %v845_v50  ;;  %v822_v59 = vpack.c.bf16 %v773_v51, %v773_v51  ;;  %v464_v61 = vpop.f32.mrf.mxu0  ;;  %v609_v11 = vadd.f32 %v557_v58, %v147_v2 }
  0xf1   :  { %908 = vst.msk [vmem:[%s1632_s3 + $0xb4] sm:$0xf] %vm862_vm1, %v858_v54  ;;  %v834_v63 = vpack.c.bf16 %v785_v55, %v785_v55  ;;  %v810_v0 = vmax.f32 %v761_v56, 0.0  ;;  %v494_v1 = vpop.f32.mrf.mxu1  ;;  %v572_v4 = vadd.f32 %v464_v61, %v110_v57 }
  0xf2   :  { %v695_v3 = vld [vmem:[#allocation2 + $0x108] sm:$0xff]  ;;  %872 = vst.msk [vmem:[%s1632_s3 + $0x24] sm:$0xf] %vm862_vm1, %v822_v59  ;;  %v584_v8 = vadd.f32 %v494_v1, %v122_v62 }
  0xf3   :  { %v748_v5 = vadd.f32 %v1336_v47, %v695_v3  ;;  %884 = vst.msk [vmem:[%s1632_s3 + $0x54] sm:$0xf] %vm862_vm1, %v834_v63  ;;  %v859_v6 = vpack.c.bf16 %v810_v0, %v810_v0  ;;  %v672_v7 = vld [vmem:[#allocation2 + $0x50] sm:$0xff] }
  0xf4   :  { %644 = vst.msk [vmem:[#allocation2 + $0x110] sm:$0xff] %vm49_vm0, %v595_v60  ;;  %v725_v9 = vadd.f32 %v1336_v47, %v672_v7  ;;  %v684_v10 = vld [vmem:[#allocation2 + $0xb0] sm:$0xff] }
  0xf5   :  { %v797_v12 = vmax.f32 %v748_v5, 0.0  ;;  %909 = vst.msk [vmem:[%s1632_s3 + $0xb8] sm:$0xf] %vm862_vm1, %v859_v6  ;;  %v737_v13 = vadd.f32 %v1336_v47, %v684_v10 }
  0xf6   :  { %v774_v15 = vmax.f32 %v725_v9, 0.0  ;;  %v524_v16 = vpop.f32.mrf.mxu2  ;;  %v709_v17 = vld [vmem:[#allocation2 + $0x178] sm:$0xff]  ;;  %621 = vst.msk [vmem:[#allocation2 + $0x58] sm:$0xff] %vm49_vm0, %v572_v4 }
  0xf7   :  { %v846_v18 = vpack.c.bf16 %v797_v12, %v797_v12  ;;  %v786_v19 = vmax.f32 %v737_v13, 0.0  ;;  %v762_v20 = vadd.f32 %v1336_v47, %v709_v17  ;;  %633 = vst.msk [vmem:[#allocation2 + $0xb8] sm:$0xff] %vm49_vm0, %v584_v8  ;;  %v559_v21 = vpop.f32.mrf.mxu3  ;;  %v596_v23 = vadd.f32 %v524_v16, %v134_v14 }
  0xf8   :  { %v823_v22 = vpack.c.bf16 %v774_v15, %v774_v15  ;;  %658 = vst.msk [vmem:[#allocation2 + $0x180] sm:$0xff] %vm49_vm0, %v609_v11 }
  0xf9   :  { %896 = vst.msk [vmem:[%s1632_s3 + $0x84] sm:$0xf] %vm862_vm1, %v846_v18  ;;  %v835_v24 = vpack.c.bf16 %v786_v19, %v786_v19  ;;  %v811_v25 = vmax.f32 %v762_v20, 0.0 }
  0xfa   :  { %873 = vst.msk [vmem:[%s1632_s3 + $0x28] sm:$0xf] %vm862_vm1, %v823_v22 }
  0xfb   :  { %v696_v26 = vld [vmem:[#allocation2 + $0x110] sm:$0xff]  ;;  %885 = vst.msk [vmem:[%s1632_s3 + $0x58] sm:$0xf] %vm862_vm1, %v835_v24  ;;  %v860_v27 = vpack.c.bf16 %v811_v25, %v811_v25 }
  0xfc   :  { %v749_v28 = vadd.f32 %v1336_v47, %v696_v26  ;;  %645 = vst.msk [vmem:[#allocation2 + $0x118] sm:$0xff] %vm49_vm0, %v596_v23 }
  0xfd   :  { %910 = vst.msk [vmem:[%s1632_s3 + $0xbc] sm:$0xf] %vm862_vm1, %v860_v27  ;;  %v673_v30 = vld [vmem:[#allocation2 + $0x58] sm:$0xff] }
  0xfe   :  { %v798_v31 = vmax.f32 %v749_v28, 0.0  ;;  %v726_v32 = vadd.f32 %v1336_v47, %v673_v30  ;;  %v685_v33 = vld [vmem:[#allocation2 + $0xb8] sm:$0xff]  ;;  %v527_v34 = vpop.f32.mrf.mxu2 }
  0xff   :  { %v738_v35 = vadd.f32 %v1336_v47, %v685_v33  ;;  %v597_v36 = vadd.f32 %v527_v34, %v135_v29  ;;  %v710_v37 = vld [vmem:[#allocation2 + $0x180] sm:$0xff] }
 0x100   :  { %v847_v38 = vpack.c.bf16 %v798_v31, %v798_v31  ;;  %v775_v39 = vmax.f32 %v726_v32, 0.0  ;;  %v763_v40 = vadd.f32 %v1336_v47, %v710_v37 }
 0x101   :  { %v787_v41 = vmax.f32 %v738_v35, 0.0  ;;  %646 = vst.msk [vmem:[#allocation2 + $0x120] sm:$0xff] %vm49_vm0, %v597_v36 }
 0x102   :  { %897 = vst.msk [vmem:[%s1632_s3 + $0x88] sm:$0xf] %vm862_vm1, %v847_v38  ;;  %v824_v42 = vpack.c.bf16 %v775_v39, %v775_v39  ;;  %v812_v43 = vmax.f32 %v763_v40, 0.0 }
 0x103   :  { %v697_v44 = vld [vmem:[#allocation2 + $0x118] sm:$0xff]  ;;  %v836_v45 = vpack.c.bf16 %v787_v41, %v787_v41 }
 0x104   :  { %v750_v46 = vadd.f32 %v1336_v47, %v697_v44  ;;  %874 = vst.msk [vmem:[%s1632_s3 + $0x2c] sm:$0xf] %vm862_vm1, %v824_v42  ;;  %v861_v48 = vpack.c.bf16 %v812_v43, %v812_v43 }
 0x105   :  { %886 = vst.msk [vmem:[%s1632_s3 + $0x5c] sm:$0xf] %vm862_vm1, %v836_v45 }
 0x106   :  { %v799_v50 = vmax.f32 %v750_v46, 0.0  ;;  %911 = vst.msk [vmem:[%s1632_s3 + $0xc0] sm:$0xf] %vm862_vm1, %v861_v48  ;;  %v529_v51 = vpop.f32.mrf.mxu2 }
 0x107   :  { %v598_v52 = vadd.f32 %v529_v51, %v136_v49 }
 0x108   :  { %v848_v53 = vpack.c.bf16 %v799_v50, %v799_v50  ;;  %v698_v54 = vld [vmem:[#allocation2 + $0x120] sm:$0xff] }
 0x109   :  { %v751_v55 = vadd.f32 %v1336_v47, %v698_v54  ;;  %647 = vst.msk [vmem:[#allocation2 + $0x128] sm:$0xff] %vm49_vm0, %v598_v52 }
 0x10a   :  { %898 = vst.msk [vmem:[%s1632_s3 + $0x8c] sm:$0xf] %vm862_vm1, %v848_v53 }
 0x10b   :  { %v800_v56 = vmax.f32 %v751_v55, 0.0 }
 0x10d   :  { %v849_v57 = vpack.c.bf16 %v800_v56, %v800_v56 }
 0x10f   :  { %899 = vst.msk [vmem:[%s1632_s3 + $0x90] sm:$0xf] %vm862_vm1, %v849_v57 }
 0x110   :  { %v699_v58 = vld [vmem:[#allocation2 + $0x128] sm:$0xff] }
 0x111   :  { %v752_v59 = vadd.f32 %v1336_v47, %v699_v58 }
 0x113   :  { %v801_v60 = vmax.f32 %v752_v59, 0.0 }
 0x115   :  { %v850_v61 = vpack.c.bf16 %v801_v60, %v801_v60 }
 0x117   :  { %900 = vst.msk [vmem:[%s1632_s3 + $0x94] sm:$0xf] %vm862_vm1, %v850_v61 }
 0x118   :  { %916 = vsyncpa [#allocation4], 1 }
 0x119   :  { %917 = vsyncpa [#allocation6], 1 }

// kernel: autoencoder_forward.5
= control target key start
LH: loop header
LB: loop body
LE: loop exit
PB: predicated region body
PF: predicated region fallthrough
CT: control target
= control target key end

     0   :  { %s2088_s12 = smov 0   ;;  %s2090_s13 = smov 0   ;;  %s2490_s0 = inlined_call_operand.vmem [shape: bf16[128,2304], index: 0, kind: input, shape index: {}]   ;;  %s2491_s1 = inlined_call_operand.vmem [shape: bf16[2304,128], index: 1, kind: input, shape index: {}]   ;;  %s2492_s2 = inlined_call_operand.vmem [shape: f32[1,128], index: 2, kind: input, shape index: {}]   ;;  %s2493_s3 = inlined_call_operand.vmem [shape: bf16[128,128], index: 3, kind: output, shape index: {}]  }
   0x1   :  { %s2092_s14 = smov 0  }
   0x2 LB: > { %s2104_s15 = sadd.s32 4294967295, %s2065_s14   ;;  %s2107_s16 = sadd.s32 1, %s2065_s14   ;;  %s2065_s14 = sphi %s2092_s14, %s2496_s14   ;;  %s2061_s13 = sphi %s2090_s13, %s2495_s13   ;;  %s2057_s12 = sphi %s2088_s12, %s2494_s12  }
   0x3   : > { %s17_s17 = ssub.s32 %s2065_s14, %s2107_s16  ;;  %s20_s18 = sadd.s32 1, %s2061_s13 }
   0x4   : > { %p18_p0 = scmp.eq.s32.totalorder %s17_s17, 0  ;;  %p27_p1 = scmp.ne.s32.totalorder %s2061_s13, %s2057_s12 }
   0x5   : > { %p28_p2 = scmp.eq.s32.totalorder %s2065_s14, 0  ;;  %p1463_p4 = scmp.ge.s32.totalorder %s2065_s14, 3 }
   0x6   : > { %s2116_s19 = scalar_select %p18_p0, %s2061_s13, %s20_s18  }
   0x7   : > { %p29_p3 = por %p28_p2, %p27_p1  ;;  %124 = sbr.rel (%p1463_p4) target bundleno = 65 (0x41), region = 20 }
   0xc   : > { %127 = sbr.rel (!%p29_p3) target bundleno = 65 (0x41), region = 24  ;;  %s129_s20 = sand.u32 (%p29_p3), 1, %s2061_s13  }
   0xd   : > { %s1855_s21 = smul.u32 (%p29_p3), 24, %s2065_s14 }
   0xe   : > { %s2015_s22 = smul.u32 (%p29_p3), 384, %s129_s20 }
   0xf   : > { %s2124_s25 = scalar_lea.vmem (%p29_p3), %s2490_s0, %s1855_s21 }
  0x10   : > { %v147_v0 = vld [vmem:[%s2124_s25] sm:$0xff] (%p29_p3)  ;;  %v149_v1 = vld [vmem:[%s2124_s25 + $0x8] sm:$0xff] (%p29_p3)  ;;  %v151_v2 = vld [vmem:[%s2124_s25 + $0x10] sm:$0xff] (%p29_p3)  ;;  %s2129_s26 = scalar_lea.vmem (%p29_p3), [#allocation3], %s2015_s22 }
  0x11   : > { %148 = vst [vmem:[%s2129_s26] sm:$0xff] %v147_v0  ;;  %v153_v3 = vld [vmem:[%s2124_s25 + $0x48] sm:$0xff]  ;;  %v155_v4 = vld [vmem:[%s2124_s25 + $0x50] sm:$0xff]  ;;  %v157_v5 = vld [vmem:[%s2124_s25 + $0x58] sm:$0xff] }
  0x12   : > { %150 = vst [vmem:[%s2129_s26 + $0x8] sm:$0xff] %v149_v1  ;;  %v159_v6 = vld [vmem:[%s2124_s25 + $0x90] sm:$0xff]  ;;  %v161_v7 = vld [vmem:[%s2124_s25 + $0x98] sm:$0xff]  ;;  %v163_v8 = vld [vmem:[%s2124_s25 + $0xa0] sm:$0xff] }
  0x13   : > { %152 = vst [vmem:[%s2129_s26 + $0x10] sm:$0xff] %v151_v2  ;;  %v165_v9 = vld [vmem:[%s2124_s25 + $0xd8] sm:$0xff]  ;;  %v167_v10 = vld [vmem:[%s2124_s25 + $0xe0] sm:$0xff]  ;;  %v169_v11 = vld [vmem:[%s2124_s25 + $0xe8] sm:$0xff] }
  0x14   : > { %154 = vst [vmem:[%s2129_s26 + $0x18] sm:$0xff] %v153_v3  ;;  %v171_v12 = vld [vmem:[%s2124_s25 + $0x120] sm:$0xff]  ;;  %v173_v13 = vld [vmem:[%s2124_s25 + $0x128] sm:$0xff]  ;;  %v175_v14 = vld [vmem:[%s2124_s25 + $0x130] sm:$0xff] }
  0x15   : > { %156 = vst [vmem:[%s2129_s26 + $0x20] sm:$0xff] %v155_v4  ;;  %v177_v15 = vld [vmem:[%s2124_s25 + $0x168] sm:$0xff]  ;;  %v179_v16 = vld [vmem:[%s2124_s25 + $0x170] sm:$0xff]  ;;  %v181_v17 = vld [vmem:[%s2124_s25 + $0x178] sm:$0xff] }
  0x16   : > { %158 = vst [vmem:[%s2129_s26 + $0x28] sm:$0xff] %v157_v5  ;;  %v183_v18 = vld [vmem:[%s2124_s25 + $0x1b0] sm:$0xff]  ;;  %v185_v19 = vld [vmem:[%s2124_s25 + $0x1b8] sm:$0xff]  ;;  %v187_v20 = vld [vmem:[%s2124_s25 + $0x1c0] sm:$0xff] }
  0x17   : > { %160 = vst [vmem:[%s2129_s26 + $0x30] sm:$0xff] %v159_v6  ;;  %v189_v21 = vld [vmem:[%s2124_s25 + $0x1f8] sm:$0xff]  ;;  %v191_v22 = vld [vmem:[%s2124_s25 + $0x200] sm:$0xff]  ;;  %v193_v23 = vld [vmem:[%s2124_s25 + $0x208] sm:$0xff] }
  0x18   : > { %162 = vst [vmem:[%s2129_s26 + $0x38] sm:$0xff] %v161_v7  ;;  %v195_v24 = vld [vmem:[%s2124_s25 + $0x240] sm:$0xff]  ;;  %v197_v25 = vld [vmem:[%s2124_s25 + $0x248] sm:$0xff]  ;;  %v199_v26 = vld [vmem:[%s2124_s25 + $0x250] sm:$0xff] }
  0x19   : > { %164 = vst [vmem:[%s2129_s26 + $0x40] sm:$0xff] %v163_v8  ;;  %v201_v27 = vld [vmem:[%s2124_s25 + $0x288] sm:$0xff]  ;;  %v203_v28 = vld [vmem:[%s2124_s25 + $0x290] sm:$0xff]  ;;  %v205_v29 = vld [vmem:[%s2124_s25 + $0x298] sm:$0xff] }
  0x1a   : > { %166 = vst [vmem:[%s2129_s26 + $0x48] sm:$0xff] %v165_v9  ;;  %v207_v30 = vld [vmem:[%s2124_s25 + $0x2d0] sm:$0xff]  ;;  %v209_v31 = vld [vmem:[%s2124_s25 + $0x2d8] sm:$0xff]  ;;  %v211_v32 = vld [vmem:[%s2124_s25 + $0x2e0] sm:$0xff] }
  0x1b   : > { %168 = vst [vmem:[%s2129_s26 + $0x50] sm:$0xff] %v167_v10  ;;  %v213_v33 = vld [vmem:[%s2124_s25 + $0x318] sm:$0xff]  ;;  %v215_v34 = vld [vmem:[%s2124_s25 + $0x320] sm:$0xff]  ;;  %v217_v35 = vld [vmem:[%s2124_s25 + $0x328] sm:$0xff] }
  0x1c   : > { %170 = vst [vmem:[%s2129_s26 + $0x58] sm:$0xff] %v169_v11  ;;  %v219_v36 = vld [vmem:[%s2124_s25 + $0x360] sm:$0xff]  ;;  %v221_v37 = vld [vmem:[%s2124_s25 + $0x368] sm:$0xff]  ;;  %v223_v38 = vld [vmem:[%s2124_s25 + $0x370] sm:$0xff] }
  0x1d   : > { %172 = vst [vmem:[%s2129_s26 + $0x60] sm:$0xff] %v171_v12  ;;  %v225_v39 = vld [vmem:[%s2124_s25 + $0x3a8] sm:$0xff]  ;;  %v227_v40 = vld [vmem:[%s2124_s25 + $0x3b0] sm:$0xff]  ;;  %v229_v41 = vld [vmem:[%s2124_s25 + $0x3b8] sm:$0xff] }
  0x1e   : > { %174 = vst [vmem:[%s2129_s26 + $0x68] sm:$0xff] %v173_v13  ;;  %v231_v42 = vld [vmem:[%s2124_s25 + $0x3f0] sm:$0xff]  ;;  %v233_v43 = vld [vmem:[%s2124_s25 + $0x3f8] sm:$0xff]  ;;  %v235_v44 = vld [vmem:[%s2124_s25 + $0x400] sm:$0xff] }
  0x1f   : > { %176 = vst [vmem:[%s2129_s26 + $0x70] sm:$0xff] %v175_v14  ;;  %v237_v45 = vld [vmem:[%s2124_s25 + $0x438] sm:$0xff]  ;;  %v239_v46 = vld [vmem:[%s2124_s25 + $0x440] sm:$0xff]  ;;  %v241_v47 = vld [vmem:[%s2124_s25 + $0x448] sm:$0xff] }
  0x20   : > { %178 = vst [vmem:[%s2129_s26 + $0x78] sm:$0xff] %v177_v15 }
  0x21   : > { %180 = vst [vmem:[%s2129_s26 + $0x80] sm:$0xff] %v179_v16 }
  0x22   : > { %182 = vst [vmem:[%s2129_s26 + $0x88] sm:$0xff] %v181_v17 }
  0x23   : > { %184 = vst [vmem:[%s2129_s26 + $0x90] sm:$0xff] %v183_v18 }
  0x24   : > { %186 = vst [vmem:[%s2129_s26 + $0x98] sm:$0xff] %v185_v19 }
  0x25   : > { %188 = vst [vmem:[%s2129_s26 + $0xa0] sm:$0xff] %v187_v20 }
  0x26   : > { %190 = vst [vmem:[%s2129_s26 + $0xa8] sm:$0xff] %v189_v21 }
  0x27   : > { %192 = vst [vmem:[%s2129_s26 + $0xb0] sm:$0xff] %v191_v22 }
  0x28   : > { %194 = vst [vmem:[%s2129_s26 + $0xb8] sm:$0xff] %v193_v23 }
  0x29   : > { %196 = vst [vmem:[%s2129_s26 + $0xc0] sm:$0xff] %v195_v24 }
  0x2a   : > { %198 = vst [vmem:[%s2129_s26 + $0xc8] sm:$0xff] %v197_v25 }
  0x2b   : > { %200 = vst [vmem:[%s2129_s26 + $0xd0] sm:$0xff] %v199_v26 }
  0x2c   : > { %202 = vst [vmem:[%s2129_s26 + $0xd8] sm:$0xff] %v201_v27 }
  0x2d   : > { %204 = vst [vmem:[%s2129_s26 + $0xe0] sm:$0xff] %v203_v28 }
  0x2e   : > { %206 = vst [vmem:[%s2129_s26 + $0xe8] sm:$0xff] %v205_v29 }
  0x2f   : > { %208 = vst [vmem:[%s2129_s26 + $0xf0] sm:$0xff] %v207_v30 }
  0x30   : > { %210 = vst [vmem:[%s2129_s26 + $0xf8] sm:$0xff] %v209_v31 }
  0x31   : > { %212 = vst [vmem:[%s2129_s26 + $0x100] sm:$0xff] %v211_v32 }
  0x32   : > { %214 = vst [vmem:[%s2129_s26 + $0x108] sm:$0xff] %v213_v33 }
  0x33   : > { %216 = vst [vmem:[%s2129_s26 + $0x110] sm:$0xff] %v215_v34 }
  0x34   : > { %218 = vst [vmem:[%s2129_s26 + $0x118] sm:$0xff] %v217_v35 }
  0x35   : > { %220 = vst [vmem:[%s2129_s26 + $0x120] sm:$0xff] %v219_v36 }
  0x36   : > { %222 = vst [vmem:[%s2129_s26 + $0x128] sm:$0xff] %v221_v37 }
  0x37   : > { %224 = vst [vmem:[%s2129_s26 + $0x130] sm:$0xff] %v223_v38 }
  0x38   : > { %226 = vst [vmem:[%s2129_s26 + $0x138] sm:$0xff] %v225_v39 }
  0x39   : > { %228 = vst [vmem:[%s2129_s26 + $0x140] sm:$0xff] %v227_v40 }
  0x3a   : > { %230 = vst [vmem:[%s2129_s26 + $0x148] sm:$0xff] %v229_v41 }
  0x3b   : > { %232 = vst [vmem:[%s2129_s26 + $0x150] sm:$0xff] %v231_v42 }
  0x3c   : > { %234 = vst [vmem:[%s2129_s26 + $0x158] sm:$0xff] %v233_v43 }
  0x3d   : > { %236 = vst [vmem:[%s2129_s26 + $0x160] sm:$0xff] %v235_v44 }
  0x3e   : > { %238 = vst [vmem:[%s2129_s26 + $0x168] sm:$0xff] %v237_v45 }
  0x3f   : > { %240 = vst [vmem:[%s2129_s26 + $0x170] sm:$0xff] %v239_v46 }
  0x40   : > { %242 = vst [vmem:[%s2129_s26 + $0x178] sm:$0xff] %v241_v47 }
  0x41 PF: > { %p1465_p5 = scmp.ge.s32.totalorder %s2065_s14, 1  ;;  %p256_p6 = scmp.lt.s32.totalorder %s2065_s14, 4 }
  0x43   : > { %p257_p7 = pnand %p1465_p5, %p256_p6 }
  0x44   : > { %s263_s27 = sand.u32 (!%p257_p7), 1, %s2057_s12   ;;  %s287_s28 = smul.u32 (!%p257_p7), 96, %s2104_s15 }
  0x45   : > { %260 = sbr.rel (%p257_p7) target bundleno = 471 (0x1d7), region = 51  ;;  %p1467_p9 = scmp.ne.s32.totalorder (!%p257_p7), %s2104_s15, 0 }
  0x46   : > { %s2016_s29 = smul.u32 (!%p257_p7), 384, %s263_s27  ;;  %p288_p8 = scmp.lt.s32.totalorder (!%p257_p7), %s287_s28, 287 }
  0x48   : > { %s2233_s7 = scalar_lea.vmem (!%p257_p7), [#allocation3], %s2016_s29 }
  0x4a   : > { %s2498_s28 = smov (!%p288_p8, %s287_s28), 287  ;;  %296 = sbr.rel (%p1467_p9) target bundleno = 96 (0x60), region = 59 }
  0x4b   : > { %s1466_s30 = sshll.u32 %s2498_s28, 2 }
  0x4c   : > { %s2231_s6 = scalar_lea.vmem %s2491_s1, %s1466_s30 }
  0x4f   : > { %v2067_v48 = vmov 0.0  }
  0x50   : > { %297 = vst [vmem:[#allocation2 + $0x30] sm:$0xff] %v2067_v48 }
  0x51   : > { %298 = vst [vmem:[#allocation2] sm:$0xff] %v2067_v48 }
  0x52   : > { %299 = vst [vmem:[#allocation2 + $0x58] sm:$0xff] %v2067_v48 }
  0x53   : > { %300 = vst [vmem:[#allocation2 + $0x18] sm:$0xff] %v2067_v48 }
  0x54   : > { %301 = vst [vmem:[#allocation2 + $0x50] sm:$0xff] %v2067_v48 }
  0x55   : > { %302 = vst [vmem:[#allocation2 + $0x68] sm:$0xff] %v2067_v48 }
  0x56   : > { %303 = vst [vmem:[#allocation2 + $0x8] sm:$0xff] %v2067_v48 }
  0x57   : > { %304 = vst [vmem:[#allocation2 + $0x48] sm:$0xff] %v2067_v48 }
  0x58   : > { %305 = vst [vmem:[#allocation2 + $0x40] sm:$0xff] %v2067_v48 }
  0x59   : > { %306 = vst [vmem:[#allocation2 + $0x20] sm:$0xff] %v2067_v48 }
  0x5a   : > { %307 = vst [vmem:[#allocation2 + $0x10] sm:$0xff] %v2067_v48 }
  0x5b   : > { %308 = vst [vmem:[#allocation2 + $0x38] sm:$0xff] %v2067_v48 }
  0x5c   : > { %309 = vst [vmem:[#allocation2 + $0x60] sm:$0xff] %v2067_v48 }
  0x5d   : > { %310 = vst [vmem:[#allocation2 + $0x70] sm:$0xff] %v2067_v48 }
  0x5e   : > { %311 = vst [vmem:[#allocation2 + $0x78] sm:$0xff] %v2067_v48 }
  0x5f   : > { %312 = vst [vmem:[#allocation2 + $0x28] sm:$0xff] %v2067_v48 }
  0x60 PF: > { %v1911_v49 = vld [vmem:[%s2231_s6 + $0x38] sm:$0xff]  ;;  %v1910_v51 = vld [vmem:[%s2231_s6 + $0x30] sm:$0xff]  ;;  %v1909_v53 = vld [vmem:[%s2231_s6 + $0x28] sm:$0xff]  ;;  %p1852_p10 = scmp.ne.s32.totalorder %s2104_s15, 2 }
  0x61   : > { %v1919_v50 = vld [vmem:[%s2231_s6 + $0x78] sm:$0xff]  ;;  %1999 = vmatpush.bf16.msra.mxu2 %v1911_v49  ;;  %v1918_v52 = vld [vmem:[%s2231_s6 + $0x70] sm:$0xff]  ;;  %1001 = vmatpush.bf16.msra.mxu0 %v1911_v49  ;;  %v1917_v54 = vld [vmem:[%s2231_s6 + $0x68] sm:$0xff] }
  0x62   : > { %2007 = vmatpush.bf16.msra.mxu3 %v1919_v50  ;;  %1050 = vmatpush.bf16.msra.mxu1 %v1919_v50  ;;  %v1908_v55 = vld [vmem:[%s2231_s6 + $0x20] sm:$0xff]  ;;  %v1907_v57 = vld [vmem:[%s2231_s6 + $0x18] sm:$0xff]  ;;  %v1906_v59 = vld [vmem:[%s2231_s6 + $0x10] sm:$0xff] }
  0x63   : > { %v1916_v56 = vld [vmem:[%s2231_s6 + $0x60] sm:$0xff]  ;;  %v1915_v58 = vld [vmem:[%s2231_s6 + $0x58] sm:$0xff]  ;;  %v1914_v60 = vld [vmem:[%s2231_s6 + $0x50] sm:$0xff] }
  0x64   : > { %v1905_v61 = vld [vmem:[%s2231_s6 + $0x8] sm:$0xff]  ;;  %v1904_v63 = vld [vmem:[%s2231_s6] sm:$0xff]  ;;  %v1883_v2 = vld [vmem:[%s2233_s7 + $0xd4] sm:$0xf0] }
  0x65   : > { %2000 = vmatpush.bf16.msra.mxu2 %v1910_v51  ;;  %1002 = vmatpush.bf16.msra.mxu0 %v1910_v51  ;;  %v1913_v62 = vld [vmem:[%s2231_s6 + $0x48] sm:$0xff]  ;;  %v1912_v0 = vld [vmem:[%s2231_s6 + $0x40] sm:$0xff]  ;;  %v1568_v4 = vld [vmem:[%s2233_s7 + $0xd8] sm:$0xf0] }
  0x66   : > { %2008 = vmatpush.bf16.msra.mxu3 %v1918_v52  ;;  %1051 = vmatpush.bf16.msra.mxu1 %v1918_v52  ;;  %v1566_v1 = vld [vmem:[%s2233_s7 + $0xc0] sm:$0xf]  ;;  %v1880_v3 = vld [vmem:[%s2233_s7 + $0xc4] sm:$0xf]  ;;  %v1859_v6 = vld [vmem:[%s2233_s7 + $0x14] sm:$0xf0] }
  0x67   : > { %v1470_v5 = vld [vmem:[%s2233_s7] sm:$0xf]  ;;  %v1856_v7 = vld [vmem:[%s2233_s7 + $0x4] sm:$0xf]  ;;  %v1472_v8 = vld [vmem:[%s2233_s7 + $0x18] sm:$0xf0]  ;;  %v1567_v11 = vor.u32 %v1883_v2, %v1566_v1  ;;  %v1571_v12 = vor.u32 %v1880_v3, %v1568_v4 }
  0x68   : > { %v1927_v9 = vld [vmem:[%s2231_s6 + $0xb8] sm:$0xff]  ;;  %v1471_v13 = vor.u32 %v1859_v6, %v1470_v5  ;;  %v1475_v14 = vor.u32 %v1856_v7, %v1472_v8  ;;  %v1926_v17 = vld [vmem:[%s2231_s6 + $0xb0] sm:$0xff]  ;;  %v1925_v21 = vld [vmem:[%s2231_s6 + $0xa8] sm:$0xff] }
  0x69   : > { %2001 = vmatpush.bf16.msra.mxu2 %v1909_v53  ;;  %1003 = vmatpush.bf16.msra.mxu0 %v1909_v53  ;;  %v1935_v10 = vld [vmem:[%s2231_s6 + $0xf8] sm:$0xff]  ;;  %v1934_v18 = vld [vmem:[%s2231_s6 + $0xf0] sm:$0xff]  ;;  %v1933_v22 = vld [vmem:[%s2231_s6 + $0xe8] sm:$0xff] }
  0x6a   : > { %2009 = vmatpush.bf16.msra.mxu3 %v1917_v54  ;;  %1052 = vmatpush.bf16.msra.mxu1 %v1917_v54  ;;  %v1943_v15 = vld [vmem:[%s2231_s6 + $0x138] sm:$0xff]  ;;  %v1942_v19 = vld [vmem:[%s2231_s6 + $0x130] sm:$0xff]  ;;  %v1941_v23 = vld [vmem:[%s2231_s6 + $0x128] sm:$0xff] }
  0x6b   : > { %v1951_v16 = vld [vmem:[%s2231_s6 + $0x178] sm:$0xff]  ;;  %v1950_v20 = vld [vmem:[%s2231_s6 + $0x170] sm:$0xff]  ;;  %v1949_v24 = vld [vmem:[%s2231_s6 + $0x168] sm:$0xff] }
  0x6c   : > { %v1590_v25 = vld [vmem:[%s2233_s7 + $0xf0] sm:$0xf]  ;;  %v1924_v26 = vld [vmem:[%s2231_s6 + $0xa0] sm:$0xff]  ;;  %v1889_v28 = vld [vmem:[%s2233_s7 + $0x104] sm:$0xf0] }
  0x6d   : > { %2002 = vmatpush.bf16.msra.mxu2 %v1908_v55  ;;  %1004 = vmatpush.bf16.msra.mxu0 %v1908_v55  ;;  %v1932_v27 = vld [vmem:[%s2231_s6 + $0xe0] sm:$0xff]  ;;  %v1886_v29 = vld [vmem:[%s2233_s7 + $0xf4] sm:$0xf]  ;;  %v1592_v30 = vld [vmem:[%s2233_s7 + $0x108] sm:$0xf0]  ;;  %v1591_v39 = vor.u32 %v1889_v28, %v1590_v25 }
  0x6e   : > { %2010 = vmatpush.bf16.msra.mxu3 %v1916_v56  ;;  %1053 = vmatpush.bf16.msra.mxu1 %v1916_v56  ;;  %v1494_v31 = vld [vmem:[%s2233_s7 + $0x30] sm:$0xf]  ;;  %v1865_v32 = vld [vmem:[%s2233_s7 + $0x44] sm:$0xf0]  ;;  %v1862_v33 = vld [vmem:[%s2233_s7 + $0x34] sm:$0xf]  ;;  %v1595_v40 = vor.u32 %v1886_v29, %v1592_v30 }
  0x6f   : > { %v1496_v34 = vld [vmem:[%s2233_s7 + $0x48] sm:$0xf0]  ;;  %v1940_v35 = vld [vmem:[%s2231_s6 + $0x120] sm:$0xff]  ;;  %v1923_v37 = vld [vmem:[%s2231_s6 + $0x98] sm:$0xff]  ;;  %v1495_v41 = vor.u32 %v1865_v32, %v1494_v31 }
  0x70   : > { %v1948_v36 = vld [vmem:[%s2231_s6 + $0x160] sm:$0xff]  ;;  %v1931_v38 = vld [vmem:[%s2231_s6 + $0xd8] sm:$0xff]  ;;  %v1499_v42 = vor.u32 %v1862_v33, %v1496_v34  ;;  %v1922_v45 = vld [vmem:[%s2231_s6 + $0x90] sm:$0xff] }
  0x71   : > { %2003 = vmatpush.bf16.msra.mxu2 %v1907_v57  ;;  %1005 = vmatpush.bf16.msra.mxu0 %v1907_v57  ;;  %v1939_v43 = vld [vmem:[%s2231_s6 + $0x118] sm:$0xff]  ;;  %v1930_v46 = vld [vmem:[%s2231_s6 + $0xd0] sm:$0xff]  ;;  %v1921_v49 = vld [vmem:[%s2231_s6 + $0x88] sm:$0xff] }
  0x72   : > { %2011 = vmatpush.bf16.msra.mxu3 %v1915_v58  ;;  %1054 = vmatpush.bf16.msra.mxu1 %v1915_v58  ;;  %v1947_v44 = vld [vmem:[%s2231_s6 + $0x158] sm:$0xff]  ;;  %v1938_v47 = vld [vmem:[%s2231_s6 + $0x110] sm:$0xff]  ;;  %v1929_v50 = vld [vmem:[%s2231_s6 + $0xc8] sm:$0xff] }
  0x73   : > { %v1946_v48 = vld [vmem:[%s2231_s6 + $0x150] sm:$0xff]  ;;  %v1937_v51 = vld [vmem:[%s2231_s6 + $0x108] sm:$0xff]  ;;  %v1920_v53 = vld [vmem:[%s2231_s6 + $0x80] sm:$0xff] }
  0x74   : > { %v1945_v52 = vld [vmem:[%s2231_s6 + $0x148] sm:$0xff]  ;;  %v1928_v54 = vld [vmem:[%s2231_s6 + $0xc0] sm:$0xff]  ;;  %v1895_v56 = vld [vmem:[%s2233_s7 + $0x134] sm:$0xf0] }
  0x75   : > { %2004 = vmatpush.bf16.msra.mxu2 %v1906_v59  ;;  %1006 = vmatpush.bf16.msra.mxu0 %v1906_v59  ;;  %v1614_v55 = vld [vmem:[%s2233_s7 + $0x120] sm:$0xf]  ;;  %v1892_v57 = vld [vmem:[%s2233_s7 + $0x124] sm:$0xf]  ;;  %v1616_v58 = vld [vmem:[%s2233_s7 + $0x138] sm:$0xf0] }
  0x76   : > { %2012 = vmatpush.bf16.msra.mxu3 %v1914_v60  ;;  %1055 = vmatpush.bf16.msra.mxu1 %v1914_v60  ;;  %v1518_v59 = vld [vmem:[%s2233_s7 + $0x60] sm:$0xf]  ;;  %v1871_v60 = vld [vmem:[%s2233_s7 + $0x74] sm:$0xf0]  ;;  %v1619_v1 = vor.u32 %v1892_v57, %v1616_v58  ;;  %v1638_v5 = vld [vmem:[%s2233_s7 + $0x150] sm:$0xf] }
  0x77   : > { %v1519_v2 = vor.u32 %v1871_v60, %v1518_v59  ;;  %v1944_v4 = vld [vmem:[%s2231_s6 + $0x140] sm:$0xff]  ;;  %v1901_v6 = vld [vmem:[%s2233_s7 + $0x164] sm:$0xf0]  ;;  %v1898_v7 = vld [vmem:[%s2233_s7 + $0x154] sm:$0xf] }
  0x78   : > { %v1640_v8 = vld [vmem:[%s2233_s7 + $0x168] sm:$0xf0]  ;;  %v1502_v29 = vld [vmem:[%s2233_s7 + $0x38] sm:$0xf]  ;;  %v1866_v30 = vld [vmem:[%s2233_s7 + $0x4c] sm:$0xf0] }
  0x79   : > { %2005 = vmatpush.bf16.msra.mxu2 %v1905_v61  ;;  %1007 = vmatpush.bf16.msra.mxu0 %v1905_v61  ;;  %v1868_v61 = vld [vmem:[%s2233_s7 + $0x64] sm:$0xf]  ;;  %v1863_v31 = vld [vmem:[%s2233_s7 + $0x3c] sm:$0xf]  ;;  %v1504_v32 = vld [vmem:[%s2233_s7 + $0x50] sm:$0xf0] }
  0x7a   : > { %2013 = vmatpush.bf16.msra.mxu3 %v1913_v62  ;;  %1056 = vmatpush.bf16.msra.mxu1 %v1913_v62  ;;  %v1520_v62 = vld [vmem:[%s2233_s7 + $0x78] sm:$0xf0]  ;;  %v1510_v33 = vld [vmem:[%s2233_s7 + $0x40] sm:$0xf]  ;;  %v1867_v34 = vld [vmem:[%s2233_s7 + $0x54] sm:$0xf0] }
  0x7b   : > { %v1523_v3 = vor.u32 %v1868_v61, %v1520_v62  ;;  %v1558_v57 = vld [vmem:[%s2233_s7 + $0xa0] sm:$0xf]  ;;  %v1879_v58 = vld [vmem:[%s2233_s7 + $0xb4] sm:$0xf0]  ;;  %v1876_v59 = vld [vmem:[%s2233_s7 + $0xa4] sm:$0xf] }
  0x7c   : > { %v1560_v60 = vld [vmem:[%s2233_s7 + $0xb8] sm:$0xf0] }
  0x7d   : > { %2006 = vmatpush.bf16.msra.mxu2 %v1904_v63  ;;  %1008 = vmatpush.bf16.msra.mxu0 %v1904_v63  ;;  %v1936_v63 = vld [vmem:[%s2231_s6 + $0x100] sm:$0xff] }
  0x7e   : > { %2014 = vmatpush.bf16.msra.mxu3 %v1912_v0  ;;  %1057 = vmatpush.bf16.msra.mxu1 %v1912_v0  ;;  %v1615_v0 = vor.u32 %v1895_v56, %v1614_v55  ;;  %v1875_v55 = vld [vmem:[%s2233_s7 + $0x9c] sm:$0xf]  ;;  %v1552_v56 = vld [vmem:[%s2233_s7 + $0xb0] sm:$0xf0] }
  0x7f   : > { %v1555_v62 = vor.u32 %v1875_v55, %v1552_v56 }
  0x80   : > { %1029 = vmatmul.bf16.vlgmr.msra.gmra.mxu2 %v1567_v11  ;;  %1009 = vmatmul.bf16.vlgmr.msra.gmra.mxu0 %v1471_v13  ;;  %v1874_v11 = vld [vmem:[%s2233_s7 + $0x94] sm:$0xf]  ;;  %v1639_v13 = vor.u32 %v1901_v6, %v1638_v5  ;;  %v1582_v5 = vld [vmem:[%s2233_s7 + $0xd0] sm:$0xf]  ;;  %v1885_v6 = vld [vmem:[%s2233_s7 + $0xe4] sm:$0xf0] }
  0x81   : > { %1099 = vmatpush.bf16.msrb.mxu2 %v1927_v9  ;;  %1078 = vmatmul.bf16.vlgmr.msra.gmra.mxu3 %v1571_v12  ;;  %v1542_v9 = vld [vmem:[%s2233_s7 + $0x90] sm:$0xf]  ;;  %v1544_v12 = vld [vmem:[%s2233_s7 + $0xa8] sm:$0xf0] }
  0x82   : > { %1148 = vmatpush.bf16.msrb.mxu3 %v1935_v10  ;;  %1058 = vmatmul.bf16.vlgmr.msra.gmra.mxu1 %v1475_v14  ;;  %v1877_v10 = vld [vmem:[%s2233_s7 + $0xa4] sm:$0xf0]  ;;  %v1643_v14 = vor.u32 %v1898_v7, %v1640_v8  ;;  %v1882_v7 = vld [vmem:[%s2233_s7 + $0xd4] sm:$0xf]  ;;  %v1584_v8 = vld [vmem:[%s2233_s7 + $0xe8] sm:$0xf0] }
  0x83   : > { %1197 = vmatpush.bf16.msrb.mxu0 %v1943_v15  ;;  %1246 = vmatpush.bf16.msrb.mxu1 %v1951_v16  ;;  %v1543_v15 = vor.u32 %v1877_v10, %v1542_v9  ;;  %v1547_v16 = vor.u32 %v1874_v11, %v1544_v12  ;;  %v1583_v11 = vor.u32 %v1885_v6, %v1582_v5  ;;  %v1903_v5 = vld [vmem:[%s2233_s7 + $0x174] sm:$0xf0]  ;;  %v1900_v6 = vld [vmem:[%s2233_s7 + $0x164] sm:$0xf] }
  0x84   : > { %v1587_v12 = vor.u32 %v1882_v7, %v1584_v8  ;;  %v1656_v7 = vld [vmem:[%s2233_s7 + $0x178] sm:$0xf0] }
  0x85   : > { %1100 = vmatpush.bf16.msrb.mxu2 %v1926_v17  ;;  %v1478_v17 = vld [vmem:[%s2233_s7 + $0x8] sm:$0xf] }
  0x86   : > { %1149 = vmatpush.bf16.msrb.mxu3 %v1934_v18  ;;  %v1860_v18 = vld [vmem:[%s2233_s7 + $0x1c] sm:$0xf0] }
  0x87   : > { %1198 = vmatpush.bf16.msrb.mxu0 %v1942_v19  ;;  %1247 = vmatpush.bf16.msrb.mxu1 %v1950_v20  ;;  %v1857_v19 = vld [vmem:[%s2233_s7 + $0xc] sm:$0xf]  ;;  %v1480_v20 = vld [vmem:[%s2233_s7 + $0x20] sm:$0xf0]  ;;  %v1479_v25 = vor.u32 %v1860_v18, %v1478_v17 }
  0x89   : > { %1101 = vmatpush.bf16.msrb.mxu2 %v1925_v21  ;;  %v1486_v21 = vld [vmem:[%s2233_s7 + $0x10] sm:$0xf] }
  0x8a   : > { %1150 = vmatpush.bf16.msrb.mxu3 %v1933_v22  ;;  %v1861_v22 = vld [vmem:[%s2233_s7 + $0x24] sm:$0xf0] }
  0x8b   : > { %1199 = vmatpush.bf16.msrb.mxu0 %v1941_v23  ;;  %1248 = vmatpush.bf16.msrb.mxu1 %v1949_v24  ;;  %v1858_v23 = vld [vmem:[%s2233_s7 + $0x14] sm:$0xf]  ;;  %v1488_v24 = vld [vmem:[%s2233_s7 + $0x28] sm:$0xf0] }
  0x8c   : > { %v1491_v28 = vor.u32 %v1858_v23, %v1488_v24  ;;  %v1600_v23 = vld [vmem:[%s2233_s7 + $0x110] sm:$0xf0]  ;;  %v1606_v24 = vld [vmem:[%s2233_s7 + $0x100] sm:$0xf] }
  0x8d   : > { %1102 = vmatpush.bf16.msrb.mxu2 %v1924_v26  ;;  %v1483_v26 = vor.u32 %v1857_v19, %v1480_v20  ;;  %v1598_v20 = vld [vmem:[%s2233_s7 + $0xf8] sm:$0xf] }
  0x8e   : > { %1151 = vmatpush.bf16.msrb.mxu3 %v1932_v27  ;;  %v1487_v27 = vor.u32 %v1861_v22, %v1486_v21  ;;  %v1890_v21 = vld [vmem:[%s2233_s7 + $0x10c] sm:$0xf0]  ;;  %v1887_v22 = vld [vmem:[%s2233_s7 + $0xfc] sm:$0xf] }
  0x8f   : > { %1200 = vmatpush.bf16.msrb.mxu0 %v1940_v35  ;;  %1249 = vmatpush.bf16.msrb.mxu1 %v1948_v36  ;;  %v1864_v35 = vld [vmem:[%s2233_s7 + $0x44] sm:$0xf]  ;;  %v1512_v36 = vld [vmem:[%s2233_s7 + $0x58] sm:$0xf0] }
  0x90   : > { %1034 = vmatmul.bf16.gmra.mxu2 %v1591_v39  ;;  %1014 = vmatmul.bf16.gmra.mxu0 %v1495_v41  ;;  %v1511_v39 = vor.u32 %v1867_v34, %v1510_v33  ;;  %v1526_v41 = vld [vmem:[%s2233_s7 + $0x68] sm:$0xf] }
  0x91   : > { %1103 = vmatpush.bf16.msrb.mxu2 %v1923_v37  ;;  %1083 = vmatmul.bf16.gmra.mxu3 %v1595_v40  ;;  %v1503_v37 = vor.u32 %v1866_v30, %v1502_v29  ;;  %v1515_v40 = vor.u32 %v1864_v35, %v1512_v36 }
  0x92   : > { %1152 = vmatpush.bf16.msrb.mxu3 %v1931_v38  ;;  %1063 = vmatmul.bf16.gmra.mxu1 %v1499_v42  ;;  %v1507_v38 = vor.u32 %v1863_v31, %v1504_v32  ;;  %v1872_v42 = vld [vmem:[%s2233_s7 + $0x7c] sm:$0xf0]  ;;  %v1599_v31 = vor.u32 %v1890_v21, %v1598_v20  ;;  %v1603_v32 = vor.u32 %v1887_v22, %v1600_v23 }
  0x93   : > { %1201 = vmatpush.bf16.msrb.mxu0 %v1939_v43  ;;  %1250 = vmatpush.bf16.msrb.mxu1 %v1947_v44  ;;  %v1869_v43 = vld [vmem:[%s2233_s7 + $0x6c] sm:$0xf]  ;;  %v1528_v44 = vld [vmem:[%s2233_s7 + $0x80] sm:$0xf0] }
  0x95   : > { %1104 = vmatpush.bf16.msrb.mxu2 %v1922_v45  ;;  %v1534_v45 = vld [vmem:[%s2233_s7 + $0x70] sm:$0xf] }
  0x96   : > { %1153 = vmatpush.bf16.msrb.mxu3 %v1930_v46  ;;  %v1873_v46 = vld [vmem:[%s2233_s7 + $0x84] sm:$0xf0] }
  0x97   : > { %1202 = vmatpush.bf16.msrb.mxu0 %v1938_v47  ;;  %1251 = vmatpush.bf16.msrb.mxu1 %v1946_v48  ;;  %v1870_v47 = vld [vmem:[%s2233_s7 + $0x74] sm:$0xf]  ;;  %v1536_v48 = vld [vmem:[%s2233_s7 + $0x88] sm:$0xf0] }
  0x99   : > { %1105 = vmatpush.bf16.msrb.mxu2 %v1921_v49  ;;  %v1527_v49 = vor.u32 %v1872_v42, %v1526_v41  ;;  %v1622_v42 = vld [vmem:[%s2233_s7 + $0x128] sm:$0xf] }
  0x9a   : > { %1154 = vmatpush.bf16.msrb.mxu3 %v1929_v50  ;;  %v1531_v50 = vor.u32 %v1869_v43, %v1528_v44  ;;  %v1896_v43 = vld [vmem:[%s2233_s7 + $0x13c] sm:$0xf0]  ;;  %v1893_v44 = vld [vmem:[%s2233_s7 + $0x12c] sm:$0xf] }
  0x9b   : > { %1203 = vmatpush.bf16.msrb.mxu0 %v1937_v51  ;;  %1252 = vmatpush.bf16.msrb.mxu1 %v1945_v52  ;;  %v1535_v51 = vor.u32 %v1873_v46, %v1534_v45  ;;  %v1539_v52 = vor.u32 %v1870_v47, %v1536_v48  ;;  %v1624_v45 = vld [vmem:[%s2233_s7 + $0x140] sm:$0xf0]  ;;  %v1630_v46 = vld [vmem:[%s2233_s7 + $0x130] sm:$0xf]  ;;  %v1897_v47 = vld [vmem:[%s2233_s7 + $0x144] sm:$0xf0] }
  0x9c   : > { %v1894_v48 = vld [vmem:[%s2233_s7 + $0x134] sm:$0xf]  ;;  %v1631_v55 = vor.u32 %v1897_v47, %v1630_v46 }
  0x9d   : > { %1106 = vmatpush.bf16.msrb.mxu2 %v1920_v53  ;;  %v1550_v53 = vld [vmem:[%s2233_s7 + $0x98] sm:$0xf]  ;;  %v313_v46 = vld [vmem:[#allocation2 + $0x30] sm:$0xff] }
  0x9e   : > { %1155 = vmatpush.bf16.msrb.mxu3 %v1928_v54  ;;  %v1878_v54 = vld [vmem:[%s2233_s7 + $0xac] sm:$0xf0] }
  0x9f   : > { %1204 = vmatpush.bf16.msrb.mxu0 %v1936_v63  ;;  %1253 = vmatpush.bf16.msrb.mxu1 %v1944_v4  ;;  %v1551_v61 = vor.u32 %v1878_v54, %v1550_v53  ;;  %v1559_v63 = vor.u32 %v1879_v58, %v1558_v57  ;;  %v1576_v4 = vld [vmem:[%s2233_s7 + $0xe0] sm:$0xf0]  ;;  %v1623_v53 = vor.u32 %v1896_v43, %v1622_v42 }
  0xa0   : > { %1039 = vmatmul.bf16.gmra.mxu2 %v1615_v0  ;;  %1019 = vmatmul.bf16.gmra.mxu0 %v1519_v2  ;;  %v1563_v0 = vor.u32 %v1876_v59, %v1560_v60  ;;  %v1884_v2 = vld [vmem:[%s2233_s7 + $0xdc] sm:$0xf0]  ;;  %v1627_v54 = vor.u32 %v1893_v44, %v1624_v45 }
  0xa1   : > { %1088 = vmatmul.bf16.gmra.mxu3 %v1619_v1  ;;  %v1574_v1 = vld [vmem:[%s2233_s7 + $0xc8] sm:$0xf] }
  0xa2   : > { %1068 = vmatmul.bf16.gmra.mxu1 %v1523_v3  ;;  %v1881_v3 = vld [vmem:[%s2233_s7 + $0xcc] sm:$0xf]  ;;  %v1575_v9 = vor.u32 %v1884_v2, %v1574_v1  ;;  %v1902_v1 = vld [vmem:[%s2233_s7 + $0x16c] sm:$0xf0]  ;;  %v1899_v2 = vld [vmem:[%s2233_s7 + $0x15c] sm:$0xf] }
  0xa3   : > { %v1579_v10 = vor.u32 %v1881_v3, %v1576_v4  ;;  %v1648_v3 = vld [vmem:[%s2233_s7 + $0x170] sm:$0xf0]  ;;  %v1654_v4 = vld [vmem:[%s2233_s7 + $0x160] sm:$0xf] }
  0xb0   : > { %1044 = vmatmul.bf16.gmra.mxu2 %v1639_v13  ;;  %1024 = vmatmul.bf16.gmra.mxu0 %v1543_v15 }
  0xb1   : > { %1093 = vmatmul.bf16.gmra.mxu3 %v1643_v14 }
  0xb2   : > { %1073 = vmatmul.bf16.gmra.mxu1 %v1547_v16 }
  0xc0   : > { %1107 = vmatmul.bf16.vlgmr.msrb.gmra.mxu2 %v1479_v25  ;;  %1205 = vmatmul.bf16.vlgmr.msrb.gmra.mxu0 %v1487_v27  ;;  %v1891_v25 = vld [vmem:[%s2233_s7 + $0x114] sm:$0xf0]  ;;  %v1608_v27 = vld [vmem:[%s2233_s7 + $0x118] sm:$0xf0] }
  0xc1   : > { %1156 = vmatmul.bf16.vlgmr.msrb.gmra.mxu3 %v1483_v26  ;;  %v1888_v26 = vld [vmem:[%s2233_s7 + $0x104] sm:$0xf]  ;;  %v1607_v33 = vor.u32 %v1891_v25, %v1606_v24 }
  0xc2   : > { %1254 = vmatmul.bf16.vlgmr.msrb.gmra.mxu1 %v1491_v28  ;;  %v1611_v34 = vor.u32 %v1888_v26, %v1608_v27 }
  0xd0   : > { %1112 = vmatmul.bf16.gmra.mxu2 %v1503_v37  ;;  %1210 = vmatmul.bf16.gmra.mxu0 %v1511_v39 }
  0xd1   : > { %1161 = vmatmul.bf16.gmra.mxu3 %v1507_v38 }
  0xd2   : > { %1259 = vmatmul.bf16.gmra.mxu1 %v1515_v40 }
  0xe0   : > { %1117 = vmatmul.bf16.gmra.mxu2 %v1527_v49  ;;  %1215 = vmatmul.bf16.gmra.mxu0 %v1535_v51  ;;  %v1632_v49 = vld [vmem:[%s2233_s7 + $0x148] sm:$0xf0] }
  0xe1   : > { %1166 = vmatmul.bf16.gmra.mxu3 %v1531_v50  ;;  %v1635_v56 = vor.u32 %v1894_v48, %v1632_v49 }
  0xe2   : > { %1264 = vmatmul.bf16.gmra.mxu1 %v1539_v52 }
  0xf0   : > { %1122 = vmatmul.bf16.gmra.mxu2 %v1551_v61  ;;  %1220 = vmatmul.bf16.gmra.mxu0 %v1559_v63 }
  0xf1   : > { %1171 = vmatmul.bf16.gmra.mxu3 %v1555_v62 }
  0xf2   : > { %1269 = vmatmul.bf16.gmra.mxu1 %v1563_v0  ;;  %v1646_v0 = vld [vmem:[%s2233_s7 + $0x158] sm:$0xf] }
  0xfd   : > { %v2356_v13 = vpop.f32.mrf.mxu0 }
  0xff   : > { %v2358_v14 = vpop.f32.mrf.mxu1 }
 0x100   : > { %1127 = vmatmul.bf16.gmra.mxu2 %v1575_v9  ;;  %1225 = vmatmul.bf16.gmra.mxu0 %v1583_v11  ;;  %v1647_v11 = vor.u32 %v1902_v1, %v1646_v0 }
 0x101   : > { %1176 = vmatmul.bf16.gmra.mxu3 %v1579_v10 }
 0x102   : > { %1274 = vmatmul.bf16.gmra.mxu1 %v1587_v12  ;;  %v1651_v12 = vor.u32 %v1899_v2, %v1648_v3 }
 0x103   : > { %v1030_v15 = vpop.f32.mrf.mxu2 }
 0x104   : > { %v1079_v16 = vpop.f32.mrf.mxu3 }
 0x105   : > { %v2360_v17 = vadd.f32 %v1079_v16, %v1030_v15  ;;  %v2362_v18 = vpop.f32.mrf.mxu0  ;;  %v1655_v15 = vor.u32 %v1903_v5, %v1654_v4  ;;  %v1659_v16 = vor.u32 %v1900_v6, %v1656_v7  ;;  %v315_v6 = vld [vmem:[#allocation2 + $0x58] sm:$0xff] }
 0x107   : > { %v2364_v19 = vpop.f32.mrf.mxu1 }
 0x108   : > { %v1062_v47 = vadd.f32 %v2364_v19, %v2362_v18 }
 0x10b   : > { %v1032_v28 = vpop.f32.mrf.mxu2 }
 0x10c   : > { %v1081_v29 = vpop.f32.mrf.mxu3 }
 0x10d   : > { %v2374_v30 = vadd.f32 %v1081_v29, %v1032_v28  ;;  %v2376_v35 = vpop.f32.mrf.mxu0 }
 0x10f   : > { %v2378_v36 = vpop.f32.mrf.mxu1 }
 0x110   : > { %1132 = vmatmul.bf16.gmra.mxu2 %v1599_v31  ;;  %1230 = vmatmul.bf16.gmra.mxu0 %v1607_v33  ;;  %v1060_v33 = vadd.f32 %v2358_v14, %v2356_v13 }
 0x111   : > { %1181 = vmatmul.bf16.gmra.mxu3 %v1603_v32 }
 0x112   : > { %1279 = vmatmul.bf16.gmra.mxu1 %v1611_v34 }
 0x113   : > { %v1035_v37 = vpop.f32.mrf.mxu2 }
 0x114   : > { %v1084_v38 = vpop.f32.mrf.mxu3 }
 0x115   : > { %v2380_v39 = vadd.f32 %v1084_v38, %v1035_v37  ;;  %v2382_v40 = vpop.f32.mrf.mxu0 }
 0x117   : > { %v2384_v41 = vpop.f32.mrf.mxu1 }
 0x118   : > { %v1067_v7 = vadd.f32 %v2384_v41, %v2382_v40 }
 0x11b   : > { %v1037_v50 = vpop.f32.mrf.mxu2 }
 0x11c   : > { %v1086_v51 = vpop.f32.mrf.mxu3 }
 0x11d   : > { %v2394_v52 = vadd.f32 %v1086_v51, %v1037_v50  ;;  %v2396_v57 = vpop.f32.mrf.mxu0 }
 0x11f   : > { %v2398_v58 = vpop.f32.mrf.mxu1 }
 0x120   : > { %1137 = vmatmul.bf16.gmra.mxu2 %v1623_v53  ;;  %1235 = vmatmul.bf16.gmra.mxu0 %v1631_v55 }
 0x121   : > { %1186 = vmatmul.bf16.gmra.mxu3 %v1627_v54 }
 0x122   : > { %1284 = vmatmul.bf16.gmra.mxu1 %v1635_v56  ;;  %v314_v56 = vld [vmem:[#allocation2] sm:$0xff] }
 0x123   : > { %v1040_v59 = vpop.f32.mrf.mxu2 }
 0x124   : > { %v1089_v60 = vpop.f32.mrf.mxu3 }
 0x125   : > { %v2400_v61 = vadd.f32 %v1089_v60, %v1040_v59  ;;  %v2402_v62 = vpop.f32.mrf.mxu0  ;;  %v1065_v59 = vadd.f32 %v2378_v36, %v2376_v35 }
 0x127   : > { %v2404_v63 = vpop.f32.mrf.mxu1 }
 0x12b   : > { %v1042_v8 = vpop.f32.mrf.mxu2 }
 0x12c   : > { %v1091_v9 = vpop.f32.mrf.mxu3 }
 0x12d   : > { %v2414_v10 = vadd.f32 %v1091_v9, %v1042_v8  ;;  %v2416_v20 = vpop.f32.mrf.mxu0 }
 0x12f   : > { %v2418_v21 = vpop.f32.mrf.mxu1 }
 0x130   : > { %1142 = vmatmul.bf16.gmra.mxu2 %v1647_v11  ;;  %1240 = vmatmul.bf16.gmra.mxu0 %v1655_v15 }
 0x131   : > { %1191 = vmatmul.bf16.gmra.mxu3 %v1651_v12 }
 0x132   : > { %1289 = vmatmul.bf16.gmra.mxu1 %v1659_v16 }
 0x133   : > { %v1045_v22 = vpop.f32.mrf.mxu2 }
 0x134   : > { %v1094_v23 = vpop.f32.mrf.mxu3 }
 0x135   : > { %v2420_v24 = vadd.f32 %v1094_v23, %v1045_v22  ;;  %v2422_v25 = vpop.f32.mrf.mxu0  ;;  %v316_v23 = vld [vmem:[#allocation2 + $0x18] sm:$0xff] }
 0x137   : > { %v2424_v26 = vpop.f32.mrf.mxu1 }
 0x13b   : > { %v1047_v27 = vpop.f32.mrf.mxu2 }
 0x13c   : > { %v1096_v28 = vpop.f32.mrf.mxu3 }
 0x13d   : > { %v2426_v29 = vadd.f32 %v1096_v28, %v1047_v27  ;;  %v1206_v31 = vpop.f32.mrf.mxu0  ;;  %v1070_v27 = vadd.f32 %v2398_v58, %v2396_v57 }
 0x13f   : > { %v1255_v32 = vpop.f32.mrf.mxu1 }
 0x143   : > { %v1108_v34 = vpop.f32.mrf.mxu2 }
 0x144   : > { %v1157_v37 = vpop.f32.mrf.mxu3  ;;  %v1109_v38 = vadd.f32 %v1108_v34, %v1060_v33 }
 0x145   : > { %v1208_v43 = vpop.f32.mrf.mxu0 }
 0x146   : > { %v1158_v42 = vadd.f32 %v1157_v37, %v1109_v38 }
 0x147   : > { %v1257_v44 = vpop.f32.mrf.mxu1 }
 0x148   : > { %v1207_v45 = vadd.f32 %v1206_v31, %v1158_v42  ;;  %v317_v42 = vld [vmem:[#allocation2 + $0x50] sm:$0xff] }
 0x14a   : > { %v1256_v48 = vadd.f32 %v1255_v32, %v1207_v45 }
 0x14b   : > { %v1110_v49 = vpop.f32.mrf.mxu2 }
 0x14c   : > { %v1159_v50 = vpop.f32.mrf.mxu3  ;;  %v1295_v51 = vadd.f32 %v1256_v48, %v313_v46  ;;  %v1111_v53 = vadd.f32 %v1110_v49, %v1062_v47 }
 0x14d   : > { %v1211_v55 = vpop.f32.mrf.mxu0 }
 0x14e   : > { %1311 = vst [vmem:[#allocation2 + $0x30] sm:$0xff] %v1295_v51  ;;  %v1160_v54 = vadd.f32 %v1159_v50, %v1111_v53  ;;  %v318_v51 = vld [vmem:[#allocation2 + $0x68] sm:$0xff]  ;;  %v1075_v53 = vadd.f32 %v2418_v21, %v2416_v20 }
 0x14f   : > { %v1260_v13 = vpop.f32.mrf.mxu1 }
 0x150   : > { %v1209_v14 = vadd.f32 %v1208_v43, %v1160_v54  ;;  %v1072_v43 = vadd.f32 %v2404_v63, %v2402_v62 }
 0x152   : > { %v1258_v60 = vadd.f32 %v1257_v44, %v1209_v14 }
 0x153   : > { %v1113_v0 = vpop.f32.mrf.mxu2 }
 0x154   : > { %v1162_v1 = vpop.f32.mrf.mxu3  ;;  %v1296_v2 = vadd.f32 %v1258_v60, %v314_v56  ;;  %v1114_v3 = vadd.f32 %v1113_v0, %v1065_v59  ;;  %v319_v0 = vld [vmem:[#allocation2 + $0x8] sm:$0xff] }
 0x155   : > { %v1213_v19 = vpop.f32.mrf.mxu0 }
 0x156   : > { %1312 = vst [vmem:[#allocation2] sm:$0xff] %v1296_v2  ;;  %v1163_v18 = vadd.f32 %v1162_v1, %v1114_v3  ;;  %v1077_v1 = vadd.f32 %v2424_v26, %v2422_v25 }
 0x157   : > { %v1262_v4 = vpop.f32.mrf.mxu1 }
 0x158   : > { %v1212_v5 = vadd.f32 %v1211_v55, %v1163_v18 }
 0x15a   : > { %v1261_v8 = vadd.f32 %v1260_v13, %v1212_v5 }
 0x15b   : > { %v1115_v9 = vpop.f32.mrf.mxu2 }
 0x15c   : > { %v1164_v11 = vpop.f32.mrf.mxu3  ;;  %v1297_v12 = vadd.f32 %v1261_v8, %v315_v6  ;;  %v1116_v15 = vadd.f32 %v1115_v9, %v1067_v7  ;;  %v320_v7 = vld [vmem:[#allocation2 + $0x48] sm:$0xff] }
 0x15d   : > { %v1216_v36 = vpop.f32.mrf.mxu0 }
 0x15e   : > { %1313 = vst [vmem:[#allocation2 + $0x58] sm:$0xff] %v1297_v12  ;;  %v1165_v35 = vadd.f32 %v1164_v11, %v1116_v15 }
 0x15f   : > { %v1265_v16 = vpop.f32.mrf.mxu1 }
 0x160   : > { %v1214_v22 = vadd.f32 %v1213_v19, %v1165_v35 }
 0x162   : > { %v1263_v28 = vadd.f32 %v1262_v4, %v1214_v22 }
 0x163   : > { %v1118_v31 = vpop.f32.mrf.mxu2 }
 0x164   : > { %v1167_v32 = vpop.f32.mrf.mxu3  ;;  %v1298_v33 = vadd.f32 %v1263_v28, %v316_v23  ;;  %v1119_v34 = vadd.f32 %v1118_v31, %v1070_v27 }
 0x165   : > { %v1218_v41 = vpop.f32.mrf.mxu0 }
 0x166   : > { %1314 = vst [vmem:[#allocation2 + $0x18] sm:$0xff] %v1298_v33  ;;  %v1168_v40 = vadd.f32 %v1167_v32, %v1119_v34 }
 0x167   : > { %v1267_v37 = vpop.f32.mrf.mxu1 }
 0x168   : > { %v1217_v38 = vadd.f32 %v1216_v36, %v1168_v40 }
 0x16a   : > { %v1266_v44 = vadd.f32 %v1265_v16, %v1217_v38  ;;  %v321_v16 = vld [vmem:[#allocation2 + $0x40] sm:$0xff] }
 0x16b   : > { %v1120_v45 = vpop.f32.mrf.mxu2 }
 0x16c   : > { %v1169_v46 = vpop.f32.mrf.mxu3  ;;  %v1299_v47 = vadd.f32 %v1266_v44, %v317_v42  ;;  %v1121_v48 = vadd.f32 %v1120_v45, %v1072_v43 }
 0x16d   : > { %v1221_v58 = vpop.f32.mrf.mxu0 }
 0x16e   : > { %1315 = vst [vmem:[#allocation2 + $0x50] sm:$0xff] %v1299_v47  ;;  %v1170_v57 = vadd.f32 %v1169_v46, %v1121_v48  ;;  %v323_v48 = vld [vmem:[#allocation2 + $0x10] sm:$0xff] }
 0x16f   : > { %v1270_v49 = vpop.f32.mrf.mxu1 }
 0x170   : > { %v1219_v50 = vadd.f32 %v1218_v41, %v1170_v57  ;;  %v322_v41 = vld [vmem:[#allocation2 + $0x20] sm:$0xff] }
 0x172   : > { %v1268_v54 = vadd.f32 %v1267_v37, %v1219_v50 }
 0x173   : > { %v1123_v55 = vpop.f32.mrf.mxu2 }
 0x174   : > { %v1172_v13 = vpop.f32.mrf.mxu3  ;;  %v1300_v14 = vadd.f32 %v1268_v54, %v318_v51  ;;  %v1124_v56 = vadd.f32 %v1123_v55, %v1075_v53  ;;  %v324_v55 = vld [vmem:[#allocation2 + $0x38] sm:$0xff] }
 0x175   : > { %v1223_v63 = vpop.f32.mrf.mxu0 }
 0x176   : > { %1316 = vst [vmem:[#allocation2 + $0x68] sm:$0xff] %v1300_v14  ;;  %v1173_v62 = vadd.f32 %v1172_v13, %v1124_v56 }
 0x177   : > { %v1272_v59 = vpop.f32.mrf.mxu1 }
 0x178   : > { %v1222_v60 = vadd.f32 %v1221_v58, %v1173_v62 }
 0x17a   : > { %v1271_v2 = vadd.f32 %v1270_v49, %v1222_v60 }
 0x17b   : > { %v1125_v3 = vpop.f32.mrf.mxu2 }
 0x17c   : > { %v1174_v18 = vpop.f32.mrf.mxu3  ;;  %v1301_v19 = vadd.f32 %v1271_v2, %v319_v0  ;;  %v1126_v4 = vadd.f32 %v1125_v3, %v1077_v1  ;;  %v325_v0 = vld [vmem:[#allocation2 + $0x60] sm:$0xff] }
 0x17d   : > { %v1226_v21 = vpop.f32.mrf.mxu0 }
 0x17e   : > { %1317 = vst [vmem:[#allocation2 + $0x8] sm:$0xff] %v1301_v19  ;;  %v1175_v20 = vadd.f32 %v1174_v18, %v1126_v4 }
 0x17f   : > { %v1275_v5 = vpop.f32.mrf.mxu1 }
 0x180   : > { %v1224_v6 = vadd.f32 %v1223_v63, %v1175_v20 }
 0x182   : > { %v1273_v8 = vadd.f32 %v1272_v59, %v1224_v6 }
 0x183   : > { %v1128_v9 = vpop.f32.mrf.mxu2 }
 0x184   : > { %v1177_v11 = vpop.f32.mrf.mxu3  ;;  %v1302_v12 = vadd.f32 %v1273_v8, %v320_v7  ;;  %v1129_v15 = vadd.f32 %v1128_v9, %v2360_v17 }
 0x185   : > { %v1228_v25 = vpop.f32.mrf.mxu0 }
 0x186   : > { %1318 = vst [vmem:[#allocation2 + $0x48] sm:$0xff] %v1302_v12  ;;  %v1178_v35 = vadd.f32 %v1177_v11, %v1129_v15 }
 0x187   : > { %v1277_v26 = vpop.f32.mrf.mxu1 }
 0x188   : > { %v1227_v36 = vadd.f32 %v1226_v21, %v1178_v35 }
 0x18a   : > { %v1276_v22 = vadd.f32 %v1275_v5, %v1227_v36  ;;  %v326_v5 = vld [vmem:[#allocation2 + $0x70] sm:$0xff] }
 0x18b   : > { %v1130_v23 = vpop.f32.mrf.mxu2 }
 0x18c   : > { %v1179_v27 = vpop.f32.mrf.mxu3  ;;  %v1303_v28 = vadd.f32 %v1276_v22, %v321_v16  ;;  %v1131_v31 = vadd.f32 %v1130_v23, %v2374_v30 }
 0x18d   : > { %v1231_v33 = vpop.f32.mrf.mxu0 }
 0x18e   : > { %1319 = vst [vmem:[#allocation2 + $0x40] sm:$0xff] %v1303_v28  ;;  %v1180_v32 = vadd.f32 %v1179_v27, %v1131_v31 }
 0x18f   : > { %v1280_v34 = vpop.f32.mrf.mxu1 }
 0x190   : > { %v1229_v40 = vadd.f32 %v1228_v25, %v1180_v32  ;;  %v327_v25 = vld [vmem:[#allocation2 + $0x78] sm:$0xff]  ;;  %v328_v32 = vld [vmem:[#allocation2 + $0x28] sm:$0xff] }
 0x192   : > { %v1278_v37 = vadd.f32 %v1277_v26, %v1229_v40 }
 0x193   : > { %v1133_v17 = vpop.f32.mrf.mxu2 }
 0x194   : > { %v1182_v38 = vpop.f32.mrf.mxu3  ;;  %v1304_v42 = vadd.f32 %v1278_v37, %v322_v41  ;;  %v1134_v43 = vadd.f32 %v1133_v17, %v2380_v39 }
 0x195   : > { %v1233_v45 = vpop.f32.mrf.mxu0 }
 0x196   : > { %1320 = vst [vmem:[#allocation2 + $0x20] sm:$0xff] %v1304_v42  ;;  %v1183_v44 = vadd.f32 %v1182_v38, %v1134_v43 }
 0x197   : > { %v1282_v47 = vpop.f32.mrf.mxu1 }
 0x198   : > { %v1232_v46 = vadd.f32 %v1231_v33, %v1183_v44 }
 0x19a   : > { %v1281_v57 = vadd.f32 %v1280_v34, %v1232_v46 }
 0x19b   : > { %v1135_v30 = vpop.f32.mrf.mxu2 }
 0x19c   : > { %v1184_v58 = vpop.f32.mrf.mxu3  ;;  %v1305_v49 = vadd.f32 %v1281_v57, %v323_v48  ;;  %v1136_v50 = vadd.f32 %v1135_v30, %v2394_v52 }
 0x19d   : > { %v1236_v54 = vpop.f32.mrf.mxu0 }
 0x19e   : > { %1321 = vst [vmem:[#allocation2 + $0x10] sm:$0xff] %v1305_v49  ;;  %v1185_v51 = vadd.f32 %v1184_v58, %v1136_v50 }
 0x19f   : > { %v1285_v14 = vpop.f32.mrf.mxu1 }
 0x1a0   : > { %v1234_v53 = vadd.f32 %v1233_v45, %v1185_v51 }
 0x1a2   : > { %v1283_v13 = vadd.f32 %v1282_v47, %v1234_v53 }
 0x1a3   : > { %v1138_v39 = vpop.f32.mrf.mxu2 }
 0x1a4   : > { %v1187_v56 = vpop.f32.mrf.mxu3  ;;  %v1306_v62 = vadd.f32 %v1283_v13, %v324_v55  ;;  %v1139_v63 = vadd.f32 %v1138_v39, %v2400_v61 }
 0x1a5   : > { %v1238_v2 = vpop.f32.mrf.mxu0 }
 0x1a6   : > { %1322 = vst [vmem:[#allocation2 + $0x38] sm:$0xff] %v1306_v62  ;;  %v1188_v59 = vadd.f32 %v1187_v56, %v1139_v63 }
 0x1a7   : > { %v1287_v4 = vpop.f32.mrf.mxu1 }
 0x1a8   : > { %v1237_v60 = vadd.f32 %v1236_v54, %v1188_v59 }
 0x1aa   : > { %v1286_v1 = vadd.f32 %v1285_v14, %v1237_v60 }
 0x1ab   : > { %v1140_v3 = vpop.f32.mrf.mxu2 }
 0x1ac   : > { %v1189_v52 = vpop.f32.mrf.mxu3  ;;  %v1307_v18 = vadd.f32 %v1286_v1, %v325_v0  ;;  %v1141_v19 = vadd.f32 %v1140_v3, %v2414_v10 }
 0x1ad   : > { %v1241_v11 = vpop.f32.mrf.mxu0 }
 0x1ae   : > { %1323 = vst [vmem:[#allocation2 + $0x60] sm:$0xff] %v1307_v18  ;;  %v1190_v20 = vadd.f32 %v1189_v52, %v1141_v19 }
 0x1af   : > { %v1290_v15 = vpop.f32.mrf.mxu1 }
 0x1b0   : > { %v1239_v21 = vadd.f32 %v1238_v2, %v1190_v20 }
 0x1b2   : > { %v1288_v6 = vadd.f32 %v1287_v4, %v1239_v21 }
 0x1b3   : > { %v1143_v7 = vpop.f32.mrf.mxu2 }
 0x1b4   : > { %v1192_v8 = vpop.f32.mrf.mxu3  ;;  %v1308_v61 = vadd.f32 %v1288_v6, %v326_v5  ;;  %v1144_v9 = vadd.f32 %v1143_v7, %v2420_v24 }
 0x1b5   : > { %v1243_v27 = vpop.f32.mrf.mxu0 }
 0x1b6   : > { %1324 = vst [vmem:[#allocation2 + $0x70] sm:$0xff] %v1308_v61  ;;  %v1193_v12 = vadd.f32 %v1192_v8, %v1144_v9 }
 0x1b7   : > { %v1292_v31 = vpop.f32.mrf.mxu1 }
 0x1b8   : > { %v1242_v35 = vadd.f32 %v1241_v11, %v1193_v12 }
 0x1ba   : > { %v1291_v26 = vadd.f32 %v1290_v15, %v1242_v35 }
 0x1bb   : > { %v1145_v36 = vpop.f32.mrf.mxu2 }
 0x1bc   : > { %v1309_v10 = vadd.f32 %v1291_v26, %v327_v25  ;;  %v1146_v16 = vadd.f32 %v1145_v36, %v2426_v29  ;;  %v1194_v22 = vpop.f32.mrf.mxu3 }
 0x1be   : > { %1325 = vst [vmem:[#allocation2 + $0x78] sm:$0xff] %v1309_v10  ;;  %v1195_v23 = vadd.f32 %v1194_v22, %v1146_v16 }
 0x1c0   : > { %v1244_v28 = vadd.f32 %v1243_v27, %v1195_v23 }
 0x1c2   : > { %v1293_v33 = vadd.f32 %v1292_v31, %v1244_v28  ;;  %1330 = sbr.rel (%p1852_p10) target bundleno = 471 (0x1d7), region = 63 }
 0x1c4   : > { %v1310_v24 = vadd.f32 %v1293_v33, %v328_v32 }
 0x1c6   : > { %1326 = vst [vmem:[#allocation2 + $0x28] sm:$0xff] %v1310_v24 }
 0x1c7   : > { %v1331_v34 = vld [vmem:[#allocation2 + $0x30] sm:$0xff]  ;;  %v1332_v40 = vld [vmem:[#allocation2] sm:$0xff]  ;;  %v1333_v29 = vld [vmem:[#allocation2 + $0x58] sm:$0xff] }
 0x1c8   : > { %v2042_v41 = vld [vmem:[%s2492_s2] ss:$0 sm:$0xff]  ;;  %v1334_v37 = vld [vmem:[#allocation2 + $0x18] sm:$0xff]  ;;  %v1335_v17 = vld [vmem:[#allocation2 + $0x50] sm:$0xff] }
 0x1c9   : > { %v1336_v38 = vld [vmem:[#allocation2 + $0x68] sm:$0xff]  ;;  %v1351_v43 = vadd.f32 %v2042_v41, %v1331_v34  ;;  %v1352_v44 = vadd.f32 %v2042_v41, %v1332_v40  ;;  %v1353_v45 = vadd.f32 %v2042_v41, %v1333_v29  ;;  %v1354_v46 = vadd.f32 %v2042_v41, %v1334_v37  ;;  %v1339_v49 = vld [vmem:[#allocation2 + $0x40] sm:$0xff]  ;;  %v1341_v13 = vld [vmem:[#allocation2 + $0x10] sm:$0xff] }
 0x1ca   : > { %v1337_v42 = vld [vmem:[#allocation2 + $0x8] sm:$0xff]  ;;  %v1355_v48 = vadd.f32 %v2042_v41, %v1335_v17  ;;  %v1356_v57 = vadd.f32 %v2042_v41, %v1336_v38  ;;  %v1340_v50 = vld [vmem:[#allocation2 + $0x20] sm:$0xff]  ;;  %v1342_v14 = vld [vmem:[#allocation2 + $0x38] sm:$0xff]  ;;  %v1359_v2 = vadd.f32 %v2042_v41, %v1339_v49  ;;  %v1361_v20 = vadd.f32 %v2042_v41, %v1341_v13 }
 0x1cb   : > { %v1338_v47 = vld [vmem:[#allocation2 + $0x48] sm:$0xff]  ;;  %v1357_v30 = vadd.f32 %v2042_v41, %v1337_v42  ;;  %v1367_v51 = vmax.f32 %v1351_v43, 0.0  ;;  %v1368_v53 = vmax.f32 %v1352_v44, 0.0  ;;  %v1369_v54 = vmax.f32 %v1353_v45, 0.0  ;;  %v1343_v59 = vld [vmem:[#allocation2 + $0x60] sm:$0xff]  ;;  %v1344_v60 = vld [vmem:[#allocation2 + $0x70] sm:$0xff] }
 0x1cc   : > { %v1358_v58 = vadd.f32 %v2042_v41, %v1338_v47  ;;  %v1370_v55 = vmax.f32 %v1354_v46, 0.0  ;;  %v1371_v39 = vmax.f32 %v1355_v48, 0.0  ;;  %v1372_v56 = vmax.f32 %v1356_v57, 0.0  ;;  %v1345_v52 = vld [vmem:[#allocation2 + $0x78] sm:$0xff] }
 0x1cd   : > { %v1373_v62 = vmax.f32 %v1357_v30, 0.0  ;;  %v1955_v0 = vpack.c.bf16 %v1368_v53, %v1367_v51  ;;  %v1360_v3 = vadd.f32 %v2042_v41, %v1340_v50  ;;  %v1346_v18 = vld [vmem:[#allocation2 + $0x28] sm:$0xff]  ;;  %v1362_v21 = vadd.f32 %v2042_v41, %v1342_v14 }
 0x1ce   : > { %v1374_v63 = vmax.f32 %v1358_v58, 0.0  ;;  %v1960_v1 = vpack.c.bf16 %v1370_v55, %v1369_v54  ;;  %v1965_v19 = vpack.c.bf16 %v1372_v56, %v1371_v39  ;;  %v1375_v5 = vmax.f32 %v1359_v2, 0.0 }
 0x1cf   : > { %1956 = vst [vmem:[%s2493_s3] sm:$0xff] %v1955_v0   ;;  %v1376_v6 = vmax.f32 %v1360_v3, 0.0  ;;  %v1363_v7 = vadd.f32 %v2042_v41, %v1343_v59  ;;  %v1364_v8 = vadd.f32 %v2042_v41, %v1344_v60  ;;  %v1377_v61 = vmax.f32 %v1361_v20, 0.0 }
 0x1d0   : > { %v1970_v4 = vpack.c.bf16 %v1374_v63, %v1373_v62  ;;  %1992 = vst [vmem:[%s2493_s3 + $0x8] sm:$0xff] %v1960_v1   ;;  %v1378_v9 = vmax.f32 %v1362_v21, 0.0  ;;  %v1365_v11 = vadd.f32 %v2042_v41, %v1345_v52  ;;  %v1366_v12 = vadd.f32 %v2042_v41, %v1346_v18 }
 0x1d1   : > { %1993 = vst [vmem:[%s2493_s3 + $0x10] sm:$0xff] %v1965_v19   ;;  %v1975_v15 = vpack.c.bf16 %v1376_v6, %v1375_v5  ;;  %v1379_v35 = vmax.f32 %v1363_v7, 0.0  ;;  %v1380_v25 = vmax.f32 %v1364_v8, 0.0 }
 0x1d2   : > { %1994 = vst [vmem:[%s2493_s3 + $0x18] sm:$0xff] %v1970_v4   ;;  %v1980_v26 = vpack.c.bf16 %v1378_v9, %v1377_v61  ;;  %v1381_v36 = vmax.f32 %v1365_v11, 0.0  ;;  %v1382_v10 = vmax.f32 %v1366_v12, 0.0 }
 0x1d3   : > { %1995 = vst [vmem:[%s2493_s3 + $0x20] sm:$0xff] %v1975_v15   ;;  %v1985_v16 = vpack.c.bf16 %v1380_v25, %v1379_v35 }
 0x1d4   : > { %1996 = vst [vmem:[%s2493_s3 + $0x28] sm:$0xff] %v1980_v26   ;;  %v1990_v22 = vpack.c.bf16 %v1382_v10, %v1381_v36 }
 0x1d5   : > { %1997 = vst [vmem:[%s2493_s3 + $0x30] sm:$0xff] %v1985_v16  }
 0x1d6   : > { %1998 = vst [vmem:[%s2493_s3 + $0x38] sm:$0xff] %v1990_v22  }
 0x1d7 PF: > { %p10_p11 = scmp.ge.s32.totalorder %s2107_s16, 5   ;;  %s2494_s12 = smov %s2061_s13 }
 0x1d8   : > { %s2495_s13 = smov %s2116_s19  ;;  %s2496_s14 = smov %s2107_s16 }
 0x1d9   :  { %12 = sbr.rel (!%p10_p11) target bundleno = 2 (0x2), region = 97 }

// kernel: autoencoder_forward.6
= control target key start
LH: loop header
LB: loop body
LE: loop exit
PB: predicated region body
PF: predicated region fallthrough
CT: control target
= control target key end

     0   :  { %s1169_s12 = smov 0   ;;  %s1171_s13 = smov 0   ;;  %s1297_s0 = inlined_call_operand.vmem [shape: bf16[32,3200], index: 0, kind: input, shape index: {}]   ;;  %s1298_s1 = inlined_call_operand.vmem [shape: bf16[3200,128], index: 1, kind: input, shape index: {}]   ;;  %s1299_s2 = inlined_call_operand.vmem [shape: f32[1,128], index: 2, kind: input, shape index: {}]   ;;  %s1300_s3 = inlined_call_operand.vmem [shape: bf16[32,128], index: 3, kind: output, shape index: {}]  }
   0x1   :  { %s1173_s14 = smov 0  }
   0x2 LB: > { %s1185_s15 = sadd.s32 4294967295, %s1146_s14   ;;  %s1188_s16 = sadd.s32 1, %s1146_s14   ;;  %s1146_s14 = sphi %s1173_s14, %s1303_s14   ;;  %s1142_s13 = sphi %s1171_s13, %s1302_s13   ;;  %s1138_s12 = sphi %s1169_s12, %s1301_s12  }
   0x3   : > { %s17_s17 = ssub.s32 %s1146_s14, %s1188_s16  ;;  %s20_s18 = sadd.s32 1, %s1142_s13 }
   0x4   : > { %p18_p0 = scmp.eq.s32.totalorder %s17_s17, 0  ;;  %p27_p1 = scmp.ne.s32.totalorder %s1142_s13, %s1138_s12 }
   0x5   : > { %p28_p2 = scmp.eq.s32.totalorder %s1146_s14, 0  ;;  %p810_p4 = scmp.ge.s32.totalorder %s1146_s14, 5 }
   0x6   : > { %s1197_s19 = scalar_select %p18_p0, %s1142_s13, %s20_s18  }
   0x7   : > { %p29_p3 = por %p28_p2, %p27_p1  ;;  %124 = sbr.rel (%p810_p4) target bundleno = 29 (0x1d), region = 20 }
   0xc   : > { %127 = sbr.rel (!%p29_p3) target bundleno = 29 (0x1d), region = 24  ;;  %s129_s20 = sand.u32 (%p29_p3), 1, %s1142_s13  }
   0xd   : > { %s1026_s21 = smul.u32 (%p29_p3), 20, %s1146_s14 }
   0xe   : > { %s1096_s22 = smul.u32 (%p29_p3), 80, %s129_s20 }
   0xf   : > { %s134_s25 = scalar_lea.vmem (%p29_p3), %s1297_s0, %s1026_s21 }
  0x10   : > { %v149_v0 = vld [vmem:[%s134_s25] sm:$0xff] (%p29_p3)  ;;  %v151_v1 = vld [vmem:[%s134_s25 + $0x8] sm:$0xff] (%p29_p3)  ;;  %s131_s26 = scalar_lea.vmem (%p29_p3), [#allocation3], %s1096_s22  ;;  %v159_v5 = vld [vmem:[%s134_s25 + $0xd0] sm:$0xff] (%p29_p3) }
  0x11   : > { %v153_v2 = vld [vmem:[%s134_s25 + $0x64] sm:$0xff]  ;;  %150 = vst [vmem:[%s131_s26] sm:$0xff] %v149_v0  ;;  %v155_v3 = vld [vmem:[%s134_s25 + $0x6c] sm:$0xff]  ;;  %v163_v7 = vld [vmem:[%s134_s25 + $0x134] sm:$0xff] }
  0x12   : > { %152 = vst [vmem:[%s131_s26 + $0x8] sm:$0xff] %v151_v1  ;;  %v157_v4 = vld [vmem:[%s134_s25 + $0xc8] sm:$0xff]  ;;  %v812_v8 = vld [vmem:[%s134_s25 + $0x10] sm:$0xf]  ;;  %v814_v9 = vld [vmem:[%s134_s25 + $0x74] sm:$0xf] }
  0x13   : > { %154 = vst [vmem:[%s131_s26 + $0x14] sm:$0xff] %v153_v2  ;;  %v161_v6 = vld [vmem:[%s134_s25 + $0x12c] sm:$0xff]  ;;  %v816_v10 = vld [vmem:[%s134_s25 + $0xd8] sm:$0xf]  ;;  %v818_v11 = vld [vmem:[%s134_s25 + $0x13c] sm:$0xf] }
  0x14   : > { %156 = vst [vmem:[%s131_s26 + $0x1c] sm:$0xff] %v155_v3 }
  0x15   : > { %158 = vst [vmem:[%s131_s26 + $0x28] sm:$0xff] %v157_v4 }
  0x16   : > { %160 = vst [vmem:[%s131_s26 + $0x30] sm:$0xff] %v159_v5 }
  0x17   : > { %162 = vst [vmem:[%s131_s26 + $0x3c] sm:$0xff] %v161_v6 }
  0x18   : > { %164 = vst [vmem:[%s131_s26 + $0x44] sm:$0xff] %v163_v7 }
  0x19   : > { %813 = vst [vmem:[%s131_s26 + $0x10] sm:$0xf] %v812_v8 }
  0x1a   : > { %815 = vst [vmem:[%s131_s26 + $0x24] sm:$0xf] %v814_v9 }
  0x1b   : > { %817 = vst [vmem:[%s131_s26 + $0x38] sm:$0xf] %v816_v10 }
  0x1c   : > { %819 = vst [vmem:[%s131_s26 + $0x4c] sm:$0xf] %v818_v11 }
  0x1d PF: > { %p820_p5 = scmp.ge.s32.totalorder %s1146_s14, 1  ;;  %p194_p6 = scmp.lt.s32.totalorder %s1146_s14, 6 }
  0x1f   : > { %p195_p7 = pnand %p820_p5, %p194_p6 }
  0x20   : > { %s201_s27 = sand.u32 (!%p195_p7), 1, %s1138_s12   ;;  %s225_s28 = smul.u32 (!%p195_p7), 80, %s1185_s15 }
  0x21   : > { %198 = sbr.rel (%p195_p7) target bundleno = 266 (0x10a), region = 54  ;;  %p822_p9 = scmp.ne.s32.totalorder (!%p195_p7), %s1185_s15, 0 }
  0x22   : > { %s1097_s29 = smul.u32 (!%p195_p7), 80, %s201_s27  ;;  %p226_p8 = scmp.lt.s32.totalorder (!%p195_p7), %s225_s28, 399 }
  0x24   : > { %s1214_s7 = scalar_lea.vmem (!%p195_p7), [#allocation3], %s1097_s29 }
  0x26   : > { %s1305_s28 = smov (!%p226_p8, %s225_s28), 399  ;;  %234 = sbr.rel (%p822_p9) target bundleno = 48 (0x30), region = 62 }
  0x27   : > { %s821_s30 = sshll.u32 %s1305_s28, 2 }
  0x28   : > { %s1212_s6 = scalar_lea.vmem %s1298_s1, %s821_s30 }
  0x2b   : > { %v1148_v12 = vmov 0.0  }
  0x2c   : > { %235 = vst [vmem:[#allocation2 + $0x10] sm:$0xff] %v1148_v12 }
  0x2d   : > { %236 = vst [vmem:[#allocation2] sm:$0xff] %v1148_v12 }
  0x2e   : > { %237 = vst [vmem:[#allocation2 + $0x18] sm:$0xff] %v1148_v12 }
  0x2f   : > { %238 = vst [vmem:[#allocation2 + $0x8] sm:$0xff] %v1148_v12 }
  0x30 PF: > { %v1044_v13 = vld [vmem:[%s1212_s6 + $0x38] sm:$0xff]  ;;  %v1043_v17 = vld [vmem:[%s1212_s6 + $0x30] sm:$0xff]  ;;  %v1042_v21 = vld [vmem:[%s1212_s6 + $0x28] sm:$0xff]  ;;  %p1023_p10 = scmp.ne.s32.totalorder %s1185_s15, 4 }
  0x31   : > { %v1052_v14 = vld [vmem:[%s1212_s6 + $0x78] sm:$0xff]  ;;  %627 = vmatpush.bf16.msra.mxu0 %v1044_v13  ;;  %v1051_v18 = vld [vmem:[%s1212_s6 + $0x70] sm:$0xff]  ;;  %v1050_v22 = vld [vmem:[%s1212_s6 + $0x68] sm:$0xff] }
  0x32   : > { %v1060_v15 = vld [vmem:[%s1212_s6 + $0xb8] sm:$0xff]  ;;  %646 = vmatpush.bf16.msra.mxu1 %v1052_v14  ;;  %v1059_v19 = vld [vmem:[%s1212_s6 + $0xb0] sm:$0xff]  ;;  %v1058_v23 = vld [vmem:[%s1212_s6 + $0xa8] sm:$0xff] }
  0x33   : > { %v1068_v16 = vld [vmem:[%s1212_s6 + $0xf8] sm:$0xff]  ;;  %665 = vmatpush.bf16.msra.mxu2 %v1060_v15  ;;  %v1067_v20 = vld [vmem:[%s1212_s6 + $0xf0] sm:$0xff]  ;;  %v1066_v24 = vld [vmem:[%s1212_s6 + $0xe8] sm:$0xff] }
  0x34   : > { %684 = vmatpush.bf16.msra.mxu3 %v1068_v16  ;;  %v1041_v25 = vld [vmem:[%s1212_s6 + $0x20] sm:$0xff]  ;;  %v1040_v29 = vld [vmem:[%s1212_s6 + $0x18] sm:$0xff]  ;;  %v1039_v33 = vld [vmem:[%s1212_s6 + $0x10] sm:$0xff] }
  0x35   : > { %628 = vmatpush.bf16.msra.mxu0 %v1043_v17  ;;  %v1049_v26 = vld [vmem:[%s1212_s6 + $0x60] sm:$0xff]  ;;  %v1048_v30 = vld [vmem:[%s1212_s6 + $0x58] sm:$0xff]  ;;  %v1047_v34 = vld [vmem:[%s1212_s6 + $0x50] sm:$0xff] }
  0x36   : > { %647 = vmatpush.bf16.msra.mxu1 %v1051_v18  ;;  %v1057_v27 = vld [vmem:[%s1212_s6 + $0xa0] sm:$0xff]  ;;  %v1056_v31 = vld [vmem:[%s1212_s6 + $0x98] sm:$0xff]  ;;  %v1055_v35 = vld [vmem:[%s1212_s6 + $0x90] sm:$0xff] }
  0x37   : > { %666 = vmatpush.bf16.msra.mxu2 %v1059_v19  ;;  %v1065_v28 = vld [vmem:[%s1212_s6 + $0xe0] sm:$0xff]  ;;  %v1064_v32 = vld [vmem:[%s1212_s6 + $0xd8] sm:$0xff]  ;;  %v1063_v36 = vld [vmem:[%s1212_s6 + $0xd0] sm:$0xff] }
  0x38   : > { %685 = vmatpush.bf16.msra.mxu3 %v1067_v20  ;;  %v1038_v37 = vld [vmem:[%s1212_s6 + $0x8] sm:$0xff]  ;;  %v1037_v41 = vld [vmem:[%s1212_s6] sm:$0xff]  ;;  %v1076_v53 = vld [vmem:[%s1212_s6 + $0x138] sm:$0xff] }
  0x39   : > { %629 = vmatpush.bf16.msra.mxu0 %v1042_v21  ;;  %v1046_v38 = vld [vmem:[%s1212_s6 + $0x48] sm:$0xff]  ;;  %v1045_v42 = vld [vmem:[%s1212_s6 + $0x40] sm:$0xff]  ;;  %v1075_v58 = vld [vmem:[%s1212_s6 + $0x130] sm:$0xff] }
  0x3a   : > { %648 = vmatpush.bf16.msra.mxu1 %v1050_v22  ;;  %v1054_v39 = vld [vmem:[%s1212_s6 + $0x88] sm:$0xff]  ;;  %v1053_v43 = vld [vmem:[%s1212_s6 + $0x80] sm:$0xff]  ;;  %v1072_v5 = vld [vmem:[%s1212_s6 + $0x118] sm:$0xff] }
  0x3b   : > { %667 = vmatpush.bf16.msra.mxu2 %v1058_v23  ;;  %v1062_v40 = vld [vmem:[%s1212_s6 + $0xc8] sm:$0xff]  ;;  %v1061_v44 = vld [vmem:[%s1212_s6 + $0xc0] sm:$0xff]  ;;  %v1071_v10 = vld [vmem:[%s1212_s6 + $0x110] sm:$0xff] }
  0x3c   : > { %686 = vmatpush.bf16.msra.mxu3 %v1066_v24  ;;  %v825_v45 = vld [vmem:[%s1214_s7] sm:$0xf]  ;;  %v1029_v46 = vld [vmem:[%s1214_s7 + $0x10] sm:$0xf0]  ;;  %v1027_v47 = vld [vmem:[%s1214_s7 + $0x4] sm:$0xf] }
  0x3d   : > { %630 = vmatpush.bf16.msra.mxu0 %v1041_v25  ;;  %v827_v48 = vld [vmem:[%s1214_s7 + $0x14] sm:$0xf0]  ;;  %v833_v49 = vld [vmem:[%s1214_s7 + $0x8] sm:$0xf]  ;;  %v1030_v50 = vld [vmem:[%s1214_s7 + $0x18] sm:$0xf0]  ;;  %v826_v54 = vor.u32 %v1029_v46, %v825_v45 }
  0x3e   : > { %649 = vmatpush.bf16.msra.mxu1 %v1049_v26  ;;  %v1028_v51 = vld [vmem:[%s1214_s7 + $0xc] sm:$0xf]  ;;  %v835_v52 = vld [vmem:[%s1214_s7 + $0x1c] sm:$0xf0]  ;;  %v830_v55 = vor.u32 %v1027_v47, %v827_v48  ;;  %v834_v56 = vor.u32 %v1030_v50, %v833_v49  ;;  %v845_v61 = vld [vmem:[%s1214_s7 + $0x28] sm:$0xf] }
  0x3f   : > { %668 = vmatpush.bf16.msra.mxu2 %v1057_v27  ;;  %v838_v57 = vor.u32 %v1028_v51, %v835_v52  ;;  %v1074_v59 = vld [vmem:[%s1212_s6 + $0x128] sm:$0xff]  ;;  %v1073_v60 = vld [vmem:[%s1212_s6 + $0x120] sm:$0xff] }
  0x40   : > { %687 = vmatpush.bf16.msra.mxu3 %v1065_v28  ;;  %v1034_v62 = vld [vmem:[%s1214_s7 + $0x38] sm:$0xf0]  ;;  %v1032_v63 = vld [vmem:[%s1214_s7 + $0x2c] sm:$0xf]  ;;  %v847_v0 = vld [vmem:[%s1214_s7 + $0x3c] sm:$0xf0] }
  0x41   : > { %631 = vmatpush.bf16.msra.mxu0 %v1040_v29  ;;  %v853_v1 = vld [vmem:[%s1214_s7 + $0x30] sm:$0xf]  ;;  %v1035_v2 = vld [vmem:[%s1214_s7 + $0x40] sm:$0xf0]  ;;  %v1033_v3 = vld [vmem:[%s1214_s7 + $0x34] sm:$0xf]  ;;  %v846_v6 = vor.u32 %v1034_v62, %v845_v61  ;;  %v850_v7 = vor.u32 %v1032_v63, %v847_v0 }
  0x42   : > { %650 = vmatpush.bf16.msra.mxu1 %v1048_v30  ;;  %v855_v4 = vld [vmem:[%s1214_s7 + $0x44] sm:$0xf0]  ;;  %v854_v8 = vor.u32 %v1035_v2, %v853_v1  ;;  %v1069_v12 = vld [vmem:[%s1212_s6 + $0x100] sm:$0xff]  ;;  %v861_v15 = vld [vmem:[%s1214_s7 + $0x38] sm:$0xf] }
  0x43   : > { %669 = vmatpush.bf16.msra.mxu2 %v1056_v31  ;;  %v858_v9 = vor.u32 %v1033_v3, %v855_v4  ;;  %v1070_v11 = vld [vmem:[%s1212_s6 + $0x108] sm:$0xff]  ;;  %v841_v13 = vld [vmem:[%s1214_s7 + $0x10] sm:$0xf]  ;;  %v1031_v14 = vld [vmem:[%s1214_s7 + $0x20] sm:$0xf0] }
  0x44   : > { %688 = vmatpush.bf16.msra.mxu3 %v1064_v32  ;;  %v1036_v16 = vld [vmem:[%s1214_s7 + $0x48] sm:$0xf0]  ;;  %v842_v17 = vor.u32 %v1031_v14, %v841_v13 }
  0x45   : > { %632 = vmatpush.bf16.msra.mxu0 %v1039_v33  ;;  %v862_v18 = vor.u32 %v1036_v16, %v861_v15 }
  0x46   : > { %651 = vmatpush.bf16.msra.mxu1 %v1047_v34 }
  0x47   : > { %670 = vmatpush.bf16.msra.mxu2 %v1055_v35 }
  0x48   : > { %689 = vmatpush.bf16.msra.mxu3 %v1063_v36 }
  0x49   : > { %633 = vmatpush.bf16.msra.mxu0 %v1038_v37 }
  0x4a   : > { %652 = vmatpush.bf16.msra.mxu1 %v1046_v38 }
  0x4b   : > { %671 = vmatpush.bf16.msra.mxu2 %v1054_v39 }
  0x4c   : > { %690 = vmatpush.bf16.msra.mxu3 %v1062_v40  ;;  %v239_v40 = vld [vmem:[#allocation2 + $0x10] sm:$0xff] }
  0x4d   : > { %634 = vmatpush.bf16.msra.mxu0 %v1037_v41 }
  0x4e   : > { %653 = vmatpush.bf16.msra.mxu1 %v1045_v42  ;;  %v241_v42 = vld [vmem:[#allocation2 + $0x18] sm:$0xff] }
  0x4f   : > { %672 = vmatpush.bf16.msra.mxu2 %v1053_v43 }
  0x50   : > { %691 = vmatpush.bf16.msra.mxu3 %v1061_v44  ;;  %635 = vmatmul.bf16.vlgmr.msra.gmra.mxu0 %v826_v54 }
  0x51   : > { %703 = vmatpush.bf16.msrb.mxu0 %v1076_v53  ;;  %654 = vmatmul.bf16.vlgmr.msra.gmra.mxu1 %v830_v55  ;;  %v240_v55 = vld [vmem:[#allocation2] sm:$0xff] }
  0x52   : > { %1088 = vmatpush.bf16.msrb.mxu1 %v1076_v53  ;;  %673 = vmatmul.bf16.vlgmr.msra.gmra.mxu2 %v834_v56 }
  0x53   : > { %692 = vmatmul.bf16.vlgmr.msra.gmra.mxu3 %v838_v57  ;;  %v242_v57 = vld [vmem:[#allocation2 + $0x8] sm:$0xff] }
  0x55   : > { %704 = vmatpush.bf16.msrb.mxu0 %v1075_v58 }
  0x56   : > { %1089 = vmatpush.bf16.msrb.mxu1 %v1075_v58 }
  0x59   : > { %705 = vmatpush.bf16.msrb.mxu0 %v1074_v59 }
  0x5a   : > { %1090 = vmatpush.bf16.msrb.mxu1 %v1074_v59 }
  0x5d   : > { %706 = vmatpush.bf16.msrb.mxu0 %v1073_v60 }
  0x5e   : > { %1091 = vmatpush.bf16.msrb.mxu1 %v1073_v60 }
  0x60   : > { %640 = vmatmul.bf16.gmra.mxu0 %v846_v6 }
  0x61   : > { %707 = vmatpush.bf16.msrb.mxu0 %v1072_v5  ;;  %659 = vmatmul.bf16.gmra.mxu1 %v850_v7 }
  0x62   : > { %1092 = vmatpush.bf16.msrb.mxu1 %v1072_v5  ;;  %678 = vmatmul.bf16.gmra.mxu2 %v854_v8 }
  0x63   : > { %697 = vmatmul.bf16.gmra.mxu3 %v858_v9 }
  0x65   : > { %708 = vmatpush.bf16.msrb.mxu0 %v1071_v10 }
  0x66   : > { %1093 = vmatpush.bf16.msrb.mxu1 %v1071_v10 }
  0x69   : > { %709 = vmatpush.bf16.msrb.mxu0 %v1070_v11 }
  0x6a   : > { %1094 = vmatpush.bf16.msrb.mxu1 %v1070_v11 }
  0x6d   : > { %710 = vmatpush.bf16.msrb.mxu0 %v1069_v12 }
  0x6e   : > { %1095 = vmatpush.bf16.msrb.mxu1 %v1069_v12 }
  0x70   : > { %711 = vmatmul.bf16.vlgmr.msrb.gmra.mxu0 %v842_v17 }
  0x71   : > { %716 = vmatmul.bf16.vlgmr.msrb.gmra.mxu1 %v862_v18 }
  0xcd   : > { %v636_v19 = vpop.f32.mrf.mxu0 }
  0xce   : > { %v655_v20 = vpop.f32.mrf.mxu1 }
  0xcf   : > { %v656_v32 = vadd.f32 %v655_v20, %v636_v19 }
  0xd5   : > { %v674_v21 = vpop.f32.mrf.mxu2  ;;  %v638_v23 = vpop.f32.mrf.mxu0 }
  0xd6   : > { %v693_v22 = vpop.f32.mrf.mxu3  ;;  %v657_v24 = vpop.f32.mrf.mxu1  ;;  %v675_v34 = vadd.f32 %v674_v21, %v656_v32 }
  0xd7   : > { %v658_v44 = vadd.f32 %v657_v24, %v638_v23 }
  0xd8   : > { %v694_v37 = vadd.f32 %v693_v22, %v675_v34 }
  0xdd   : > { %v676_v25 = vpop.f32.mrf.mxu2  ;;  %v641_v26 = vpop.f32.mrf.mxu0 }
  0xde   : > { %v660_v27 = vpop.f32.mrf.mxu1  ;;  %v695_v28 = vpop.f32.mrf.mxu3  ;;  %v677_v48 = vadd.f32 %v676_v25, %v658_v44 }
  0xdf   : > { %v661_v33 = vadd.f32 %v660_v27, %v641_v26 }
  0xe0   : > { %v696_v53 = vadd.f32 %v695_v28, %v677_v48 }
  0xe5   : > { %v679_v29 = vpop.f32.mrf.mxu2  ;;  %v643_v30 = vpop.f32.mrf.mxu0 }
  0xe6   : > { %v662_v31 = vpop.f32.mrf.mxu1  ;;  %v680_v35 = vadd.f32 %v679_v29, %v661_v33  ;;  %v698_v36 = vpop.f32.mrf.mxu3 }
  0xe7   : > { %v663_v45 = vadd.f32 %v662_v31, %v643_v30 }
  0xe8   : > { %v699_v38 = vadd.f32 %v698_v36, %v680_v35 }
  0xed   : > { %v681_v39 = vpop.f32.mrf.mxu2  ;;  %v712_v41 = vpop.f32.mrf.mxu0 }
  0xee   : > { %v717_v43 = vpop.f32.mrf.mxu1  ;;  %v713_v46 = vadd.f32 %v712_v41, %v694_v37  ;;  %v682_v49 = vadd.f32 %v681_v39, %v663_v45  ;;  %v700_v52 = vpop.f32.mrf.mxu3 }
  0xef   : > { %v718_v47 = vadd.f32 %v717_v43, %v699_v38 }
  0xf0   : > { %v722_v50 = vadd.f32 %v713_v46, %v239_v40  ;;  %v701_v54 = vadd.f32 %v700_v52, %v682_v49 }
  0xf1   : > { %v724_v51 = vadd.f32 %v718_v47, %v241_v42 }
  0xf2   : > { %726 = vst [vmem:[#allocation2 + $0x10] sm:$0xff] %v722_v50 }
  0xf3   : > { %728 = vst [vmem:[#allocation2 + $0x18] sm:$0xff] %v724_v51 }
  0xf5   : > { %v714_v56 = vpop.f32.mrf.mxu0 }
  0xf6   : > { %v719_v58 = vpop.f32.mrf.mxu1  ;;  %v715_v59 = vadd.f32 %v714_v56, %v696_v53 }
  0xf7   : > { %v720_v60 = vadd.f32 %v719_v58, %v701_v54  ;;  %733 = sbr.rel (%p1023_p10) target bundleno = 266 (0x10a), region = 66 }
  0xf8   : > { %v723_v61 = vadd.f32 %v715_v59, %v240_v55 }
  0xf9   : > { %v725_v62 = vadd.f32 %v720_v60, %v242_v57 }
  0xfa   : > { %727 = vst [vmem:[#allocation2] sm:$0xff] %v723_v61 }
  0xfb   : > { %729 = vst [vmem:[#allocation2 + $0x8] sm:$0xff] %v725_v62 }
  0xfc   : > { %v734_v63 = vld [vmem:[#allocation2 + $0x10] sm:$0xff]  ;;  %v1123_v1 = vld [vmem:[%s1299_s2] ss:$0 sm:$0xff]  ;;  %v736_v2 = vld [vmem:[#allocation2 + $0x18] sm:$0xff] }
  0xfd   : > { %v742_v4 = vadd.f32 %v1123_v1, %v734_v63  ;;  %v744_v6 = vadd.f32 %v1123_v1, %v736_v2 }
  0xff   : > { %v746_v8 = vmax.f32 %v742_v4, 0.0  ;;  %v748_v10 = vmax.f32 %v744_v6, 0.0 }
 0x101   : > { %v735_v0 = vld [vmem:[#allocation2] sm:$0xff] }
 0x102   : > { %v737_v3 = vld [vmem:[#allocation2 + $0x8] sm:$0xff]  ;;  %v743_v5 = vadd.f32 %v1123_v1, %v735_v0 }
 0x103   : > { %v745_v7 = vadd.f32 %v1123_v1, %v737_v3 }
 0x104   : > { %v747_v9 = vmax.f32 %v743_v5, 0.0 }
 0x105   : > { %v749_v11 = vmax.f32 %v745_v7, 0.0 }
 0x106   : > { %v1080_v12 = vpack.c.bf16 %v747_v9, %v746_v8 }
 0x107   : > { %v1085_v13 = vpack.c.bf16 %v749_v11, %v748_v10 }
 0x108   : > { %1081 = vst [vmem:[%s1300_s3] sm:$0xff] %v1080_v12  }
 0x109   : > { %1087 = vst [vmem:[%s1300_s3 + $0x8] sm:$0xff] %v1085_v13  }
 0x10a PF: > { %p10_p11 = scmp.ge.s32.totalorder %s1188_s16, 7   ;;  %s1301_s12 = smov %s1142_s13 }
 0x10b   : > { %s1302_s13 = smov %s1197_s19  ;;  %s1303_s14 = smov %s1188_s16 }
 0x10c   :  { %12 = sbr.rel (!%p10_p11) target bundleno = 2 (0x2), region = 106 }

// kernel: autoencoder_forward.7
= control target key start
LH: loop header
LB: loop body
LE: loop exit
PB: predicated region body
PF: predicated region fallthrough
CT: control target
= control target key end

     0   :  { %s14044_s0 = inlined_call_operand.vmem [shape: bf16[2,2048], index: 0, kind: input, shape index: {}]   ;;  %s14045_s1 = inlined_call_operand.vmem [shape: bf16[2048,400], index: 1, kind: input, shape index: {}]   ;;  %s14046_s2 = inlined_call_operand.vmem [shape: f32[1,400], index: 2, kind: input, shape index: {}]   ;;  %s14047_s3 = inlined_call_operand.vmem [shape: bf16[400,20], index: 3, kind: input, shape index: {}]   ;;  %s14048_s4 = inlined_call_operand.vmem [shape: f32[1,20], index: 4, kind: input, shape index: {}]   ;;  %s14049_s5 = inlined_call_operand.vmem [shape: bf16[20,400], index: 5, kind: input, shape index: {}]   ;;  %s14050_s6 = inlined_call_operand.vmem [shape: f32[1,400], index: 6, kind: input, shape index: {}]   ;;  %s14051_s7 = inlined_call_operand.vmem [shape: bf16[400,784], index: 7, kind: input, shape index: {}]   ;;  %s14052_s8 = inlined_call_operand.vmem [shape: f32[1,784], index: 8, kind: input, shape index: {}]   ;;  %s14053_s9 = inlined_call_operand.hbm [shape: f32[2,20], index: 9, kind: output, shape index: {0}]   ;;  %s14054_s10 = inlined_call_operand.vmem [shape: f32[2,784], index: 10, kind: output, shape index: {1}]  }
   0x1   :  { %v6026_v0 = vld [vmem:[%s14045_s1 + $0xe0] sm:$0xf]  ;;  %v8818_v1 = vld [vmem:[%s14045_s1 + $0xec] sm:$0xf0] }
   0x2   :  { %v6154_v2 = vld [vmem:[%s14045_s1 + $0x1e0] sm:$0xf]  ;;  %v6027_v3 = vor.u32 %v8818_v1, %v6026_v0  ;;  %v8850_v4 = vld [vmem:[%s14045_s1 + $0x1ec] sm:$0xf0] }
   0x3   :  { %v6282_v5 = vld [vmem:[%s14045_s1 + $0x2e0] sm:$0xf]  ;;  %v8882_v6 = vld [vmem:[%s14045_s1 + $0x2ec] sm:$0xf0]  ;;  %v6155_v7 = vor.u32 %v8850_v4, %v6154_v2 }
   0x4   :  { %v6283_v8 = vor.u32 %v8882_v6, %v6282_v5  ;;  %v6410_v9 = vld [vmem:[%s14045_s1 + $0x3e0] sm:$0xf]  ;;  %v8914_v10 = vld [vmem:[%s14045_s1 + $0x3ec] sm:$0xf0]  ;;  %3156 = vmatpush.bf16.msra.mxu0 %v6027_v3 }
   0x5   :  { %v6010_v11 = vld [vmem:[%s14045_s1 + $0xc0] sm:$0xf]  ;;  %v6411_v12 = vor.u32 %v8914_v10, %v6410_v9  ;;  %v8814_v13 = vld [vmem:[%s14045_s1 + $0xcc] sm:$0xf0]  ;;  %3169 = vmatpush.bf16.msra.mxu1 %v6155_v7 }
   0x6   :  { %v6138_v14 = vld [vmem:[%s14045_s1 + $0x1c0] sm:$0xf]  ;;  %v8846_v15 = vld [vmem:[%s14045_s1 + $0x1cc] sm:$0xf0]  ;;  %3182 = vmatpush.bf16.msra.mxu2 %v6283_v8  ;;  %v6011_v16 = vor.u32 %v8814_v13, %v6010_v11 }
   0x7   :  { %v6139_v17 = vor.u32 %v8846_v15, %v6138_v14  ;;  %v6266_v18 = vld [vmem:[%s14045_s1 + $0x2c0] sm:$0xf]  ;;  %v8878_v19 = vld [vmem:[%s14045_s1 + $0x2cc] sm:$0xf0]  ;;  %3195 = vmatpush.bf16.msra.mxu3 %v6411_v12 }
   0x8   :  { %v6394_v20 = vld [vmem:[%s14045_s1 + $0x3c0] sm:$0xf]  ;;  %v6267_v21 = vor.u32 %v8878_v19, %v6266_v18  ;;  %v8910_v22 = vld [vmem:[%s14045_s1 + $0x3cc] sm:$0xf0]  ;;  %3157 = vmatpush.bf16.msra.mxu0 %v6011_v16 }
   0x9   :  { %v5994_v23 = vld [vmem:[%s14045_s1 + $0xa0] sm:$0xf]  ;;  %v8810_v24 = vld [vmem:[%s14045_s1 + $0xac] sm:$0xf0]  ;;  %v6395_v25 = vor.u32 %v8910_v22, %v6394_v20  ;;  %3170 = vmatpush.bf16.msra.mxu1 %v6139_v17 }
   0xa   :  { %v6122_v26 = vld [vmem:[%s14045_s1 + $0x1a0] sm:$0xf]  ;;  %v8842_v27 = vld [vmem:[%s14045_s1 + $0x1ac] sm:$0xf0]  ;;  %v5995_v29 = vor.u32 %v8810_v24, %v5994_v23  ;;  %3183 = vmatpush.bf16.msra.mxu2 %v6267_v21 }
   0xb   :  { %v6250_v28 = vld [vmem:[%s14045_s1 + $0x2a0] sm:$0xf]  ;;  %v8874_v30 = vld [vmem:[%s14045_s1 + $0x2ac] sm:$0xf0]  ;;  %v6123_v33 = vor.u32 %v8842_v27, %v6122_v26  ;;  %3196 = vmatpush.bf16.msra.mxu3 %v6395_v25 }
   0xc   :  { %v6378_v31 = vld [vmem:[%s14045_s1 + $0x3a0] sm:$0xf]  ;;  %v8906_v32 = vld [vmem:[%s14045_s1 + $0x3ac] sm:$0xf0]  ;;  %v6251_v34 = vor.u32 %v8874_v30, %v6250_v28  ;;  %3158 = vmatpush.bf16.msra.mxu0 %v5995_v29 }
   0xd   :  { %v5978_v35 = vld [vmem:[%s14045_s1 + $0x80] sm:$0xf]  ;;  %v8806_v36 = vld [vmem:[%s14045_s1 + $0x8c] sm:$0xf0]  ;;  %v6379_v38 = vor.u32 %v8906_v32, %v6378_v31  ;;  %3171 = vmatpush.bf16.msra.mxu1 %v6123_v33 }
   0xe   :  { %v6106_v37 = vld [vmem:[%s14045_s1 + $0x180] sm:$0xf]  ;;  %v8838_v39 = vld [vmem:[%s14045_s1 + $0x18c] sm:$0xf0]  ;;  %v5979_v44 = vor.u32 %v8806_v36, %v5978_v35  ;;  %3184 = vmatpush.bf16.msra.mxu2 %v6251_v34 }
   0xf   :  { %v6234_v40 = vld [vmem:[%s14045_s1 + $0x280] sm:$0xf]  ;;  %v8870_v41 = vld [vmem:[%s14045_s1 + $0x28c] sm:$0xf0]  ;;  %v6107_v45 = vor.u32 %v8838_v39, %v6106_v37  ;;  %3197 = vmatpush.bf16.msra.mxu3 %v6379_v38 }
  0x10   :  { %v6362_v42 = vld [vmem:[%s14045_s1 + $0x380] sm:$0xf]  ;;  %v8902_v43 = vld [vmem:[%s14045_s1 + $0x38c] sm:$0xf0]  ;;  %v6235_v46 = vor.u32 %v8870_v41, %v6234_v40  ;;  %3159 = vmatpush.bf16.msra.mxu0 %v5979_v44 }
  0x11   :  { %v5962_v47 = vld [vmem:[%s14045_s1 + $0x60] sm:$0xf]  ;;  %v8802_v48 = vld [vmem:[%s14045_s1 + $0x6c] sm:$0xf0]  ;;  %v6363_v50 = vor.u32 %v8902_v43, %v6362_v42  ;;  %3172 = vmatpush.bf16.msra.mxu1 %v6107_v45 }
  0x12   :  { %v6090_v49 = vld [vmem:[%s14045_s1 + $0x160] sm:$0xf]  ;;  %v8834_v51 = vld [vmem:[%s14045_s1 + $0x16c] sm:$0xf0]  ;;  %v5963_v56 = vor.u32 %v8802_v48, %v5962_v47  ;;  %3185 = vmatpush.bf16.msra.mxu2 %v6235_v46 }
  0x13   :  { %v6218_v52 = vld [vmem:[%s14045_s1 + $0x260] sm:$0xf]  ;;  %v8866_v53 = vld [vmem:[%s14045_s1 + $0x26c] sm:$0xf0]  ;;  %v6091_v57 = vor.u32 %v8834_v51, %v6090_v49  ;;  %3198 = vmatpush.bf16.msra.mxu3 %v6363_v50 }
  0x14   :  { %v6346_v54 = vld [vmem:[%s14045_s1 + $0x360] sm:$0xf]  ;;  %v8898_v55 = vld [vmem:[%s14045_s1 + $0x36c] sm:$0xf0]  ;;  %v6219_v58 = vor.u32 %v8866_v53, %v6218_v52  ;;  %3160 = vmatpush.bf16.msra.mxu0 %v5963_v56 }
  0x15   :  { %v5946_v59 = vld [vmem:[%s14045_s1 + $0x40] sm:$0xf]  ;;  %v8798_v60 = vld [vmem:[%s14045_s1 + $0x4c] sm:$0xf0]  ;;  %v6347_v62 = vor.u32 %v8898_v55, %v6346_v54  ;;  %3173 = vmatpush.bf16.msra.mxu1 %v6091_v57 }
  0x16   :  { %v6074_v61 = vld [vmem:[%s14045_s1 + $0x140] sm:$0xf]  ;;  %v8830_v63 = vld [vmem:[%s14045_s1 + $0x14c] sm:$0xf0]  ;;  %v5947_v4 = vor.u32 %v8798_v60, %v5946_v59  ;;  %3186 = vmatpush.bf16.msra.mxu2 %v6219_v58 }
  0x17   :  { %v6202_v0 = vld [vmem:[%s14045_s1 + $0x240] sm:$0xf]  ;;  %v8862_v1 = vld [vmem:[%s14045_s1 + $0x24c] sm:$0xf0]  ;;  %v6075_v5 = vor.u32 %v8830_v63, %v6074_v61  ;;  %3199 = vmatpush.bf16.msra.mxu3 %v6347_v62 }
  0x18   :  { %v6330_v2 = vld [vmem:[%s14045_s1 + $0x340] sm:$0xf]  ;;  %v8894_v3 = vld [vmem:[%s14045_s1 + $0x34c] sm:$0xf0]  ;;  %v6203_v6 = vor.u32 %v8862_v1, %v6202_v0  ;;  %3161 = vmatpush.bf16.msra.mxu0 %v5947_v4 }
  0x19   :  { %v5930_v7 = vld [vmem:[%s14045_s1 + $0x20] sm:$0xf]  ;;  %v8794_v8 = vld [vmem:[%s14045_s1 + $0x2c] sm:$0xf0]  ;;  %v6331_v10 = vor.u32 %v8894_v3, %v6330_v2  ;;  %3174 = vmatpush.bf16.msra.mxu1 %v6075_v5 }
  0x1a   :  { %v6058_v9 = vld [vmem:[%s14045_s1 + $0x120] sm:$0xf]  ;;  %v8826_v11 = vld [vmem:[%s14045_s1 + $0x12c] sm:$0xf0]  ;;  %v5931_v16 = vor.u32 %v8794_v8, %v5930_v7  ;;  %3187 = vmatpush.bf16.msra.mxu2 %v6203_v6 }
  0x1b   :  { %v6186_v12 = vld [vmem:[%s14045_s1 + $0x220] sm:$0xf]  ;;  %v8858_v13 = vld [vmem:[%s14045_s1 + $0x22c] sm:$0xf0]  ;;  %v6059_v19 = vor.u32 %v8826_v11, %v6058_v9  ;;  %3200 = vmatpush.bf16.msra.mxu3 %v6331_v10 }
  0x1c   :  { %v6314_v14 = vld [vmem:[%s14045_s1 + $0x320] sm:$0xf]  ;;  %v8890_v15 = vld [vmem:[%s14045_s1 + $0x32c] sm:$0xf0]  ;;  %v6187_v20 = vor.u32 %v8858_v13, %v6186_v12  ;;  %3162 = vmatpush.bf16.msra.mxu0 %v5931_v16 }
  0x1d   :  { %v5914_v17 = vld [vmem:[%s14045_s1] sm:$0xf]  ;;  %v8790_v18 = vld [vmem:[%s14045_s1 + $0xc] sm:$0xf0]  ;;  %v6315_v24 = vor.u32 %v8890_v15, %v6314_v14  ;;  %3175 = vmatpush.bf16.msra.mxu1 %v6059_v19 }
  0x1e   :  { %v6042_v21 = vld [vmem:[%s14045_s1 + $0x100] sm:$0xf]  ;;  %v8822_v22 = vld [vmem:[%s14045_s1 + $0x10c] sm:$0xf0]  ;;  %v5915_v31 = vor.u32 %v8790_v18, %v5914_v17  ;;  %3188 = vmatpush.bf16.msra.mxu2 %v6187_v20 }
  0x1f   :  { %v6170_v23 = vld [vmem:[%s14045_s1 + $0x200] sm:$0xf]  ;;  %v8854_v25 = vld [vmem:[%s14045_s1 + $0x20c] sm:$0xf0]  ;;  %v6043_v35 = vor.u32 %v8822_v22, %v6042_v21  ;;  %3201 = vmatpush.bf16.msra.mxu3 %v6315_v24 }
  0x20   :  { %v6298_v26 = vld [vmem:[%s14045_s1 + $0x300] sm:$0xf]  ;;  %v8886_v27 = vld [vmem:[%s14045_s1 + $0x30c] sm:$0xf0]  ;;  %v6171_v36 = vor.u32 %v8854_v25, %v6170_v23  ;;  %3163 = vmatpush.bf16.msra.mxu0 %v5915_v31 }
  0x21   :  { %v6538_v28 = vld [vmem:[%s14045_s1 + $0x4e0] sm:$0xf]  ;;  %v8946_v29 = vld [vmem:[%s14045_s1 + $0x4ec] sm:$0xf0]  ;;  %v6299_v39 = vor.u32 %v8886_v27, %v6298_v26  ;;  %3176 = vmatpush.bf16.msra.mxu1 %v6043_v35 }
  0x22   :  { %v6666_v30 = vld [vmem:[%s14045_s1 + $0x5e0] sm:$0xf]  ;;  %v8978_v32 = vld [vmem:[%s14045_s1 + $0x5ec] sm:$0xf0]  ;;  %v6539_v40 = vor.u32 %v8946_v29, %v6538_v28  ;;  %3189 = vmatpush.bf16.msra.mxu2 %v6171_v36 }
  0x23   :  { %v6794_v33 = vld [vmem:[%s14045_s1 + $0x6e0] sm:$0xf]  ;;  %v9010_v34 = vld [vmem:[%s14045_s1 + $0x6ec] sm:$0xf0]  ;;  %v6667_v41 = vor.u32 %v8978_v32, %v6666_v30  ;;  %3202 = vmatpush.bf16.msra.mxu3 %v6299_v39 }
  0x24   :  { %v6922_v37 = vld [vmem:[%s14045_s1 + $0x7e0] sm:$0xf]  ;;  %v9042_v38 = vld [vmem:[%s14045_s1 + $0x7ec] sm:$0xf0]  ;;  %v6795_v42 = vor.u32 %v9010_v34, %v6794_v33  ;;  %3208 = vmatpush.bf16.msrb.mxu0 %v6539_v40 }
  0x25   :  { %v6522_v43 = vld [vmem:[%s14045_s1 + $0x4c0] sm:$0xf]  ;;  %v8942_v44 = vld [vmem:[%s14045_s1 + $0x4cc] sm:$0xf0]  ;;  %v6923_v46 = vor.u32 %v9042_v38, %v6922_v37  ;;  %3221 = vmatpush.bf16.msrb.mxu1 %v6667_v41 }
  0x26   :  { %v6650_v45 = vld [vmem:[%s14045_s1 + $0x5c0] sm:$0xf]  ;;  %v8974_v47 = vld [vmem:[%s14045_s1 + $0x5cc] sm:$0xf0]  ;;  %v6523_v52 = vor.u32 %v8942_v44, %v6522_v43  ;;  %3234 = vmatpush.bf16.msrb.mxu2 %v6795_v42 }
  0x27   :  { %v6778_v48 = vld [vmem:[%s14045_s1 + $0x6c0] sm:$0xf]  ;;  %v9006_v49 = vld [vmem:[%s14045_s1 + $0x6cc] sm:$0xf0]  ;;  %v6651_v53 = vor.u32 %v8974_v47, %v6650_v45  ;;  %3247 = vmatpush.bf16.msrb.mxu3 %v6923_v46 }
  0x28   :  { %v6906_v50 = vld [vmem:[%s14045_s1 + $0x7c0] sm:$0xf]  ;;  %v9038_v51 = vld [vmem:[%s14045_s1 + $0x7cc] sm:$0xf0]  ;;  %v6779_v54 = vor.u32 %v9006_v49, %v6778_v48  ;;  %3209 = vmatpush.bf16.msrb.mxu0 %v6523_v52 }
  0x29   :  { %v6506_v55 = vld [vmem:[%s14045_s1 + $0x4a0] sm:$0xf]  ;;  %v8938_v56 = vld [vmem:[%s14045_s1 + $0x4ac] sm:$0xf0]  ;;  %v6907_v58 = vor.u32 %v9038_v51, %v6906_v50  ;;  %3222 = vmatpush.bf16.msrb.mxu1 %v6651_v53 }
  0x2a   :  { %v6634_v57 = vld [vmem:[%s14045_s1 + $0x5a0] sm:$0xf]  ;;  %v8970_v59 = vld [vmem:[%s14045_s1 + $0x5ac] sm:$0xf0]  ;;  %v6507_v0 = vor.u32 %v8938_v56, %v6506_v55  ;;  %3235 = vmatpush.bf16.msrb.mxu2 %v6779_v54 }
  0x2b   :  { %v6762_v60 = vld [vmem:[%s14045_s1 + $0x6a0] sm:$0xf]  ;;  %v9002_v61 = vld [vmem:[%s14045_s1 + $0x6ac] sm:$0xf0]  ;;  %v6635_v3 = vor.u32 %v8970_v59, %v6634_v57  ;;  %3248 = vmatpush.bf16.msrb.mxu3 %v6907_v58 }
  0x2c   :  { %v6890_v62 = vld [vmem:[%s14045_s1 + $0x7a0] sm:$0xf]  ;;  %v9034_v63 = vld [vmem:[%s14045_s1 + $0x7ac] sm:$0xf0]  ;;  %v6763_v4 = vor.u32 %v9002_v61, %v6762_v60  ;;  %3210 = vmatpush.bf16.msrb.mxu0 %v6507_v0  ;;  %v37_v61 = vld [vmem:[%s14044_s0 + $0x8] sm:$0xff] }
  0x2d   :  { %v6490_v1 = vld [vmem:[%s14045_s1 + $0x480] sm:$0xf]  ;;  %v8934_v5 = vld [vmem:[%s14045_s1 + $0x48c] sm:$0xf0]  ;;  %v6891_v7 = vor.u32 %v9034_v63, %v6890_v62  ;;  %3223 = vmatpush.bf16.msrb.mxu1 %v6635_v3 }
  0x2e   :  { %v36_v2 = vld [vmem:[%s14044_s0] sm:$0xff]  ;;  %v8966_v8 = vld [vmem:[%s14045_s1 + $0x58c] sm:$0xf0]  ;;  %v6491_v13 = vor.u32 %v8934_v5, %v6490_v1  ;;  %3236 = vmatpush.bf16.msrb.mxu2 %v6763_v4 }
  0x2f   :  { %v6618_v6 = vld [vmem:[%s14045_s1 + $0x580] sm:$0xf]  ;;  %561 = vst [vmem:[#allocation1] ss:$9 sm:$0xff] %v36_v2  ;;  %v8998_v10 = vld [vmem:[%s14045_s1 + $0x68c] sm:$0xf0]  ;;  %3249 = vmatpush.bf16.msrb.mxu3 %v6891_v7 }
  0x30   :  { %v6746_v9 = vld [vmem:[%s14045_s1 + $0x680] sm:$0xf]  ;;  %v9030_v12 = vld [vmem:[%s14045_s1 + $0x78c] sm:$0xf0]  ;;  %v6619_v14 = vor.u32 %v8966_v8, %v6618_v6  ;;  %3211 = vmatpush.bf16.msrb.mxu0 %v6491_v13 }
  0x31   :  { %v6874_v11 = vld [vmem:[%s14045_s1 + $0x780] sm:$0xf]  ;;  %v6747_v15 = vor.u32 %v8998_v10, %v6746_v9  ;;  %v8930_v17 = vld [vmem:[%s14045_s1 + $0x46c] sm:$0xf0] }
  0x32   :  { %v6474_v16 = vld [vmem:[%s14045_s1 + $0x460] sm:$0xf]  ;;  %v6875_v19 = vor.u32 %v9030_v12, %v6874_v11  ;;  %v8962_v20 = vld [vmem:[%s14045_s1 + $0x56c] sm:$0xf0]  ;;  %3224 = vmatpush.bf16.msrb.mxu1 %v6619_v14 }
  0x33   :  { %v6602_v18 = vld [vmem:[%s14045_s1 + $0x560] sm:$0xf]  ;;  %v8994_v22 = vld [vmem:[%s14045_s1 + $0x66c] sm:$0xf0]  ;;  %v6475_v26 = vor.u32 %v8930_v17, %v6474_v16  ;;  %3237 = vmatpush.bf16.msrb.mxu2 %v6747_v15 }
  0x34   :  { %v6730_v21 = vld [vmem:[%s14045_s1 + $0x660] sm:$0xf]  ;;  %v9026_v24 = vld [vmem:[%s14045_s1 + $0x76c] sm:$0xf0]  ;;  %v6603_v30 = vor.u32 %v8962_v20, %v6602_v18  ;;  %3250 = vmatpush.bf16.msrb.mxu3 %v6875_v19 }
  0x35   :  { %v6858_v23 = vld [vmem:[%s14045_s1 + $0x760] sm:$0xf]  ;;  %v6731_v31 = vor.u32 %v8994_v22, %v6730_v21  ;;  %v8926_v32 = vld [vmem:[%s14045_s1 + $0x44c] sm:$0xf0]  ;;  %3212 = vmatpush.bf16.msrb.mxu0 %v6475_v26 }
  0x36   :  { %v6458_v25 = vld [vmem:[%s14045_s1 + $0x440] sm:$0xf]  ;;  %v9932_v27 = vld [vmem:[#allocation1 + $0x12] sm:$0xff]  ;;  %v9944_v34 = vld [vmem:[#allocation1 + $0x9] sm:$0xff]  ;;  %v6859_v35 = vor.u32 %v9026_v24, %v6858_v23  ;;  %3225 = vmatpush.bf16.msrb.mxu1 %v6603_v30 }
  0x37   :  { %v9934_v28 = vld [vmem:[#allocation1] sm:$0xff]  ;;  %v8958_v36 = vld [vmem:[%s14045_s1 + $0x54c] sm:$0xf0]  ;;  %3190 = vmatmul.bf16.vlgmr.msra.gmra.mxu2 %v9932_v27  ;;  %v6459_v41 = vor.u32 %v8926_v32, %v6458_v25  ;;  %3177 = vmatmul.bf16.vlgmr.msra.gmra.mxu1 %v9944_v34  ;;  %v10007_v60 = vld [vmem:[#allocation1 + $0x36] sm:$0xff] }
  0x38   :  { %v9936_v29 = vld [vmem:[#allocation1 + $0x1b] sm:$0xff]  ;;  %v8990_v38 = vld [vmem:[%s14045_s1 + $0x64c] sm:$0xf0]  ;;  %3164 = vmatmul.bf16.vlgmr.msra.gmra.mxu0 %v9934_v28  ;;  %3238 = vmatpush.bf16.msrb.mxu2 %v6731_v31  ;;  %v10012_v0 = vld [vmem:[#allocation1 + $0x24] sm:$0xff] }
  0x39   :  { %v6586_v33 = vld [vmem:[%s14045_s1 + $0x540] sm:$0xf]  ;;  %v9022_v40 = vld [vmem:[%s14045_s1 + $0x74c] sm:$0xf0]  ;;  %3203 = vmatmul.bf16.vlgmr.msra.gmra.mxu3 %v9936_v29  ;;  %3213 = vmatpush.bf16.msrb.mxu0 %v6459_v41 }
  0x3a   :  { %v6714_v37 = vld [vmem:[%s14045_s1 + $0x640] sm:$0xf]  ;;  %v6587_v43 = vor.u32 %v8958_v36, %v6586_v33  ;;  %v8922_v45 = vld [vmem:[%s14045_s1 + $0x42c] sm:$0xf0]  ;;  %3251 = vmatpush.bf16.msrb.mxu3 %v6859_v35 }
  0x3b   :  { %v6842_v39 = vld [vmem:[%s14045_s1 + $0x740] sm:$0xf]  ;;  %v6715_v44 = vor.u32 %v8990_v38, %v6714_v37  ;;  %v8954_v47 = vld [vmem:[%s14045_s1 + $0x52c] sm:$0xf0] }
  0x3c   :  { %v6442_v42 = vld [vmem:[%s14045_s1 + $0x420] sm:$0xf]  ;;  %v6843_v48 = vor.u32 %v9022_v40, %v6842_v39  ;;  %v8986_v50 = vld [vmem:[%s14045_s1 + $0x62c] sm:$0xf0]  ;;  %3226 = vmatpush.bf16.msrb.mxu1 %v6587_v43 }
  0x3d   :  { %v6570_v46 = vld [vmem:[%s14045_s1 + $0x520] sm:$0xf]  ;;  %v9018_v52 = vld [vmem:[%s14045_s1 + $0x72c] sm:$0xf0]  ;;  %v6443_v55 = vor.u32 %v8922_v45, %v6442_v42  ;;  %3239 = vmatpush.bf16.msrb.mxu2 %v6715_v44 }
  0x3e   :  { %v6698_v49 = vld [vmem:[%s14045_s1 + $0x620] sm:$0xf]  ;;  %v8918_v54 = vld [vmem:[%s14045_s1 + $0x40c] sm:$0xf0]  ;;  %v6571_v62 = vor.u32 %v8954_v47, %v6570_v46  ;;  %3252 = vmatpush.bf16.msrb.mxu3 %v6843_v48 }
  0x3f   :  { %v6826_v51 = vld [vmem:[%s14045_s1 + $0x720] sm:$0xf]  ;;  %v8950_v57 = vld [vmem:[%s14045_s1 + $0x50c] sm:$0xf0]  ;;  %v6699_v63 = vor.u32 %v8986_v50, %v6698_v49  ;;  %3214 = vmatpush.bf16.msrb.mxu0 %v6443_v55 }
  0x40   :  { %v6426_v53 = vld [vmem:[%s14045_s1 + $0x400] sm:$0xf]  ;;  %v8982_v59 = vld [vmem:[%s14045_s1 + $0x60c] sm:$0xf0]  ;;  %v6827_v3 = vor.u32 %v9018_v52, %v6826_v51  ;;  %3227 = vmatpush.bf16.msrb.mxu1 %v6571_v62 }
  0x41   :  { %v6554_v56 = vld [vmem:[%s14045_s1 + $0x500] sm:$0xf]  ;;  %v10016_v2 = vld [vmem:[#allocation1 + $0x2d] sm:$0xff]  ;;  %v6427_v9 = vor.u32 %v8918_v54, %v6426_v53  ;;  %3240 = vmatpush.bf16.msrb.mxu2 %v6699_v63 }
  0x42   :  { %v6682_v58 = vld [vmem:[%s14045_s1 + $0x600] sm:$0xf]  ;;  %v9014_v5 = vld [vmem:[%s14045_s1 + $0x70c] sm:$0xf0]  ;;  %v6555_v13 = vor.u32 %v8950_v57, %v6554_v56  ;;  %3253 = vmatpush.bf16.msrb.mxu3 %v6827_v3 }
  0x43   :  { %v10014_v1 = vld [vmem:[#allocation1 + $0x3f] sm:$0xff]  ;;  %v9074_v7 = vld [vmem:[%s14045_s1 + $0x8ec] sm:$0xf0]  ;;  %v6683_v14 = vor.u32 %v8982_v59, %v6682_v58  ;;  %3215 = vmatpush.bf16.msrb.mxu0 %v6427_v9 }
  0x44   :  { %v6810_v4 = vld [vmem:[%s14045_s1 + $0x700] sm:$0xf]  ;;  %571 = vst [vmem:[#allocation1] ss:$9 sm:$0xff] %v37_v61  ;;  %v9106_v10 = vld [vmem:[%s14045_s1 + $0x9ec] sm:$0xf0]  ;;  %3228 = vmatpush.bf16.msrb.mxu1 %v6555_v13 }
  0x45   :  { %v7050_v6 = vld [vmem:[%s14045_s1 + $0x8e0] sm:$0xf]  ;;  %v9138_v12 = vld [vmem:[%s14045_s1 + $0xaec] sm:$0xf0]  ;;  %v6811_v17 = vor.u32 %v9014_v5, %v6810_v4  ;;  %3241 = vmatpush.bf16.msrb.mxu2 %v6683_v14 }
  0x46   :  { %v7178_v8 = vld [vmem:[%s14045_s1 + $0x9e0] sm:$0xf]  ;;  %v9170_v16 = vld [vmem:[%s14045_s1 + $0xbec] sm:$0xf0]  ;;  %v7051_v18 = vor.u32 %v9074_v7, %v7050_v6 }
  0x47   :  { %v7306_v11 = vld [vmem:[%s14045_s1 + $0xae0] sm:$0xf]  ;;  %v7179_v19 = vor.u32 %v9106_v10, %v7178_v8  ;;  %v9070_v22 = vld [vmem:[%s14045_s1 + $0x8cc] sm:$0xf0]  ;;  %3254 = vmatpush.bf16.msrb.mxu3 %v6811_v17  ;;  %3229 = vmatmul.bf16.vlgmr.msrb.gmra.mxu1 %v10016_v2 }
  0x48   :  { %v7434_v15 = vld [vmem:[%s14045_s1 + $0xbe0] sm:$0xf]  ;;  %v7307_v20 = vor.u32 %v9138_v12, %v7306_v11  ;;  %v9102_v25 = vld [vmem:[%s14045_s1 + $0x9cc] sm:$0xf0]  ;;  %3260 = vmatpush.bf16.msra.mxu0 %v7051_v18  ;;  %3242 = vmatmul.bf16.vlgmr.msrb.gmra.mxu2 %v10007_v60 }
  0x49   :  { %v7034_v21 = vld [vmem:[%s14045_s1 + $0x8c0] sm:$0xf]  ;;  %v7435_v24 = vor.u32 %v9170_v16, %v7434_v15  ;;  %v9134_v30 = vld [vmem:[%s14045_s1 + $0xacc] sm:$0xf0]  ;;  %3273 = vmatpush.bf16.msra.mxu1 %v7179_v19  ;;  %3216 = vmatmul.bf16.vlgmr.msrb.gmra.mxu0 %v10012_v0 }
  0x4a   :  { %v7162_v23 = vld [vmem:[%s14045_s1 + $0x9c0] sm:$0xf]  ;;  %v9166_v32 = vld [vmem:[%s14045_s1 + $0xbcc] sm:$0xf0]  ;;  %v7035_v33 = vor.u32 %v9070_v22, %v7034_v21  ;;  %3286 = vmatpush.bf16.msra.mxu2 %v7307_v20  ;;  %3255 = vmatmul.bf16.vlgmr.msrb.gmra.mxu3 %v10014_v1 }
  0x4b   :  { %v7290_v26 = vld [vmem:[%s14045_s1 + $0xac0] sm:$0xf]  ;;  %v7163_v35 = vor.u32 %v9102_v25, %v7162_v23  ;;  %v9066_v38 = vld [vmem:[%s14045_s1 + $0x8ac] sm:$0xf0]  ;;  %3299 = vmatpush.bf16.msra.mxu3 %v7435_v24 }
  0x4c   :  { %v7418_v31 = vld [vmem:[%s14045_s1 + $0xbc0] sm:$0xf]  ;;  %v7291_v36 = vor.u32 %v9134_v30, %v7290_v26  ;;  %v9098_v41 = vld [vmem:[%s14045_s1 + $0x9ac] sm:$0xf0]  ;;  %3261 = vmatpush.bf16.msra.mxu0 %v7035_v33 }
  0x4d   :  { %v7018_v37 = vld [vmem:[%s14045_s1 + $0x8a0] sm:$0xf]  ;;  %v7419_v40 = vor.u32 %v9166_v32, %v7418_v31  ;;  %v9130_v43 = vld [vmem:[%s14045_s1 + $0xaac] sm:$0xf0]  ;;  %3274 = vmatpush.bf16.msra.mxu1 %v7163_v35 }
  0x4e   :  { %v7146_v39 = vld [vmem:[%s14045_s1 + $0x9a0] sm:$0xf]  ;;  %v9162_v45 = vld [vmem:[%s14045_s1 + $0xbac] sm:$0xf0]  ;;  %v7019_v46 = vor.u32 %v9066_v38, %v7018_v37  ;;  %3287 = vmatpush.bf16.msra.mxu2 %v7291_v36 }
  0x4f   :  { %v7274_v42 = vld [vmem:[%s14045_s1 + $0xaa0] sm:$0xf]  ;;  %v7147_v47 = vor.u32 %v9098_v41, %v7146_v39  ;;  %v9062_v50 = vld [vmem:[%s14045_s1 + $0x88c] sm:$0xf0]  ;;  %3300 = vmatpush.bf16.msra.mxu3 %v7419_v40 }
  0x50   :  { %v7402_v44 = vld [vmem:[%s14045_s1 + $0xba0] sm:$0xf]  ;;  %v7275_v48 = vor.u32 %v9130_v43, %v7274_v42  ;;  %v9094_v53 = vld [vmem:[%s14045_s1 + $0x98c] sm:$0xf0]  ;;  %3262 = vmatpush.bf16.msra.mxu0 %v7019_v46 }
  0x51   :  { %v7002_v49 = vld [vmem:[%s14045_s1 + $0x880] sm:$0xf]  ;;  %v7403_v52 = vor.u32 %v9162_v45, %v7402_v44  ;;  %v9126_v55 = vld [vmem:[%s14045_s1 + $0xa8c] sm:$0xf0]  ;;  %3275 = vmatpush.bf16.msra.mxu1 %v7147_v47 }
  0x52   :  { %v7130_v51 = vld [vmem:[%s14045_s1 + $0x980] sm:$0xf]  ;;  %v9158_v57 = vld [vmem:[%s14045_s1 + $0xb8c] sm:$0xf0]  ;;  %v7003_v58 = vor.u32 %v9062_v50, %v7002_v49  ;;  %3288 = vmatpush.bf16.msra.mxu2 %v7275_v48 }
  0x53   :  { %v7258_v54 = vld [vmem:[%s14045_s1 + $0xa80] sm:$0xf]  ;;  %v7131_v59 = vor.u32 %v9094_v53, %v7130_v51  ;;  %v9058_v63 = vld [vmem:[%s14045_s1 + $0x86c] sm:$0xf0]  ;;  %3301 = vmatpush.bf16.msra.mxu3 %v7403_v52 }
  0x54   :  { %v7386_v56 = vld [vmem:[%s14045_s1 + $0xb80] sm:$0xf]  ;;  %v7259_v61 = vor.u32 %v9126_v55, %v7258_v54  ;;  %v9090_v5 = vld [vmem:[%s14045_s1 + $0x96c] sm:$0xf0]  ;;  %3263 = vmatpush.bf16.msra.mxu0 %v7003_v58 }
  0x55   :  { %v6986_v62 = vld [vmem:[%s14045_s1 + $0x860] sm:$0xf]  ;;  %v7387_v4 = vor.u32 %v9158_v57, %v7386_v56  ;;  %v9122_v7 = vld [vmem:[%s14045_s1 + $0xa6c] sm:$0xf0]  ;;  %3276 = vmatpush.bf16.msra.mxu1 %v7131_v59 }
  0x56   :  { %v7114_v3 = vld [vmem:[%s14045_s1 + $0x960] sm:$0xf]  ;;  %v9154_v9 = vld [vmem:[%s14045_s1 + $0xb6c] sm:$0xf0]  ;;  %v6987_v10 = vor.u32 %v9058_v63, %v6986_v62  ;;  %3289 = vmatpush.bf16.msra.mxu2 %v7259_v61 }
  0x57   :  { %v7242_v6 = vld [vmem:[%s14045_s1 + $0xa60] sm:$0xf]  ;;  %v7115_v11 = vor.u32 %v9090_v5, %v7114_v3  ;;  %v9054_v14 = vld [vmem:[%s14045_s1 + $0x84c] sm:$0xf0]  ;;  %3302 = vmatpush.bf16.msra.mxu3 %v7387_v4 }
  0x58   :  { %v7370_v8 = vld [vmem:[%s14045_s1 + $0xb60] sm:$0xf]  ;;  %v7243_v12 = vor.u32 %v9122_v7, %v7242_v6  ;;  %v9086_v17 = vld [vmem:[%s14045_s1 + $0x94c] sm:$0xf0]  ;;  %3264 = vmatpush.bf16.msra.mxu0 %v6987_v10 }
  0x59   :  { %v6970_v13 = vld [vmem:[%s14045_s1 + $0x840] sm:$0xf]  ;;  %v7371_v16 = vor.u32 %v9154_v9, %v7370_v8  ;;  %v9118_v19 = vld [vmem:[%s14045_s1 + $0xa4c] sm:$0xf0]  ;;  %3277 = vmatpush.bf16.msra.mxu1 %v7115_v11 }
  0x5a   :  { %v7098_v15 = vld [vmem:[%s14045_s1 + $0x940] sm:$0xf]  ;;  %v9150_v21 = vld [vmem:[%s14045_s1 + $0xb4c] sm:$0xf0]  ;;  %v6971_v22 = vor.u32 %v9054_v14, %v6970_v13  ;;  %3290 = vmatpush.bf16.msra.mxu2 %v7243_v12 }
  0x5b   :  { %v7226_v18 = vld [vmem:[%s14045_s1 + $0xa40] sm:$0xf]  ;;  %v7099_v23 = vor.u32 %v9086_v17, %v7098_v15  ;;  %v9050_v26 = vld [vmem:[%s14045_s1 + $0x82c] sm:$0xf0]  ;;  %3303 = vmatpush.bf16.msra.mxu3 %v7371_v16 }
  0x5c   :  { %v7354_v20 = vld [vmem:[%s14045_s1 + $0xb40] sm:$0xf]  ;;  %v7227_v24 = vor.u32 %v9118_v19, %v7226_v18  ;;  %v9082_v32 = vld [vmem:[%s14045_s1 + $0x92c] sm:$0xf0]  ;;  %3265 = vmatpush.bf16.msra.mxu0 %v6971_v22 }
  0x5d   :  { %v6954_v25 = vld [vmem:[%s14045_s1 + $0x820] sm:$0xf]  ;;  %v7355_v31 = vor.u32 %v9150_v21, %v7354_v20  ;;  %v9114_v35 = vld [vmem:[%s14045_s1 + $0xa2c] sm:$0xf0]  ;;  %3278 = vmatpush.bf16.msra.mxu1 %v7099_v23 }
  0x5e   :  { %v7082_v30 = vld [vmem:[%s14045_s1 + $0x920] sm:$0xf]  ;;  %v9146_v37 = vld [vmem:[%s14045_s1 + $0xb2c] sm:$0xf0]  ;;  %v6955_v38 = vor.u32 %v9050_v26, %v6954_v25  ;;  %3291 = vmatpush.bf16.msra.mxu2 %v7227_v24 }
  0x5f   :  { %v7210_v33 = vld [vmem:[%s14045_s1 + $0xa20] sm:$0xf]  ;;  %v9046_v40 = vld [vmem:[%s14045_s1 + $0x80c] sm:$0xf0]  ;;  %v7083_v41 = vor.u32 %v9082_v32, %v7082_v30  ;;  %3304 = vmatpush.bf16.msra.mxu3 %v7355_v31 }
  0x60   :  { %v7338_v36 = vld [vmem:[%s14045_s1 + $0xb20] sm:$0xf]  ;;  %v7211_v42 = vor.u32 %v9114_v35, %v7210_v33  ;;  %v9078_v44 = vld [vmem:[%s14045_s1 + $0x90c] sm:$0xf0]  ;;  %3266 = vmatpush.bf16.msra.mxu0 %v6955_v38 }
  0x61   :  { %v6938_v39 = vld [vmem:[%s14045_s1 + $0x800] sm:$0xf]  ;;  %v7339_v46 = vor.u32 %v9146_v37, %v7338_v36  ;;  %v9110_v47 = vld [vmem:[%s14045_s1 + $0xa0c] sm:$0xf0]  ;;  %3279 = vmatpush.bf16.msra.mxu1 %v7083_v41 }
  0x62   :  { %v7066_v43 = vld [vmem:[%s14045_s1 + $0x900] sm:$0xf]  ;;  %v9142_v49 = vld [vmem:[%s14045_s1 + $0xb0c] sm:$0xf0]  ;;  %v6939_v53 = vor.u32 %v9046_v40, %v6938_v39  ;;  %3292 = vmatpush.bf16.msra.mxu2 %v7211_v42 }
  0x63   :  { %v7194_v45 = vld [vmem:[%s14045_s1 + $0xa00] sm:$0xf]  ;;  %v9202_v51 = vld [vmem:[%s14045_s1 + $0xcec] sm:$0xf0]  ;;  %v7067_v57 = vor.u32 %v9078_v44, %v7066_v43  ;;  %3305 = vmatpush.bf16.msra.mxu3 %v7339_v46 }
  0x64   :  { %v7322_v48 = vld [vmem:[%s14045_s1 + $0xb00] sm:$0xf]  ;;  %v9234_v54 = vld [vmem:[%s14045_s1 + $0xdec] sm:$0xf0]  ;;  %v7195_v58 = vor.u32 %v9110_v47, %v7194_v45  ;;  %3267 = vmatpush.bf16.msra.mxu0 %v6939_v53 }
  0x65   :  { %v7562_v50 = vld [vmem:[%s14045_s1 + $0xce0] sm:$0xf]  ;;  %v9266_v56 = vld [vmem:[%s14045_s1 + $0xeec] sm:$0xf0]  ;;  %v7323_v62 = vor.u32 %v9142_v49, %v7322_v48  ;;  %3280 = vmatpush.bf16.msra.mxu1 %v7067_v57 }
  0x66   :  { %v7690_v52 = vld [vmem:[%s14045_s1 + $0xde0] sm:$0xf]  ;;  %v9298_v61 = vld [vmem:[%s14045_s1 + $0xfec] sm:$0xf0]  ;;  %v7563_v63 = vor.u32 %v9202_v51, %v7562_v50  ;;  %3293 = vmatpush.bf16.msra.mxu2 %v7195_v58 }
  0x67   :  { %v7818_v55 = vld [vmem:[%s14045_s1 + $0xee0] sm:$0xf]  ;;  %v7691_v3 = vor.u32 %v9234_v54, %v7690_v52  ;;  %v9198_v6 = vld [vmem:[%s14045_s1 + $0xccc] sm:$0xf0]  ;;  %3306 = vmatpush.bf16.msra.mxu3 %v7323_v62 }
  0x68   :  { %v7946_v59 = vld [vmem:[%s14045_s1 + $0xfe0] sm:$0xf]  ;;  %v7819_v4 = vor.u32 %v9266_v56, %v7818_v55  ;;  %v9230_v9 = vld [vmem:[%s14045_s1 + $0xdcc] sm:$0xf0]  ;;  %3312 = vmatpush.bf16.msrb.mxu0 %v7563_v63 }
  0x69   :  { %v7546_v5 = vld [vmem:[%s14045_s1 + $0xcc0] sm:$0xf]  ;;  %v7947_v8 = vor.u32 %v9298_v61, %v7946_v59  ;;  %v9262_v11 = vld [vmem:[%s14045_s1 + $0xecc] sm:$0xf0]  ;;  %3325 = vmatpush.bf16.msrb.mxu1 %v7691_v3 }
  0x6a   :  { %v7674_v7 = vld [vmem:[%s14045_s1 + $0xdc0] sm:$0xf]  ;;  %v9294_v14 = vld [vmem:[%s14045_s1 + $0xfcc] sm:$0xf0]  ;;  %v7547_v18 = vor.u32 %v9198_v6, %v7546_v5  ;;  %3338 = vmatpush.bf16.msrb.mxu2 %v7819_v4 }
  0x6b   :  { %v7802_v10 = vld [vmem:[%s14045_s1 + $0xec0] sm:$0xf]  ;;  %v574_v15 = vld [vmem:[#allocation1 + $0x12] sm:$0xff]  ;;  %v573_v16 = vld [vmem:[#allocation1 + $0x9] sm:$0xff]  ;;  %v7675_v19 = vor.u32 %v9230_v9, %v7674_v7  ;;  %3351 = vmatpush.bf16.msrb.mxu3 %v7947_v8 }
  0x6c   :  { %v572_v12 = vld [vmem:[#allocation1] sm:$0xff]  ;;  %v7803_v20 = vor.u32 %v9262_v11, %v7802_v10  ;;  %v9194_v22 = vld [vmem:[%s14045_s1 + $0xcac] sm:$0xf0]  ;;  %3294 = vmatmul.bf16.vlgmr.msra.gmra.mxu2 %v574_v15  ;;  %3281 = vmatmul.bf16.vlgmr.msra.gmra.mxu1 %v573_v16 }
  0x6d   :  { %v7930_v13 = vld [vmem:[%s14045_s1 + $0xfc0] sm:$0xf]  ;;  %3268 = vmatmul.bf16.vlgmr.msra.gmra.mxu0 %v572_v12  ;;  %v9226_v25 = vld [vmem:[%s14045_s1 + $0xdac] sm:$0xf0]  ;;  %3326 = vmatpush.bf16.msrb.mxu1 %v7675_v19 }
  0x6e   :  { %v575_v17 = vld [vmem:[#allocation1 + $0x1b] sm:$0xff]  ;;  %v7931_v24 = vor.u32 %v9294_v14, %v7930_v13  ;;  %v9258_v30 = vld [vmem:[%s14045_s1 + $0xeac] sm:$0xf0]  ;;  %3313 = vmatpush.bf16.msrb.mxu0 %v7547_v18  ;;  %3339 = vmatpush.bf16.msrb.mxu2 %v7803_v20 }
  0x6f   :  { %v7530_v21 = vld [vmem:[%s14045_s1 + $0xca0] sm:$0xf]  ;;  %v9290_v32 = vld [vmem:[%s14045_s1 + $0xfac] sm:$0xf0]  ;;  %3307 = vmatmul.bf16.vlgmr.msra.gmra.mxu3 %v575_v17 }
  0x70   :  { %v7658_v23 = vld [vmem:[%s14045_s1 + $0xda0] sm:$0xf]  ;;  %v7531_v33 = vor.u32 %v9194_v22, %v7530_v21  ;;  %v9190_v38 = vld [vmem:[%s14045_s1 + $0xc8c] sm:$0xf0]  ;;  %3352 = vmatpush.bf16.msrb.mxu3 %v7931_v24 }
  0x71   :  { %v7786_v26 = vld [vmem:[%s14045_s1 + $0xea0] sm:$0xf]  ;;  %v7659_v36 = vor.u32 %v9226_v25, %v7658_v23  ;;  %v9222_v40 = vld [vmem:[%s14045_s1 + $0xd8c] sm:$0xf0] }
  0x72   :  { %v7914_v31 = vld [vmem:[%s14045_s1 + $0xfa0] sm:$0xf]  ;;  %v7787_v37 = vor.u32 %v9258_v30, %v7786_v26  ;;  %v9254_v43 = vld [vmem:[%s14045_s1 + $0xe8c] sm:$0xf0] }
  0x73   :  { %v7514_v35 = vld [vmem:[%s14045_s1 + $0xc80] sm:$0xf]  ;;  %v7915_v41 = vor.u32 %v9290_v32, %v7914_v31  ;;  %v9286_v45 = vld [vmem:[%s14045_s1 + $0xf8c] sm:$0xf0] }
  0x74   :  { %v7642_v39 = vld [vmem:[%s14045_s1 + $0xd80] sm:$0xf] }
  0x75   :  { %v7770_v42 = vld [vmem:[%s14045_s1 + $0xe80] sm:$0xf] }
  0x76   :  { %v7898_v44 = vld [vmem:[%s14045_s1 + $0xf80] sm:$0xf] }
  0x77   :  { %16 = vsyncpa [#allocation3], 0  ;;  %3314 = vmatpush.bf16.msrb.mxu0 %v7531_v33  ;;  %v7515_v46 = vor.u32 %v9190_v38, %v7514_v35  ;;  %3327 = vmatpush.bf16.msrb.mxu1 %v7659_v36  ;;  %v7643_v47 = vor.u32 %v9222_v40, %v7642_v39  ;;  %v7771_v48 = vor.u32 %v9254_v43, %v7770_v42  ;;  %v7498_v49 = vld [vmem:[%s14045_s1 + $0xc60] sm:$0xf]  ;;  %v9186_v50 = vld [vmem:[%s14045_s1 + $0xc6c] sm:$0xf0] }
  0x78   :  { %3340 = vmatpush.bf16.msrb.mxu2 %v7787_v37  ;;  %v7626_v51 = vld [vmem:[%s14045_s1 + $0xd60] sm:$0xf]  ;;  %3353 = vmatpush.bf16.msrb.mxu3 %v7915_v41  ;;  %v7899_v52 = vor.u32 %v9286_v45, %v7898_v44  ;;  %v9218_v53 = vld [vmem:[%s14045_s1 + $0xd6c] sm:$0xf0]  ;;  %v7499_v58 = vor.u32 %v9186_v50, %v7498_v49  ;;  %v8816_v38 = vld [vmem:[%s14045_s1 + $0xe4] sm:$0xf] }
  0x79   :  { %v7754_v54 = vld [vmem:[%s14045_s1 + $0xe60] sm:$0xf]  ;;  %v9250_v55 = vld [vmem:[%s14045_s1 + $0xe6c] sm:$0xf0]  ;;  %v7627_v59 = vor.u32 %v9218_v53, %v7626_v51  ;;  %v6028_v39 = vld [vmem:[%s14045_s1 + $0xf0] sm:$0xf0] }
  0x7a   :  { %v7882_v56 = vld [vmem:[%s14045_s1 + $0xf60] sm:$0xf]  ;;  %v9282_v57 = vld [vmem:[%s14045_s1 + $0xf6c] sm:$0xf0]  ;;  %v7755_v61 = vor.u32 %v9250_v55, %v7754_v54  ;;  %v8848_v40 = vld [vmem:[%s14045_s1 + $0x1e4] sm:$0xf]  ;;  %v6031_v50 = vor.u32 %v8816_v38, %v6028_v39 }
  0x7b   :  { %3315 = vmatpush.bf16.msrb.mxu0 %v7515_v46  ;;  %3328 = vmatpush.bf16.msrb.mxu1 %v7643_v47  ;;  %v7482_v62 = vld [vmem:[%s14045_s1 + $0xc40] sm:$0xf]  ;;  %v9182_v63 = vld [vmem:[%s14045_s1 + $0xc4c] sm:$0xf0]  ;;  %v7883_v4 = vor.u32 %v9282_v57, %v7882_v56  ;;  %v6156_v42 = vld [vmem:[%s14045_s1 + $0x1f0] sm:$0xf0] }
  0x7c   :  { %3341 = vmatpush.bf16.msrb.mxu2 %v7771_v48  ;;  %v7610_v3 = vld [vmem:[%s14045_s1 + $0xd40] sm:$0xf]  ;;  %3354 = vmatpush.bf16.msrb.mxu3 %v7899_v52  ;;  %v9214_v5 = vld [vmem:[%s14045_s1 + $0xd4c] sm:$0xf0]  ;;  %v7483_v10 = vor.u32 %v9182_v63, %v7482_v62  ;;  %v8880_v43 = vld [vmem:[%s14045_s1 + $0x2e4] sm:$0xf]  ;;  %v6159_v51 = vor.u32 %v8848_v40, %v6156_v42 }
  0x7d   :  { %v7738_v6 = vld [vmem:[%s14045_s1 + $0xe40] sm:$0xf]  ;;  %v9246_v7 = vld [vmem:[%s14045_s1 + $0xe4c] sm:$0xf0]  ;;  %v7611_v11 = vor.u32 %v9214_v5, %v7610_v3  ;;  %v6284_v44 = vld [vmem:[%s14045_s1 + $0x2f0] sm:$0xf0] }
  0x7e   :  { %v7866_v8 = vld [vmem:[%s14045_s1 + $0xf40] sm:$0xf]  ;;  %v9278_v9 = vld [vmem:[%s14045_s1 + $0xf4c] sm:$0xf0]  ;;  %v7739_v12 = vor.u32 %v9246_v7, %v7738_v6  ;;  %v8912_v47 = vld [vmem:[%s14045_s1 + $0x3e4] sm:$0xf]  ;;  %v6287_v52 = vor.u32 %v8880_v43, %v6284_v44 }
  0x7f   :  { %3316 = vmatpush.bf16.msrb.mxu0 %v7499_v58  ;;  %3329 = vmatpush.bf16.msrb.mxu1 %v7627_v59  ;;  %v7466_v13 = vld [vmem:[%s14045_s1 + $0xc20] sm:$0xf]  ;;  %v9178_v14 = vld [vmem:[%s14045_s1 + $0xc2c] sm:$0xf0]  ;;  %v7867_v16 = vor.u32 %v9278_v9, %v7866_v8  ;;  %v6412_v48 = vld [vmem:[%s14045_s1 + $0x3f0] sm:$0xf0] }
  0x80   :  { %3342 = vmatpush.bf16.msrb.mxu2 %v7755_v61  ;;  %v7594_v15 = vld [vmem:[%s14045_s1 + $0xd20] sm:$0xf]  ;;  %3355 = vmatpush.bf16.msrb.mxu3 %v7883_v4  ;;  %v9210_v17 = vld [vmem:[%s14045_s1 + $0xd2c] sm:$0xf0]  ;;  %v7467_v22 = vor.u32 %v9178_v14, %v7466_v13  ;;  %v8812_v53 = vld [vmem:[%s14045_s1 + $0xc4] sm:$0xf]  ;;  %v6415_v56 = vor.u32 %v8912_v47, %v6412_v48 }
  0x81   :  { %v7722_v18 = vld [vmem:[%s14045_s1 + $0xe20] sm:$0xf]  ;;  %v9242_v19 = vld [vmem:[%s14045_s1 + $0xe2c] sm:$0xf0]  ;;  %v7595_v25 = vor.u32 %v9210_v17, %v7594_v15  ;;  %v6012_v54 = vld [vmem:[%s14045_s1 + $0xd0] sm:$0xf0] }
  0x82   :  { %v7850_v20 = vld [vmem:[%s14045_s1 + $0xf20] sm:$0xf]  ;;  %v9274_v21 = vld [vmem:[%s14045_s1 + $0xf2c] sm:$0xf0]  ;;  %v7723_v26 = vor.u32 %v9242_v19, %v7722_v18  ;;  %v8844_v55 = vld [vmem:[%s14045_s1 + $0x1c4] sm:$0xf]  ;;  %v6015_v6 = vor.u32 %v8812_v53, %v6012_v54 }
  0x83   :  { %3317 = vmatpush.bf16.msrb.mxu0 %v7483_v10  ;;  %v7450_v23 = vld [vmem:[%s14045_s1 + $0xc00] sm:$0xf]  ;;  %v9174_v24 = vld [vmem:[%s14045_s1 + $0xc0c] sm:$0xf0]  ;;  %3330 = vmatpush.bf16.msrb.mxu1 %v7611_v11  ;;  %v7851_v33 = vor.u32 %v9274_v21, %v7850_v20  ;;  %v6140_v57 = vld [vmem:[%s14045_s1 + $0x1d0] sm:$0xf0] }
  0x84   :  { %3343 = vmatpush.bf16.msrb.mxu2 %v7739_v12  ;;  %v7578_v30 = vld [vmem:[%s14045_s1 + $0xd00] sm:$0xf]  ;;  %v9206_v31 = vld [vmem:[%s14045_s1 + $0xd0c] sm:$0xf0]  ;;  %3356 = vmatpush.bf16.msrb.mxu3 %v7867_v16  ;;  %v7451_v41 = vor.u32 %v9174_v24, %v7450_v23  ;;  %v8876_v58 = vld [vmem:[%s14045_s1 + $0x2c4] sm:$0xf]  ;;  %v6143_v7 = vor.u32 %v8844_v55, %v6140_v57 }
  0x85   :  { %v7706_v32 = vld [vmem:[%s14045_s1 + $0xe00] sm:$0xf]  ;;  %v9238_v35 = vld [vmem:[%s14045_s1 + $0xe0c] sm:$0xf0]  ;;  %v7579_v45 = vor.u32 %v9206_v31, %v7578_v30  ;;  %v6268_v59 = vld [vmem:[%s14045_s1 + $0x2d0] sm:$0xf0] }
  0x86   :  { %v7834_v36 = vld [vmem:[%s14045_s1 + $0xf00] sm:$0xf]  ;;  %v9270_v37 = vld [vmem:[%s14045_s1 + $0xf0c] sm:$0xf0]  ;;  %v7707_v46 = vor.u32 %v9238_v35, %v7706_v32  ;;  %v576_v61 = vld [vmem:[#allocation1 + $0x24] sm:$0xff]  ;;  %v6271_v8 = vor.u32 %v8876_v58, %v6268_v59  ;;  %vm4200_vm0 = vcmask 130048  }
  0x87   :  { %3318 = vmatpush.bf16.msrb.mxu0 %v7467_v22  ;;  %3331 = vmatpush.bf16.msrb.mxu1 %v7595_v25  ;;  %v7835_v49 = vor.u32 %v9270_v37, %v7834_v36  ;;  %v8908_v62 = vld [vmem:[%s14045_s1 + $0x3c4] sm:$0xf]  ;;  %v6396_v63 = vld [vmem:[%s14045_s1 + $0x3d0] sm:$0xf0]  ;;  %vm4307_vm1 = vcmask 1041408   ;;  %vm5863_vm2 = vcmask 156672  }
  0x88   :  { %3344 = vmatpush.bf16.msrb.mxu2 %v7723_v26  ;;  %3357 = vmatpush.bf16.msrb.mxu3 %v7851_v33  ;;  %v578_v3 = vld [vmem:[#allocation1 + $0x36] sm:$0xff]  ;;  %v577_v4 = vld [vmem:[#allocation1 + $0x2d] sm:$0xff]  ;;  %v579_v5 = vld [vmem:[#allocation1 + $0x3f] sm:$0xff]  ;;  %v6399_v12 = vor.u32 %v8908_v62, %v6396_v63  ;;  %vm4303_vm3 = vcmask 162816   ;;  %s9558_s16 = smov [#allocation2]   ;;  %s5899_s19 = sshll.u32 %s14053_s9, 4  ;;  %s5900_s19 = int_to_ptr.hbm [resolvable:$true] %s5899_s19 }
  0x89   :  { %v8808_v9 = vld [vmem:[%s14045_s1 + $0xa4] sm:$0xf]  ;;  %v5996_v10 = vld [vmem:[%s14045_s1 + $0xb0] sm:$0xf0]  ;;  %s5897_s17 = sshll.u32 %s9558_s16, 4  ;;  %vm5878_vm4 = vcmask 1045508   ;;  %s5898_s17 = int_to_ptr.vmem [resolvable:$true] %s5897_s17 }
  0x8a   :  { %v8840_v11 = vld [vmem:[%s14045_s1 + $0x1a4] sm:$0xf]  ;;  %v6124_v13 = vld [vmem:[%s14045_s1 + $0x1b0] sm:$0xf0]  ;;  %v5999_v18 = vor.u32 %v8808_v9, %v5996_v10  ;;  %vm5880_vm5 = vcmask 1043456   ;;  %vm5887_vm6 = vcmask 1043458  }
  0x8b   :  { %3319 = vmatpush.bf16.msrb.mxu0 %v7451_v41  ;;  %3332 = vmatpush.bf16.msrb.mxu1 %v7579_v45  ;;  %v8872_v14 = vld [vmem:[%s14045_s1 + $0x2a4] sm:$0xf]  ;;  %v6252_v15 = vld [vmem:[%s14045_s1 + $0x2b0] sm:$0xf0]  ;;  %v6127_v19 = vor.u32 %v8840_v11, %v6124_v13  ;;  %vm5888_vm7 = vmor %vm5887_vm6, %vm4307_vm1  ;;  %vm5889_vm8 = vcmask 128004  }
  0x8c   :  { %3345 = vmatpush.bf16.msrb.mxu2 %v7707_v46  ;;  %3358 = vmatpush.bf16.msrb.mxu3 %v7835_v49  ;;  %v8904_v16 = vld [vmem:[%s14045_s1 + $0x3a4] sm:$0xf]  ;;  %v6380_v17 = vld [vmem:[%s14045_s1 + $0x3b0] sm:$0xf0]  ;;  %v6255_v20 = vor.u32 %v8872_v14, %v6252_v15  ;;  %vm5890_vm9 = vmor %vm5889_vm8, %vm5888_vm7 }
  0x8d   :  { %v8804_v21 = vld [vmem:[%s14045_s1 + $0x84] sm:$0xf]  ;;  %v5980_v22 = vld [vmem:[%s14045_s1 + $0x90] sm:$0xf0]  ;;  %v6383_v24 = vor.u32 %v8904_v16, %v6380_v17 }
  0x8e   :  { %3320 = vmatmul.bf16.vlgmr.msrb.gmra.mxu0 %v576_v61  ;;  %3333 = vmatmul.bf16.vlgmr.msrb.gmra.mxu1 %v577_v4  ;;  %v8836_v23 = vld [vmem:[%s14045_s1 + $0x184] sm:$0xf]  ;;  %v6108_v25 = vld [vmem:[%s14045_s1 + $0x190] sm:$0xf0]  ;;  %v5983_v33 = vor.u32 %v8804_v21, %v5980_v22 }
  0x8f   :  { %3364 = vmatpush.bf16.msra.mxu0 %v6031_v50  ;;  %3377 = vmatpush.bf16.msra.mxu1 %v6159_v51  ;;  %v8868_v26 = vld [vmem:[%s14045_s1 + $0x284] sm:$0xf]  ;;  %v6236_v30 = vld [vmem:[%s14045_s1 + $0x290] sm:$0xf0]  ;;  %v6111_v35 = vor.u32 %v8836_v23, %v6108_v25 }
  0x90   :  { %3390 = vmatpush.bf16.msra.mxu2 %v6287_v52  ;;  %3403 = vmatpush.bf16.msra.mxu3 %v6415_v56  ;;  %v8900_v31 = vld [vmem:[%s14045_s1 + $0x384] sm:$0xf]  ;;  %v6364_v32 = vld [vmem:[%s14045_s1 + $0x390] sm:$0xf0]  ;;  %v6239_v36 = vor.u32 %v8868_v26, %v6236_v30 }
  0x91   :  { %3346 = vmatmul.bf16.vlgmr.msrb.gmra.mxu2 %v578_v3  ;;  %3359 = vmatmul.bf16.vlgmr.msrb.gmra.mxu3 %v579_v5  ;;  %v8800_v37 = vld [vmem:[%s14045_s1 + $0x64] sm:$0xf]  ;;  %v5964_v38 = vld [vmem:[%s14045_s1 + $0x70] sm:$0xf0]  ;;  %v6367_v40 = vor.u32 %v8900_v31, %v6364_v32 }
  0x92   :  { %v8832_v39 = vld [vmem:[%s14045_s1 + $0x164] sm:$0xf]  ;;  %v6092_v41 = vld [vmem:[%s14045_s1 + $0x170] sm:$0xf0]  ;;  %v5967_v46 = vor.u32 %v8800_v37, %v5964_v38 }
  0x93   :  { %3365 = vmatpush.bf16.msra.mxu0 %v6015_v6  ;;  %3378 = vmatpush.bf16.msra.mxu1 %v6143_v7  ;;  %v8864_v42 = vld [vmem:[%s14045_s1 + $0x264] sm:$0xf]  ;;  %v6220_v43 = vld [vmem:[%s14045_s1 + $0x270] sm:$0xf0]  ;;  %v6095_v47 = vor.u32 %v8832_v39, %v6092_v41 }
  0x94   :  { %3391 = vmatpush.bf16.msra.mxu2 %v6271_v8  ;;  %3404 = vmatpush.bf16.msra.mxu3 %v6399_v12  ;;  %v8896_v44 = vld [vmem:[%s14045_s1 + $0x364] sm:$0xf]  ;;  %v6348_v45 = vld [vmem:[%s14045_s1 + $0x370] sm:$0xf0]  ;;  %v6223_v48 = vor.u32 %v8864_v42, %v6220_v43 }
  0x95   :  { %v8796_v49 = vld [vmem:[%s14045_s1 + $0x44] sm:$0xf]  ;;  %v5948_v50 = vld [vmem:[%s14045_s1 + $0x50] sm:$0xf0]  ;;  %v6351_v52 = vor.u32 %v8896_v44, %v6348_v45 }
  0x96   :  { %v8828_v51 = vld [vmem:[%s14045_s1 + $0x144] sm:$0xf]  ;;  %v6076_v53 = vld [vmem:[%s14045_s1 + $0x150] sm:$0xf0]  ;;  %v5951_v58 = vor.u32 %v8796_v49, %v5948_v50 }
  0x97   :  { %3366 = vmatpush.bf16.msra.mxu0 %v5999_v18  ;;  %3379 = vmatpush.bf16.msra.mxu1 %v6127_v19  ;;  %v8860_v54 = vld [vmem:[%s14045_s1 + $0x244] sm:$0xf]  ;;  %v6204_v55 = vld [vmem:[%s14045_s1 + $0x250] sm:$0xf0]  ;;  %v6079_v59 = vor.u32 %v8828_v51, %v6076_v53 }
  0x98   :  { %3392 = vmatpush.bf16.msra.mxu2 %v6255_v20  ;;  %3405 = vmatpush.bf16.msra.mxu3 %v6383_v24  ;;  %v8892_v56 = vld [vmem:[%s14045_s1 + $0x344] sm:$0xf]  ;;  %v6332_v57 = vld [vmem:[%s14045_s1 + $0x350] sm:$0xf0]  ;;  %v6207_v61 = vor.u32 %v8860_v54, %v6204_v55 }
  0x99   :  { %v8792_v62 = vld [vmem:[%s14045_s1 + $0x24] sm:$0xf]  ;;  %v5932_v63 = vld [vmem:[%s14045_s1 + $0x30] sm:$0xf0]  ;;  %v6335_v4 = vor.u32 %v8892_v56, %v6332_v57 }
  0x9a   :  { %v8824_v3 = vld [vmem:[%s14045_s1 + $0x124] sm:$0xf]  ;;  %v6060_v5 = vld [vmem:[%s14045_s1 + $0x130] sm:$0xf0]  ;;  %v5935_v10 = vor.u32 %v8792_v62, %v5932_v63 }
  0x9b   :  { %3367 = vmatpush.bf16.msra.mxu0 %v5983_v33  ;;  %3380 = vmatpush.bf16.msra.mxu1 %v6111_v35  ;;  %v8856_v6 = vld [vmem:[%s14045_s1 + $0x224] sm:$0xf]  ;;  %v6188_v7 = vld [vmem:[%s14045_s1 + $0x230] sm:$0xf0]  ;;  %v6063_v13 = vor.u32 %v8824_v3, %v6060_v5 }
  0x9c   :  { %3393 = vmatpush.bf16.msra.mxu2 %v6239_v36  ;;  %3406 = vmatpush.bf16.msra.mxu3 %v6367_v40  ;;  %v8888_v8 = vld [vmem:[%s14045_s1 + $0x324] sm:$0xf]  ;;  %v6316_v9 = vld [vmem:[%s14045_s1 + $0x330] sm:$0xf0]  ;;  %v6191_v14 = vor.u32 %v8856_v6, %v6188_v7 }
  0x9d   :  { %v8788_v11 = vld [vmem:[%s14045_s1 + $0x4] sm:$0xf]  ;;  %v5916_v12 = vld [vmem:[%s14045_s1 + $0x10] sm:$0xf0]  ;;  %v6319_v18 = vor.u32 %v8888_v8, %v6316_v9 }
  0x9e   :  { %v8820_v15 = vld [vmem:[%s14045_s1 + $0x104] sm:$0xf]  ;;  %v6044_v16 = vld [vmem:[%s14045_s1 + $0x110] sm:$0xf0]  ;;  %v5919_v25 = vor.u32 %v8788_v11, %v5916_v12 }
  0x9f   :  { %3368 = vmatpush.bf16.msra.mxu0 %v5967_v46  ;;  %3381 = vmatpush.bf16.msra.mxu1 %v6095_v47  ;;  %v8852_v17 = vld [vmem:[%s14045_s1 + $0x204] sm:$0xf]  ;;  %v6172_v19 = vld [vmem:[%s14045_s1 + $0x210] sm:$0xf0]  ;;  %v6047_v32 = vor.u32 %v8820_v15, %v6044_v16 }
  0xa0   :  { %3394 = vmatpush.bf16.msra.mxu2 %v6223_v48  ;;  %3407 = vmatpush.bf16.msra.mxu3 %v6351_v52  ;;  %v8884_v20 = vld [vmem:[%s14045_s1 + $0x304] sm:$0xf]  ;;  %v6300_v21 = vld [vmem:[%s14045_s1 + $0x310] sm:$0xf0]  ;;  %v6175_v33 = vor.u32 %v8852_v17, %v6172_v19 }
  0xa1   :  { %v8944_v22 = vld [vmem:[%s14045_s1 + $0x4e4] sm:$0xf]  ;;  %v6540_v23 = vld [vmem:[%s14045_s1 + $0x4f0] sm:$0xf0]  ;;  %v6303_v37 = vor.u32 %v8884_v20, %v6300_v21 }
  0xa2   :  { %v8976_v24 = vld [vmem:[%s14045_s1 + $0x5e4] sm:$0xf]  ;;  %v6668_v26 = vld [vmem:[%s14045_s1 + $0x5f0] sm:$0xf0]  ;;  %v6543_v38 = vor.u32 %v8944_v22, %v6540_v23 }
  0xa3   :  { %3369 = vmatpush.bf16.msra.mxu0 %v5951_v58  ;;  %3382 = vmatpush.bf16.msra.mxu1 %v6079_v59  ;;  %v9008_v30 = vld [vmem:[%s14045_s1 + $0x6e4] sm:$0xf]  ;;  %v6796_v31 = vld [vmem:[%s14045_s1 + $0x6f0] sm:$0xf0]  ;;  %v6671_v39 = vor.u32 %v8976_v24, %v6668_v26 }
  0xa4   :  { %3395 = vmatpush.bf16.msra.mxu2 %v6207_v61  ;;  %3408 = vmatpush.bf16.msra.mxu3 %v6335_v4  ;;  %v9040_v35 = vld [vmem:[%s14045_s1 + $0x7e4] sm:$0xf]  ;;  %v6924_v36 = vld [vmem:[%s14045_s1 + $0x7f0] sm:$0xf0]  ;;  %v6799_v40 = vor.u32 %v9008_v30, %v6796_v31 }
  0xa5   :  { %v8940_v41 = vld [vmem:[%s14045_s1 + $0x4c4] sm:$0xf]  ;;  %v6524_v42 = vld [vmem:[%s14045_s1 + $0x4d0] sm:$0xf0]  ;;  %v6927_v44 = vor.u32 %v9040_v35, %v6924_v36 }
  0xa6   :  { %v8972_v43 = vld [vmem:[%s14045_s1 + $0x5c4] sm:$0xf]  ;;  %v6652_v45 = vld [vmem:[%s14045_s1 + $0x5d0] sm:$0xf0]  ;;  %v6527_v50 = vor.u32 %v8940_v41, %v6524_v42 }
  0xa7   :  { %3370 = vmatpush.bf16.msra.mxu0 %v5935_v10  ;;  %3383 = vmatpush.bf16.msra.mxu1 %v6063_v13  ;;  %v9004_v46 = vld [vmem:[%s14045_s1 + $0x6c4] sm:$0xf]  ;;  %v6780_v47 = vld [vmem:[%s14045_s1 + $0x6d0] sm:$0xf0]  ;;  %v6655_v51 = vor.u32 %v8972_v43, %v6652_v45 }
  0xa8   :  { %3396 = vmatpush.bf16.msra.mxu2 %v6191_v14  ;;  %3409 = vmatpush.bf16.msra.mxu3 %v6319_v18  ;;  %v9036_v48 = vld [vmem:[%s14045_s1 + $0x7c4] sm:$0xf]  ;;  %v6908_v49 = vld [vmem:[%s14045_s1 + $0x7d0] sm:$0xf0]  ;;  %v6783_v52 = vor.u32 %v9004_v46, %v6780_v47 }
  0xa9   :  { %v8936_v53 = vld [vmem:[%s14045_s1 + $0x4a4] sm:$0xf]  ;;  %v6508_v54 = vld [vmem:[%s14045_s1 + $0x4b0] sm:$0xf0]  ;;  %v6911_v56 = vor.u32 %v9036_v48, %v6908_v49 }
  0xaa   :  { %v8968_v55 = vld [vmem:[%s14045_s1 + $0x5a4] sm:$0xf]  ;;  %v6636_v57 = vld [vmem:[%s14045_s1 + $0x5b0] sm:$0xf0]  ;;  %v6511_v63 = vor.u32 %v8936_v53, %v6508_v54 }
  0xab   :  { %3371 = vmatpush.bf16.msra.mxu0 %v5919_v25  ;;  %3384 = vmatpush.bf16.msra.mxu1 %v6047_v32  ;;  %v9000_v58 = vld [vmem:[%s14045_s1 + $0x6a4] sm:$0xf]  ;;  %v6764_v59 = vld [vmem:[%s14045_s1 + $0x6b0] sm:$0xf0]  ;;  %v6639_v3 = vor.u32 %v8968_v55, %v6636_v57 }
  0xac   :  { %3397 = vmatpush.bf16.msra.mxu2 %v6175_v33  ;;  %3410 = vmatpush.bf16.msra.mxu3 %v6303_v37  ;;  %v9032_v61 = vld [vmem:[%s14045_s1 + $0x7a4] sm:$0xf]  ;;  %v6892_v62 = vld [vmem:[%s14045_s1 + $0x7b0] sm:$0xf0]  ;;  %v6767_v4 = vor.u32 %v9000_v58, %v6764_v59 }
  0xad   :  { %v8932_v5 = vld [vmem:[%s14045_s1 + $0x484] sm:$0xf]  ;;  %v6492_v6 = vld [vmem:[%s14045_s1 + $0x490] sm:$0xf0]  ;;  %v6895_v8 = vor.u32 %v9032_v61, %v6892_v62 }
  0xae   :  { %3372 = vmatmul.bf16.vlgmr.msra.gmra.mxu0 %v9934_v28  ;;  %3385 = vmatmul.bf16.vlgmr.msra.gmra.mxu1 %v9944_v34  ;;  %v8964_v7 = vld [vmem:[%s14045_s1 + $0x584] sm:$0xf]  ;;  %v6620_v9 = vld [vmem:[%s14045_s1 + $0x590] sm:$0xf0]  ;;  %v6495_v14 = vor.u32 %v8932_v5, %v6492_v6 }
  0xaf   :  { %3416 = vmatpush.bf16.msrb.mxu0 %v6543_v38  ;;  %3429 = vmatpush.bf16.msrb.mxu1 %v6671_v39  ;;  %v8996_v10 = vld [vmem:[%s14045_s1 + $0x684] sm:$0xf]  ;;  %v6748_v11 = vld [vmem:[%s14045_s1 + $0x690] sm:$0xf0]  ;;  %v6623_v15 = vor.u32 %v8964_v7, %v6620_v9 }
  0xb0   :  { %3442 = vmatpush.bf16.msrb.mxu2 %v6799_v40  ;;  %3455 = vmatpush.bf16.msrb.mxu3 %v6927_v44  ;;  %v9028_v12 = vld [vmem:[%s14045_s1 + $0x784] sm:$0xf]  ;;  %v6876_v13 = vld [vmem:[%s14045_s1 + $0x790] sm:$0xf0]  ;;  %v6751_v16 = vor.u32 %v8996_v10, %v6748_v11  ;;  %v550_v40 = vld [vmem:[%s14046_s2] sm:$0xf] }
  0xb1   :  { %3398 = vmatmul.bf16.vlgmr.msra.gmra.mxu2 %v9932_v27  ;;  %3411 = vmatmul.bf16.vlgmr.msra.gmra.mxu3 %v9936_v29  ;;  %v8928_v17 = vld [vmem:[%s14045_s1 + $0x464] sm:$0xf]  ;;  %v6476_v18 = vld [vmem:[%s14045_s1 + $0x470] sm:$0xf0]  ;;  %v6879_v20 = vor.u32 %v9028_v12, %v6876_v13  ;;  %v552_v49 = vperm.slane %v550_v40, 0 }
  0xb2   :  { %v8960_v19 = vld [vmem:[%s14045_s1 + $0x564] sm:$0xf]  ;;  %v6604_v21 = vld [vmem:[%s14045_s1 + $0x570] sm:$0xf0]  ;;  %v6479_v26 = vor.u32 %v8928_v17, %v6476_v18 }
  0xb3   :  { %3417 = vmatpush.bf16.msrb.mxu0 %v6527_v50  ;;  %3430 = vmatpush.bf16.msrb.mxu1 %v6655_v51  ;;  %v8992_v22 = vld [vmem:[%s14045_s1 + $0x664] sm:$0xf]  ;;  %v6732_v23 = vld [vmem:[%s14045_s1 + $0x670] sm:$0xf0]  ;;  %v6607_v31 = vor.u32 %v8960_v19, %v6604_v21 }
  0xb4   :  { %3443 = vmatpush.bf16.msrb.mxu2 %v6783_v52  ;;  %3456 = vmatpush.bf16.msrb.mxu3 %v6911_v56  ;;  %v9024_v24 = vld [vmem:[%s14045_s1 + $0x764] sm:$0xf]  ;;  %v6860_v25 = vld [vmem:[%s14045_s1 + $0x770] sm:$0xf0]  ;;  %v6735_v32 = vor.u32 %v8992_v22, %v6732_v23  ;;  %v3178_v6 = vpop.f32.mrf.mxu1 }
  0xb5   :  { %v8924_v30 = vld [vmem:[%s14045_s1 + $0x444] sm:$0xf]  ;;  %v6460_v33 = vld [vmem:[%s14045_s1 + $0x450] sm:$0xf0]  ;;  %v6863_v37 = vor.u32 %v9024_v24, %v6860_v25  ;;  %v3165_v59 = vpop.f32.mrf.mxu0 }
  0xb6   :  { %v8956_v35 = vld [vmem:[%s14045_s1 + $0x544] sm:$0xf]  ;;  %v6588_v36 = vld [vmem:[%s14045_s1 + $0x550] sm:$0xf0]  ;;  %v6463_v43 = vor.u32 %v8924_v30, %v6460_v33  ;;  %v3166_v5 = vadd.f32 %v3165_v59, %v552_v49 }
  0xb7   :  { %3418 = vmatpush.bf16.msrb.mxu0 %v6511_v63  ;;  %3431 = vmatpush.bf16.msrb.mxu1 %v6639_v3  ;;  %v8988_v38 = vld [vmem:[%s14045_s1 + $0x644] sm:$0xf]  ;;  %v6716_v39 = vld [vmem:[%s14045_s1 + $0x650] sm:$0xf0]  ;;  %v6591_v45 = vor.u32 %v8956_v35, %v6588_v36 }
  0xb8   :  { %3444 = vmatpush.bf16.msrb.mxu2 %v6767_v4  ;;  %3457 = vmatpush.bf16.msrb.mxu3 %v6895_v8  ;;  %v9020_v41 = vld [vmem:[%s14045_s1 + $0x744] sm:$0xf]  ;;  %v6844_v42 = vld [vmem:[%s14045_s1 + $0x750] sm:$0xf0]  ;;  %v6719_v46 = vor.u32 %v8988_v38, %v6716_v39 }
  0xb9   :  { %v8920_v44 = vld [vmem:[%s14045_s1 + $0x424] sm:$0xf]  ;;  %v6444_v47 = vld [vmem:[%s14045_s1 + $0x430] sm:$0xf0]  ;;  %v6847_v50 = vor.u32 %v9020_v41, %v6844_v42 }
  0xba   :  { %v8952_v48 = vld [vmem:[%s14045_s1 + $0x524] sm:$0xf]  ;;  %v6572_v51 = vld [vmem:[%s14045_s1 + $0x530] sm:$0xf0]  ;;  %v6447_v56 = vor.u32 %v8920_v44, %v6444_v47  ;;  %v3191_v23 = vpop.f32.mrf.mxu2 }
  0xbb   :  { %3419 = vmatpush.bf16.msrb.mxu0 %v6495_v14  ;;  %3432 = vmatpush.bf16.msrb.mxu1 %v6623_v15  ;;  %v8984_v52 = vld [vmem:[%s14045_s1 + $0x624] sm:$0xf]  ;;  %v6700_v53 = vld [vmem:[%s14045_s1 + $0x630] sm:$0xf0]  ;;  %v6575_v61 = vor.u32 %v8952_v48, %v6572_v51  ;;  %v3179_v14 = vadd.f32 %v3178_v6, %v3166_v5 }
  0xbc   :  { %3445 = vmatpush.bf16.msrb.mxu2 %v6751_v16  ;;  %3458 = vmatpush.bf16.msrb.mxu3 %v6879_v20  ;;  %v9016_v54 = vld [vmem:[%s14045_s1 + $0x724] sm:$0xf]  ;;  %v6828_v55 = vld [vmem:[%s14045_s1 + $0x730] sm:$0xf0]  ;;  %v6703_v62 = vor.u32 %v8984_v52, %v6700_v53  ;;  %v3204_v30 = vpop.f32.mrf.mxu3 }
  0xbd   :  { %v8916_v57 = vld [vmem:[%s14045_s1 + $0x404] sm:$0xf]  ;;  %v6428_v58 = vld [vmem:[%s14045_s1 + $0x410] sm:$0xf0]  ;;  %v6831_v7 = vor.u32 %v9016_v54, %v6828_v55  ;;  %v3167_v42 = vpop.f32.mrf.mxu0 }
  0xbe   :  { %v8948_v63 = vld [vmem:[%s14045_s1 + $0x504] sm:$0xf]  ;;  %v6556_v3 = vld [vmem:[%s14045_s1 + $0x510] sm:$0xf0]  ;;  %v6431_v15 = vor.u32 %v8916_v57, %v6428_v58 }
  0xbf   :  { %3420 = vmatpush.bf16.msrb.mxu0 %v6479_v26  ;;  %3433 = vmatpush.bf16.msrb.mxu1 %v6607_v31  ;;  %v8980_v4 = vld [vmem:[%s14045_s1 + $0x604] sm:$0xf]  ;;  %v6684_v8 = vld [vmem:[%s14045_s1 + $0x610] sm:$0xf0]  ;;  %v6559_v19 = vor.u32 %v8948_v63, %v6556_v3  ;;  %v3192_v26 = vadd.f32 %v3191_v23, %v3179_v14 }
  0xc0   :  { %3446 = vmatpush.bf16.msrb.mxu2 %v6735_v32  ;;  %3459 = vmatpush.bf16.msrb.mxu3 %v6863_v37  ;;  %v9012_v9 = vld [vmem:[%s14045_s1 + $0x704] sm:$0xf]  ;;  %v6812_v10 = vld [vmem:[%s14045_s1 + $0x710] sm:$0xf0]  ;;  %v6687_v20 = vor.u32 %v8980_v4, %v6684_v8 }
  0xc1   :  { %v9072_v11 = vld [vmem:[%s14045_s1 + $0x8e4] sm:$0xf]  ;;  %v7052_v12 = vld [vmem:[%s14045_s1 + $0x8f0] sm:$0xf0]  ;;  %v6815_v24 = vor.u32 %v9012_v9, %v6812_v10  ;;  %v3205_v41 = vadd.f32 %v3204_v30, %v3192_v26 }
  0xc2   :  { %v9104_v13 = vld [vmem:[%s14045_s1 + $0x9e4] sm:$0xf]  ;;  %v7180_v16 = vld [vmem:[%s14045_s1 + $0x9f0] sm:$0xf0]  ;;  %v7055_v25 = vor.u32 %v9072_v11, %v7052_v12  ;;  %v3193_v58 = vpop.f32.mrf.mxu2 }
  0xc3   :  { %3421 = vmatpush.bf16.msrb.mxu0 %v6463_v43  ;;  %3434 = vmatpush.bf16.msrb.mxu1 %v6591_v45  ;;  %v9136_v17 = vld [vmem:[%s14045_s1 + $0xae4] sm:$0xf]  ;;  %v7308_v18 = vld [vmem:[%s14045_s1 + $0xaf0] sm:$0xf0]  ;;  %v7183_v31 = vor.u32 %v9104_v13, %v7180_v16  ;;  %v3180_v45 = vpop.f32.mrf.mxu1 }
  0xc4   :  { %3447 = vmatpush.bf16.msrb.mxu2 %v6719_v46  ;;  %3460 = vmatpush.bf16.msrb.mxu3 %v6847_v50  ;;  %v9168_v21 = vld [vmem:[%s14045_s1 + $0xbe4] sm:$0xf]  ;;  %v7436_v22 = vld [vmem:[%s14045_s1 + $0xbf0] sm:$0xf0]  ;;  %v7311_v32 = vor.u32 %v9136_v17, %v7308_v18 }
  0xc5   :  { %v9068_v33 = vld [vmem:[%s14045_s1 + $0x8c4] sm:$0xf]  ;;  %v7036_v35 = vld [vmem:[%s14045_s1 + $0x8d0] sm:$0xf0]  ;;  %v7439_v37 = vor.u32 %v9168_v21, %v7436_v22 }
  0xc6   :  { %v9100_v36 = vld [vmem:[%s14045_s1 + $0x9c4] sm:$0xf]  ;;  %v7164_v38 = vld [vmem:[%s14045_s1 + $0x9d0] sm:$0xf0]  ;;  %v7039_v46 = vor.u32 %v9068_v33, %v7036_v35  ;;  %v3217_v13 = vpop.f32.mrf.mxu0 }
  0xc7   :  { %3422 = vmatpush.bf16.msrb.mxu0 %v6447_v56  ;;  %3435 = vmatpush.bf16.msrb.mxu1 %v6575_v61  ;;  %v9132_v39 = vld [vmem:[%s14045_s1 + $0xac4] sm:$0xf]  ;;  %v7292_v40 = vld [vmem:[%s14045_s1 + $0xad0] sm:$0xf0]  ;;  %v7167_v47 = vor.u32 %v9100_v36, %v7164_v38  ;;  %v3206_v61 = vpop.f32.mrf.mxu3 }
  0xc8   :  { %3448 = vmatpush.bf16.msrb.mxu2 %v6703_v62  ;;  %3461 = vmatpush.bf16.msrb.mxu3 %v6831_v7  ;;  %v9164_v43 = vld [vmem:[%s14045_s1 + $0xbc4] sm:$0xf]  ;;  %v7420_v44 = vld [vmem:[%s14045_s1 + $0xbd0] sm:$0xf0]  ;;  %v7295_v48 = vor.u32 %v9132_v39, %v7292_v40 }
  0xc9   :  { %v9064_v49 = vld [vmem:[%s14045_s1 + $0x8a4] sm:$0xf]  ;;  %v7020_v50 = vld [vmem:[%s14045_s1 + $0x8b0] sm:$0xf0]  ;;  %v7423_v52 = vor.u32 %v9164_v43, %v7420_v44 }
  0xca   :  { %v9096_v51 = vld [vmem:[%s14045_s1 + $0x9a4] sm:$0xf]  ;;  %v7148_v53 = vld [vmem:[%s14045_s1 + $0x9b0] sm:$0xf0]  ;;  %v7023_v59 = vor.u32 %v9064_v49, %v7020_v50 }
  0xcb   :  { %3423 = vmatpush.bf16.msrb.mxu0 %v6431_v15  ;;  %3436 = vmatpush.bf16.msrb.mxu1 %v6559_v19  ;;  %v9128_v54 = vld [vmem:[%s14045_s1 + $0xaa4] sm:$0xf]  ;;  %v7276_v55 = vld [vmem:[%s14045_s1 + $0xab0] sm:$0xf0]  ;;  %v7151_v62 = vor.u32 %v9096_v51, %v7148_v53  ;;  %v3218_v19 = vadd.f32 %v3217_v13, %v3205_v41  ;;  %v3243_v38 = vpop.f32.mrf.mxu2 }
  0xcc   :  { %3449 = vmatpush.bf16.msrb.mxu2 %v6687_v20  ;;  %3462 = vmatpush.bf16.msrb.mxu3 %v6815_v24  ;;  %v9160_v56 = vld [vmem:[%s14045_s1 + $0xba4] sm:$0xf]  ;;  %v7404_v57 = vld [vmem:[%s14045_s1 + $0xbb0] sm:$0xf0]  ;;  %v7279_v63 = vor.u32 %v9128_v54, %v7276_v55  ;;  %v3230_v20 = vpop.f32.mrf.mxu1 }
  0xcd   :  { %v9060_v3 = vld [vmem:[%s14045_s1 + $0x884] sm:$0xf]  ;;  %v7004_v4 = vld [vmem:[%s14045_s1 + $0x890] sm:$0xf0]  ;;  %v7407_v6 = vor.u32 %v9160_v56, %v7404_v57  ;;  %v3231_v30 = vadd.f32 %v3230_v20, %v3218_v19 }
  0xce   :  { %3424 = vmatmul.bf16.vlgmr.msrb.gmra.mxu0 %v10012_v0  ;;  %3437 = vmatmul.bf16.vlgmr.msrb.gmra.mxu1 %v10016_v2  ;;  %v9092_v5 = vld [vmem:[%s14045_s1 + $0x984] sm:$0xf]  ;;  %v7132_v7 = vld [vmem:[%s14045_s1 + $0x990] sm:$0xf0]  ;;  %v7007_v12 = vor.u32 %v9060_v3, %v7004_v4  ;;  %v3219_v49 = vpop.f32.mrf.mxu0 }
  0xcf   :  { %3468 = vmatpush.bf16.msra.mxu0 %v7055_v25  ;;  %3481 = vmatpush.bf16.msra.mxu1 %v7183_v31  ;;  %v9124_v8 = vld [vmem:[%s14045_s1 + $0xa84] sm:$0xf]  ;;  %v7260_v9 = vld [vmem:[%s14045_s1 + $0xa90] sm:$0xf0]  ;;  %v7135_v14 = vor.u32 %v9092_v5, %v7132_v7  ;;  %v3244_v43 = vadd.f32 %v3243_v38, %v3231_v30  ;;  %v3256_v44 = vpop.f32.mrf.mxu3 }
  0xd0   :  { %3494 = vmatpush.bf16.msra.mxu2 %v7311_v32  ;;  %3507 = vmatpush.bf16.msra.mxu3 %v7439_v37  ;;  %v9156_v10 = vld [vmem:[%s14045_s1 + $0xb84] sm:$0xf]  ;;  %v7388_v11 = vld [vmem:[%s14045_s1 + $0xb90] sm:$0xf0]  ;;  %v7263_v15 = vor.u32 %v9124_v8, %v7260_v9 }
  0xd1   :  { %3450 = vmatmul.bf16.vlgmr.msrb.gmra.mxu2 %v10007_v60  ;;  %3463 = vmatmul.bf16.vlgmr.msrb.gmra.mxu3 %v10014_v1  ;;  %v9056_v16 = vld [vmem:[%s14045_s1 + $0x864] sm:$0xf]  ;;  %v6988_v17 = vld [vmem:[%s14045_s1 + $0x870] sm:$0xf0]  ;;  %v7391_v21 = vor.u32 %v9156_v10, %v7388_v11 }
  0xd2   :  { %v9088_v18 = vld [vmem:[%s14045_s1 + $0x964] sm:$0xf]  ;;  %v7116_v22 = vld [vmem:[%s14045_s1 + $0x970] sm:$0xf0]  ;;  %v6991_v31 = vor.u32 %v9056_v16, %v6988_v17 }
  0xd3   :  { %3469 = vmatpush.bf16.msra.mxu0 %v7039_v46  ;;  %3482 = vmatpush.bf16.msra.mxu1 %v7167_v47  ;;  %v9120_v23 = vld [vmem:[%s14045_s1 + $0xa64] sm:$0xf]  ;;  %v7244_v24 = vld [vmem:[%s14045_s1 + $0xa70] sm:$0xf0]  ;;  %v7119_v32 = vor.u32 %v9088_v18, %v7116_v22  ;;  %v3245_v10 = vpop.f32.mrf.mxu2 }
  0xd4   :  { %3495 = vmatpush.bf16.msra.mxu2 %v7295_v48  ;;  %3508 = vmatpush.bf16.msra.mxu3 %v7423_v52  ;;  %v9152_v25 = vld [vmem:[%s14045_s1 + $0xb64] sm:$0xf]  ;;  %v7372_v26 = vld [vmem:[%s14045_s1 + $0xb70] sm:$0xf0]  ;;  %v7247_v33 = vor.u32 %v9120_v23, %v7244_v24  ;;  %v10951_v48 = vadd.f32 %v3256_v44, %v3244_v43  ;;  %v3232_v55 = vpop.f32.mrf.mxu1 }
  0xd5   :  { %v9052_v35 = vld [vmem:[%s14045_s1 + $0x844] sm:$0xf]  ;;  %v6972_v36 = vld [vmem:[%s14045_s1 + $0x850] sm:$0xf0]  ;;  %v7375_v39 = vor.u32 %v9152_v25, %v7372_v26 }
  0xd6   :  { %v9084_v37 = vld [vmem:[%s14045_s1 + $0x944] sm:$0xf]  ;;  %v7100_v40 = vld [vmem:[%s14045_s1 + $0x950] sm:$0xf0]  ;;  %v6975_v47 = vor.u32 %v9052_v35, %v6972_v36 }
  0xd7   :  { %3470 = vmatpush.bf16.msra.mxu0 %v7023_v59  ;;  %3483 = vmatpush.bf16.msra.mxu1 %v7151_v62  ;;  %v9116_v41 = vld [vmem:[%s14045_s1 + $0xa44] sm:$0xf]  ;;  %v7228_v42 = vld [vmem:[%s14045_s1 + $0xa50] sm:$0xf0]  ;;  %v7103_v50 = vor.u32 %v9084_v37, %v7100_v40 }
  0xd8   :  { %3496 = vmatpush.bf16.msra.mxu2 %v7279_v63  ;;  %3509 = vmatpush.bf16.msra.mxu3 %v7407_v6  ;;  %v9148_v45 = vld [vmem:[%s14045_s1 + $0xb44] sm:$0xf]  ;;  %v7356_v46 = vld [vmem:[%s14045_s1 + $0xb50] sm:$0xf0]  ;;  %v7231_v51 = vor.u32 %v9116_v41, %v7228_v42 }
  0xd9   :  { %v9048_v52 = vld [vmem:[%s14045_s1 + $0x824] sm:$0xf]  ;;  %v6956_v53 = vld [vmem:[%s14045_s1 + $0x830] sm:$0xf0]  ;;  %v7359_v56 = vor.u32 %v9148_v45, %v7356_v46 }
  0xda   :  { %v9080_v54 = vld [vmem:[%s14045_s1 + $0x924] sm:$0xf]  ;;  %v7084_v57 = vld [vmem:[%s14045_s1 + $0x930] sm:$0xf0]  ;;  %v6959_v63 = vor.u32 %v9048_v52, %v6956_v53 }
  0xdb   :  { %3471 = vmatpush.bf16.msra.mxu0 %v7007_v12  ;;  %3484 = vmatpush.bf16.msra.mxu1 %v7135_v14  ;;  %v9112_v58 = vld [vmem:[%s14045_s1 + $0xa24] sm:$0xf]  ;;  %v7212_v59 = vld [vmem:[%s14045_s1 + $0xa30] sm:$0xf0]  ;;  %v7087_v5 = vor.u32 %v9080_v54, %v7084_v57  ;;  %v9508_v57 = vld [vmem:[#allocation1 + $0x9] sm:$0xff] }
  0xdc   :  { %3497 = vmatpush.bf16.msra.mxu2 %v7263_v15  ;;  %3510 = vmatpush.bf16.msra.mxu3 %v7391_v21  ;;  %v9144_v61 = vld [vmem:[%s14045_s1 + $0xb24] sm:$0xf]  ;;  %v7340_v62 = vld [vmem:[%s14045_s1 + $0xb30] sm:$0xf0]  ;;  %v7215_v6 = vor.u32 %v9112_v58, %v7212_v59  ;;  %v3258_v15 = vpop.f32.mrf.mxu3 }
  0xdd   :  { %v9044_v3 = vld [vmem:[%s14045_s1 + $0x804] sm:$0xf]  ;;  %v6940_v4 = vld [vmem:[%s14045_s1 + $0x810] sm:$0xf0]  ;;  %v7343_v11 = vor.u32 %v9144_v61, %v7340_v62  ;;  %v9509_v61 = vld [vmem:[#allocation1 + $0x1b] sm:$0xff] }
  0xde   :  { %v9076_v7 = vld [vmem:[%s14045_s1 + $0x904] sm:$0xf]  ;;  %v7068_v8 = vld [vmem:[%s14045_s1 + $0x910] sm:$0xf0]  ;;  %v6943_v19 = vor.u32 %v9044_v3, %v6940_v4 }
  0xdf   :  { %3472 = vmatpush.bf16.msra.mxu0 %v6991_v31  ;;  %3485 = vmatpush.bf16.msra.mxu1 %v7119_v32  ;;  %v9108_v9 = vld [vmem:[%s14045_s1 + $0xa04] sm:$0xf]  ;;  %v7196_v12 = vld [vmem:[%s14045_s1 + $0xa10] sm:$0xf0]  ;;  %v7071_v23 = vor.u32 %v9076_v7, %v7068_v8 }
  0xe0   :  { %3498 = vmatpush.bf16.msra.mxu2 %v7247_v33  ;;  %3511 = vmatpush.bf16.msra.mxu3 %v7375_v39  ;;  %v9140_v13 = vld [vmem:[%s14045_s1 + $0xb04] sm:$0xf]  ;;  %v7324_v14 = vld [vmem:[%s14045_s1 + $0xb10] sm:$0xf0]  ;;  %v7199_v24 = vor.u32 %v9108_v9, %v7196_v12 }
  0xe1   :  { %v9200_v16 = vld [vmem:[%s14045_s1 + $0xce4] sm:$0xf]  ;;  %v7564_v17 = vld [vmem:[%s14045_s1 + $0xcf0] sm:$0xf0]  ;;  %v7327_v30 = vor.u32 %v9140_v13, %v7324_v14 }
  0xe2   :  { %v9232_v18 = vld [vmem:[%s14045_s1 + $0xde4] sm:$0xf]  ;;  %v7692_v20 = vld [vmem:[%s14045_s1 + $0xdf0] sm:$0xf0]  ;;  %v7567_v31 = vor.u32 %v9200_v16, %v7564_v17 }
  0xe3   :  { %3473 = vmatpush.bf16.msra.mxu0 %v6975_v47  ;;  %3486 = vmatpush.bf16.msra.mxu1 %v7103_v50  ;;  %v9264_v21 = vld [vmem:[%s14045_s1 + $0xee4] sm:$0xf]  ;;  %v7820_v22 = vld [vmem:[%s14045_s1 + $0xef0] sm:$0xf0]  ;;  %v7695_v32 = vor.u32 %v9232_v18, %v7692_v20 }
  0xe4   :  { %3499 = vmatpush.bf16.msra.mxu2 %v7231_v51  ;;  %3512 = vmatpush.bf16.msra.mxu3 %v7359_v56  ;;  %v9296_v25 = vld [vmem:[%s14045_s1 + $0xfe4] sm:$0xf]  ;;  %v7948_v26 = vld [vmem:[%s14045_s1 + $0xff0] sm:$0xf0]  ;;  %v7823_v33 = vor.u32 %v9264_v21, %v7820_v22 }
  0xe5   :  { %v9196_v35 = vld [vmem:[%s14045_s1 + $0xcc4] sm:$0xf]  ;;  %v7548_v36 = vld [vmem:[%s14045_s1 + $0xcd0] sm:$0xf0]  ;;  %v7951_v38 = vor.u32 %v9296_v25, %v7948_v26 }
  0xe6   :  { %v9228_v37 = vld [vmem:[%s14045_s1 + $0xdc4] sm:$0xf]  ;;  %v7676_v39 = vld [vmem:[%s14045_s1 + $0xdd0] sm:$0xf0]  ;;  %v7551_v44 = vor.u32 %v9196_v35, %v7548_v36 }
  0xe7   :  { %3474 = vmatpush.bf16.msra.mxu0 %v6959_v63  ;;  %3487 = vmatpush.bf16.msra.mxu1 %v7087_v5  ;;  %v9260_v40 = vld [vmem:[%s14045_s1 + $0xec4] sm:$0xf]  ;;  %v7804_v41 = vld [vmem:[%s14045_s1 + $0xed0] sm:$0xf0]  ;;  %v7679_v45 = vor.u32 %v9228_v37, %v7676_v39 }
  0xe8   :  { %3500 = vmatpush.bf16.msra.mxu2 %v7215_v6  ;;  %3513 = vmatpush.bf16.msra.mxu3 %v7343_v11  ;;  %v9292_v42 = vld [vmem:[%s14045_s1 + $0xfc4] sm:$0xf]  ;;  %v7932_v43 = vld [vmem:[%s14045_s1 + $0xfd0] sm:$0xf0]  ;;  %v7807_v46 = vor.u32 %v9260_v40, %v7804_v41 }
  0xe9   :  { %v9192_v47 = vld [vmem:[%s14045_s1 + $0xca4] sm:$0xf]  ;;  %v7532_v49 = vld [vmem:[%s14045_s1 + $0xcb0] sm:$0xf0]  ;;  %v7935_v52 = vor.u32 %v9292_v42, %v7932_v43  ;;  %v3282_v16 = vpop.f32.mrf.mxu1 }
  0xea   :  { %v9224_v50 = vld [vmem:[%s14045_s1 + $0xda4] sm:$0xf]  ;;  %v7660_v53 = vld [vmem:[%s14045_s1 + $0xdb0] sm:$0xf0]  ;;  %v7535_v62 = vor.u32 %v9192_v47, %v7532_v49  ;;  %v3269_v11 = vpop.f32.mrf.mxu0 }
  0xeb   :  { %3475 = vmatpush.bf16.msra.mxu0 %v6943_v19  ;;  %3488 = vmatpush.bf16.msra.mxu1 %v7071_v23  ;;  %v9506_v51 = vld [vmem:[#allocation1] sm:$0xff]  ;;  %v7788_v55 = vld [vmem:[%s14045_s1 + $0xeb0] sm:$0xf0]  ;;  %v7663_v63 = vor.u32 %v9224_v50, %v7660_v53  ;;  %v3270_v14 = vadd.f32 %v3269_v11, %v10951_v48 }
  0xec   :  { %3501 = vmatpush.bf16.msra.mxu2 %v7199_v24  ;;  %3514 = vmatpush.bf16.msra.mxu3 %v7327_v30  ;;  %v9256_v54 = vld [vmem:[%s14045_s1 + $0xea4] sm:$0xf]  ;;  %v9507_v56 = vld [vmem:[#allocation1 + $0x12] sm:$0xff] }
  0xed   :  { %v9288_v58 = vld [vmem:[%s14045_s1 + $0xfa4] sm:$0xf]  ;;  %v7916_v59 = vld [vmem:[%s14045_s1 + $0xfb0] sm:$0xf0]  ;;  %v7791_v3 = vor.u32 %v9256_v54, %v7788_v55  ;;  %v3283_v22 = vadd.f32 %v3282_v16, %v3270_v14  ;;  %v6034_v16 = vld [vmem:[%s14045_s1 + $0xe8] sm:$0xf] }
  0xee   :  { %3476 = vmatmul.bf16.vlgmr.msra.gmra.mxu0 %v9506_v51  ;;  %3489 = vmatmul.bf16.vlgmr.msra.gmra.mxu1 %v9508_v57  ;;  %v9188_v4 = vld [vmem:[%s14045_s1 + $0xc84] sm:$0xf]  ;;  %v7516_v5 = vld [vmem:[%s14045_s1 + $0xc90] sm:$0xf0]  ;;  %v7919_v7 = vor.u32 %v9288_v58, %v7916_v59 }
  0xef   :  { %3520 = vmatpush.bf16.msrb.mxu0 %v7567_v31  ;;  %3533 = vmatpush.bf16.msrb.mxu1 %v7695_v32  ;;  %v9220_v6 = vld [vmem:[%s14045_s1 + $0xd84] sm:$0xf]  ;;  %v7644_v8 = vld [vmem:[%s14045_s1 + $0xd90] sm:$0xf0]  ;;  %v7519_v15 = vor.u32 %v9188_v4, %v7516_v5  ;;  %v3295_v39 = vpop.f32.mrf.mxu2 }
  0xf0   :  { %3546 = vmatpush.bf16.msrb.mxu2 %v7823_v33  ;;  %3559 = vmatpush.bf16.msrb.mxu3 %v7951_v38  ;;  %v9252_v9 = vld [vmem:[%s14045_s1 + $0xe84] sm:$0xf]  ;;  %v7772_v10 = vld [vmem:[%s14045_s1 + $0xe90] sm:$0xf0]  ;;  %v7647_v17 = vor.u32 %v9220_v6, %v7644_v8  ;;  %v3296_v43 = vadd.f32 %v3295_v39, %v3283_v22  ;;  %v8883_v22 = vld [vmem:[%s14045_s1 + $0x2f4] sm:$0xf0] }
  0xf1   :  { %3502 = vmatmul.bf16.vlgmr.msra.gmra.mxu2 %v9507_v56  ;;  %3515 = vmatmul.bf16.vlgmr.msra.gmra.mxu3 %v9509_v61  ;;  %v9284_v12 = vld [vmem:[%s14045_s1 + $0xf84] sm:$0xf]  ;;  %v7900_v13 = vld [vmem:[%s14045_s1 + $0xf90] sm:$0xf0]  ;;  %v7775_v18 = vor.u32 %v9252_v9, %v7772_v10  ;;  %v3284_v50 = vpop.f32.mrf.mxu1  ;;  %v8847_v39 = vld [vmem:[%s14045_s1 + $0x1d4] sm:$0xf0] }
  0xf2   :  { %v9184_v19 = vld [vmem:[%s14045_s1 + $0xc64] sm:$0xf]  ;;  %v7500_v20 = vld [vmem:[%s14045_s1 + $0xc70] sm:$0xf0]  ;;  %v7903_v48 = vor.u32 %v9284_v12, %v7900_v13  ;;  %v3271_v47 = vpop.f32.mrf.mxu0  ;;  %v6130_v50 = vld [vmem:[%s14045_s1 + $0x1a8] sm:$0xf] }
  0xf3   :  { %3521 = vmatpush.bf16.msrb.mxu0 %v7551_v44  ;;  %3534 = vmatpush.bf16.msrb.mxu1 %v7679_v45  ;;  %v9216_v21 = vld [vmem:[%s14045_s1 + $0xd64] sm:$0xf]  ;;  %v7628_v23 = vld [vmem:[%s14045_s1 + $0xd70] sm:$0xf0]  ;;  %v7503_v31 = vor.u32 %v9184_v19, %v7500_v20  ;;  %v3308_v44 = vpop.f32.mrf.mxu3  ;;  %v6002_v47 = vld [vmem:[%s14045_s1 + $0xa8] sm:$0xf] }
  0xf4   :  { %3547 = vmatpush.bf16.msrb.mxu2 %v7807_v46  ;;  %3560 = vmatpush.bf16.msrb.mxu3 %v7935_v52  ;;  %v9248_v24 = vld [vmem:[%s14045_s1 + $0xe64] sm:$0xf]  ;;  %v7756_v25 = vld [vmem:[%s14045_s1 + $0xe70] sm:$0xf0]  ;;  %v7631_v32 = vor.u32 %v9216_v21, %v7628_v23  ;;  %v11146_v51 = vadd.f32 %v3308_v44, %v3296_v43  ;;  %v8851_v21 = vld [vmem:[%s14045_s1 + $0x1f4] sm:$0xf0] }
  0xf5   :  { %v9280_v26 = vld [vmem:[%s14045_s1 + $0xf64] sm:$0xf]  ;;  %v7884_v30 = vld [vmem:[%s14045_s1 + $0xf70] sm:$0xf0]  ;;  %v7759_v33 = vor.u32 %v9248_v24, %v7756_v25  ;;  %v6418_v25 = vld [vmem:[%s14045_s1 + $0x3e8] sm:$0xf] }
  0xf6   :  { %v9180_v35 = vld [vmem:[%s14045_s1 + $0xc44] sm:$0xf]  ;;  %v7484_v36 = vld [vmem:[%s14045_s1 + $0xc50] sm:$0xf0]  ;;  %v7887_v38 = vor.u32 %v9280_v26, %v7884_v30  ;;  %v8915_v26 = vld [vmem:[%s14045_s1 + $0x3f4] sm:$0xf0] }
  0xf7   :  { %3522 = vmatpush.bf16.msrb.mxu0 %v7535_v62  ;;  %3535 = vmatpush.bf16.msrb.mxu1 %v7663_v63  ;;  %v9212_v37 = vld [vmem:[%s14045_s1 + $0xd44] sm:$0xf]  ;;  %v7612_v40 = vld [vmem:[%s14045_s1 + $0xd50] sm:$0xf0]  ;;  %v7487_v49 = vor.u32 %v9180_v35, %v7484_v36  ;;  %v6018_v35 = vld [vmem:[%s14045_s1 + $0xc8] sm:$0xf] }
  0xf8   :  { %3548 = vmatpush.bf16.msrb.mxu2 %v7791_v3  ;;  %3561 = vmatpush.bf16.msrb.mxu3 %v7919_v7  ;;  %v9244_v41 = vld [vmem:[%s14045_s1 + $0xe44] sm:$0xf]  ;;  %v7740_v42 = vld [vmem:[%s14045_s1 + $0xe50] sm:$0xf0]  ;;  %v7615_v52 = vor.u32 %v9212_v37, %v7612_v40  ;;  %v8815_v36 = vld [vmem:[%s14045_s1 + $0xd4] sm:$0xf0] }
  0xf9   :  { %v9276_v45 = vld [vmem:[%s14045_s1 + $0xf44] sm:$0xf]  ;;  %v7868_v46 = vld [vmem:[%s14045_s1 + $0xf50] sm:$0xf0]  ;;  %v7743_v53 = vor.u32 %v9244_v41, %v7740_v42  ;;  %v6146_v37 = vld [vmem:[%s14045_s1 + $0x1c8] sm:$0xf]  ;;  %v6019_v44 = vor.u32 %v8815_v36, %v6018_v35 }
  0xfa   :  { %v9176_v54 = vld [vmem:[%s14045_s1 + $0xc24] sm:$0xf]  ;;  %v7468_v55 = vld [vmem:[%s14045_s1 + $0xc30] sm:$0xf0]  ;;  %v7871_v57 = vor.u32 %v9276_v45, %v7868_v46  ;;  %v6274_v40 = vld [vmem:[%s14045_s1 + $0x2c8] sm:$0xf]  ;;  %v6147_v45 = vor.u32 %v8847_v39, %v6146_v37 }
  0xfb   :  { %3523 = vmatpush.bf16.msrb.mxu0 %v7519_v15  ;;  %3536 = vmatpush.bf16.msrb.mxu1 %v7647_v17  ;;  %v9208_v56 = vld [vmem:[%s14045_s1 + $0xd24] sm:$0xf]  ;;  %v7596_v58 = vld [vmem:[%s14045_s1 + $0xd30] sm:$0xf0]  ;;  %v7471_v3 = vor.u32 %v9176_v54, %v7468_v55  ;;  %v3297_v15 = vpop.f32.mrf.mxu2  ;;  %v8819_v17 = vld [vmem:[%s14045_s1 + $0xf4] sm:$0xf0]  ;;  %v3310_v19 = vpop.f32.mrf.mxu3 }
  0xfc   :  { %3549 = vmatpush.bf16.msrb.mxu2 %v7775_v18  ;;  %3562 = vmatpush.bf16.msrb.mxu3 %v7903_v48  ;;  %v9240_v59 = vld [vmem:[%s14045_s1 + $0xe24] sm:$0xf]  ;;  %v7724_v61 = vld [vmem:[%s14045_s1 + $0xe30] sm:$0xf0]  ;;  %v7599_v6 = vor.u32 %v9208_v56, %v7596_v58  ;;  %v6162_v18 = vld [vmem:[%s14045_s1 + $0x1e8] sm:$0xf] }
  0xfd   :  { %v9272_v62 = vld [vmem:[%s14045_s1 + $0xf24] sm:$0xf]  ;;  %v7852_v63 = vld [vmem:[%s14045_s1 + $0xf30] sm:$0xf0]  ;;  %v7727_v7 = vor.u32 %v9240_v59, %v7724_v61  ;;  %v6290_v48 = vld [vmem:[%s14045_s1 + $0x2e8] sm:$0xf] }
  0xfe   :  { %v9172_v4 = vld [vmem:[%s14045_s1 + $0xc04] sm:$0xf]  ;;  %v7452_v5 = vld [vmem:[%s14045_s1 + $0xc10] sm:$0xf0]  ;;  %v7855_v11 = vor.u32 %v9272_v62, %v7852_v63  ;;  %v8879_v41 = vld [vmem:[%s14045_s1 + $0x2d4] sm:$0xf0] }
  0xff   :  { %3524 = vmatpush.bf16.msrb.mxu0 %v7503_v31  ;;  %3537 = vmatpush.bf16.msrb.mxu1 %v7631_v32  ;;  %v9204_v8 = vld [vmem:[%s14045_s1 + $0xd04] sm:$0xf]  ;;  %v7580_v9 = vld [vmem:[%s14045_s1 + $0xd10] sm:$0xf0]  ;;  %v7455_v20 = vor.u32 %v9172_v4, %v7452_v5  ;;  %v6035_v31 = vor.u32 %v8819_v17, %v6034_v16  ;;  %v6163_v32 = vor.u32 %v8851_v21, %v6162_v18  ;;  %v6402_v42 = vld [vmem:[%s14045_s1 + $0x3c8] sm:$0xf] }
 0x100   :  { %3550 = vmatpush.bf16.msrb.mxu2 %v7759_v33  ;;  %3563 = vmatpush.bf16.msrb.mxu3 %v7887_v38  ;;  %v9236_v10 = vld [vmem:[%s14045_s1 + $0xe04] sm:$0xf]  ;;  %v7708_v12 = vld [vmem:[%s14045_s1 + $0xe10] sm:$0xf0]  ;;  %v7583_v23 = vor.u32 %v9204_v8, %v7580_v9  ;;  %v6291_v33 = vor.u32 %v8883_v22, %v6290_v48  ;;  %v6419_v38 = vor.u32 %v8915_v26, %v6418_v25  ;;  %v8911_v43 = vld [vmem:[%s14045_s1 + $0x3d4] sm:$0xf0] }
 0x101   :  { %v9268_v13 = vld [vmem:[%s14045_s1 + $0xf04] sm:$0xf]  ;;  %v7836_v14 = vld [vmem:[%s14045_s1 + $0xf10] sm:$0xf0]  ;;  %v7711_v24 = vor.u32 %v9236_v10, %v7708_v12  ;;  %v6275_v46 = vor.u32 %v8879_v41, %v6274_v40  ;;  %v8843_v54 = vld [vmem:[%s14045_s1 + $0x1b4] sm:$0xf0] }
 0x102   :  { %v7839_v30 = vor.u32 %v9268_v13, %v7836_v14  ;;  %v6258_v55 = vld [vmem:[%s14045_s1 + $0x2a8] sm:$0xf]  ;;  %v8875_v56 = vld [vmem:[%s14045_s1 + $0x2b4] sm:$0xf0]  ;;  %v9512_v58 = vld [vmem:[#allocation1 + $0x2d] sm:$0xff] }
 0x103   :  { %3525 = vmatpush.bf16.msrb.mxu0 %v7487_v49  ;;  %3538 = vmatpush.bf16.msrb.mxu1 %v7615_v52  ;;  %v8811_v49 = vld [vmem:[%s14045_s1 + $0xb4] sm:$0xf0]  ;;  %v9510_v52 = vld [vmem:[#allocation1 + $0x24] sm:$0xff]  ;;  %v6259_v4 = vor.u32 %v8875_v56, %v6258_v55 }
 0x104   :  { %3551 = vmatpush.bf16.msrb.mxu2 %v7743_v53  ;;  %3564 = vmatpush.bf16.msrb.mxu3 %v7871_v57  ;;  %v6403_v53 = vor.u32 %v8911_v43, %v6402_v42  ;;  %v9511_v57 = vld [vmem:[#allocation1 + $0x36] sm:$0xff]  ;;  %v6386_v59 = vld [vmem:[%s14045_s1 + $0x3a8] sm:$0xf]  ;;  %v9513_v62 = vld [vmem:[#allocation1 + $0x3f] sm:$0xff]  ;;  %v6003_v63 = vor.u32 %v8811_v49, %v6002_v47 }
 0x105   :  { %v8907_v61 = vld [vmem:[%s14045_s1 + $0x3b4] sm:$0xf0]  ;;  %v5986_v5 = vld [vmem:[%s14045_s1 + $0x88] sm:$0xf] }
 0x106   :  { %v6387_v8 = vor.u32 %v8907_v61, %v6386_v59  ;;  %v8839_v9 = vld [vmem:[%s14045_s1 + $0x194] sm:$0xf0]  ;;  %v6242_v10 = vld [vmem:[%s14045_s1 + $0x288] sm:$0xf] }
 0x107   :  { %3526 = vmatpush.bf16.msrb.mxu0 %v7471_v3  ;;  %3539 = vmatpush.bf16.msrb.mxu1 %v7599_v6  ;;  %v6131_v3 = vor.u32 %v8843_v54, %v6130_v50  ;;  %v8807_v6 = vld [vmem:[%s14045_s1 + $0x94] sm:$0xf0]  ;;  %v6370_v13 = vld [vmem:[%s14045_s1 + $0x388] sm:$0xf] }
 0x108   :  { %3552 = vmatpush.bf16.msrb.mxu2 %v7727_v7  ;;  %3565 = vmatpush.bf16.msrb.mxu3 %v7855_v11  ;;  %v6114_v7 = vld [vmem:[%s14045_s1 + $0x188] sm:$0xf]  ;;  %v8871_v11 = vld [vmem:[%s14045_s1 + $0x294] sm:$0xf0]  ;;  %v5987_v16 = vor.u32 %v8807_v6, %v5986_v5 }
 0x109   :  { %v8903_v14 = vld [vmem:[%s14045_s1 + $0x394] sm:$0xf0]  ;;  %v6115_v18 = vor.u32 %v8839_v9, %v6114_v7  ;;  %v6243_v19 = vor.u32 %v8871_v11, %v6242_v10  ;;  %v6098_v48 = vld [vmem:[%s14045_s1 + $0x168] sm:$0xf] }
 0x10a   :  { %v8803_v21 = vld [vmem:[%s14045_s1 + $0x74] sm:$0xf0]  ;;  %v6354_v26 = vld [vmem:[%s14045_s1 + $0x368] sm:$0xf] }
 0x10b   :  { %3527 = vmatpush.bf16.msrb.mxu0 %v7455_v20  ;;  %3540 = vmatpush.bf16.msrb.mxu1 %v7583_v23  ;;  %v3321_v12 = vpop.f32.mrf.mxu0  ;;  %v3334_v17 = vpop.f32.mrf.mxu1  ;;  %v5970_v20 = vld [vmem:[%s14045_s1 + $0x68] sm:$0xf]  ;;  %v8835_v23 = vld [vmem:[%s14045_s1 + $0x174] sm:$0xf0] }
 0x10c   :  { %3553 = vmatpush.bf16.msrb.mxu2 %v7711_v24  ;;  %3566 = vmatpush.bf16.msrb.mxu3 %v7839_v30  ;;  %v3322_v15 = vadd.f32 %v3321_v12, %v11146_v51  ;;  %v6371_v51 = vor.u32 %v8903_v14, %v6370_v13  ;;  %v6226_v24 = vld [vmem:[%s14045_s1 + $0x268] sm:$0xf]  ;;  %v8867_v25 = vld [vmem:[%s14045_s1 + $0x274] sm:$0xf0] }
 0x10d   :  { %v8899_v30 = vld [vmem:[%s14045_s1 + $0x374] sm:$0xf0]  ;;  %v5954_v35 = vld [vmem:[%s14045_s1 + $0x48] sm:$0xf] }
 0x10e   :  { %3528 = vmatmul.bf16.vlgmr.msrb.gmra.mxu0 %v9510_v52  ;;  %3541 = vmatmul.bf16.vlgmr.msrb.gmra.mxu1 %v9512_v58  ;;  %v3335_v22 = vadd.f32 %v3334_v17, %v3322_v15  ;;  %v8799_v36 = vld [vmem:[%s14045_s1 + $0x54] sm:$0xf0]  ;;  %v6082_v37 = vld [vmem:[%s14045_s1 + $0x148] sm:$0xf] }
 0x10f   :  { %3572 = vmatpush.bf16.msra.mxu0 %v6035_v31  ;;  %3585 = vmatpush.bf16.msra.mxu1 %v6163_v32  ;;  %v5971_v31 = vor.u32 %v8803_v21, %v5970_v20  ;;  %v6099_v32 = vor.u32 %v8835_v23, %v6098_v48  ;;  %v8831_v40 = vld [vmem:[%s14045_s1 + $0x154] sm:$0xf0]  ;;  %v6210_v41 = vld [vmem:[%s14045_s1 + $0x248] sm:$0xf]  ;;  %v5955_v49 = vor.u32 %v8799_v36, %v5954_v35 }
 0x110   :  { %3598 = vmatpush.bf16.msra.mxu2 %v6291_v33  ;;  %3611 = vmatpush.bf16.msra.mxu3 %v6419_v38  ;;  %v6227_v33 = vor.u32 %v8867_v25, %v6226_v24  ;;  %v6355_v38 = vor.u32 %v8899_v30, %v6354_v26  ;;  %v8863_v42 = vld [vmem:[%s14045_s1 + $0x254] sm:$0xf0]  ;;  %v5938_v55 = vld [vmem:[%s14045_s1 + $0x28] sm:$0xf] }
 0x111   :  { %3554 = vmatmul.bf16.vlgmr.msrb.gmra.mxu2 %v9511_v57  ;;  %3567 = vmatmul.bf16.vlgmr.msrb.gmra.mxu3 %v9513_v62  ;;  %v6211_v54 = vor.u32 %v8863_v42, %v6210_v41  ;;  %v8795_v56 = vld [vmem:[%s14045_s1 + $0x34] sm:$0xf0]  ;;  %v6066_v57 = vld [vmem:[%s14045_s1 + $0x128] sm:$0xf] }
 0x112   :  { %v8827_v59 = vld [vmem:[%s14045_s1 + $0x134] sm:$0xf0]  ;;  %v6194_v61 = vld [vmem:[%s14045_s1 + $0x228] sm:$0xf] }
 0x113   :  { %3573 = vmatpush.bf16.msra.mxu0 %v6019_v44  ;;  %3586 = vmatpush.bf16.msra.mxu1 %v6147_v45  ;;  %v6338_v45 = vld [vmem:[%s14045_s1 + $0x348] sm:$0xf]  ;;  %v3323_v47 = vpop.f32.mrf.mxu0  ;;  %v3336_v50 = vpop.f32.mrf.mxu1  ;;  %v8859_v62 = vld [vmem:[%s14045_s1 + $0x234] sm:$0xf0]  ;;  %v6067_v7 = vor.u32 %v8827_v59, %v6066_v57 }
 0x114   :  { %3599 = vmatpush.bf16.msra.mxu2 %v6275_v46  ;;  %3612 = vmatpush.bf16.msra.mxu3 %v6403_v53  ;;  %v3347_v39 = vpop.f32.mrf.mxu2  ;;  %v3360_v44 = vpop.f32.mrf.mxu3  ;;  %v8895_v46 = vld [vmem:[%s14045_s1 + $0x354] sm:$0xf0]  ;;  %v6083_v53 = vor.u32 %v8831_v40, %v6082_v37  ;;  %v5922_v5 = vld [vmem:[%s14045_s1 + $0x8] sm:$0xf] }
 0x115   :  { %v3348_v43 = vadd.f32 %v3347_v39, %v3335_v22  ;;  %v6339_v58 = vor.u32 %v8895_v46, %v6338_v45  ;;  %v8791_v6 = vld [vmem:[%s14045_s1 + $0x14] sm:$0xf0]  ;;  %v6050_v9 = vld [vmem:[%s14045_s1 + $0x108] sm:$0xf] }
 0x116   :  { %v8823_v10 = vld [vmem:[%s14045_s1 + $0x114] sm:$0xf0]  ;;  %v6178_v11 = vld [vmem:[%s14045_s1 + $0x208] sm:$0xf]  ;;  %v5923_v21 = vor.u32 %v8791_v6, %v5922_v5  ;;  %v9514_v5 = vld [vmem:[%s14046_s2] sm:$0xf] }
 0x117   :  { %3574 = vmatpush.bf16.msra.mxu0 %v6003_v63  ;;  %3587 = vmatpush.bf16.msra.mxu1 %v6131_v3  ;;  %v11341_v52 = vadd.f32 %v3360_v44, %v3348_v43  ;;  %v6322_v63 = vld [vmem:[%s14045_s1 + $0x328] sm:$0xf]  ;;  %v8891_v3 = vld [vmem:[%s14045_s1 + $0x334] sm:$0xf0]  ;;  %v6051_v23 = vor.u32 %v8823_v10, %v6050_v9  ;;  %v553_v6 = vperm.slane %v9514_v5, 1 }
 0x118   :  { %3600 = vmatpush.bf16.msra.mxu2 %v6259_v4  ;;  %3613 = vmatpush.bf16.msra.mxu3 %v6387_v8  ;;  %v5939_v4 = vor.u32 %v8795_v56, %v5938_v55  ;;  %v6195_v8 = vor.u32 %v8859_v62, %v6194_v61  ;;  %v6323_v12 = vor.u32 %v8891_v3, %v6322_v63  ;;  %v8855_v13 = vld [vmem:[%s14045_s1 + $0x214] sm:$0xf0]  ;;  %v6306_v14 = vld [vmem:[%s14045_s1 + $0x308] sm:$0xf] }
 0x119   :  { %v8887_v15 = vld [vmem:[%s14045_s1 + $0x314] sm:$0xf0]  ;;  %v6546_v17 = vld [vmem:[%s14045_s1 + $0x4e8] sm:$0xf]  ;;  %v6179_v24 = vor.u32 %v8855_v13, %v6178_v11 }
 0x11a   :  { %v8979_v48 = vld [vmem:[%s14045_s1 + $0x5f4] sm:$0xf0]  ;;  %v6930_v25 = vld [vmem:[%s14045_s1 + $0x7e8] sm:$0xf]  ;;  %v6307_v30 = vor.u32 %v8887_v15, %v6306_v14 }
 0x11b   :  { %3575 = vmatpush.bf16.msra.mxu0 %v5987_v16  ;;  %3588 = vmatpush.bf16.msra.mxu1 %v6115_v18  ;;  %v8947_v18 = vld [vmem:[%s14045_s1 + $0x4f4] sm:$0xf0]  ;;  %v6530_v35 = vld [vmem:[%s14045_s1 + $0x4c8] sm:$0xf] }
 0x11c   :  { %3601 = vmatpush.bf16.msra.mxu2 %v6243_v19  ;;  %3614 = vmatpush.bf16.msra.mxu3 %v6371_v51  ;;  %v3349_v16 = vpop.f32.mrf.mxu2  ;;  %v6674_v19 = vld [vmem:[%s14045_s1 + $0x5e8] sm:$0xf]  ;;  %v3362_v20 = vpop.f32.mrf.mxu3  ;;  %v9011_v22 = vld [vmem:[%s14045_s1 + $0x6f4] sm:$0xf0] }
 0x11d   :  { %v6802_v51 = vld [vmem:[%s14045_s1 + $0x6e8] sm:$0xf]  ;;  %v9043_v26 = vld [vmem:[%s14045_s1 + $0x7f4] sm:$0xf0] }
 0x11e   :  { %v8943_v36 = vld [vmem:[%s14045_s1 + $0x4d4] sm:$0xf0]  ;;  %v6658_v37 = vld [vmem:[%s14045_s1 + $0x5c8] sm:$0xf] }
 0x11f   :  { %3576 = vmatpush.bf16.msra.mxu0 %v5971_v31  ;;  %3589 = vmatpush.bf16.msra.mxu1 %v6099_v32  ;;  %v6547_v31 = vor.u32 %v8947_v18, %v6546_v17  ;;  %v6675_v32 = vor.u32 %v8979_v48, %v6674_v19  ;;  %v8975_v39 = vld [vmem:[%s14045_s1 + $0x5d4] sm:$0xf0]  ;;  %v6786_v40 = vld [vmem:[%s14045_s1 + $0x6c8] sm:$0xf]  ;;  %v6531_v44 = vor.u32 %v8943_v36, %v6530_v35 }
 0x120   :  { %3602 = vmatpush.bf16.msra.mxu2 %v6227_v33  ;;  %3615 = vmatpush.bf16.msra.mxu3 %v6355_v38  ;;  %v6803_v33 = vor.u32 %v9011_v22, %v6802_v51  ;;  %v6931_v38 = vor.u32 %v9043_v26, %v6930_v25  ;;  %v9007_v41 = vld [vmem:[%s14045_s1 + $0x6d4] sm:$0xf0]  ;;  %v6914_v42 = vld [vmem:[%s14045_s1 + $0x7c8] sm:$0xf]  ;;  %v6659_v45 = vor.u32 %v8975_v39, %v6658_v37 }
 0x121   :  { %v9039_v43 = vld [vmem:[%s14045_s1 + $0x7d4] sm:$0xf0]  ;;  %v6787_v46 = vor.u32 %v9007_v41, %v6786_v40  ;;  %v6514_v47 = vld [vmem:[%s14045_s1 + $0x4a8] sm:$0xf] }
 0x122   :  { %v6642_v50 = vld [vmem:[%s14045_s1 + $0x5a8] sm:$0xf]  ;;  %v9003_v56 = vld [vmem:[%s14045_s1 + $0x6b4] sm:$0xf0] }
 0x123   :  { %3577 = vmatpush.bf16.msra.mxu0 %v5955_v49  ;;  %3590 = vmatpush.bf16.msra.mxu1 %v6083_v53  ;;  %v8939_v49 = vld [vmem:[%s14045_s1 + $0x4b4] sm:$0xf0]  ;;  %v6915_v53 = vor.u32 %v9039_v43, %v6914_v42  ;;  %v6770_v55 = vld [vmem:[%s14045_s1 + $0x6a8] sm:$0xf] }
 0x124   :  { %3603 = vmatpush.bf16.msra.mxu2 %v6211_v54  ;;  %3616 = vmatpush.bf16.msra.mxu3 %v6339_v58  ;;  %v8971_v54 = vld [vmem:[%s14045_s1 + $0x5b4] sm:$0xf0]  ;;  %v6898_v57 = vld [vmem:[%s14045_s1 + $0x7a8] sm:$0xf]  ;;  %v6515_v59 = vor.u32 %v8939_v49, %v6514_v47  ;;  %v6771_v63 = vor.u32 %v9003_v56, %v6770_v55 }
 0x125   :  { %v9035_v58 = vld [vmem:[%s14045_s1 + $0x7b4] sm:$0xf0]  ;;  %v6498_v61 = vld [vmem:[%s14045_s1 + $0x488] sm:$0xf]  ;;  %v6643_v62 = vor.u32 %v8971_v54, %v6642_v50 }
 0x126   :  { %v8935_v3 = vld [vmem:[%s14045_s1 + $0x494] sm:$0xf0]  ;;  %v6754_v9 = vld [vmem:[%s14045_s1 + $0x688] sm:$0xf] }
 0x127   :  { %3578 = vmatpush.bf16.msra.mxu0 %v5939_v4  ;;  %3591 = vmatpush.bf16.msra.mxu1 %v6067_v7  ;;  %v6626_v4 = vld [vmem:[%s14045_s1 + $0x588] sm:$0xf]  ;;  %v6899_v7 = vor.u32 %v9035_v58, %v6898_v57  ;;  %v8999_v10 = vld [vmem:[%s14045_s1 + $0x694] sm:$0xf0]  ;;  %v6499_v13 = vor.u32 %v8935_v3, %v6498_v61 }
 0x128   :  { %3604 = vmatpush.bf16.msra.mxu2 %v6195_v8  ;;  %3617 = vmatpush.bf16.msra.mxu3 %v6323_v12  ;;  %v8967_v8 = vld [vmem:[%s14045_s1 + $0x594] sm:$0xf0]  ;;  %v6882_v11 = vld [vmem:[%s14045_s1 + $0x788] sm:$0xf]  ;;  %v6755_v16 = vor.u32 %v8999_v10, %v6754_v9 }
 0x129   :  { %v9031_v12 = vld [vmem:[%s14045_s1 + $0x794] sm:$0xf0]  ;;  %v6627_v15 = vor.u32 %v8967_v8, %v6626_v4  ;;  %v6482_v17 = vld [vmem:[%s14045_s1 + $0x468] sm:$0xf] }
 0x12a   :  { %v8931_v18 = vld [vmem:[%s14045_s1 + $0x474] sm:$0xf0]  ;;  %v6610_v19 = vld [vmem:[%s14045_s1 + $0x568] sm:$0xf]  ;;  %v6883_v48 = vor.u32 %v9031_v12, %v6882_v11 }
 0x12b   :  { %3579 = vmatpush.bf16.msra.mxu0 %v5923_v21  ;;  %3592 = vmatpush.bf16.msra.mxu1 %v6051_v23  ;;  %v3373_v14 = vpop.f32.mrf.mxu0  ;;  %v3386_v21 = vpop.f32.mrf.mxu1  ;;  %v8963_v51 = vld [vmem:[%s14045_s1 + $0x574] sm:$0xf0]  ;;  %v6738_v22 = vld [vmem:[%s14045_s1 + $0x668] sm:$0xf] }
 0x12c   :  { %3605 = vmatpush.bf16.msra.mxu2 %v6179_v24  ;;  %3618 = vmatpush.bf16.msra.mxu3 %v6307_v30  ;;  %v3374_v20 = vadd.f32 %v3373_v14, %v553_v6  ;;  %v8995_v23 = vld [vmem:[%s14045_s1 + $0x674] sm:$0xf0]  ;;  %v6866_v24 = vld [vmem:[%s14045_s1 + $0x768] sm:$0xf]  ;;  %v6483_v30 = vor.u32 %v8931_v18, %v6482_v17 }
 0x12d   :  { %v9027_v25 = vld [vmem:[%s14045_s1 + $0x774] sm:$0xf0]  ;;  %v6594_v36 = vld [vmem:[%s14045_s1 + $0x548] sm:$0xf] }
 0x12e   :  { %3580 = vmatmul.bf16.vlgmr.msra.gmra.mxu0 %v9934_v28  ;;  %3593 = vmatmul.bf16.vlgmr.msra.gmra.mxu1 %v9944_v34  ;;  %v3387_v26 = vadd.f32 %v3386_v21, %v3374_v20  ;;  %v8927_v35 = vld [vmem:[%s14045_s1 + $0x454] sm:$0xf0]  ;;  %v6722_v40 = vld [vmem:[%s14045_s1 + $0x648] sm:$0xf] }
 0x12f   :  { %3624 = vmatpush.bf16.msrb.mxu0 %v6547_v31  ;;  %3637 = vmatpush.bf16.msrb.mxu1 %v6675_v32  ;;  %v6611_v31 = vor.u32 %v8963_v51, %v6610_v19  ;;  %v6739_v32 = vor.u32 %v8995_v23, %v6738_v22  ;;  %v8959_v39 = vld [vmem:[%s14045_s1 + $0x554] sm:$0xf0]  ;;  %v6450_v54 = vld [vmem:[%s14045_s1 + $0x428] sm:$0xf] }
 0x130   :  { %3650 = vmatpush.bf16.msrb.mxu2 %v6803_v33  ;;  %3663 = vmatpush.bf16.msrb.mxu3 %v6931_v38  ;;  %v6466_v33 = vld [vmem:[%s14045_s1 + $0x448] sm:$0xf]  ;;  %v6867_v38 = vor.u32 %v9027_v25, %v6866_v24  ;;  %v8991_v41 = vld [vmem:[%s14045_s1 + $0x654] sm:$0xf0]  ;;  %v6595_v50 = vor.u32 %v8959_v39, %v6594_v36 }
 0x131   :  { %3606 = vmatmul.bf16.vlgmr.msra.gmra.mxu2 %v9932_v27  ;;  %3619 = vmatmul.bf16.vlgmr.msra.gmra.mxu3 %v9936_v29  ;;  %v8923_v55 = vld [vmem:[%s14045_s1 + $0x434] sm:$0xf0]  ;;  %v6578_v56 = vld [vmem:[%s14045_s1 + $0x528] sm:$0xf] }
 0x132   :  { %v6706_v61 = vld [vmem:[%s14045_s1 + $0x628] sm:$0xf]  ;;  %v9019_v3 = vld [vmem:[%s14045_s1 + $0x734] sm:$0xf0]  ;;  %v6451_v4 = vor.u32 %v8923_v55, %v6450_v54 }
 0x133   :  { %3625 = vmatpush.bf16.msrb.mxu0 %v6531_v44  ;;  %3638 = vmatpush.bf16.msrb.mxu1 %v6659_v45  ;;  %v6850_v44 = vld [vmem:[%s14045_s1 + $0x748] sm:$0xf]  ;;  %v9023_v45 = vld [vmem:[%s14045_s1 + $0x754] sm:$0xf0]  ;;  %v3375_v49 = vpop.f32.mrf.mxu0  ;;  %v3388_v57 = vpop.f32.mrf.mxu1 }
 0x134   :  { %3651 = vmatpush.bf16.msrb.mxu2 %v6787_v46  ;;  %3664 = vmatpush.bf16.msrb.mxu3 %v6915_v53  ;;  %v3399_v37 = vpop.f32.mrf.mxu2  ;;  %v3412_v43 = vpop.f32.mrf.mxu3  ;;  %v6467_v46 = vor.u32 %v8927_v35, %v6466_v33  ;;  %v6723_v53 = vor.u32 %v8991_v41, %v6722_v40  ;;  %v6851_v58 = vor.u32 %v9023_v45, %v6850_v44  ;;  %v6434_v5 = vld [vmem:[%s14045_s1 + $0x408] sm:$0xf]  ;;  %v8919_v6 = vld [vmem:[%s14045_s1 + $0x414] sm:$0xf0] }
 0x135   :  { %v3400_v42 = vadd.f32 %v3399_v37, %v3387_v26  ;;  %v6562_v9 = vld [vmem:[%s14045_s1 + $0x508] sm:$0xf]  ;;  %v8951_v10 = vld [vmem:[%s14045_s1 + $0x514] sm:$0xf0]  ;;  %v6435_v21 = vor.u32 %v8919_v6, %v6434_v5 }
 0x136   :  { %v6690_v11 = vld [vmem:[%s14045_s1 + $0x608] sm:$0xf]  ;;  %v8983_v14 = vld [vmem:[%s14045_s1 + $0x614] sm:$0xf0]  ;;  %v6563_v23 = vor.u32 %v8951_v10, %v6562_v9 }
 0x137   :  { %3626 = vmatpush.bf16.msrb.mxu0 %v6515_v59  ;;  %3639 = vmatpush.bf16.msrb.mxu1 %v6643_v62  ;;  %v11542_v47 = vadd.f32 %v3412_v43, %v3400_v42  ;;  %v8955_v59 = vld [vmem:[%s14045_s1 + $0x534] sm:$0xf0]  ;;  %v7058_v18 = vld [vmem:[%s14045_s1 + $0x8e8] sm:$0xf]  ;;  %v6691_v24 = vor.u32 %v8983_v14, %v6690_v11 }
 0x138   :  { %3652 = vmatpush.bf16.msrb.mxu2 %v6771_v63  ;;  %3665 = vmatpush.bf16.msrb.mxu3 %v6899_v7  ;;  %v8987_v62 = vld [vmem:[%s14045_s1 + $0x634] sm:$0xf0]  ;;  %v6834_v63 = vld [vmem:[%s14045_s1 + $0x728] sm:$0xf]  ;;  %v6579_v7 = vor.u32 %v8955_v59, %v6578_v56 }
 0x139   :  { %v6707_v8 = vor.u32 %v8987_v62, %v6706_v61  ;;  %v9075_v19 = vld [vmem:[%s14045_s1 + $0x8f4] sm:$0xf0]  ;;  %v7186_v20 = vld [vmem:[%s14045_s1 + $0x9e8] sm:$0xf] }
 0x13a   :  { %v7314_v51 = vld [vmem:[%s14045_s1 + $0xae8] sm:$0xf]  ;;  %v9139_v22 = vld [vmem:[%s14045_s1 + $0xaf4] sm:$0xf0] }
 0x13b   :  { %3627 = vmatpush.bf16.msrb.mxu0 %v6499_v13  ;;  %3640 = vmatpush.bf16.msrb.mxu1 %v6627_v15  ;;  %v6835_v13 = vor.u32 %v9019_v3, %v6834_v63  ;;  %v6818_v15 = vld [vmem:[%s14045_s1 + $0x708] sm:$0xf]  ;;  %v9171_v26 = vld [vmem:[%s14045_s1 + $0xbf4] sm:$0xf0]  ;;  %v7315_v33 = vor.u32 %v9139_v22, %v7314_v51 }
 0x13c   :  { %3653 = vmatpush.bf16.msrb.mxu2 %v6755_v16  ;;  %3666 = vmatpush.bf16.msrb.mxu3 %v6883_v48  ;;  %v3401_v12 = vpop.f32.mrf.mxu2  ;;  %v9015_v16 = vld [vmem:[%s14045_s1 + $0x714] sm:$0xf0]  ;;  %v3414_v17 = vpop.f32.mrf.mxu3  ;;  %v7442_v25 = vld [vmem:[%s14045_s1 + $0xbe8] sm:$0xf] }
 0x13d   :  { %v9107_v48 = vld [vmem:[%s14045_s1 + $0x9f4] sm:$0xf0]  ;;  %v7042_v35 = vld [vmem:[%s14045_s1 + $0x8c8] sm:$0xf] }
 0x13e   :  { %v9071_v36 = vld [vmem:[%s14045_s1 + $0x8d4] sm:$0xf0]  ;;  %v7170_v37 = vld [vmem:[%s14045_s1 + $0x9c8] sm:$0xf] }
 0x13f   :  { %3628 = vmatpush.bf16.msrb.mxu0 %v6483_v30  ;;  %3641 = vmatpush.bf16.msrb.mxu1 %v6611_v31  ;;  %v6819_v30 = vor.u32 %v9015_v16, %v6818_v15  ;;  %v7059_v31 = vor.u32 %v9075_v19, %v7058_v18  ;;  %v9103_v39 = vld [vmem:[%s14045_s1 + $0x9d4] sm:$0xf0]  ;;  %v7298_v40 = vld [vmem:[%s14045_s1 + $0xac8] sm:$0xf]  ;;  %v7043_v44 = vor.u32 %v9071_v36, %v7042_v35 }
 0x140   :  { %3654 = vmatpush.bf16.msrb.mxu2 %v6739_v32  ;;  %3667 = vmatpush.bf16.msrb.mxu3 %v6867_v38  ;;  %v7187_v32 = vor.u32 %v9107_v48, %v7186_v20  ;;  %v7443_v38 = vor.u32 %v9171_v26, %v7442_v25  ;;  %v9135_v41 = vld [vmem:[%s14045_s1 + $0xad4] sm:$0xf0]  ;;  %v7426_v42 = vld [vmem:[%s14045_s1 + $0xbc8] sm:$0xf]  ;;  %v7171_v45 = vor.u32 %v9103_v39, %v7170_v37 }
 0x141   :  { %v9167_v43 = vld [vmem:[%s14045_s1 + $0xbd4] sm:$0xf0]  ;;  %v7026_v49 = vld [vmem:[%s14045_s1 + $0x8a8] sm:$0xf] }
 0x142   :  { %v7427_v54 = vor.u32 %v9167_v43, %v7426_v42  ;;  %v9099_v55 = vld [vmem:[%s14045_s1 + $0x9b4] sm:$0xf0]  ;;  %v7282_v56 = vld [vmem:[%s14045_s1 + $0xaa8] sm:$0xf] }
 0x143   :  { %3629 = vmatpush.bf16.msrb.mxu0 %v6467_v46  ;;  %3642 = vmatpush.bf16.msrb.mxu1 %v6595_v50  ;;  %v7299_v46 = vor.u32 %v9135_v41, %v7298_v40  ;;  %v9067_v50 = vld [vmem:[%s14045_s1 + $0x8b4] sm:$0xf0]  ;;  %v7010_v3 = vld [vmem:[%s14045_s1 + $0x888] sm:$0xf] }
 0x144   :  { %3655 = vmatpush.bf16.msrb.mxu2 %v6723_v53  ;;  %3668 = vmatpush.bf16.msrb.mxu3 %v6851_v58  ;;  %v7154_v53 = vld [vmem:[%s14045_s1 + $0x9a8] sm:$0xf]  ;;  %v9131_v57 = vld [vmem:[%s14045_s1 + $0xab4] sm:$0xf0]  ;;  %v7027_v61 = vor.u32 %v9067_v50, %v7026_v49 }
 0x145   :  { %v7410_v58 = vld [vmem:[%s14045_s1 + $0xba8] sm:$0xf]  ;;  %v9163_v59 = vld [vmem:[%s14045_s1 + $0xbb4] sm:$0xf0]  ;;  %v7155_v62 = vor.u32 %v9099_v55, %v7154_v53  ;;  %v7283_v63 = vor.u32 %v9131_v57, %v7282_v56 }
 0x146   :  { %v7138_v5 = vld [vmem:[%s14045_s1 + $0x988] sm:$0xf]  ;;  %v7411_v6 = vor.u32 %v9163_v59, %v7410_v58  ;;  %v9127_v9 = vld [vmem:[%s14045_s1 + $0xa94] sm:$0xf0] }
 0x147   :  { %3630 = vmatpush.bf16.msrb.mxu0 %v6451_v4  ;;  %3643 = vmatpush.bf16.msrb.mxu1 %v6579_v7  ;;  %v9063_v4 = vld [vmem:[%s14045_s1 + $0x894] sm:$0xf0]  ;;  %v7394_v10 = vld [vmem:[%s14045_s1 + $0xb88] sm:$0xf] }
 0x148   :  { %3656 = vmatpush.bf16.msrb.mxu2 %v6707_v8  ;;  %3669 = vmatpush.bf16.msrb.mxu3 %v6835_v13  ;;  %v9095_v7 = vld [vmem:[%s14045_s1 + $0x994] sm:$0xf0]  ;;  %v7266_v8 = vld [vmem:[%s14045_s1 + $0xa88] sm:$0xf]  ;;  %v7011_v12 = vor.u32 %v9063_v4, %v7010_v3 }
 0x149   :  { %v9159_v11 = vld [vmem:[%s14045_s1 + $0xb94] sm:$0xf0]  ;;  %v7139_v14 = vor.u32 %v9095_v7, %v7138_v5  ;;  %v7267_v15 = vor.u32 %v9127_v9, %v7266_v8  ;;  %v6994_v16 = vld [vmem:[%s14045_s1 + $0x868] sm:$0xf] }
 0x14a   :  { %v9059_v17 = vld [vmem:[%s14045_s1 + $0x874] sm:$0xf0]  ;;  %v7122_v18 = vld [vmem:[%s14045_s1 + $0x968] sm:$0xf] }
 0x14b   :  { %3631 = vmatpush.bf16.msrb.mxu0 %v6435_v21  ;;  %3644 = vmatpush.bf16.msrb.mxu1 %v6563_v23  ;;  %v3425_v13 = vpop.f32.mrf.mxu0  ;;  %v3438_v20 = vpop.f32.mrf.mxu1  ;;  %v7395_v21 = vor.u32 %v9159_v11, %v7394_v10  ;;  %v9091_v48 = vld [vmem:[%s14045_s1 + $0x974] sm:$0xf0]  ;;  %v7250_v51 = vld [vmem:[%s14045_s1 + $0xa68] sm:$0xf]  ;;  %v6995_v25 = vor.u32 %v9059_v17, %v6994_v16 }
 0x14c   :  { %3657 = vmatpush.bf16.msrb.mxu2 %v6691_v24  ;;  %3670 = vmatpush.bf16.msrb.mxu3 %v6819_v30  ;;  %v3426_v19 = vadd.f32 %v3425_v13, %v11542_v47  ;;  %v9123_v22 = vld [vmem:[%s14045_s1 + $0xa74] sm:$0xf0]  ;;  %v7378_v23 = vld [vmem:[%s14045_s1 + $0xb68] sm:$0xf]  ;;  %v7123_v26 = vor.u32 %v9091_v48, %v7122_v18 }
 0x14d   :  { %v9155_v47 = vld [vmem:[%s14045_s1 + $0xb74] sm:$0xf0]  ;;  %v7251_v30 = vor.u32 %v9123_v22, %v7250_v51  ;;  %v7362_v42 = vld [vmem:[%s14045_s1 + $0xb48] sm:$0xf] }
 0x14e   :  { %3632 = vmatmul.bf16.vlgmr.msrb.gmra.mxu0 %v10012_v0  ;;  %3645 = vmatmul.bf16.vlgmr.msrb.gmra.mxu1 %v10016_v2  ;;  %v3439_v24 = vadd.f32 %v3438_v20, %v3426_v19  ;;  %v7379_v36 = vor.u32 %v9155_v47, %v7378_v23  ;;  %v9087_v37 = vld [vmem:[%s14045_s1 + $0x954] sm:$0xf0]  ;;  %v6962_v53 = vld [vmem:[%s14045_s1 + $0x828] sm:$0xf] }
 0x14f   :  { %3676 = vmatpush.bf16.msra.mxu0 %v7059_v31  ;;  %3689 = vmatpush.bf16.msra.mxu1 %v7187_v32  ;;  %v6978_v31 = vld [vmem:[%s14045_s1 + $0x848] sm:$0xf]  ;;  %v9055_v32 = vld [vmem:[%s14045_s1 + $0x854] sm:$0xf0] }
 0x150   :  { %3702 = vmatpush.bf16.msra.mxu2 %v7315_v33  ;;  %3715 = vmatpush.bf16.msra.mxu3 %v7443_v38  ;;  %v7106_v33 = vld [vmem:[%s14045_s1 + $0x948] sm:$0xf]  ;;  %v9119_v39 = vld [vmem:[%s14045_s1 + $0xa54] sm:$0xf0] }
 0x151   :  { %3658 = vmatmul.bf16.vlgmr.msrb.gmra.mxu2 %v10007_v60  ;;  %3671 = vmatmul.bf16.vlgmr.msrb.gmra.mxu3 %v10014_v1  ;;  %v7234_v38 = vld [vmem:[%s14045_s1 + $0xa48] sm:$0xf]  ;;  %v9151_v43 = vld [vmem:[%s14045_s1 + $0xb54] sm:$0xf0]  ;;  %v7107_v49 = vor.u32 %v9087_v37, %v7106_v33 }
 0x152   :  { %v7235_v50 = vor.u32 %v9119_v39, %v7234_v38  ;;  %v7090_v55 = vld [vmem:[%s14045_s1 + $0x928] sm:$0xf]  ;;  %v7363_v57 = vor.u32 %v9151_v43, %v7362_v42  ;;  %v9083_v58 = vld [vmem:[%s14045_s1 + $0x934] sm:$0xf0] }
 0x153   :  { %3677 = vmatpush.bf16.msra.mxu0 %v7043_v44  ;;  %3690 = vmatpush.bf16.msra.mxu1 %v7171_v45  ;;  %v6979_v44 = vor.u32 %v9055_v32, %v6978_v31  ;;  %v3440_v56 = vpop.f32.mrf.mxu1  ;;  %v7218_v59 = vld [vmem:[%s14045_s1 + $0xa28] sm:$0xf]  ;;  %v9047_v5 = vld [vmem:[%s14045_s1 + $0x814] sm:$0xf0] }
 0x154   :  { %3703 = vmatpush.bf16.msra.mxu2 %v7299_v46  ;;  %3716 = vmatpush.bf16.msra.mxu3 %v7427_v54  ;;  %v3451_v35 = vpop.f32.mrf.mxu2  ;;  %v3464_v41 = vpop.f32.mrf.mxu3  ;;  %v9051_v54 = vld [vmem:[%s14045_s1 + $0x834] sm:$0xf0]  ;;  %v6946_v4 = vld [vmem:[%s14045_s1 + $0x808] sm:$0xf] }
 0x155   :  { %v3452_v40 = vadd.f32 %v3451_v35, %v3439_v24  ;;  %v3427_v46 = vpop.f32.mrf.mxu0  ;;  %v6963_v3 = vor.u32 %v9051_v54, %v6962_v53  ;;  %v7074_v8 = vld [vmem:[%s14045_s1 + $0x908] sm:$0xf]  ;;  %v9079_v9 = vld [vmem:[%s14045_s1 + $0x914] sm:$0xf0]  ;;  %v6947_v20 = vor.u32 %v9047_v5, %v6946_v4  ;;  %v9515_v53 = vld [vmem:[#allocation1] sm:$0xff] }
 0x156   :  { %v7202_v10 = vld [vmem:[%s14045_s1 + $0xa08] sm:$0xf]  ;;  %v9111_v13 = vld [vmem:[%s14045_s1 + $0xa14] sm:$0xf0]  ;;  %v7075_v22 = vor.u32 %v9079_v9, %v7074_v8 }
 0x157   :  { %3678 = vmatpush.bf16.msra.mxu0 %v7027_v61  ;;  %3691 = vmatpush.bf16.msra.mxu1 %v7155_v62  ;;  %v11741_v45 = vadd.f32 %v3464_v41, %v3452_v40  ;;  %v9115_v61 = vld [vmem:[%s14045_s1 + $0xa34] sm:$0xf0]  ;;  %v7346_v62 = vld [vmem:[%s14045_s1 + $0xb28] sm:$0xf]  ;;  %v7203_v23 = vor.u32 %v9111_v13, %v7202_v10 }
 0x158   :  { %3704 = vmatpush.bf16.msra.mxu2 %v7283_v63  ;;  %3717 = vmatpush.bf16.msra.mxu3 %v7411_v6  ;;  %v9147_v63 = vld [vmem:[%s14045_s1 + $0xb34] sm:$0xf0]  ;;  %v7091_v6 = vor.u32 %v9083_v58, %v7090_v55  ;;  %v7219_v7 = vor.u32 %v9115_v61, %v7218_v59  ;;  %v7570_v17 = vld [vmem:[%s14045_s1 + $0xce8] sm:$0xf] }
 0x159   :  { %v9203_v18 = vld [vmem:[%s14045_s1 + $0xcf4] sm:$0xf0]  ;;  %v7698_v19 = vld [vmem:[%s14045_s1 + $0xde8] sm:$0xf] }
 0x15a   :  { %v7826_v48 = vld [vmem:[%s14045_s1 + $0xee8] sm:$0xf]  ;;  %v9267_v51 = vld [vmem:[%s14045_s1 + $0xef4] sm:$0xf0] }
 0x15b   :  { %3679 = vmatpush.bf16.msra.mxu0 %v7011_v12  ;;  %3692 = vmatpush.bf16.msra.mxu1 %v7139_v14  ;;  %v7347_v12 = vor.u32 %v9147_v63, %v7346_v62  ;;  %v7330_v14 = vld [vmem:[%s14045_s1 + $0xb08] sm:$0xf]  ;;  %v9299_v24 = vld [vmem:[%s14045_s1 + $0xff4] sm:$0xf0]  ;;  %v7827_v31 = vor.u32 %v9267_v51, %v7826_v48 }
 0x15c   :  { %3705 = vmatpush.bf16.msra.mxu2 %v7267_v15  ;;  %3718 = vmatpush.bf16.msra.mxu3 %v7395_v21  ;;  %v3453_v11 = vpop.f32.mrf.mxu2  ;;  %v9143_v15 = vld [vmem:[%s14045_s1 + $0xb14] sm:$0xf0]  ;;  %v3466_v16 = vpop.f32.mrf.mxu3  ;;  %v7954_v47 = vld [vmem:[%s14045_s1 + $0xfe8] sm:$0xf] }
 0x15d   :  { %v9235_v21 = vld [vmem:[%s14045_s1 + $0xdf4] sm:$0xf0]  ;;  %v7554_v32 = vld [vmem:[%s14045_s1 + $0xcc8] sm:$0xf] }
 0x15e   :  { %v9199_v33 = vld [vmem:[%s14045_s1 + $0xcd4] sm:$0xf0]  ;;  %v7682_v35 = vld [vmem:[%s14045_s1 + $0xdc8] sm:$0xf] }
 0x15f   :  { %3680 = vmatpush.bf16.msra.mxu0 %v6995_v25  ;;  %3693 = vmatpush.bf16.msra.mxu1 %v7123_v26  ;;  %v7331_v25 = vor.u32 %v9143_v15, %v7330_v14  ;;  %v7571_v26 = vor.u32 %v9203_v18, %v7570_v17  ;;  %v9231_v37 = vld [vmem:[%s14045_s1 + $0xdd4] sm:$0xf0]  ;;  %v7810_v38 = vld [vmem:[%s14045_s1 + $0xec8] sm:$0xf]  ;;  %v7555_v42 = vor.u32 %v9199_v33, %v7554_v32 }
 0x160   :  { %3706 = vmatpush.bf16.msra.mxu2 %v7251_v30  ;;  %3719 = vmatpush.bf16.msra.mxu3 %v7379_v36  ;;  %v7699_v30 = vor.u32 %v9235_v21, %v7698_v19  ;;  %v7955_v36 = vor.u32 %v9299_v24, %v7954_v47  ;;  %v9263_v39 = vld [vmem:[%s14045_s1 + $0xed4] sm:$0xf0]  ;;  %v7938_v40 = vld [vmem:[%s14045_s1 + $0xfc8] sm:$0xf]  ;;  %v7683_v43 = vor.u32 %v9231_v37, %v7682_v35 }
 0x161   :  { %v9295_v41 = vld [vmem:[%s14045_s1 + $0xfd4] sm:$0xf0]  ;;  %v7538_v46 = vld [vmem:[%s14045_s1 + $0xca8] sm:$0xf] }
 0x162   :  { %v7939_v54 = vor.u32 %v9295_v41, %v7938_v40  ;;  %v9227_v55 = vld [vmem:[%s14045_s1 + $0xdb4] sm:$0xf0]  ;;  %v7794_v56 = vld [vmem:[%s14045_s1 + $0xea8] sm:$0xf] }
 0x163   :  { %3681 = vmatpush.bf16.msra.mxu0 %v6979_v44  ;;  %3694 = vmatpush.bf16.msra.mxu1 %v7107_v49  ;;  %v7811_v44 = vor.u32 %v9263_v39, %v7810_v38  ;;  %v9195_v49 = vld [vmem:[%s14045_s1 + $0xcb4] sm:$0xf0]  ;;  %v9517_v59 = vld [vmem:[#allocation1 + $0x9] sm:$0xff] }
 0x164   :  { %3707 = vmatpush.bf16.msra.mxu2 %v7235_v50  ;;  %3720 = vmatpush.bf16.msra.mxu3 %v7363_v57  ;;  %v7666_v50 = vld [vmem:[%s14045_s1 + $0xda8] sm:$0xf]  ;;  %v9259_v57 = vld [vmem:[%s14045_s1 + $0xeb4] sm:$0xf0] }
 0x165   :  { %v9516_v58 = vld [vmem:[#allocation1 + $0x12] sm:$0xff]  ;;  %v7922_v61 = vld [vmem:[%s14045_s1 + $0xfa8] sm:$0xf]  ;;  %v9518_v63 = vld [vmem:[#allocation1 + $0x1b] sm:$0xff]  ;;  %v7667_v4 = vor.u32 %v9227_v55, %v7666_v50  ;;  %v7795_v5 = vor.u32 %v9259_v57, %v7794_v56 }
 0x166   :  { %v9291_v62 = vld [vmem:[%s14045_s1 + $0xfb4] sm:$0xf0]  ;;  %v7650_v8 = vld [vmem:[%s14045_s1 + $0xd88] sm:$0xf] }
 0x167   :  { %3682 = vmatpush.bf16.msra.mxu0 %v6963_v3  ;;  %3695 = vmatpush.bf16.msra.mxu1 %v7091_v6  ;;  %v7539_v3 = vor.u32 %v9195_v49, %v7538_v46  ;;  %v7522_v6 = vld [vmem:[%s14045_s1 + $0xc88] sm:$0xf]  ;;  %v7923_v9 = vor.u32 %v9291_v62, %v7922_v61  ;;  %v9223_v10 = vld [vmem:[%s14045_s1 + $0xd94] sm:$0xf0] }
 0x168   :  { %3708 = vmatpush.bf16.msra.mxu2 %v7219_v7  ;;  %3721 = vmatpush.bf16.msra.mxu3 %v7347_v12  ;;  %v9191_v7 = vld [vmem:[%s14045_s1 + $0xc94] sm:$0xf0]  ;;  %v7778_v11 = vld [vmem:[%s14045_s1 + $0xe88] sm:$0xf]  ;;  %v7651_v19 = vor.u32 %v9223_v10, %v7650_v8 }
 0x169   :  { %v9255_v12 = vld [vmem:[%s14045_s1 + $0xe94] sm:$0xf0]  ;;  %v7906_v14 = vld [vmem:[%s14045_s1 + $0xf88] sm:$0xf]  ;;  %v7523_v17 = vor.u32 %v9191_v7, %v7522_v6 }
 0x16a   :  { %v9287_v15 = vld [vmem:[%s14045_s1 + $0xf94] sm:$0xf0]  ;;  %v7506_v21 = vld [vmem:[%s14045_s1 + $0xc68] sm:$0xf] }
 0x16b   :  { %3683 = vmatpush.bf16.msra.mxu0 %v6947_v20  ;;  %3696 = vmatpush.bf16.msra.mxu1 %v7075_v22  ;;  %v3477_v13 = vpop.f32.mrf.mxu0  ;;  %v3490_v18 = vpop.f32.mrf.mxu1  ;;  %v7779_v20 = vor.u32 %v9255_v12, %v7778_v11  ;;  %v9187_v48 = vld [vmem:[%s14045_s1 + $0xc74] sm:$0xf0]  ;;  %v7634_v51 = vld [vmem:[%s14045_s1 + $0xd68] sm:$0xf] }
 0x16c   :  { %3709 = vmatpush.bf16.msra.mxu2 %v7203_v23  ;;  %3722 = vmatpush.bf16.msra.mxu3 %v7331_v25  ;;  %v3478_v16 = vadd.f32 %v3477_v13, %v11741_v45  ;;  %v7907_v45 = vor.u32 %v9287_v15, %v7906_v14  ;;  %v9219_v23 = vld [vmem:[%s14045_s1 + $0xd74] sm:$0xf0]  ;;  %v7762_v47 = vld [vmem:[%s14045_s1 + $0xe68] sm:$0xf] }
 0x16d   :  { %v9251_v24 = vld [vmem:[%s14045_s1 + $0xe74] sm:$0xf0]  ;;  %v7890_v25 = vld [vmem:[%s14045_s1 + $0xf68] sm:$0xf] }
 0x16e   :  { %3684 = vmatmul.bf16.vlgmr.msra.gmra.mxu0 %v9515_v53  ;;  %3697 = vmatmul.bf16.vlgmr.msra.gmra.mxu1 %v9517_v59  ;;  %v3491_v22 = vadd.f32 %v3490_v18, %v3478_v16  ;;  %v7763_v32 = vor.u32 %v9251_v24, %v7762_v47  ;;  %v7490_v33 = vld [vmem:[%s14045_s1 + $0xc48] sm:$0xf]  ;;  %v9183_v35 = vld [vmem:[%s14045_s1 + $0xc54] sm:$0xf0] }
 0x16f   :  { %3728 = vmatpush.bf16.msrb.mxu0 %v7571_v26  ;;  %3741 = vmatpush.bf16.msrb.mxu1 %v7699_v30  ;;  %v9283_v26 = vld [vmem:[%s14045_s1 + $0xf74] sm:$0xf0]  ;;  %v7507_v30 = vor.u32 %v9187_v48, %v7506_v21  ;;  %v7746_v40 = vld [vmem:[%s14045_s1 + $0xe48] sm:$0xf]  ;;  %v7491_v50 = vor.u32 %v9183_v35, %v7490_v33  ;;  %v8849_v21 = vld [vmem:[%s14045_s1 + $0x1ec] sm:$0xf] }
 0x170   :  { %3754 = vmatpush.bf16.msrb.mxu2 %v7827_v31  ;;  %3767 = vmatpush.bf16.msrb.mxu3 %v7955_v36  ;;  %v7635_v31 = vor.u32 %v9219_v23, %v7634_v51  ;;  %v7618_v36 = vld [vmem:[%s14045_s1 + $0xd48] sm:$0xf]  ;;  %v7891_v37 = vor.u32 %v9283_v26, %v7890_v25  ;;  %v9215_v39 = vld [vmem:[%s14045_s1 + $0xd54] sm:$0xf0]  ;;  %v6292_v23 = vld [vmem:[%s14045_s1 + $0x2f8] sm:$0xf0] }
 0x171   :  { %3710 = vmatmul.bf16.vlgmr.msra.gmra.mxu2 %v9516_v58  ;;  %3723 = vmatmul.bf16.vlgmr.msra.gmra.mxu3 %v9518_v63  ;;  %v9247_v41 = vld [vmem:[%s14045_s1 + $0xe54] sm:$0xf0]  ;;  %v7619_v55 = vor.u32 %v9215_v39, %v7618_v36  ;;  %v7474_v57 = vld [vmem:[%s14045_s1 + $0xc28] sm:$0xf]  ;;  %v8913_v25 = vld [vmem:[%s14045_s1 + $0x3ec] sm:$0xf] }
 0x172   :  { %v9279_v46 = vld [vmem:[%s14045_s1 + $0xf54] sm:$0xf0]  ;;  %v7747_v56 = vor.u32 %v9247_v41, %v7746_v40  ;;  %v7602_v59 = vld [vmem:[%s14045_s1 + $0xd28] sm:$0xf]  ;;  %v6420_v26 = vld [vmem:[%s14045_s1 + $0x3f8] sm:$0xf0] }
 0x173   :  { %3729 = vmatpush.bf16.msrb.mxu0 %v7555_v42  ;;  %3742 = vmatpush.bf16.msrb.mxu1 %v7683_v43  ;;  %v3479_v49 = vpop.f32.mrf.mxu0  ;;  %v3492_v53 = vpop.f32.mrf.mxu1  ;;  %v9179_v58 = vld [vmem:[%s14045_s1 + $0xc34] sm:$0xf0]  ;;  %v7730_v63 = vld [vmem:[%s14045_s1 + $0xe28] sm:$0xf]  ;;  %v8813_v35 = vld [vmem:[%s14045_s1 + $0xcc] sm:$0xf] }
 0x174   :  { %3755 = vmatpush.bf16.msrb.mxu2 %v7811_v44  ;;  %3768 = vmatpush.bf16.msrb.mxu3 %v7939_v54  ;;  %v3503_v38 = vpop.f32.mrf.mxu2  ;;  %v3516_v43 = vpop.f32.mrf.mxu3  ;;  %v7874_v44 = vld [vmem:[%s14045_s1 + $0xf48] sm:$0xf]  ;;  %v9211_v62 = vld [vmem:[%s14045_s1 + $0xd34] sm:$0xf0]  ;;  %v7475_v6 = vor.u32 %v9179_v58, %v7474_v57  ;;  %v6020_v36 = vld [vmem:[%s14045_s1 + $0xd8] sm:$0xf0] }
 0x175   :  { %v3504_v42 = vadd.f32 %v3503_v38, %v3491_v22  ;;  %v7875_v61 = vor.u32 %v9279_v46, %v7874_v44  ;;  %v7458_v7 = vld [vmem:[%s14045_s1 + $0xc08] sm:$0xf]  ;;  %v9175_v8 = vld [vmem:[%s14045_s1 + $0xc14] sm:$0xf0]  ;;  %v8881_v22 = vld [vmem:[%s14045_s1 + $0x2ec] sm:$0xf]  ;;  %v6423_v38 = vor.u32 %v8913_v25, %v6420_v26  ;;  %v6023_v44 = vor.u32 %v8813_v35, %v6020_v36 }
 0x176   :  { %v7586_v11 = vld [vmem:[%s14045_s1 + $0xd08] sm:$0xf]  ;;  %v9207_v12 = vld [vmem:[%s14045_s1 + $0xd14] sm:$0xf0]  ;;  %v7459_v51 = vor.u32 %v9175_v8, %v7458_v7  ;;  %v6295_v33 = vor.u32 %v8881_v22, %v6292_v23  ;;  %v6148_v39 = vld [vmem:[%s14045_s1 + $0x1d8] sm:$0xf0] }
 0x177   :  { %3730 = vmatpush.bf16.msrb.mxu0 %v7539_v3  ;;  %3743 = vmatpush.bf16.msrb.mxu1 %v7667_v4  ;;  %v11936_v54 = vadd.f32 %v3516_v43, %v3504_v42  ;;  %v9243_v3 = vld [vmem:[%s14045_s1 + $0xe34] sm:$0xf0]  ;;  %v7858_v4 = vld [vmem:[%s14045_s1 + $0xf28] sm:$0xf]  ;;  %v7587_v47 = vor.u32 %v9207_v12, %v7586_v11  ;;  %v8877_v40 = vld [vmem:[%s14045_s1 + $0x2cc] sm:$0xf] }
 0x178   :  { %3756 = vmatpush.bf16.msrb.mxu2 %v7795_v5  ;;  %3769 = vmatpush.bf16.msrb.mxu3 %v7923_v9  ;;  %v9275_v5 = vld [vmem:[%s14045_s1 + $0xf34] sm:$0xf0]  ;;  %v7603_v9 = vor.u32 %v9211_v62, %v7602_v59  ;;  %v7731_v10 = vor.u32 %v9243_v3, %v7730_v63  ;;  %v7714_v13 = vld [vmem:[%s14045_s1 + $0xe08] sm:$0xf]  ;;  %v6276_v41 = vld [vmem:[%s14045_s1 + $0x2d8] sm:$0xf0] }
 0x179   :  { %v7859_v14 = vor.u32 %v9275_v5, %v7858_v4  ;;  %v9239_v15 = vld [vmem:[%s14045_s1 + $0xe14] sm:$0xf0]  ;;  %v7842_v16 = vld [vmem:[%s14045_s1 + $0xf08] sm:$0xf]  ;;  %v8909_v42 = vld [vmem:[%s14045_s1 + $0x3cc] sm:$0xf]  ;;  %v6279_v49 = vor.u32 %v8877_v40, %v6276_v41 }
 0x17a   :  { %v7715_v24 = vor.u32 %v9239_v15, %v7714_v13  ;;  %v6404_v43 = vld [vmem:[%s14045_s1 + $0x3d8] sm:$0xf0]  ;;  %v8873_v59 = vld [vmem:[%s14045_s1 + $0x2ac] sm:$0xf] }
 0x17b   :  { %3731 = vmatpush.bf16.msrb.mxu0 %v7523_v17  ;;  %3744 = vmatpush.bf16.msrb.mxu1 %v7651_v19  ;;  %v9271_v17 = vld [vmem:[%s14045_s1 + $0xf14] sm:$0xf0]  ;;  %v8817_v19 = vld [vmem:[%s14045_s1 + $0xec] sm:$0xf]  ;;  %v6004_v53 = vld [vmem:[%s14045_s1 + $0xb8] sm:$0xf0]  ;;  %v6407_v57 = vor.u32 %v8909_v42, %v6404_v43 }
 0x17c   :  { %3757 = vmatpush.bf16.msrb.mxu2 %v7779_v20  ;;  %3770 = vmatpush.bf16.msrb.mxu3 %v7907_v45  ;;  %v3505_v18 = vpop.f32.mrf.mxu2  ;;  %v6036_v20 = vld [vmem:[%s14045_s1 + $0xf8] sm:$0xf0]  ;;  %v3518_v48 = vpop.f32.mrf.mxu3  ;;  %v9521_v63 = vld [vmem:[#allocation1 + $0x2d] sm:$0xff] }
 0x17d   :  { %v6164_v45 = vld [vmem:[%s14045_s1 + $0x1f8] sm:$0xf0]  ;;  %v8905_v3 = vld [vmem:[%s14045_s1 + $0x3ac] sm:$0xf] }
 0x17e   :  { %v6132_v58 = vld [vmem:[%s14045_s1 + $0x1b8] sm:$0xf0]  ;;  %v8837_v11 = vld [vmem:[%s14045_s1 + $0x18c] sm:$0xf] }
 0x17f   :  { %3732 = vmatpush.bf16.msrb.mxu0 %v7507_v30  ;;  %3745 = vmatpush.bf16.msrb.mxu1 %v7635_v31  ;;  %v7843_v30 = vor.u32 %v9271_v17, %v7842_v16  ;;  %v6039_v31 = vor.u32 %v8817_v19, %v6036_v20  ;;  %v9520_v62 = vld [vmem:[#allocation1 + $0x36] sm:$0xff]  ;;  %v9522_v5 = vld [vmem:[#allocation1 + $0x3f] sm:$0xff]  ;;  %v8901_v17 = vld [vmem:[%s14045_s1 + $0x38c] sm:$0xf] }
 0x180   :  { %3758 = vmatpush.bf16.msrb.mxu2 %v7763_v32  ;;  %3771 = vmatpush.bf16.msrb.mxu3 %v7891_v37  ;;  %v6167_v32 = vor.u32 %v8849_v21, %v6164_v45  ;;  %v8845_v37 = vld [vmem:[%s14045_s1 + $0x1cc] sm:$0xf]  ;;  %v6388_v4 = vld [vmem:[%s14045_s1 + $0x3b8] sm:$0xf0] }
 0x181   :  { %v6151_v46 = vor.u32 %v8845_v37, %v6148_v39  ;;  %v6391_v12 = vor.u32 %v8905_v3, %v6388_v4  ;;  %v6116_v13 = vld [vmem:[%s14045_s1 + $0x198] sm:$0xf0]  ;;  %v8801_v45 = vld [vmem:[%s14045_s1 + $0x6c] sm:$0xf] }
 0x182   :  { %v6244_v15 = vld [vmem:[%s14045_s1 + $0x298] sm:$0xf0]  ;;  %v6119_v48 = vor.u32 %v8837_v11, %v6116_v13  ;;  %v8833_v23 = vld [vmem:[%s14045_s1 + $0x16c] sm:$0xf] }
 0x183   :  { %3733 = vmatpush.bf16.msrb.mxu0 %v7491_v50  ;;  %3746 = vmatpush.bf16.msrb.mxu1 %v7619_v55  ;;  %v8809_v50 = vld [vmem:[%s14045_s1 + $0xac] sm:$0xf]  ;;  %v6372_v18 = vld [vmem:[%s14045_s1 + $0x398] sm:$0xf0] }
 0x184   :  { %3759 = vmatpush.bf16.msrb.mxu2 %v7747_v56  ;;  %3772 = vmatpush.bf16.msrb.mxu3 %v7875_v61  ;;  %v8841_v55 = vld [vmem:[%s14045_s1 + $0x1ac] sm:$0xf]  ;;  %v9519_v56 = vld [vmem:[#allocation1 + $0x24] sm:$0xff]  ;;  %v6260_v61 = vld [vmem:[%s14045_s1 + $0x2b8] sm:$0xf0] }
 0x185   :  { %v6135_v7 = vor.u32 %v8841_v55, %v6132_v58  ;;  %v6263_v8 = vor.u32 %v8873_v59, %v6260_v61  ;;  %v5972_v22 = vld [vmem:[%s14045_s1 + $0x78] sm:$0xf0]  ;;  %v8865_v25 = vld [vmem:[%s14045_s1 + $0x26c] sm:$0xf] }
 0x186   :  { %v6228_v26 = vld [vmem:[%s14045_s1 + $0x278] sm:$0xf0]  ;;  %v8797_v36 = vld [vmem:[%s14045_s1 + $0x4c] sm:$0xf] }
 0x187   :  { %3734 = vmatpush.bf16.msrb.mxu0 %v7475_v6  ;;  %3747 = vmatpush.bf16.msrb.mxu1 %v7603_v9  ;;  %v6007_v6 = vor.u32 %v8809_v50, %v6004_v53  ;;  %v8805_v9 = vld [vmem:[%s14045_s1 + $0x8c] sm:$0xf]  ;;  %v6231_v35 = vor.u32 %v8865_v25, %v6228_v26  ;;  %v5956_v37 = vld [vmem:[%s14045_s1 + $0x58] sm:$0xf0] }
 0x188   :  { %3760 = vmatpush.bf16.msrb.mxu2 %v7731_v10  ;;  %3773 = vmatpush.bf16.msrb.mxu3 %v7859_v14  ;;  %v5988_v10 = vld [vmem:[%s14045_s1 + $0x98] sm:$0xf0]  ;;  %v8869_v14 = vld [vmem:[%s14045_s1 + $0x28c] sm:$0xf]  ;;  %v5959_v55 = vor.u32 %v8797_v36, %v5956_v37 }
 0x189   :  { %v5991_v20 = vor.u32 %v8805_v9, %v5988_v10  ;;  %v6084_v41 = vld [vmem:[%s14045_s1 + $0x158] sm:$0xf0]  ;;  %v8861_v42 = vld [vmem:[%s14045_s1 + $0x24c] sm:$0xf] }
 0x18a   :  { %v6212_v43 = vld [vmem:[%s14045_s1 + $0x258] sm:$0xf0]  ;;  %v8793_v61 = vld [vmem:[%s14045_s1 + $0x2c] sm:$0xf] }
 0x18b   :  { %3735 = vmatpush.bf16.msrb.mxu0 %v7459_v51  ;;  %3748 = vmatpush.bf16.msrb.mxu1 %v7587_v47  ;;  %v3529_v16 = vpop.f32.mrf.mxu0  ;;  %v3542_v21 = vpop.f32.mrf.mxu1  ;;  %v6247_v51 = vor.u32 %v8869_v14, %v6244_v15  ;;  %v6340_v50 = vld [vmem:[%s14045_s1 + $0x358] sm:$0xf0]  ;;  %v6215_v59 = vor.u32 %v8861_v42, %v6212_v43  ;;  %v8789_v10 = vld [vmem:[%s14045_s1 + $0xc] sm:$0xf] }
 0x18c   :  { %3761 = vmatpush.bf16.msrb.mxu2 %v7715_v24  ;;  %3774 = vmatpush.bf16.msrb.mxu3 %v7843_v30  ;;  %v3530_v19 = vadd.f32 %v3529_v16, %v11936_v54  ;;  %v6375_v54 = vor.u32 %v8901_v17, %v6372_v18  ;;  %v6100_v24 = vld [vmem:[%s14045_s1 + $0x178] sm:$0xf0]  ;;  %v8897_v30 = vld [vmem:[%s14045_s1 + $0x36c] sm:$0xf] }
 0x18d   :  { %v6068_v4 = vld [vmem:[%s14045_s1 + $0x138] sm:$0xf0]  ;;  %v8821_v14 = vld [vmem:[%s14045_s1 + $0x10c] sm:$0xf] }
 0x18e   :  { %3736 = vmatmul.bf16.vlgmr.msrb.gmra.mxu0 %v9519_v56  ;;  %3749 = vmatmul.bf16.vlgmr.msrb.gmra.mxu1 %v9521_v63  ;;  %v3543_v47 = vadd.f32 %v3542_v21, %v3530_v19  ;;  %v8825_v63 = vld [vmem:[%s14045_s1 + $0x12c] sm:$0xf]  ;;  %v5924_v11 = vld [vmem:[%s14045_s1 + $0x18] sm:$0xf0] }
 0x18f   :  { %3780 = vmatpush.bf16.msra.mxu0 %v6039_v31  ;;  %3793 = vmatpush.bf16.msra.mxu1 %v6167_v32  ;;  %v6356_v31 = vld [vmem:[%s14045_s1 + $0x378] sm:$0xf0]  ;;  %v5975_v32 = vor.u32 %v8801_v45, %v5972_v22  ;;  %v8853_v16 = vld [vmem:[%s14045_s1 + $0x20c] sm:$0xf] }
 0x190   :  { %3806 = vmatpush.bf16.msra.mxu2 %v6295_v33  ;;  %3819 = vmatpush.bf16.msra.mxu3 %v6423_v38  ;;  %v6103_v33 = vor.u32 %v8833_v23, %v6100_v24  ;;  %v8829_v38 = vld [vmem:[%s14045_s1 + $0x14c] sm:$0xf]  ;;  %v6359_v39 = vor.u32 %v8897_v30, %v6356_v31  ;;  %v6052_v15 = vld [vmem:[%s14045_s1 + $0x118] sm:$0xf0]  ;;  %v5927_v23 = vor.u32 %v8789_v10, %v5924_v11 }
 0x191   :  { %3762 = vmatmul.bf16.vlgmr.msrb.gmra.mxu2 %v9520_v62  ;;  %3775 = vmatmul.bf16.vlgmr.msrb.gmra.mxu3 %v9522_v5  ;;  %v6087_v58 = vor.u32 %v8829_v38, %v6084_v41  ;;  %v5940_v62 = vld [vmem:[%s14045_s1 + $0x38] sm:$0xf0]  ;;  %v8857_v5 = vld [vmem:[%s14045_s1 + $0x22c] sm:$0xf]  ;;  %v6055_v25 = vor.u32 %v8821_v14, %v6052_v15 }
 0x192   :  { %v5943_v9 = vor.u32 %v8793_v61, %v5940_v62  ;;  %v6180_v18 = vld [vmem:[%s14045_s1 + $0x218] sm:$0xf0]  ;;  %v8885_v19 = vld [vmem:[%s14045_s1 + $0x30c] sm:$0xf] }
 0x193   :  { %3781 = vmatpush.bf16.msra.mxu0 %v6023_v44  ;;  %3794 = vmatpush.bf16.msra.mxu1 %v6151_v46  ;;  %v3531_v53 = vpop.f32.mrf.mxu0  ;;  %v3544_v56 = vpop.f32.mrf.mxu1  ;;  %v8977_v45 = vld [vmem:[%s14045_s1 + $0x5ec] sm:$0xf]  ;;  %v6804_v24 = vld [vmem:[%s14045_s1 + $0x6f8] sm:$0xf0]  ;;  %v6183_v26 = vor.u32 %v8853_v16, %v6180_v18 }
 0x194   :  { %3807 = vmatpush.bf16.msra.mxu2 %v6279_v49  ;;  %3820 = vmatpush.bf16.msra.mxu3 %v6407_v57  ;;  %v3555_v40 = vpop.f32.mrf.mxu2  ;;  %v3568_v46 = vpop.f32.mrf.mxu3  ;;  %v8893_v49 = vld [vmem:[%s14045_s1 + $0x34c] sm:$0xf]  ;;  %v6932_v31 = vld [vmem:[%s14045_s1 + $0x7f8] sm:$0xf0] }
 0x195   :  { %v3556_v44 = vadd.f32 %v3555_v40, %v3543_v47  ;;  %v6343_v3 = vor.u32 %v8893_v49, %v6340_v50  ;;  %v9009_v47 = vld [vmem:[%s14045_s1 + $0x6ec] sm:$0xf]  ;;  %v6532_v38 = vld [vmem:[%s14045_s1 + $0x4d8] sm:$0xf0] }
 0x196   :  { %v9041_v30 = vld [vmem:[%s14045_s1 + $0x7ec] sm:$0xf]  ;;  %v6807_v36 = vor.u32 %v9009_v47, %v6804_v24  ;;  %v6660_v41 = vld [vmem:[%s14045_s1 + $0x5d8] sm:$0xf0] }
 0x197   :  { %3782 = vmatpush.bf16.msra.mxu0 %v6007_v6  ;;  %3795 = vmatpush.bf16.msra.mxu1 %v6135_v7  ;;  %v12131_v57 = vadd.f32 %v3568_v46, %v3556_v44  ;;  %v6196_v6 = vld [vmem:[%s14045_s1 + $0x238] sm:$0xf0]  ;;  %v8889_v7 = vld [vmem:[%s14045_s1 + $0x32c] sm:$0xf]  ;;  %v6935_v40 = vor.u32 %v9041_v30, %v6932_v31 }
 0x198   :  { %3808 = vmatpush.bf16.msra.mxu2 %v6263_v8  ;;  %3821 = vmatpush.bf16.msra.mxu3 %v6391_v12  ;;  %v6324_v8 = vld [vmem:[%s14045_s1 + $0x338] sm:$0xf0]  ;;  %v6071_v12 = vor.u32 %v8825_v63, %v6068_v4  ;;  %v6199_v13 = vor.u32 %v8857_v5, %v6196_v6  ;;  %v8941_v37 = vld [vmem:[%s14045_s1 + $0x4cc] sm:$0xf] }
 0x199   :  { %v6327_v17 = vor.u32 %v8889_v7, %v6324_v8  ;;  %v9005_v42 = vld [vmem:[%s14045_s1 + $0x6cc] sm:$0xf]  ;;  %v6788_v43 = vld [vmem:[%s14045_s1 + $0x6d8] sm:$0xf0]  ;;  %v6535_v49 = vor.u32 %v8941_v37, %v6532_v38 }
 0x19a   :  { %v9037_v44 = vld [vmem:[%s14045_s1 + $0x7cc] sm:$0xf]  ;;  %v6916_v46 = vld [vmem:[%s14045_s1 + $0x7d8] sm:$0xf0]  ;;  %v6791_v53 = vor.u32 %v9005_v42, %v6788_v43 }
 0x19b   :  { %3783 = vmatpush.bf16.msra.mxu0 %v5991_v20  ;;  %3796 = vmatpush.bf16.msra.mxu1 %v6119_v48  ;;  %v6308_v20 = vld [vmem:[%s14045_s1 + $0x318] sm:$0xf0]  ;;  %v8945_v48 = vld [vmem:[%s14045_s1 + $0x4ec] sm:$0xf] }
 0x19c   :  { %3809 = vmatpush.bf16.msra.mxu2 %v6247_v51  ;;  %3822 = vmatpush.bf16.msra.mxu3 %v6375_v54  ;;  %v3557_v21 = vpop.f32.mrf.mxu2  ;;  %v6548_v51 = vld [vmem:[%s14045_s1 + $0x4f8] sm:$0xf0]  ;;  %v3570_v22 = vpop.f32.mrf.mxu3  ;;  %v9001_v62 = vld [vmem:[%s14045_s1 + $0x6ac] sm:$0xf] }
 0x19d   :  { %v6676_v54 = vld [vmem:[%s14045_s1 + $0x5f8] sm:$0xf0]  ;;  %v8933_v6 = vld [vmem:[%s14045_s1 + $0x48c] sm:$0xf] }
 0x19e   :  { %v6516_v56 = vld [vmem:[%s14045_s1 + $0x4b8] sm:$0xf0]  ;;  %v8997_v11 = vld [vmem:[%s14045_s1 + $0x68c] sm:$0xf] }
 0x19f   :  { %3784 = vmatpush.bf16.msra.mxu0 %v5975_v32  ;;  %3797 = vmatpush.bf16.msra.mxu1 %v6103_v33  ;;  %v6311_v32 = vor.u32 %v8885_v19, %v6308_v20  ;;  %v6551_v33 = vor.u32 %v8945_v48, %v6548_v51  ;;  %v6644_v61 = vld [vmem:[%s14045_s1 + $0x5b8] sm:$0xf0]  ;;  %v8929_v19 = vld [vmem:[%s14045_s1 + $0x46c] sm:$0xf] }
 0x1a0   :  { %3810 = vmatpush.bf16.msra.mxu2 %v6231_v35  ;;  %3823 = vmatpush.bf16.msra.mxu3 %v6359_v39  ;;  %v6679_v35 = vor.u32 %v8977_v45, %v6676_v54  ;;  %v8973_v39 = vld [vmem:[%s14045_s1 + $0x5cc] sm:$0xf]  ;;  %v6772_v63 = vld [vmem:[%s14045_s1 + $0x6b8] sm:$0xf0] }
 0x1a1   :  { %v6663_v50 = vor.u32 %v8973_v39, %v6660_v41  ;;  %v6900_v4 = vld [vmem:[%s14045_s1 + $0x7b8] sm:$0xf0]  ;;  %v6775_v7 = vor.u32 %v9001_v62, %v6772_v63  ;;  %v8961_v21 = vld [vmem:[%s14045_s1 + $0x56c] sm:$0xf] }
 0x1a2   :  { %v6500_v8 = vld [vmem:[%s14045_s1 + $0x498] sm:$0xf0]  ;;  %v9025_v47 = vld [vmem:[%s14045_s1 + $0x76c] sm:$0xf] }
 0x1a3   :  { %3785 = vmatpush.bf16.msra.mxu0 %v5959_v55  ;;  %3798 = vmatpush.bf16.msra.mxu1 %v6087_v58  ;;  %v8937_v55 = vld [vmem:[%s14045_s1 + $0x4ac] sm:$0xf]  ;;  %v6628_v10 = vld [vmem:[%s14045_s1 + $0x598] sm:$0xf0]  ;;  %v6503_v15 = vor.u32 %v8933_v6, %v6500_v8 }
 0x1a4   :  { %3811 = vmatpush.bf16.msra.mxu2 %v6215_v59  ;;  %3824 = vmatpush.bf16.msra.mxu3 %v6343_v3  ;;  %v8969_v58 = vld [vmem:[%s14045_s1 + $0x5ac] sm:$0xf]  ;;  %v6919_v59 = vor.u32 %v9037_v44, %v6916_v46  ;;  %v6519_v5 = vor.u32 %v8937_v55, %v6516_v56  ;;  %v6884_v14 = vld [vmem:[%s14045_s1 + $0x798] sm:$0xf0] }
 0x1a5   :  { %v9033_v3 = vld [vmem:[%s14045_s1 + $0x7ac] sm:$0xf]  ;;  %v6484_v20 = vld [vmem:[%s14045_s1 + $0x478] sm:$0xf0] }
 0x1a6   :  { %v6612_v22 = vld [vmem:[%s14045_s1 + $0x578] sm:$0xf0]  ;;  %v8989_v39 = vld [vmem:[%s14045_s1 + $0x64c] sm:$0xf] }
 0x1a7   :  { %3786 = vmatpush.bf16.msra.mxu0 %v5943_v9  ;;  %3799 = vmatpush.bf16.msra.mxu1 %v6071_v12  ;;  %v6756_v12 = vld [vmem:[%s14045_s1 + $0x698] sm:$0xf0]  ;;  %v6615_v30 = vor.u32 %v8961_v21, %v6612_v22  ;;  %v9021_v43 = vld [vmem:[%s14045_s1 + $0x74c] sm:$0xf] }
 0x1a8   :  { %3812 = vmatpush.bf16.msra.mxu2 %v6199_v13  ;;  %3825 = vmatpush.bf16.msra.mxu3 %v6327_v17  ;;  %v9029_v13 = vld [vmem:[%s14045_s1 + $0x78c] sm:$0xf]  ;;  %v6759_v18 = vor.u32 %v8997_v11, %v6756_v12  ;;  %v6740_v54 = vld [vmem:[%s14045_s1 + $0x678] sm:$0xf0] }
 0x1a9   :  { %v6887_v45 = vor.u32 %v9029_v13, %v6884_v14  ;;  %v6868_v24 = vld [vmem:[%s14045_s1 + $0x778] sm:$0xf0]  ;;  %v8921_v56 = vld [vmem:[%s14045_s1 + $0x42c] sm:$0xf] }
 0x1aa   :  { %v6871_v37 = vor.u32 %v9025_v47, %v6868_v24  ;;  %v6596_v38 = vld [vmem:[%s14045_s1 + $0x558] sm:$0xf0]  ;;  %v8981_v11 = vld [vmem:[%s14045_s1 + $0x60c] sm:$0xf] }
 0x1ab   :  { %3787 = vmatpush.bf16.msra.mxu0 %v5927_v23  ;;  %3800 = vmatpush.bf16.msra.mxu1 %v6055_v25  ;;  %v3581_v16 = vpop.f32.mrf.mxu0  ;;  %v3594_v51 = vpop.f32.mrf.mxu1  ;;  %v8993_v23 = vld [vmem:[%s14045_s1 + $0x66c] sm:$0xf]  ;;  %v6852_v44 = vld [vmem:[%s14045_s1 + $0x758] sm:$0xf0] }
 0x1ac   :  { %3813 = vmatpush.bf16.msra.mxu2 %v6183_v26  ;;  %3826 = vmatpush.bf16.msra.mxu3 %v6311_v32  ;;  %v6487_v26 = vor.u32 %v8929_v19, %v6484_v20  ;;  %v6743_v31 = vor.u32 %v8993_v23, %v6740_v54  ;;  %v8925_v32 = vld [vmem:[%s14045_s1 + $0x44c] sm:$0xf]  ;;  %v6855_v62 = vor.u32 %v9021_v43, %v6852_v44  ;;  %v6580_v63 = vld [vmem:[%s14045_s1 + $0x538] sm:$0xf0] }
 0x1ad   :  { %v6836_v6 = vld [vmem:[%s14045_s1 + $0x738] sm:$0xf0]  ;;  %v9105_v20 = vld [vmem:[%s14045_s1 + $0x9ec] sm:$0xf] }
 0x1ae   :  { %3788 = vmatmul.bf16.vlgmr.msra.gmra.mxu0 %v9934_v28  ;;  %3801 = vmatmul.bf16.vlgmr.msra.gmra.mxu1 %v9944_v34  ;;  %v8965_v28 = vld [vmem:[%s14045_s1 + $0x58c] sm:$0xf]  ;;  %v6903_v34 = vor.u32 %v9033_v3, %v6900_v4  ;;  %v6708_v4 = vld [vmem:[%s14045_s1 + $0x638] sm:$0xf0] }
 0x1af   :  { %3832 = vmatpush.bf16.msrb.mxu0 %v6551_v33  ;;  %3845 = vmatpush.bf16.msrb.mxu1 %v6679_v35  ;;  %v6631_v17 = vor.u32 %v8965_v28, %v6628_v10  ;;  %v6468_v33 = vld [vmem:[%s14045_s1 + $0x458] sm:$0xf0]  ;;  %v8957_v35 = vld [vmem:[%s14045_s1 + $0x54c] sm:$0xf] }
 0x1b0   :  { %3858 = vmatpush.bf16.msrb.mxu2 %v6807_v36  ;;  %3871 = vmatpush.bf16.msrb.mxu3 %v6935_v40  ;;  %v6724_v40 = vld [vmem:[%s14045_s1 + $0x658] sm:$0xf0]  ;;  %v6471_v46 = vor.u32 %v8925_v32, %v6468_v33  ;;  %v8985_v3 = vld [vmem:[%s14045_s1 + $0x62c] sm:$0xf] }
 0x1b1   :  { %3814 = vmatmul.bf16.vlgmr.msra.gmra.mxu2 %v9932_v27  ;;  %3827 = vmatmul.bf16.vlgmr.msra.gmra.mxu3 %v9936_v29  ;;  %v6647_v27 = vor.u32 %v8969_v58, %v6644_v61  ;;  %v12269_v29 = vld [vmem:[%s14046_s2] sm:$0xf]  ;;  %v6727_v55 = vor.u32 %v8989_v39, %v6724_v40  ;;  %v6452_v58 = vld [vmem:[%s14045_s1 + $0x438] sm:$0xf0]  ;;  %v9169_v54 = vld [vmem:[%s14045_s1 + $0xbec] sm:$0xf] }
 0x1b2   :  { %v554_v9 = vperm.slane %v12269_v29, 2  ;;  %v6436_v8 = vld [vmem:[%s14045_s1 + $0x418] sm:$0xf0]  ;;  %v9101_v33 = vld [vmem:[%s14045_s1 + $0x9cc] sm:$0xf] }
 0x1b3   :  { %3833 = vmatpush.bf16.msrb.mxu0 %v6535_v49  ;;  %3846 = vmatpush.bf16.msrb.mxu1 %v6663_v50  ;;  %v3583_v50 = vpop.f32.mrf.mxu0  ;;  %v3596_v61 = vpop.f32.mrf.mxu1  ;;  %v6564_v10 = vld [vmem:[%s14045_s1 + $0x518] sm:$0xf0]  ;;  %v9165_v39 = vld [vmem:[%s14045_s1 + $0xbcc] sm:$0xf] }
 0x1b4   :  { %3859 = vmatpush.bf16.msrb.mxu2 %v6791_v53  ;;  %3872 = vmatpush.bf16.msrb.mxu3 %v6919_v59  ;;  %v3582_v48 = vadd.f32 %v3581_v16, %v554_v9  ;;  %v3607_v36 = vpop.f32.mrf.mxu2  ;;  %v3620_v42 = vpop.f32.mrf.mxu3  ;;  %v6599_v53 = vor.u32 %v8957_v35, %v6596_v38  ;;  %v8953_v59 = vld [vmem:[%s14045_s1 + $0x52c] sm:$0xf]  ;;  %v6711_v9 = vor.u32 %v8985_v3, %v6708_v4  ;;  %v6692_v14 = vld [vmem:[%s14045_s1 + $0x618] sm:$0xf0] }
 0x1b5   :  { %v6583_v28 = vor.u32 %v8953_v59, %v6580_v63  ;;  %v6820_v16 = vld [vmem:[%s14045_s1 + $0x718] sm:$0xf0]  ;;  %v6695_v23 = vor.u32 %v8981_v11, %v6692_v14  ;;  %v9065_v44 = vld [vmem:[%s14045_s1 + $0x8ac] sm:$0xf] }
 0x1b6   :  { %v3595_v25 = vadd.f32 %v3594_v51, %v3582_v48  ;;  %v7060_v19 = vld [vmem:[%s14045_s1 + $0x8f8] sm:$0xf0]  ;;  %v9137_v51 = vld [vmem:[%s14045_s1 + $0xaec] sm:$0xf] }
 0x1b7   :  { %3834 = vmatpush.bf16.msrb.mxu0 %v6519_v5  ;;  %3847 = vmatpush.bf16.msrb.mxu1 %v6647_v27  ;;  %v9017_v5 = vld [vmem:[%s14045_s1 + $0x72c] sm:$0xf]  ;;  %v6455_v27 = vor.u32 %v8921_v56, %v6452_v58  ;;  %v7188_v48 = vld [vmem:[%s14045_s1 + $0x9f8] sm:$0xf0] }
 0x1b8   :  { %3860 = vmatpush.bf16.msrb.mxu2 %v6775_v7  ;;  %3873 = vmatpush.bf16.msrb.mxu3 %v6903_v34  ;;  %v3608_v41 = vadd.f32 %v3607_v36, %v3595_v25  ;;  %v8917_v7 = vld [vmem:[%s14045_s1 + $0x40c] sm:$0xf]  ;;  %v6839_v13 = vor.u32 %v9017_v5, %v6836_v6  ;;  %v7444_v47 = vld [vmem:[%s14045_s1 + $0xbf8] sm:$0xf0] }
 0x1b9   :  { %v8949_v34 = vld [vmem:[%s14045_s1 + $0x50c] sm:$0xf]  ;;  %v6439_v21 = vor.u32 %v8917_v7, %v6436_v8  ;;  %v7044_v32 = vld [vmem:[%s14045_s1 + $0x8d8] sm:$0xf0]  ;;  %v7447_v35 = vor.u32 %v9169_v54, %v7444_v47 }
 0x1ba   :  { %v12335_v49 = vadd.f32 %v3620_v42, %v3608_v41  ;;  %v6567_v22 = vor.u32 %v8949_v34, %v6564_v10  ;;  %v7172_v36 = vld [vmem:[%s14045_s1 + $0x9d8] sm:$0xf0]  ;;  %v9097_v50 = vld [vmem:[%s14045_s1 + $0x9ac] sm:$0xf] }
 0x1bb   :  { %3835 = vmatpush.bf16.msrb.mxu0 %v6503_v15  ;;  %3848 = vmatpush.bf16.msrb.mxu1 %v6631_v17  ;;  %v9013_v15 = vld [vmem:[%s14045_s1 + $0x70c] sm:$0xf]  ;;  %v7300_v38 = vld [vmem:[%s14045_s1 + $0xad8] sm:$0xf0]  ;;  %v7175_v42 = vor.u32 %v9101_v33, %v7172_v36 }
 0x1bc   :  { %3861 = vmatpush.bf16.msrb.mxu2 %v6759_v18  ;;  %3874 = vmatpush.bf16.msrb.mxu3 %v6887_v45  ;;  %v3609_v12 = vpop.f32.mrf.mxu2  ;;  %v3622_v17 = vpop.f32.mrf.mxu3  ;;  %v9073_v18 = vld [vmem:[%s14045_s1 + $0x8ec] sm:$0xf]  ;;  %v7316_v45 = vld [vmem:[%s14045_s1 + $0xaf8] sm:$0xf0]  ;;  %v6823_v24 = vor.u32 %v9013_v15, %v6820_v16 }
 0x1bd   :  { %v7063_v25 = vor.u32 %v9073_v18, %v7060_v19  ;;  %v7428_v40 = vld [vmem:[%s14045_s1 + $0xbd8] sm:$0xf0]  ;;  %v9129_v56 = vld [vmem:[%s14045_s1 + $0xaac] sm:$0xf] }
 0x1be   :  { %v7284_v58 = vld [vmem:[%s14045_s1 + $0xab8] sm:$0xf0]  ;;  %v9161_v59 = vld [vmem:[%s14045_s1 + $0xbac] sm:$0xf] }
 0x1bf   :  { %3836 = vmatpush.bf16.msrb.mxu0 %v6487_v26  ;;  %3849 = vmatpush.bf16.msrb.mxu1 %v6615_v30  ;;  %v7191_v26 = vor.u32 %v9105_v20, %v7188_v48  ;;  %v7319_v30 = vor.u32 %v9137_v51, %v7316_v45  ;;  %v7287_v63 = vor.u32 %v9129_v56, %v7284_v58  ;;  %v9061_v3 = vld [vmem:[%s14045_s1 + $0x88c] sm:$0xf]  ;;  %v7012_v4 = vld [vmem:[%s14045_s1 + $0x898] sm:$0xf0] }
 0x1c0   :  { %3862 = vmatpush.bf16.msrb.mxu2 %v6743_v31  ;;  %3875 = vmatpush.bf16.msrb.mxu3 %v6871_v37  ;;  %v9069_v31 = vld [vmem:[%s14045_s1 + $0x8cc] sm:$0xf]  ;;  %v7268_v6 = vld [vmem:[%s14045_s1 + $0xa98] sm:$0xf0]  ;;  %v7015_v8 = vor.u32 %v9061_v3, %v7012_v4 }
 0x1c1   :  { %v9133_v37 = vld [vmem:[%s14045_s1 + $0xacc] sm:$0xf]  ;;  %v7047_v41 = vor.u32 %v9069_v31, %v7044_v32  ;;  %v7396_v7 = vld [vmem:[%s14045_s1 + $0xb98] sm:$0xf0] }
 0x1c2   :  { %v7303_v43 = vor.u32 %v9133_v37, %v7300_v38  ;;  %v9125_v5 = vld [vmem:[%s14045_s1 + $0xa8c] sm:$0xf]  ;;  %v6996_v11 = vld [vmem:[%s14045_s1 + $0x878] sm:$0xf0] }
 0x1c3   :  { %3837 = vmatpush.bf16.msrb.mxu0 %v6471_v46  ;;  %3850 = vmatpush.bf16.msrb.mxu1 %v6599_v53  ;;  %v7028_v46 = vld [vmem:[%s14045_s1 + $0x8b8] sm:$0xf0]  ;;  %v7431_v53 = vor.u32 %v9165_v39, %v7428_v40  ;;  %v7271_v34 = vor.u32 %v9125_v5, %v7268_v6  ;;  %v9057_v10 = vld [vmem:[%s14045_s1 + $0x86c] sm:$0xf] }
 0x1c4   :  { %3863 = vmatpush.bf16.msrb.mxu2 %v6727_v55  ;;  %3876 = vmatpush.bf16.msrb.mxu3 %v6855_v62  ;;  %v7156_v55 = vld [vmem:[%s14045_s1 + $0x9b8] sm:$0xf0]  ;;  %v7031_v61 = vor.u32 %v9065_v44, %v7028_v46  ;;  %v9089_v12 = vld [vmem:[%s14045_s1 + $0x96c] sm:$0xf]  ;;  %v6999_v20 = vor.u32 %v9057_v10, %v6996_v11 }
 0x1c5   :  { %v7159_v62 = vor.u32 %v9097_v50, %v7156_v55  ;;  %v7124_v15 = vld [vmem:[%s14045_s1 + $0x978] sm:$0xf0]  ;;  %v9121_v16 = vld [vmem:[%s14045_s1 + $0xa6c] sm:$0xf] }
 0x1c6   :  { %v7252_v17 = vld [vmem:[%s14045_s1 + $0xa78] sm:$0xf0]  ;;  %v9153_v18 = vld [vmem:[%s14045_s1 + $0xb6c] sm:$0xf] }
 0x1c7   :  { %3838 = vmatpush.bf16.msrb.mxu0 %v6455_v27  ;;  %3851 = vmatpush.bf16.msrb.mxu1 %v6583_v28  ;;  %v9157_v27 = vld [vmem:[%s14045_s1 + $0xb8c] sm:$0xf]  ;;  %v7380_v19 = vld [vmem:[%s14045_s1 + $0xb78] sm:$0xf0]  ;;  %v7255_v48 = vor.u32 %v9121_v16, %v7252_v17 }
 0x1c8   :  { %3864 = vmatpush.bf16.msrb.mxu2 %v6711_v9  ;;  %3877 = vmatpush.bf16.msrb.mxu3 %v6839_v13  ;;  %v7399_v14 = vor.u32 %v9157_v27, %v7396_v7  ;;  %v9053_v51 = vld [vmem:[%s14045_s1 + $0x84c] sm:$0xf]  ;;  %v6980_v45 = vld [vmem:[%s14045_s1 + $0x858] sm:$0xf0]  ;;  %v7383_v54 = vor.u32 %v9153_v18, %v7380_v19 }
 0x1c9   :  { %v7108_v47 = vld [vmem:[%s14045_s1 + $0x958] sm:$0xf0]  ;;  %v6983_v32 = vor.u32 %v9053_v51, %v6980_v45  ;;  %v9049_v37 = vld [vmem:[%s14045_s1 + $0x82c] sm:$0xf] }
 0x1ca   :  { %v7364_v31 = vld [vmem:[%s14045_s1 + $0xb58] sm:$0xf0]  ;;  %v9081_v39 = vld [vmem:[%s14045_s1 + $0x92c] sm:$0xf] }
 0x1cb   :  { %3839 = vmatpush.bf16.msrb.mxu0 %v6439_v21  ;;  %3852 = vmatpush.bf16.msrb.mxu1 %v6567_v22  ;;  %v12485_v28 = vpop.f32.mrf.mxu0  ;;  %v12496_v13 = vpop.f32.mrf.mxu1  ;;  %v7127_v21 = vor.u32 %v9089_v12, %v7124_v15  ;;  %v9085_v22 = vld [vmem:[%s14045_s1 + $0x94c] sm:$0xf]  ;;  %v6964_v38 = vld [vmem:[%s14045_s1 + $0x838] sm:$0xf0] }
 0x1cc   :  { %3865 = vmatpush.bf16.msrb.mxu2 %v6695_v23  ;;  %3878 = vmatpush.bf16.msrb.mxu3 %v6823_v24  ;;  %v9117_v24 = vld [vmem:[%s14045_s1 + $0xa4c] sm:$0xf]  ;;  %v7220_v44 = vld [vmem:[%s14045_s1 + $0xa38] sm:$0xf0] }
 0x1cd   :  { %v9145_v46 = vld [vmem:[%s14045_s1 + $0xb2c] sm:$0xf]  ;;  %v7348_v50 = vld [vmem:[%s14045_s1 + $0xb38] sm:$0xf0] }
 0x1ce   :  { %3840 = vmatmul.bf16.vlgmr.msrb.gmra.mxu0 %v10012_v0  ;;  %3853 = vmatmul.bf16.vlgmr.msrb.gmra.mxu1 %v10016_v2  ;;  %v9093_v0 = vld [vmem:[%s14045_s1 + $0x98c] sm:$0xf]  ;;  %v7140_v2 = vld [vmem:[%s14045_s1 + $0x998] sm:$0xf0]  ;;  %v7351_v3 = vor.u32 %v9145_v46, %v7348_v50 }
 0x1cf   :  { %3884 = vmatpush.bf16.msra.mxu0 %v7063_v25  ;;  %3897 = vmatpush.bf16.msra.mxu1 %v7191_v26  ;;  %v7143_v9 = vor.u32 %v9093_v0, %v7140_v2  ;;  %v7236_v25 = vld [vmem:[%s14045_s1 + $0xa58] sm:$0xf0]  ;;  %v9045_v55 = vld [vmem:[%s14045_s1 + $0x80c] sm:$0xf] }
 0x1d0   :  { %3910 = vmatpush.bf16.msra.mxu2 %v7319_v30  ;;  %3923 = vmatpush.bf16.msra.mxu3 %v7447_v35  ;;  %v9149_v30 = vld [vmem:[%s14045_s1 + $0xb4c] sm:$0xf]  ;;  %v7111_v35 = vor.u32 %v9085_v22, %v7108_v47  ;;  %v7239_v36 = vor.u32 %v9117_v24, %v7236_v25  ;;  %v6948_v56 = vld [vmem:[%s14045_s1 + $0x818] sm:$0xf0] }
 0x1d1   :  { %3866 = vmatmul.bf16.vlgmr.msrb.gmra.mxu2 %v10007_v60  ;;  %v7412_v60 = vld [vmem:[%s14045_s1 + $0xbb8] sm:$0xf0]  ;;  %3879 = vmatmul.bf16.vlgmr.msrb.gmra.mxu3 %v10014_v1  ;;  %v9141_v0 = vld [vmem:[%s14045_s1 + $0xb0c] sm:$0xf]  ;;  %v6951_v7 = vor.u32 %v9045_v55, %v6948_v56 }
 0x1d2   :  { %v7415_v1 = vor.u32 %v9161_v59, %v7412_v60  ;;  %v9077_v60 = vld [vmem:[%s14045_s1 + $0x90c] sm:$0xf]  ;;  %v7204_v4 = vld [vmem:[%s14045_s1 + $0xa18] sm:$0xf0] }
 0x1d3   :  { %3885 = vmatpush.bf16.msra.mxu0 %v7047_v41  ;;  %3898 = vmatpush.bf16.msra.mxu1 %v7175_v42  ;;  %v3635_v33 = vpop.f32.mrf.mxu0  ;;  %v3648_v40 = vpop.f32.mrf.mxu1  ;;  %v7367_v41 = vor.u32 %v9149_v30, %v7364_v31  ;;  %v7092_v42 = vld [vmem:[%s14045_s1 + $0x938] sm:$0xf0]  ;;  %v9201_v5 = vld [vmem:[%s14045_s1 + $0xcec] sm:$0xf] }
 0x1d4   :  { %3911 = vmatpush.bf16.msra.mxu2 %v7303_v43  ;;  %3924 = vmatpush.bf16.msra.mxu3 %v7431_v53  ;;  %v12522_v23 = vpop.f32.mrf.mxu2  ;;  %v12533_v26 = vpop.f32.mrf.mxu3  ;;  %v9113_v43 = vld [vmem:[%s14045_s1 + $0xa2c] sm:$0xf]  ;;  %v6967_v53 = vor.u32 %v9049_v37, %v6964_v38  ;;  %v7095_v58 = vor.u32 %v9081_v39, %v7092_v42  ;;  %v7572_v6 = vld [vmem:[%s14045_s1 + $0xcf8] sm:$0xf0]  ;;  %v9525_v40 = vld [vmem:[#allocation1 + $0x12] sm:$0xff] }
 0x1d5   :  { %v7223_v59 = vor.u32 %v9113_v43, %v7220_v44  ;;  %v9233_v27 = vld [vmem:[%s14045_s1 + $0xdec] sm:$0xf]  ;;  %v7575_v16 = vor.u32 %v9201_v5, %v7572_v6  ;;  %v7684_v51 = vld [vmem:[%s14045_s1 + $0xdd8] sm:$0xf0] }
 0x1d6   :  { %v9297_v12 = vld [vmem:[%s14045_s1 + $0xfec] sm:$0xf]  ;;  %v7812_v22 = vld [vmem:[%s14045_s1 + $0xed8] sm:$0xf0] }
 0x1d7   :  { %3886 = vmatpush.bf16.msra.mxu0 %v7031_v61  ;;  %3899 = vmatpush.bf16.msra.mxu1 %v7159_v62  ;;  %v7076_v61 = vld [vmem:[%s14045_s1 + $0x918] sm:$0xf0]  ;;  %v9109_v62 = vld [vmem:[%s14045_s1 + $0xa0c] sm:$0xf] }
 0x1d8   :  { %3912 = vmatpush.bf16.msra.mxu2 %v7287_v63  ;;  %3925 = vmatpush.bf16.msra.mxu3 %v7415_v1  ;;  %v7332_v1 = vld [vmem:[%s14045_s1 + $0xb18] sm:$0xf0]  ;;  %v7079_v10 = vor.u32 %v9077_v60, %v7076_v61  ;;  %v7207_v11 = vor.u32 %v9109_v62, %v7204_v4  ;;  %v9197_v19 = vld [vmem:[%s14045_s1 + $0xccc] sm:$0xf] }
 0x1d9   :  { %v7335_v15 = vor.u32 %v9141_v0, %v7332_v1  ;;  %v9261_v45 = vld [vmem:[%s14045_s1 + $0xecc] sm:$0xf]  ;;  %v7940_v47 = vld [vmem:[%s14045_s1 + $0xfd8] sm:$0xf0] }
 0x1da   :  { %v7815_v30 = vor.u32 %v9261_v45, %v7812_v22  ;;  %v9193_v31 = vld [vmem:[%s14045_s1 + $0xcac] sm:$0xf]  ;;  %v7668_v37 = vld [vmem:[%s14045_s1 + $0xdb8] sm:$0xf0] }
 0x1db   :  { %3887 = vmatpush.bf16.msra.mxu0 %v7015_v8  ;;  %3900 = vmatpush.bf16.msra.mxu1 %v7143_v9  ;;  %v7700_v8 = vld [vmem:[%s14045_s1 + $0xdf8] sm:$0xf0]  ;;  %v9265_v9 = vld [vmem:[%s14045_s1 + $0xeec] sm:$0xf] }
 0x1dc   :  { %3913 = vmatpush.bf16.msra.mxu2 %v7271_v34  ;;  %3926 = vmatpush.bf16.msra.mxu3 %v7399_v14  ;;  %v3661_v63 = vpop.f32.mrf.mxu2  ;;  %v3674_v2 = vpop.f32.mrf.mxu3  ;;  %v7828_v34 = vld [vmem:[%s14045_s1 + $0xef8] sm:$0xf0]  ;;  %v7703_v17 = vor.u32 %v9233_v27, %v7700_v8  ;;  %v9225_v33 = vld [vmem:[%s14045_s1 + $0xdac] sm:$0xf] }
 0x1dd   :  { %v7956_v14 = vld [vmem:[%s14045_s1 + $0xff8] sm:$0xf0]  ;;  %v7831_v18 = vor.u32 %v9265_v9, %v7828_v34  ;;  %v9257_v38 = vld [vmem:[%s14045_s1 + $0xeac] sm:$0xf]  ;;  %v7671_v50 = vor.u32 %v9225_v33, %v7668_v37 }
 0x1de   :  { %v7796_v39 = vld [vmem:[%s14045_s1 + $0xeb8] sm:$0xf0]  ;;  %v9289_v42 = vld [vmem:[%s14045_s1 + $0xfac] sm:$0xf] }
 0x1df   :  { %3888 = vmatpush.bf16.msra.mxu0 %v6999_v20  ;;  %3901 = vmatpush.bf16.msra.mxu1 %v7127_v21  ;;  %v7556_v20 = vld [vmem:[%s14045_s1 + $0xcd8] sm:$0xf0]  ;;  %v9229_v21 = vld [vmem:[%s14045_s1 + $0xdcc] sm:$0xf] }
 0x1e0   :  { %3914 = vmatpush.bf16.msra.mxu2 %v7255_v48  ;;  %3927 = vmatpush.bf16.msra.mxu3 %v7383_v54  ;;  %v7959_v48 = vor.u32 %v9297_v12, %v7956_v14  ;;  %v9293_v54 = vld [vmem:[%s14045_s1 + $0xfcc] sm:$0xf]  ;;  %v7559_v24 = vor.u32 %v9197_v19, %v7556_v20  ;;  %v7687_v25 = vor.u32 %v9229_v21, %v7684_v51  ;;  %v7924_v43 = vld [vmem:[%s14045_s1 + $0xfb8] sm:$0xf0] }
 0x1e1   :  { %v9527_v44 = vld [vmem:[#allocation1 + $0x1b] sm:$0xff]  ;;  %v9189_v55 = vld [vmem:[%s14045_s1 + $0xc8c] sm:$0xf] }
 0x1e2   :  { %v7524_v56 = vld [vmem:[%s14045_s1 + $0xc98] sm:$0xf0]  ;;  %v9253_v61 = vld [vmem:[%s14045_s1 + $0xe8c] sm:$0xf] }
 0x1e3   :  { %3889 = vmatpush.bf16.msra.mxu0 %v6983_v32  ;;  %3902 = vmatpush.bf16.msra.mxu1 %v7111_v35  ;;  %v7540_v32 = vld [vmem:[%s14045_s1 + $0xcb8] sm:$0xf0]  ;;  %v9524_v35 = vld [vmem:[#allocation1] sm:$0xff]  ;;  %v7527_v0 = vor.u32 %v9189_v55, %v7524_v56  ;;  %v9185_v6 = vld [vmem:[%s14045_s1 + $0xc6c] sm:$0xf] }
 0x1e4   :  { %3915 = vmatpush.bf16.msra.mxu2 %v7239_v36  ;;  %3928 = vmatpush.bf16.msra.mxu3 %v7367_v41  ;;  %v7943_v36 = vor.u32 %v9293_v54, %v7940_v47  ;;  %v9526_v41 = vld [vmem:[#allocation1 + $0x9] sm:$0xff]  ;;  %v7543_v46 = vor.u32 %v9193_v31, %v7540_v32  ;;  %v7652_v60 = vld [vmem:[%s14045_s1 + $0xd98] sm:$0xf0] }
 0x1e5   :  { %v7780_v62 = vld [vmem:[%s14045_s1 + $0xe98] sm:$0xf0]  ;;  %v9249_v34 = vld [vmem:[%s14045_s1 + $0xe6c] sm:$0xf] }
 0x1e6   :  { %v7908_v4 = vld [vmem:[%s14045_s1 + $0xf98] sm:$0xf0]  ;;  %v7783_v5 = vor.u32 %v9253_v61, %v7780_v62  ;;  %v9213_v19 = vld [vmem:[%s14045_s1 + $0xd4c] sm:$0xf] }
 0x1e7   :  { %3890 = vmatpush.bf16.msra.mxu0 %v6967_v53  ;;  %3903 = vmatpush.bf16.msra.mxu1 %v7095_v58  ;;  %v7799_v53 = vor.u32 %v9257_v38, %v7796_v39  ;;  %v9221_v58 = vld [vmem:[%s14045_s1 + $0xd8c] sm:$0xf]  ;;  %v7508_v27 = vld [vmem:[%s14045_s1 + $0xc78] sm:$0xf0] }
 0x1e8   :  { %3916 = vmatpush.bf16.msra.mxu2 %v7223_v59  ;;  %3929 = vmatpush.bf16.msra.mxu3 %v7351_v3  ;;  %v7927_v59 = vor.u32 %v9289_v42, %v7924_v43  ;;  %v9285_v3 = vld [vmem:[%s14045_s1 + $0xf8c] sm:$0xf]  ;;  %v7655_v2 = vor.u32 %v9221_v58, %v7652_v60  ;;  %v7636_v9 = vld [vmem:[%s14045_s1 + $0xd78] sm:$0xf0]  ;;  %v7511_v14 = vor.u32 %v9185_v6, %v7508_v27 }
 0x1e9   :  { %v7911_v8 = vor.u32 %v9285_v3, %v7908_v4  ;;  %v7892_v12 = vld [vmem:[%s14045_s1 + $0xf78] sm:$0xf0]  ;;  %v9245_v51 = vld [vmem:[%s14045_s1 + $0xe4c] sm:$0xf] }
 0x1ea   :  { %v7748_v45 = vld [vmem:[%s14045_s1 + $0xe58] sm:$0xf0]  ;;  %v9277_v54 = vld [vmem:[%s14045_s1 + $0xf4c] sm:$0xf] }
 0x1eb   :  { %3891 = vmatpush.bf16.msra.mxu0 %v6951_v7  ;;  %3904 = vmatpush.bf16.msra.mxu1 %v7079_v10  ;;  %v12679_v63 = vpop.f32.mrf.mxu0  ;;  %v12687_v1 = vpop.f32.mrf.mxu1  ;;  %v9217_v7 = vld [vmem:[%s14045_s1 + $0xd6c] sm:$0xf]  ;;  %v7764_v10 = vld [vmem:[%s14045_s1 + $0xe78] sm:$0xf0]  ;;  %v7751_v33 = vor.u32 %v9245_v51, %v7748_v45  ;;  %v9312_v51 = vld [vmem:[%s14047_s3 + $0x60] sm:$0xff] }
 0x1ec   :  { %3917 = vmatpush.bf16.msra.mxu2 %v7207_v11  ;;  %3930 = vmatpush.bf16.msra.mxu3 %v7335_v15  ;;  %v9281_v11 = vld [vmem:[%s14045_s1 + $0xf6c] sm:$0xf]  ;;  %v7639_v15 = vor.u32 %v9217_v7, %v7636_v9  ;;  %v7876_v47 = vld [vmem:[%s14045_s1 + $0xf58] sm:$0xf0]  ;;  %v9320_v45 = vld [vmem:[%s14047_s3 + $0xa0] sm:$0xff] }
 0x1ed   :  { %v7895_v20 = vor.u32 %v9281_v11, %v7892_v12  ;;  %v9209_v37 = vld [vmem:[%s14045_s1 + $0xd2c] sm:$0xf]  ;;  %v7732_v39 = vld [vmem:[%s14045_s1 + $0xe38] sm:$0xf0]  ;;  %v9528_v11 = vld [vmem:[#allocation1 + $0x24] sm:$0xff] }
 0x1ee   :  { %3892 = vmatmul.bf16.vlgmr.msra.gmra.mxu0 %v9524_v35  ;;  %3905 = vmatmul.bf16.vlgmr.msra.gmra.mxu1 %v9526_v41  ;;  %v9177_v35 = vld [vmem:[%s14045_s1 + $0xc2c] sm:$0xf]  ;;  %v7860_v41 = vld [vmem:[%s14045_s1 + $0xf38] sm:$0xf0] }
 0x1ef   :  { %3936 = vmatpush.bf16.msrb.mxu0 %v7575_v16  ;;  %3949 = vmatpush.bf16.msrb.mxu1 %v7703_v17  ;;  %v7767_v16 = vor.u32 %v9249_v34, %v7764_v10  ;;  %v9181_v17 = vld [vmem:[%s14045_s1 + $0xc4c] sm:$0xf]  ;;  %v7588_v56 = vld [vmem:[%s14045_s1 + $0xd18] sm:$0xf0]  ;;  %v9306_v34 = vld [vmem:[%s14047_s3 + $0x30] sm:$0xff] }
 0x1f0   :  { %3962 = vmatpush.bf16.msrb.mxu2 %v7831_v18  ;;  %3975 = vmatpush.bf16.msrb.mxu3 %v7959_v48  ;;  %v7492_v18 = vld [vmem:[%s14045_s1 + $0xc58] sm:$0xf0]  ;;  %v9241_v38 = vld [vmem:[%s14045_s1 + $0xe2c] sm:$0xf]  ;;  %v9314_v10 = vld [vmem:[%s14047_s3 + $0x70] sm:$0xff] }
 0x1f1   :  { %3918 = vmatmul.bf16.vlgmr.msra.gmra.mxu2 %v9525_v40  ;;  %3931 = vmatmul.bf16.vlgmr.msra.gmra.mxu3 %v9527_v44  ;;  %v7620_v48 = vld [vmem:[%s14045_s1 + $0xd58] sm:$0xf0]  ;;  %v9273_v40 = vld [vmem:[%s14045_s1 + $0xf2c] sm:$0xf] }
 0x1f2   :  { %v7623_v32 = vor.u32 %v9213_v19, %v7620_v48  ;;  %v9205_v55 = vld [vmem:[%s14045_s1 + $0xd0c] sm:$0xf]  ;;  %v7844_v62 = vld [vmem:[%s14045_s1 + $0xf18] sm:$0xf0] }
 0x1f3   :  { %3937 = vmatpush.bf16.msrb.mxu0 %v7559_v24  ;;  %3950 = vmatpush.bf16.msrb.mxu1 %v7687_v25  ;;  %v3687_v24 = vpop.f32.mrf.mxu0  ;;  %v3634_v25 = vadd.f32 %v12485_v28, %v12335_v49  ;;  %v3700_v31 = vpop.f32.mrf.mxu1  ;;  %v7879_v49 = vor.u32 %v9277_v54, %v7876_v47  ;;  %v7604_v28 = vld [vmem:[%s14045_s1 + $0xd38] sm:$0xf0]  ;;  %v9237_v58 = vld [vmem:[%s14045_s1 + $0xe0c] sm:$0xf] }
 0x1f4   :  { %3963 = vmatpush.bf16.msrb.mxu2 %v7815_v30  ;;  %3976 = vmatpush.bf16.msrb.mxu3 %v7943_v36  ;;  %v12722_v21 = vpop.f32.mrf.mxu2  ;;  %v12733_v22 = vpop.f32.mrf.mxu3  ;;  %v7495_v30 = vor.u32 %v9181_v17, %v7492_v18  ;;  %v7476_v36 = vld [vmem:[%s14045_s1 + $0xc38] sm:$0xf0]  ;;  %v7607_v44 = vor.u32 %v9209_v37, %v7604_v28  ;;  %v9269_v61 = vld [vmem:[%s14045_s1 + $0xf0c] sm:$0xf]  ;;  %v9318_v37 = vld [vmem:[%s14047_s3 + $0x90] sm:$0xff] }
 0x1f5   :  { %v3647_v42 = vadd.f32 %v12496_v13, %v3634_v25  ;;  %v7479_v43 = vor.u32 %v9177_v35, %v7476_v36  ;;  %v7863_v13 = vor.u32 %v9273_v40, %v7860_v41  ;;  %v7847_v6 = vor.u32 %v9269_v61, %v7844_v62  ;;  %v9307_v27 = vld [vmem:[%s14047_s3 + $0x38] sm:$0xff]  ;;  %v9529_v12 = vld [vmem:[#allocation1 + $0x2d] sm:$0xff] }
 0x1f6   :  { %v9315_v7 = vld [vmem:[%s14047_s3 + $0x78] sm:$0xff]  ;;  %v9313_v17 = vld [vmem:[%s14047_s3 + $0x68] sm:$0xff]  ;;  %v9310_v36 = vld [vmem:[%s14047_s3 + $0x50] sm:$0xff] }
 0x1f7   :  { %3938 = vmatpush.bf16.msrb.mxu0 %v7543_v46  ;;  %3951 = vmatpush.bf16.msrb.mxu1 %v7671_v50  ;;  %v7735_v46 = vor.u32 %v9241_v38, %v7732_v39  ;;  %v9173_v50 = vld [vmem:[%s14045_s1 + $0xc0c] sm:$0xf]  ;;  %v3660_v4 = vadd.f32 %v12522_v23, %v3647_v42  ;;  %v9323_v23 = vld [vmem:[%s14047_s3 + $0xb8] sm:$0xff] }
 0x1f8   :  { %3964 = vmatpush.bf16.msrb.mxu2 %v7799_v53  ;;  %3977 = vmatpush.bf16.msrb.mxu3 %v7927_v59  ;;  %v7460_v53 = vld [vmem:[%s14045_s1 + $0xc18] sm:$0xf0]  ;;  %v9321_v18 = vld [vmem:[%s14047_s3 + $0xa8] sm:$0xff] }
 0x1f9   :  { %v7716_v59 = vld [vmem:[%s14045_s1 + $0xe18] sm:$0xf0]  ;;  %v9301_v28 = vld [vmem:[%s14047_s3 + $0x8] sm:$0xff] }
 0x1fa   :  { %v9303_v47 = vld [vmem:[%s14047_s3 + $0x18] sm:$0xff]  ;;  %v9309_v38 = vld [vmem:[%s14047_s3 + $0x48] sm:$0xff] }
 0x1fb   :  { %3939 = vmatpush.bf16.msrb.mxu0 %v7527_v0  ;;  %3952 = vmatpush.bf16.msrb.mxu1 %v7655_v2  ;;  %v7463_v0 = vor.u32 %v9173_v50, %v7460_v53  ;;  %v7591_v2 = vor.u32 %v9205_v55, %v7588_v56  ;;  %v9311_v24 = vld [vmem:[%s14047_s3 + $0x58] sm:$0xff]  ;;  %v9317_v39 = vld [vmem:[%s14047_s3 + $0x88] sm:$0xff]  ;;  %v9316_v50 = vld [vmem:[%s14047_s3 + $0x80] sm:$0xff]  ;;  %v3989_v53 = vmax.f32 %v12131_v57, 0.0 }
 0x1fc   :  { %3965 = vmatpush.bf16.msrb.mxu2 %v7783_v5  ;;  %3978 = vmatpush.bf16.msrb.mxu3 %v7911_v8  ;;  %v3713_v60 = vpop.f32.mrf.mxu2  ;;  %v3726_v3 = vpop.f32.mrf.mxu3  ;;  %v7719_v5 = vor.u32 %v9237_v58, %v7716_v59  ;;  %v3673_v8 = vadd.f32 %v12533_v26, %v3660_v4  ;;  %v9322_v26 = vld [vmem:[%s14047_s3 + $0xb0] sm:$0xff]  ;;  %v9319_v25 = vld [vmem:[%s14047_s3 + $0x98] sm:$0xff] }
 0x1fd   :  { %v3993_v56 = vpack.c.bf16 %v3989_v53, %v3989_v53 }
 0x1fe   :  { %v3686_v9 = vadd.f32 %v12679_v63, %v3673_v8  ;;  %v9530_v63 = vld [vmem:[#allocation1 + $0x36] sm:$0xff] }
 0x1ff   :  { %3940 = vmatpush.bf16.msrb.mxu0 %v7511_v14  ;;  %3953 = vmatpush.bf16.msrb.mxu1 %v7639_v15  ;;  %v9531_v14 = vld [vmem:[#allocation1 + $0x3f] sm:$0xff] }
 0x200   :  { %3966 = vmatpush.bf16.msrb.mxu2 %v7767_v16  ;;  %3979 = vmatpush.bf16.msrb.mxu3 %v7895_v20  ;;  %v3699_v15 = vadd.f32 %v12687_v1, %v3686_v9  ;;  %v9305_v16 = vld [vmem:[%s14047_s3 + $0x28] sm:$0xff]  ;;  %v9304_v1 = vld [vmem:[%s14047_s3 + $0x20] sm:$0xff] }
 0x202   :  { %v3712_v19 = vadd.f32 %v12722_v21, %v3699_v15 }
 0x203   :  { %3941 = vmatpush.bf16.msrb.mxu0 %v7495_v30  ;;  %3954 = vmatpush.bf16.msrb.mxu1 %v7623_v32 }
 0x204   :  { %3967 = vmatpush.bf16.msrb.mxu2 %v7751_v33  ;;  %3980 = vmatpush.bf16.msrb.mxu3 %v7879_v49  ;;  %v3725_v54 = vadd.f32 %v12733_v22, %v3712_v19  ;;  %v9302_v33 = vld [vmem:[%s14047_s3 + $0x10] sm:$0xff] }
 0x207   :  { %3942 = vmatpush.bf16.msrb.mxu0 %v7479_v43  ;;  %3955 = vmatpush.bf16.msrb.mxu1 %v7607_v44  ;;  %v9300_v43 = vld [vmem:[%s14047_s3] sm:$0xff]  ;;  %v3988_v44 = vmax.f32 %v11341_v52, 0.0  ;;  %v555_v52 = vperm.slane %v12269_v29, 3 }
 0x208   :  { %3968 = vmatpush.bf16.msrb.mxu2 %v7735_v46  ;;  %3981 = vmatpush.bf16.msrb.mxu3 %v7863_v13  ;;  %v9308_v46 = vld [vmem:[%s14047_s3 + $0x40] sm:$0xff] }
 0x209   :  { %v3992_v13 = vpack.c.bf16 %v3988_v44, %v3988_v44 }
 0x20b   :  { %3943 = vmatpush.bf16.msrb.mxu0 %v7463_v0  ;;  %3956 = vmatpush.bf16.msrb.mxu1 %v7591_v2  ;;  %v3737_v20 = vpop.f32.mrf.mxu0  ;;  %v3750_v48 = vpop.f32.mrf.mxu1 }
 0x20c   :  { %3969 = vmatpush.bf16.msrb.mxu2 %v7719_v5  ;;  %3982 = vmatpush.bf16.msrb.mxu3 %v7847_v6  ;;  %v3738_v21 = vadd.f32 %v3737_v20, %v3725_v54 }
 0x20e   :  { %3944 = vmatmul.bf16.vlgmr.msrb.gmra.mxu0 %v9528_v11  ;;  %3957 = vmatmul.bf16.vlgmr.msrb.gmra.mxu1 %v9529_v12  ;;  %v3751_v22 = vadd.f32 %v3750_v48, %v3738_v21 }
 0x20f   :  { %4204 = vmatpush.bf16.msra.mxu0 %v9307_v27  ;;  %4217 = vmatpush.bf16.msra.mxu1 %v9315_v7 }
 0x210   :  { %4230 = vmatpush.bf16.msra.mxu2 %v9323_v23  ;;  %3983 = vmatmul.bf16.vlgmr.msrb.gmra.mxu3 %v9531_v14 }
 0x211   :  { %3970 = vmatmul.bf16.vlgmr.msrb.gmra.mxu2 %v9530_v63 }
 0x213   :  { %4205 = vmatpush.bf16.msra.mxu0 %v9306_v34  ;;  %4218 = vmatpush.bf16.msra.mxu1 %v9314_v10  ;;  %v3739_v32 = vpop.f32.mrf.mxu0  ;;  %v3752_v35 = vpop.f32.mrf.mxu1 }
 0x214   :  { %4231 = vmatpush.bf16.msra.mxu2 %v9322_v26  ;;  %v3763_v30 = vpop.f32.mrf.mxu2  ;;  %v3776_v31 = vpop.f32.mrf.mxu3 }
 0x215   :  { %v3764_v49 = vadd.f32 %v3763_v30, %v3751_v22 }
 0x217   :  { %4206 = vmatpush.bf16.msra.mxu0 %v9305_v16  ;;  %4219 = vmatpush.bf16.msra.mxu1 %v9313_v17  ;;  %v3777_v40 = vadd.f32 %v3776_v31, %v3764_v49 }
 0x218   :  { %4232 = vmatpush.bf16.msra.mxu2 %v9321_v18  ;;  %v9324_v18 = vld [vmem:[%s14047_s3 + $0xc0] sm:$0xff] }
 0x219   :  { %v3990_v55 = vmax.f32 %v3777_v40, 0.0  ;;  %4250 = vmatpush.bf16.msra.mxu3 %v9324_v18  ;;  %v9374_v18 = vld [vmem:[%s14051_s7 + $0x168] sm:$0xf0] }
 0x21b   :  { %4207 = vmatpush.bf16.msra.mxu0 %v9304_v1  ;;  %4220 = vmatpush.bf16.msra.mxu1 %v9312_v51  ;;  %v3994_v58 = vpack.c.bf16 %v3990_v55, %v3990_v55 }
 0x21c   :  { %4233 = vmatpush.bf16.msra.mxu2 %v9320_v45  ;;  %v3765_v41 = vpop.f32.mrf.mxu2  ;;  %v3778_v42 = vpop.f32.mrf.mxu3 }
 0x21f   :  { %4208 = vmatpush.bf16.msra.mxu0 %v9303_v47  ;;  %4221 = vmatpush.bf16.msra.mxu1 %v9311_v24 }
 0x220   :  { %4234 = vmatpush.bf16.msra.mxu2 %v9319_v25 }
 0x223   :  { %4209 = vmatpush.bf16.msra.mxu0 %v9302_v33  ;;  %4222 = vmatpush.bf16.msra.mxu1 %v9310_v36 }
 0x224   :  { %4235 = vmatpush.bf16.msra.mxu2 %v9318_v37 }
 0x227   :  { %4210 = vmatpush.bf16.msra.mxu0 %v9301_v28  ;;  %4223 = vmatpush.bf16.msra.mxu1 %v9309_v38  ;;  %v4261_v28 = vld [vmem:[%s14049_s5 + $0x20] sm:$0x33]  ;;  %v4262_v38 = vld [vmem:[%s14049_s5 + $0x28] sm:$0x33] }
 0x228   :  { %4236 = vmatpush.bf16.msra.mxu2 %v9317_v39  ;;  %v4287_v39 = vunpack.c.l.b16 %v4261_v28  ;;  %v4288_v40 = vunpack.c.h.b16 %v4261_v28  ;;  %v4289_v41 = vunpack.c.l.b16 %v4262_v38  ;;  %v4290_v42 = vunpack.c.h.b16 %v4262_v38  ;;  %v9416_v28 = vld [vmem:[%s14051_s7 + $0x2b8] sm:$0xf0]  ;;  %v9486_v38 = vld [vmem:[%s14051_s7 + $0x4e8] sm:$0xf0] }
 0x22a   :  { %v4296_v53 = vpack.c.b16 %v4288_v40, %v4288_v40  ;;  %v4297_v55 = vpack.c.b16 %v4289_v41, %v4289_v41  ;;  %v8671_v40 = vld [vmem:[%s14051_s7 + $0x498] sm:$0xf] }
 0x22b   :  { %4211 = vmatpush.bf16.msra.mxu0 %v9300_v43  ;;  %4224 = vmatpush.bf16.msra.mxu1 %v9308_v46  ;;  %v3789_v59 = vpop.f32.mrf.mxu0  ;;  %v3802_v61 = vpop.f32.mrf.mxu1 }
 0x22c   :  { %4237 = vmatpush.bf16.msra.mxu2 %v9316_v50  ;;  %v3790_v60 = vadd.f32 %v3789_v59, %v555_v52  ;;  %v4295_v50 = vpack.c.b16 %v4287_v39, %v4287_v39  ;;  %v4315_v52 = vsel %vm4307_vm1, %v4297_v55, 0 }
 0x22e   :  { %4212 = vmatmul.bf16.vlgmr.msra.gmra.mxu0 %v3992_v13  ;;  %4225 = vmatmul.bf16.vlgmr.msra.gmra.mxu1 %v3993_v56  ;;  %v3803_v62 = vadd.f32 %v3802_v61, %v3790_v60  ;;  %v4298_v13 = vpack.c.b16 %v4290_v42, %v4290_v42  ;;  %v4309_v56 = vsel %vm4307_vm1, %v4295_v50, 0  ;;  %v9505_v60 = vld [vmem:[%s14048_s4] ss:$0 sm:$0xff]  ;;  %v9479_v42 = vld [vmem:[%s14051_s7 + $0x4b0] sm:$0xf0] }
 0x22f   :  { %4238 = vmatmul.bf16.vlgmr.msra.gmra.mxu2 %v3994_v58  ;;  %v4312_v58 = vsel %vm4307_vm1, %v4296_v53, 0  ;;  %4326 = vmatpush.bf16.msrb.mxu3 %v4309_v56  ;;  %v9353_v50 = vld [vmem:[%s14051_s7 + $0xc0] sm:$0xf0] }
 0x230   :  { %v4318_v59 = vsel %vm4307_vm1, %v4298_v13, 0  ;;  %4339 = vmatpush.bf16.msrb.mxu0 %v4312_v58  ;;  %4352 = vmatpush.bf16.msrb.mxu1 %v4315_v52  ;;  %v8391_v13 = vld [vmem:[%s14051_s7 + $0x268] sm:$0xf]  ;;  %v9409_v56 = vld [vmem:[%s14051_s7 + $0x280] sm:$0xf0]  ;;  %v8672_v58 = vor.u32 %v9479_v42, %v8671_v40 }
 0x231   :  { %4365 = vmatpush.bf16.msrb.mxu2 %v4318_v59  ;;  %v8643_v59 = vld [vmem:[%s14051_s7 + $0x460] sm:$0xf]  ;;  %v9364_v40 = vld [vmem:[%s14051_s7 + $0x11c] sm:$0xf] }
 0x232   :  { %v9420_v42 = vld [vmem:[%s14051_s7 + $0x2dc] sm:$0xf] }
 0x233   :  { %v3791_v2 = vpop.f32.mrf.mxu0  ;;  %v3804_v5 = vpop.f32.mrf.mxu1 }
 0x234   :  { %v3815_v3 = vpop.f32.mrf.mxu2  ;;  %v3828_v0 = vpop.f32.mrf.mxu3 }
 0x235   :  { %v3816_v4 = vadd.f32 %v3815_v3, %v3803_v62 }
 0x237   :  { %v3829_v57 = vadd.f32 %v3828_v0, %v3816_v4 }
 0x23c   :  { %v3817_v6 = vpop.f32.mrf.mxu2  ;;  %v3830_v27 = vpop.f32.mrf.mxu3 }
 0x23d   :  { %v8063_v27 = vld [vmem:[%s14049_s5] sm:$0xf] }
 0x24b   :  { %v3841_v7 = vpop.f32.mrf.mxu0  ;;  %v3854_v23 = vpop.f32.mrf.mxu1 }
 0x24c   :  { %v3842_v63 = vadd.f32 %v3841_v7, %v3829_v57  ;;  %v9327_v7 = vld [vmem:[%s14049_s5 + $0xc] sm:$0xf0] }
 0x24e   :  { %v3855_v19 = vadd.f32 %v3854_v23, %v3842_v63  ;;  %v9325_v23 = vld [vmem:[%s14049_s5 + $0x4] sm:$0xf] }
 0x253   :  { %v3843_v34 = vpop.f32.mrf.mxu0  ;;  %v3856_v10 = vpop.f32.mrf.mxu1 }
 0x254   :  { %v3867_v8 = vpop.f32.mrf.mxu2  ;;  %v3880_v9 = vpop.f32.mrf.mxu3  ;;  %v8071_v34 = vld [vmem:[%s14049_s5 + $0x8] sm:$0xf]  ;;  %v9328_v10 = vld [vmem:[%s14049_s5 + $0x14] sm:$0xf0] }
 0x255   :  { %v3868_v20 = vadd.f32 %v3867_v8, %v3855_v19  ;;  %v8064_v8 = vor.u32 %v9327_v7, %v8063_v27  ;;  %v8503_v19 = vld [vmem:[%s14051_s7 + $0x348] sm:$0xf]  ;;  %v9465_v27 = vld [vmem:[%s14051_s7 + $0x440] sm:$0xf0]  ;;  %v8111_v7 = vld [vmem:[%s14051_s7 + $0x38] sm:$0xf] }
 0x257   :  { %v3881_v51 = vadd.f32 %v3880_v9, %v3868_v20  ;;  %v8065_v9 = vld [vmem:[%s14049_s5 + $0x10] sm:$0xf0]  ;;  %4327 = vmatpush.bf16.msrb.mxu3 %v8064_v8  ;;  %v9437_v20 = vld [vmem:[%s14051_s7 + $0x360] sm:$0xf0] }
 0x25c   :  { %v3869_v26 = vpop.f32.mrf.mxu2  ;;  %v3882_v29 = vpop.f32.mrf.mxu3 }
 0x25d   :  { %v8068_v26 = vor.u32 %v9325_v23, %v8065_v9  ;;  %v8072_v29 = vor.u32 %v9328_v10, %v8071_v34  ;;  %v9339_v23 = vld [vmem:[%s14051_s7 + $0x50] sm:$0xf0]  ;;  %v8335_v9 = vld [vmem:[%s14051_s7 + $0x1f8] sm:$0xf] }
 0x25e   :  { %v9395_v34 = vld [vmem:[%s14051_s7 + $0x210] sm:$0xf0] }
 0x25f   :  { %4340 = vmatpush.bf16.msrb.mxu0 %v8068_v26  ;;  %4353 = vmatpush.bf16.msrb.mxu1 %v8072_v29  ;;  %v8112_v26 = vor.u32 %v9339_v23, %v8111_v7  ;;  %v8083_v29 = vld [vmem:[%s14051_s7] sm:$0xf]  ;;  %v9444_v7 = vld [vmem:[%s14051_s7 + $0x398] sm:$0xf0]  ;;  %v9469_v23 = vld [vmem:[%s14051_s7 + $0x464] sm:$0xf] }
 0x26b   :  { %v3893_v11 = vpop.f32.mrf.mxu0  ;;  %v3906_v12 = vpop.f32.mrf.mxu1 }
 0x26c   :  { %v3894_v45 = vadd.f32 %v3893_v11, %v3881_v51  ;;  %v9326_v11 = vld [vmem:[%s14049_s5 + $0xc] sm:$0xf] }
 0x26e   :  { %v3907_v54 = vadd.f32 %v3906_v12, %v3894_v45  ;;  %v8073_v12 = vld [vmem:[%s14049_s5 + $0x18] sm:$0xf0]  ;;  %v9430_v45 = vld [vmem:[%s14051_s7 + $0x328] sm:$0xf0] }
 0x26f   :  { %v8076_v63 = vor.u32 %v9326_v11, %v8073_v12  ;;  %v9332_v11 = vld [vmem:[%s14051_s7 + $0x18] sm:$0xf0]  ;;  %v9378_v12 = vld [vmem:[%s14051_s7 + $0x18c] sm:$0xf] }
 0x271   :  { %4366 = vmatpush.bf16.msrb.mxu2 %v8076_v63 }
 0x273   :  { %v3895_v16 = vpop.f32.mrf.mxu0  ;;  %v3908_v17 = vpop.f32.mrf.mxu1 }
 0x274   :  { %v3919_v14 = vpop.f32.mrf.mxu2  ;;  %v3932_v15 = vpop.f32.mrf.mxu3  ;;  %v8251_v16 = vld [vmem:[%s14051_s7 + $0x150] sm:$0xf] }
 0x275   :  { %v3920_v21 = vadd.f32 %v3919_v14, %v3907_v54  ;;  %v8279_v14 = vld [vmem:[%s14051_s7 + $0x188] sm:$0xf]  ;;  %v8252_v51 = vor.u32 %v9374_v18, %v8251_v16  ;;  %v8223_v54 = vld [vmem:[%s14051_s7 + $0x118] sm:$0xf] }
 0x276   :  { %v8505_v16 = vld [vmem:[%s14051_s7 + $0x364] sm:$0xf0] }
 0x277   :  { %v3933_v47 = vadd.f32 %v3932_v15, %v3920_v21  ;;  %v9381_v15 = vld [vmem:[%s14051_s7 + $0x1a0] sm:$0xf0]  ;;  %v9367_v21 = vld [vmem:[%s14051_s7 + $0x130] sm:$0xf0] }
 0x278   :  { %v8280_v17 = vor.u32 %v9381_v15, %v8279_v14  ;;  %v8281_v14 = vld [vmem:[%s14051_s7 + $0x1a4] sm:$0xf0]  ;;  %v9434_v15 = vld [vmem:[%s14051_s7 + $0x34c] sm:$0xf] }
 0x27c   :  { %v3921_v1 = vpop.f32.mrf.mxu2  ;;  %v3934_v48 = vpop.f32.mrf.mxu3 }
 0x27d   :  { %v8504_v1 = vor.u32 %v9437_v20, %v8503_v19  ;;  %v8475_v48 = vld [vmem:[%s14051_s7 + $0x310] sm:$0xf]  ;;  %v8307_v19 = vld [vmem:[%s14051_s7 + $0x1c0] sm:$0xf]  ;;  %v9388_v20 = vld [vmem:[%s14051_s7 + $0x1d8] sm:$0xf0] }
 0x27f   :  { %5512 = vmatpush.bf16.msra.mxu0 %v8504_v1  ;;  %v9490_v1 = vld [vmem:[%s14051_s7 + $0x50c] sm:$0xf] }
 0x28b   :  { %v3945_v24 = vpop.f32.mrf.mxu0  ;;  %v3958_v25 = vpop.f32.mrf.mxu1 }
 0x28c   :  { %v3946_v30 = vadd.f32 %v3945_v24, %v3933_v47  ;;  %v8476_v47 = vor.u32 %v9430_v45, %v8475_v48  ;;  %v8447_v24 = vld [vmem:[%s14051_s7 + $0x2d8] sm:$0xf]  ;;  %v8729_v48 = vld [vmem:[%s14051_s7 + $0x524] sm:$0xf0] }
 0x28e   :  { %v3959_v31 = vadd.f32 %v3958_v25, %v3946_v30  ;;  %v9423_v25 = vld [vmem:[%s14051_s7 + $0x2f0] sm:$0xf0]  ;;  %v8727_v30 = vld [vmem:[%s14051_s7 + $0x508] sm:$0xf]  ;;  %5513 = vmatpush.bf16.msra.mxu0 %v8476_v47  ;;  %v8508_v47 = vor.u32 %v9434_v15, %v8505_v16  ;;  %v8757_v15 = vld [vmem:[%s14051_s7 + $0x55c] sm:$0xf0] }
 0x293   :  { %v3984_v22 = vpop.f32.mrf.mxu3  ;;  %v3947_v35 = vpop.f32.mrf.mxu0 }
 0x294   :  { %v3971_v32 = vpop.f32.mrf.mxu2  ;;  %v3960_v36 = vpop.f32.mrf.mxu1  ;;  %v8448_v35 = vor.u32 %v9423_v25, %v8447_v24  ;;  %v9371_v24 = vld [vmem:[%s14051_s7 + $0x154] sm:$0xf]  ;;  %v8253_v25 = vld [vmem:[%s14051_s7 + $0x16c] sm:$0xf0] }
 0x295   :  { %v3972_v33 = vadd.f32 %v3971_v32, %v3959_v31  ;;  %v8224_v31 = vor.u32 %v9367_v21, %v8223_v54  ;;  %v9493_v32 = vld [vmem:[%s14051_s7 + $0x520] sm:$0xf0]  ;;  %v8084_v54 = vor.u32 %v9332_v11, %v8083_v29  ;;  %v8284_v21 = vor.u32 %v9378_v12, %v8281_v14  ;;  %v9399_v11 = vld [vmem:[%s14051_s7 + $0x234] sm:$0xf]  ;;  %v8365_v12 = vld [vmem:[%s14051_s7 + $0x24c] sm:$0xf0] }
 0x296   :  { %v8728_v36 = vor.u32 %v9493_v32, %v8727_v30  ;;  %5514 = vmatpush.bf16.msra.mxu0 %v8448_v35  ;;  %v8308_v30 = vor.u32 %v9388_v20, %v8307_v19  ;;  %v8477_v32 = vld [vmem:[%s14051_s7 + $0x32c] sm:$0xf0]  ;;  %v9483_v35 = vld [vmem:[%s14051_s7 + $0x4d4] sm:$0xf]  ;;  %v9497_v14 = vld [vmem:[%s14051_s7 + $0x544] sm:$0xf] }
 0x297   :  { %v3985_v37 = vadd.f32 %v3984_v22, %v3972_v33  ;;  %v8195_v22 = vld [vmem:[%s14051_s7 + $0xe0] sm:$0xf]  ;;  %v9360_v33 = vld [vmem:[%s14051_s7 + $0xf8] sm:$0xf0]  ;;  %v8760_v16 = vor.u32 %v9497_v14, %v8757_v15 }
 0x298   :  { %5525 = vmatpush.bf16.msra.mxu1 %v8728_v36  ;;  %v8196_v41 = vor.u32 %v9360_v33, %v8195_v22  ;;  %v8732_v22 = vor.u32 %v9490_v1, %v8729_v48  ;;  %v8701_v36 = vld [vmem:[%s14051_s7 + $0x4ec] sm:$0xf0]  ;;  %v9336_v20 = vld [vmem:[%s14051_s7 + $0x3c] sm:$0xf]  ;;  %v8113_v1 = vld [vmem:[%s14051_s7 + $0x54] sm:$0xf0] }
 0x299   :  { %v3991_v49 = vmax.f32 %v3985_v37, 0.0  ;;  %v8699_v37 = vld [vmem:[%s14051_s7 + $0x4d0] sm:$0xf]  ;;  %v9392_v48 = vld [vmem:[%s14051_s7 + $0x1fc] sm:$0xf] }
 0x29a   :  { %v8700_v39 = vor.u32 %v9486_v38, %v8699_v37  ;;  %v8559_v37 = vld [vmem:[%s14051_s7 + $0x3b8] sm:$0xf] }
 0x29b   :  { %v3995_v43 = vpack.c.bf16 %v3991_v49, %v3991_v49  ;;  %v3986_v46 = vpop.f32.mrf.mxu3  ;;  %v8419_v49 = vld [vmem:[%s14051_s7 + $0x2a0] sm:$0xf] }
 0x29c   :  { %v3973_v44 = vpop.f32.mrf.mxu2  ;;  %v8167_v46 = vld [vmem:[%s14051_s7 + $0xa8] sm:$0xf]  ;;  %v8420_v53 = vor.u32 %v9416_v28, %v8419_v49  ;;  %5526 = vmatpush.bf16.msra.mxu1 %v8700_v39  ;;  %v9451_v49 = vld [vmem:[%s14051_s7 + $0x3d0] sm:$0xf0]  ;;  %v8256_v28 = vor.u32 %v9371_v24, %v8253_v25  ;;  %v9329_v24 = vld [vmem:[%s14051_s7 + $0x4] sm:$0xf] }
 0x29d   :  { %8060 = vmatmul.msk.bf16.vlgmr.msra.gmra.mxu3 %vm4200_vm0, %v3995_v43  ;;  %v8755_v43 = vld [vmem:[%s14051_s7 + $0x540] sm:$0xf]  ;;  %v9500_v44 = vld [vmem:[%s14051_s7 + $0x558] sm:$0xf0]  ;;  %v8168_v52 = vor.u32 %v9353_v50, %v8167_v46  ;;  %v8560_v46 = vor.u32 %v9451_v49, %v8559_v37  ;;  %v9441_v37 = vld [vmem:[%s14051_s7 + $0x384] sm:$0xf] }
 0x29e   :  { %5499 = vmatpush.bf16.msra.mxu3 %v8280_v17  ;;  %v8756_v55 = vor.u32 %v9500_v44, %v8755_v43  ;;  %5515 = vmatpush.bf16.msra.mxu0 %v8420_v53  ;;  %v8336_v17 = vor.u32 %v9395_v34, %v8335_v9  ;;  %v8449_v43 = vld [vmem:[%s14051_s7 + $0x2f4] sm:$0xf0]  ;;  %v8704_v44 = vor.u32 %v9483_v35, %v8701_v36  ;;  %v9476_v50 = vld [vmem:[%s14051_s7 + $0x49c] sm:$0xf]  ;;  %v8645_v9 = vld [vmem:[%s14051_s7 + $0x47c] sm:$0xf0] }
 0x29f   :  { %v8673_v53 = vld [vmem:[%s14051_s7 + $0x4b4] sm:$0xf0]  ;;  %v9343_v34 = vld [vmem:[%s14051_s7 + $0x74] sm:$0xf]  ;;  %v8085_v25 = vld [vmem:[%s14051_s7 + $0x1c] sm:$0xf0] }
 0x2a0   :  { %5545 = vmatpush.bf16.msra.mxu2 %v8756_v55  ;;  %5527 = vmatpush.bf16.msra.mxu1 %v8672_v58  ;;  %v8197_v58 = vld [vmem:[%s14051_s7 + $0xfc] sm:$0xf0]  ;;  %v8561_v35 = vld [vmem:[%s14051_s7 + $0x3d4] sm:$0xf0] }
 0x2a1   :  { %v8533_v49 = vld [vmem:[%s14051_s7 + $0x39c] sm:$0xf0] }
 0x2a2   :  { %5500 = vmatpush.bf16.msra.mxu3 %v8252_v51  ;;  %v9458_v51 = vld [vmem:[%s14051_s7 + $0x408] sm:$0xf0] }
 0x2a6   :  { %5501 = vmatpush.bf16.msra.mxu3 %v8224_v31  ;;  %v9427_v31 = vld [vmem:[%s14051_s7 + $0x314] sm:$0xf] }
 0x2a7   :  { %v8480_v39 = vor.u32 %v9427_v31, %v8477_v32  ;;  %v9385_v31 = vld [vmem:[%s14051_s7 + $0x1c4] sm:$0xf]  ;;  %v8309_v32 = vld [vmem:[%s14051_s7 + $0x1dc] sm:$0xf0] }
 0x2aa   :  { %5502 = vmatpush.bf16.msra.mxu3 %v8196_v41  ;;  %v8225_v41 = vld [vmem:[%s14051_s7 + $0x134] sm:$0xf0] }
 0x2ab   :  { %v4213_v61 = vpop.f32.mrf.mxu0  ;;  %v4226_v3 = vpop.f32.mrf.mxu1  ;;  %v8228_v55 = vor.u32 %v9364_v40, %v8225_v41 }
 0x2ac   :  { %v4214_v62 = vadd.f32 %v9505_v60, %v4213_v61  ;;  %v9472_v60 = vld [vmem:[%s14051_s7 + $0x478] sm:$0xf0]  ;;  %v8139_v61 = vld [vmem:[%s14051_s7 + $0x70] sm:$0xf] }
 0x2ae   :  { %v4227_v4 = vadd.f32 %v4226_v3, %v4214_v62  ;;  %v9346_v62 = vld [vmem:[%s14051_s7 + $0x88] sm:$0xf0]  ;;  %v8392_v3 = vor.u32 %v9409_v56, %v8391_v13  ;;  %5503 = vmatpush.bf16.msra.mxu3 %v8168_v52  ;;  %v8452_v13 = vor.u32 %v9420_v42, %v8449_v43  ;;  %v9357_v56 = vld [vmem:[%s14051_s7 + $0xe4] sm:$0xf] }
 0x2af   :  { %v9413_v52 = vld [vmem:[%s14051_s7 + $0x2a4] sm:$0xf] }
 0x2b0   :  { %5516 = vmatpush.bf16.msra.mxu0 %v8392_v3  ;;  %v9350_v3 = vld [vmem:[%s14051_s7 + $0xac] sm:$0xf] }
 0x2b2   :  { %v4239_v0 = vpop.f32.mrf.mxu2 }
 0x2b3   :  { %v12890_v57 = vadd.f32 %v4239_v0, %v4227_v4  ;;  %v4215_v2 = vpop.f32.mrf.mxu0  ;;  %v4228_v5 = vpop.f32.mrf.mxu1  ;;  %v8363_v4 = vld [vmem:[%s14051_s7 + $0x230] sm:$0xf]  ;;  %v9402_v0 = vld [vmem:[%s14051_s7 + $0x248] sm:$0xf0] }
 0x2b4   :  { %v8644_v2 = vor.u32 %v9472_v60, %v8643_v59  ;;  %v8140_v5 = vor.u32 %v9346_v62, %v8139_v61  ;;  %v8364_v8 = vor.u32 %v9402_v0, %v8363_v4  ;;  %v8421_v59 = vld [vmem:[%s14051_s7 + $0x2bc] sm:$0xf0]  ;;  %v8676_v60 = vor.u32 %v9476_v50, %v8673_v53  ;;  %v8169_v4 = vld [vmem:[%s14051_s7 + $0xc4] sm:$0xf0]  ;;  %v9406_v0 = vld [vmem:[%s14051_s7 + $0x26c] sm:$0xf] }
 0x2b5   :  { %v8200_v61 = vor.u32 %v9357_v56, %v8197_v58  ;;  %v8424_v62 = vor.u32 %v9413_v52, %v8421_v59  ;;  %v8287_v53 = vld [vmem:[%s14051_s7 + $0x190] sm:$0xf] }
 0x2b6   :  { %5528 = vmatpush.bf16.msra.mxu1 %v8644_v2  ;;  %5504 = vmatpush.bf16.msra.mxu3 %v8140_v5  ;;  %v8172_v2 = vor.u32 %v9350_v3, %v8169_v4  ;;  %v8393_v5 = vld [vmem:[%s14051_s7 + $0x284] sm:$0xf0]  ;;  %v8259_v4 = vld [vmem:[%s14051_s7 + $0x158] sm:$0xf] }
 0x2b7   :  { %5517 = vmatpush.bf16.msra.mxu0 %v8364_v8 }
 0x2ba   :  { %v4241_v6 = vpop.f32.mrf.mxu2  ;;  %5505 = vmatpush.bf16.msra.mxu3 %v8112_v26  ;;  %v8648_v26 = vor.u32 %v9469_v23, %v8645_v9  ;;  %v9438_v9 = vld [vmem:[%s14051_s7 + $0x368] sm:$0xf0] }
 0x2bb   :  { %v8615_v6 = vld [vmem:[%s14051_s7 + $0x428] sm:$0xf]  ;;  %5518 = vmatpush.bf16.msra.mxu0 %v8336_v17  ;;  %v9462_v17 = vld [vmem:[%s14051_s7 + $0x42c] sm:$0xf] }
 0x2bc   :  { %v8616_v10 = vor.u32 %v9465_v27, %v8615_v6  ;;  %v8396_v6 = vor.u32 %v9406_v0, %v8393_v5  ;;  %v8531_v27 = vld [vmem:[%s14051_s7 + $0x380] sm:$0xf]  ;;  %v9375_v0 = vld [vmem:[%s14051_s7 + $0x170] sm:$0xf0] }
 0x2bd   :  { %v8532_v8 = vor.u32 %v9444_v7, %v8531_v27  ;;  %v9494_v27 = vld [vmem:[%s14051_s7 + $0x528] sm:$0xf0] }
 0x2be   :  { %5529 = vmatpush.bf16.msra.mxu1 %v8616_v10  ;;  %5506 = vmatpush.bf16.msra.mxu3 %v8084_v54  ;;  %v8141_v10 = vld [vmem:[%s14051_s7 + $0x8c] sm:$0xf0]  ;;  %v9455_v54 = vld [vmem:[%s14051_s7 + $0x3f4] sm:$0xf] }
 0x2bf   :  { %5519 = vmatpush.bf16.msra.mxu0 %v8308_v30  ;;  %v8144_v29 = vor.u32 %v9343_v34, %v8141_v10  ;;  %v8088_v30 = vor.u32 %v9329_v24, %v8085_v25  ;;  %v9480_v24 = vld [vmem:[%s14051_s7 + $0x4b8] sm:$0xf0]  ;;  %v8455_v25 = vld [vmem:[%s14051_s7 + $0x2e0] sm:$0xf] }
 0x320   :  { %v4252_v63 = vpop.f32.mrf.mxu3 }
 0x321   :  { %v4253_v18 = vadd.f32 %v4252_v63, %v12890_v57  ;;  %v8587_v57 = vld [vmem:[%s14051_s7 + $0x3f0] sm:$0xf]  ;;  %v8368_v63 = vor.u32 %v9399_v11, %v8365_v12  ;;  %v8231_v12 = vld [vmem:[%s14051_s7 + $0x120] sm:$0xf] }
 0x322   :  { %v8588_v33 = vor.u32 %v9458_v51, %v8587_v57  ;;  %v8116_v57 = vor.u32 %v9336_v20, %v8113_v1  ;;  %v8337_v51 = vld [vmem:[%s14051_s7 + $0x214] sm:$0xf0]  ;;  %v9431_v20 = vld [vmem:[%s14051_s7 + $0x330] sm:$0xf0] }
 0x323   :  { %v4256_v45 = vpack.c.bf16 %v4253_v18, %v4253_v18  ;;  %5864 = vst.msk [vmem:[#allocation2] sm:$0x3] %vm5863_vm2, %v4253_v18  ;;  %v8617_v18 = vld [vmem:[%s14051_s7 + $0x444] sm:$0xf0] }
 0x324   :  { %5530 = vmatpush.bf16.msra.mxu1 %v8588_v33  ;;  %v8620_v19 = vor.u32 %v9462_v17, %v8617_v18  ;;  %v9448_v33 = vld [vmem:[%s14051_s7 + $0x3bc] sm:$0xf]  ;;  %v9487_v17 = vld [vmem:[%s14051_s7 + $0x4f0] sm:$0xf0]  ;;  %5902 = dma.vmem_to_hbm [thread:$0]  %s5898_s17, 32, %s5900_s19, [#allocation3]  }
 0x325   :  { %8077 = vmatmul.msk.bf16.vlgmr.msrb.gmra.mxu3 %vm4303_vm3, %v4256_v45  ;;  %8078 = vmatmul.msk.bf16.vlgmr.msrb.gmra.mxu0 %vm4303_vm3, %v4256_v45  ;;  %v8564_v36 = vor.u32 %v9448_v33, %v8561_v35  ;;  %v8175_v35 = vld [vmem:[%s14051_s7 + $0xb0] sm:$0xf] }
 0x326   :  { %8079 = vmatmul.msk.bf16.vlgmr.msrb.gmra.mxu1 %vm4303_vm3, %v4256_v45  ;;  %8080 = vmatmul.msk.bf16.vlgmr.msrb.gmra.mxu2 %vm4303_vm3, %v4256_v45  ;;  %v8340_v45 = vor.u32 %v9392_v48, %v8337_v51  ;;  %v8203_v51 = vld [vmem:[%s14051_s7 + $0xe8] sm:$0xf] }
 0x327   :  { %5551 = vmatpush.bf16.msrb.mxu2 %v8284_v21  ;;  %5564 = vmatpush.bf16.msrb.mxu3 %v8508_v47  ;;  %v8589_v21 = vld [vmem:[%s14051_s7 + $0x40c] sm:$0xf0] }
 0x328   :  { %v4254_v38 = vpop.f32.mrf.mxu3  ;;  %5577 = vmatpush.bf16.msrb.mxu0 %v8732_v22  ;;  %5531 = vmatpush.bf16.msra.mxu1 %v8560_v46  ;;  %v8592_v47 = vor.u32 %v9455_v54, %v8589_v21  ;;  %v8312_v22 = vor.u32 %v9385_v31, %v8309_v32  ;;  %v9501_v46 = vld [vmem:[%s14051_s7 + $0x560] sm:$0xf0]  ;;  %v9379_v32 = vld [vmem:[%s14051_s7 + $0x194] sm:$0xf] }
 0x329   :  { %v4263_v38 = vld [vmem:[%s14050_s6] sm:$0xf] }
 0x32a   :  { %v4267_v40 = vperm.slane %v4263_v38, 2  ;;  %v4265_v56 = vperm.slane %v4263_v38, 0  ;;  %v4268_v52 = vperm.slane %v4263_v38, 3 }
 0x32b   :  { %5552 = vmatpush.bf16.msrb.mxu2 %v8256_v28  ;;  %5565 = vmatpush.bf16.msrb.mxu3 %v8480_v39  ;;  %v8536_v28 = vor.u32 %v9441_v37, %v8533_v49  ;;  %v4266_v39 = vperm.slane %v4263_v38, 1  ;;  %v8651_v49 = vld [vmem:[%s14051_s7 + $0x468] sm:$0xf] }
 0x32c   :  { %5578 = vmatpush.bf16.msrb.mxu0 %v8704_v44  ;;  %5532 = vmatpush.bf16.msra.mxu1 %v8532_v8  ;;  %v8763_v44 = vld [vmem:[%s14051_s7 + $0x548] sm:$0xf]  ;;  %v8511_v8 = vld [vmem:[%s14051_s7 + $0x350] sm:$0xf] }
 0x32d   :  { %v8764_v59 = vor.u32 %v9501_v46, %v8763_v44  ;;  %v8512_v15 = vor.u32 %v9438_v9, %v8511_v8  ;;  %v8147_v46 = vld [vmem:[%s14051_s7 + $0x78] sm:$0xf]  ;;  %v9403_v8 = vld [vmem:[%s14051_s7 + $0x250] sm:$0xf0] }
 0x32f   :  { %5553 = vmatpush.bf16.msrb.mxu2 %v8228_v55  ;;  %5566 = vmatpush.bf16.msrb.mxu3 %v8452_v13  ;;  %v9382_v55 = vld [vmem:[%s14051_s7 + $0x1a8] sm:$0xf0] }
 0x330   :  { %5579 = vmatpush.bf16.msrb.mxu0 %v8676_v60  ;;  %5597 = vmatpush.bf16.msrb.mxu1 %v8760_v16  ;;  %v8707_v16 = vld [vmem:[%s14051_s7 + $0x4d8] sm:$0xf] }
 0x333   :  { %5554 = vmatpush.bf16.msrb.mxu2 %v8200_v61  ;;  %5567 = vmatpush.bf16.msrb.mxu3 %v8424_v62  ;;  %v8288_v61 = vor.u32 %v9382_v55, %v8287_v53  ;;  %v8623_v55 = vld [vmem:[%s14051_s7 + $0x430] sm:$0xf] }
 0x334   :  { %5580 = vmatpush.bf16.msrb.mxu0 %v8648_v26  ;;  %v8260_v26 = vor.u32 %v9375_v0, %v8259_v4  ;;  %v8119_v0 = vld [vmem:[%s14051_s7 + $0x40] sm:$0xf] }
 0x337   :  { %5555 = vmatpush.bf16.msrb.mxu2 %v8172_v2  ;;  %5568 = vmatpush.bf16.msrb.mxu3 %v8396_v6  ;;  %v8735_v6 = vld [vmem:[%s14051_s7 + $0x510] sm:$0xf] }
 0x338   :  { %5581 = vmatpush.bf16.msrb.mxu0 %v8620_v19  ;;  %v8736_v11 = vor.u32 %v9494_v27, %v8735_v6  ;;  %v8483_v19 = vld [vmem:[%s14051_s7 + $0x318] sm:$0xf]  ;;  %v9459_v27 = vld [vmem:[%s14051_s7 + $0x410] sm:$0xf0] }
 0x339   :  { %v8484_v21 = vor.u32 %v9431_v20, %v8483_v19  ;;  %v8595_v6 = vld [vmem:[%s14051_s7 + $0x3f8] sm:$0xf]  ;;  %v8343_v20 = vld [vmem:[%s14051_s7 + $0x200] sm:$0xf] }
 0x33b   :  { %5556 = vmatpush.bf16.msrb.mxu2 %v8144_v29  ;;  %5569 = vmatpush.bf16.msrb.mxu3 %v8368_v63  ;;  %v9368_v63 = vld [vmem:[%s14051_s7 + $0x138] sm:$0xf0] }
 0x33c   :  { %5582 = vmatpush.bf16.msrb.mxu0 %v8592_v47  ;;  %v8232_v1 = vor.u32 %v9368_v63, %v8231_v12  ;;  %v8679_v47 = vld [vmem:[%s14051_s7 + $0x4a0] sm:$0xf]  ;;  %v9435_v12 = vld [vmem:[%s14051_s7 + $0x354] sm:$0xf] }
 0x33d   :  { %v8680_v33 = vor.u32 %v9480_v24, %v8679_v47  ;;  %v8485_v47 = vld [vmem:[%s14051_s7 + $0x334] sm:$0xf0]  ;;  %v8315_v24 = vld [vmem:[%s14051_s7 + $0x1c8] sm:$0xf] }
 0x33f   :  { %5557 = vmatpush.bf16.msrb.mxu2 %v8116_v57  ;;  %5570 = vmatpush.bf16.msrb.mxu3 %v8340_v45  ;;  %v8708_v57 = vor.u32 %v9487_v17, %v8707_v16  ;;  %v9361_v45 = vld [vmem:[%s14051_s7 + $0x100] sm:$0xf0]  ;;  %v8567_v16 = vld [vmem:[%s14051_s7 + $0x3c0] sm:$0xf]  ;;  %v9452_v17 = vld [vmem:[%s14051_s7 + $0x3d8] sm:$0xf0] }
 0x340   :  { %5583 = vmatpush.bf16.msrb.mxu0 %v8564_v36  ;;  %v8204_v31 = vor.u32 %v9361_v45, %v8203_v51  ;;  %v9354_v36 = vld [vmem:[%s14051_s7 + $0xc8] sm:$0xf0]  ;;  %v8177_v51 = vld [vmem:[%s14051_s7 + $0xcc] sm:$0xf0] }
 0x343   :  { %5558 = vmatpush.bf16.msrb.mxu2 %v8088_v30  ;;  %5571 = vmatpush.bf16.msrb.mxu3 %v8312_v22  ;;  %v9424_v30 = vld [vmem:[%s14051_s7 + $0x2f8] sm:$0xf0]  ;;  %v8289_v22 = vld [vmem:[%s14051_s7 + $0x1ac] sm:$0xf0] }
 0x344   :  { %5584 = vmatpush.bf16.msrb.mxu0 %v8536_v28  ;;  %v8456_v37 = vor.u32 %v9424_v30, %v8455_v25  ;;  %v9473_v28 = vld [vmem:[%s14051_s7 + $0x480] sm:$0xf0]  ;;  %v8292_v38 = vor.u32 %v9379_v32, %v8289_v22 }
 0x345   :  { %v8652_v44 = vor.u32 %v9473_v28, %v8651_v49  ;;  %v9389_v30 = vld [vmem:[%s14051_s7 + $0x1e0] sm:$0xf0]  ;;  %v9344_v49 = vld [vmem:[%s14051_s7 + $0x7c] sm:$0xf]  ;;  %v8149_v28 = vld [vmem:[%s14051_s7 + $0x94] sm:$0xf0] }
 0x346   :  { %v9445_v32 = vld [vmem:[%s14051_s7 + $0x3a0] sm:$0xf0] }
 0x3a2   :  { %v4342_v41 = vpop.f32.mrf.mxu0 }
 0x3a3   :  { %v4343_v42 = vadd.f32 %v4342_v41, %v4266_v39  ;;  %v4355_v43 = vpop.f32.mrf.mxu1  ;;  %v8427_v39 = vld [vmem:[%s14051_s7 + $0x2a8] sm:$0xf]  ;;  %v8176_v41 = vor.u32 %v9354_v36, %v8175_v35  ;;  %v9498_v35 = vld [vmem:[%s14051_s7 + $0x54c] sm:$0xf] }
 0x3a4   :  { %v4356_v50 = vadd.f32 %v4355_v43, %v4267_v40  ;;  %v9417_v40 = vld [vmem:[%s14051_s7 + $0x2c0] sm:$0xf0]  ;;  %v8261_v43 = vld [vmem:[%s14051_s7 + $0x174] sm:$0xf0]  ;;  %v8765_v36 = vld [vmem:[%s14051_s7 + $0x564] sm:$0xf0] }
 0x3a5   :  { %v4373_v13 = vmax.f32 %v4343_v42, 0.0  ;;  %v9372_v42 = vld [vmem:[%s14051_s7 + $0x15c] sm:$0xf]  ;;  %v8428_v53 = vor.u32 %v9417_v40, %v8427_v39  ;;  %v8316_v40 = vor.u32 %v9389_v30, %v8315_v24  ;;  %v8625_v30 = vld [vmem:[%s14051_s7 + $0x44c] sm:$0xf0] }
 0x3a6   :  { %v4374_v58 = vmax.f32 %v4356_v50, 0.0  ;;  %v9347_v50 = vld [vmem:[%s14051_s7 + $0x90] sm:$0xf0] }
 0x3a7   :  { %v13237_v60 = vpack.c.bf16 %v4373_v13, %v4373_v13  ;;  %v9466_v13 = vld [vmem:[%s14051_s7 + $0x448] sm:$0xf0] }
 0x3a8   :  { %v13239_v62 = vpack.c.bf16 %v4374_v58, %v4374_v58  ;;  %v4329_v3 = vpop.f32.mrf.mxu3  ;;  %v8399_v58 = vld [vmem:[%s14051_s7 + $0x270] sm:$0xf]  ;;  %v8624_v4 = vor.u32 %v9466_v13, %v8623_v55  ;;  %v9484_v55 = vld [vmem:[%s14051_s7 + $0x4dc] sm:$0xf]  ;;  %v8709_v13 = vld [vmem:[%s14051_s7 + $0x4f4] sm:$0xf0] }
 0x3a9   :  { %v4330_v2 = vadd.f32 %v4329_v3, %v4265_v56  ;;  %v4368_v5 = vpop.f32.mrf.mxu2  ;;  %5520 = vmatmul.bf16.vlgmr.msra.gmra.mxu0 %v13237_v60  ;;  %v8264_v56 = vor.u32 %v9372_v42, %v8261_v43  ;;  %v8233_v3 = vld [vmem:[%s14051_s7 + $0x13c] sm:$0xf0]  ;;  %v8768_v43 = vor.u32 %v9498_v35, %v8765_v36  ;;  %v9393_v35 = vld [vmem:[%s14051_s7 + $0x204] sm:$0xf] }
 0x3aa   :  { %v4369_v7 = vadd.f32 %v4368_v5, %v4268_v52  ;;  %5533 = vmatmul.bf16.vlgmr.msra.gmra.mxu1 %v13239_v62  ;;  %v4344_v23 = vpop.f32.mrf.mxu0  ;;  %5649 = vmatpush.bf16.msra.mxu0 %v8764_v59  ;;  %v9410_v52 = vld [vmem:[%s14051_s7 + $0x288] sm:$0xf0]  ;;  %v8148_v59 = vor.u32 %v9347_v50, %v8147_v46  ;;  %v8457_v42 = vld [vmem:[%s14051_s7 + $0x2fc] sm:$0xf0]  ;;  %v8152_v46 = vor.u32 %v9344_v49, %v8149_v28  ;;  %v8295_v50 = vld [vmem:[%s14051_s7 + $0x198] sm:$0xf] }
 0x3ab   :  { %v4372_v34 = vmax.f32 %v4330_v2, 0.0  ;;  %5603 = vmatpush.bf16.msra.mxu1 %v8288_v61  ;;  %v4357_v10 = vpop.f32.mrf.mxu1  ;;  %v9365_v61 = vld [vmem:[%s14051_s7 + $0x124] sm:$0xf]  ;;  %v9340_v2 = vld [vmem:[%s14051_s7 + $0x58] sm:$0xf0]  ;;  %v8400_v5 = vor.u32 %v9410_v52, %v8399_v58 }
 0x3ac   :  { %v4375_v29 = vmax.f32 %v4369_v7, 0.0  ;;  %v8236_v7 = vor.u32 %v9365_v61, %v8233_v3  ;;  %v8371_v23 = vld [vmem:[%s14051_s7 + $0x238] sm:$0xf]  ;;  %v8120_v9 = vor.u32 %v9340_v2, %v8119_v0  ;;  %v8205_v10 = vld [vmem:[%s14051_s7 + $0x104] sm:$0xf0] }
 0x3ad   :  { %v13267_v14 = vpack.c.bf16 %v4372_v34, %v4372_v34  ;;  %v9358_v34 = vld [vmem:[%s14051_s7 + $0xec] sm:$0xf]  ;;  %v8372_v63 = vor.u32 %v9403_v8, %v8371_v23  ;;  %v8121_v58 = vld [vmem:[%s14051_s7 + $0x5c] sm:$0xf0]  ;;  %v8429_v3 = vld [vmem:[%s14051_s7 + $0x2c4] sm:$0xf0] }
 0x3ae   :  { %v13275_v18 = vpack.c.bf16 %v4375_v29, %v4375_v29  ;;  %v8091_v29 = vld [vmem:[%s14051_s7 + $0x8] sm:$0xf]  ;;  %v8208_v19 = vor.u32 %v9358_v34, %v8205_v10  ;;  %v9414_v61 = vld [vmem:[%s14051_s7 + $0x2ac] sm:$0xf]  ;;  %v8267_v2 = vld [vmem:[%s14051_s7 + $0x160] sm:$0xf] }
 0x3af   :  { %5604 = vmatpush.bf16.msra.mxu1 %v8260_v26  ;;  %5507 = vmatmul.bf16.vlgmr.msra.gmra.mxu3 %v13267_v14  ;;  %v8596_v26 = vor.u32 %v9459_v27, %v8595_v6  ;;  %v9477_v6 = vld [vmem:[%s14051_s7 + $0x4a4] sm:$0xf]  ;;  %v8681_v27 = vld [vmem:[%s14051_s7 + $0x4bc] sm:$0xf0]  ;;  %v8093_v23 = vld [vmem:[%s14051_s7 + $0x24] sm:$0xf0]  ;;  %v8432_v8 = vor.u32 %v9414_v61, %v8429_v3 }
 0x3b0   :  { %8781 = vmatmul.msk.bf16.vlgmr.msra.gmra.mxu2 %vm4200_vm0, %v13275_v18  ;;  %5629 = vmatpush.bf16.msra.mxu3 %v8736_v11  ;;  %v4331_v48 = vpop.f32.mrf.mxu3  ;;  %v9333_v11 = vld [vmem:[%s14051_s7 + $0x20] sm:$0xf0]  ;;  %v9439_v34 = vld [vmem:[%s14051_s7 + $0x370] sm:$0xf0]  ;;  %v8345_v36 = vld [vmem:[%s14051_s7 + $0x21c] sm:$0xf0] }
 0x3b1   :  { %5616 = vmatpush.bf16.msra.mxu2 %v8512_v15  ;;  %v4370_v54 = vpop.f32.mrf.mxu2  ;;  %v8513_v15 = vld [vmem:[%s14051_s7 + $0x36c] sm:$0xf0]  ;;  %v8092_v48 = vor.u32 %v9333_v11, %v8091_v29  ;;  %v8684_v11 = vor.u32 %v9477_v6, %v8681_v27  ;;  %v8183_v49 = vld [vmem:[%s14051_s7 + $0xb8] sm:$0xf]  ;;  %v9355_v28 = vld [vmem:[%s14051_s7 + $0xd0] sm:$0xf0] }
 0x3b2   :  { %v8516_v45 = vor.u32 %v9435_v12, %v8513_v15  ;;  %v8568_v54 = vor.u32 %v9452_v17, %v8567_v16  ;;  %v8401_v29 = vld [vmem:[%s14051_s7 + $0x28c] sm:$0xf0]  ;;  %v9369_v15 = vld [vmem:[%s14051_s7 + $0x140] sm:$0xf0]  ;;  %v9470_v17 = vld [vmem:[%s14051_s7 + $0x46c] sm:$0xf] }
 0x3b3   :  { %5605 = vmatpush.bf16.msra.mxu1 %v8232_v1  ;;  %v9396_v1 = vld [vmem:[%s14051_s7 + $0x218] sm:$0xf0]  ;;  %v8569_v61 = vld [vmem:[%s14051_s7 + $0x3dc] sm:$0xf0]  ;;  %v8127_v6 = vld [vmem:[%s14051_s7 + $0x48] sm:$0xf] }
 0x3b4   :  { %5630 = vmatpush.bf16.msra.mxu3 %v8708_v57  ;;  %v9351_v57 = vld [vmem:[%s14051_s7 + $0xb4] sm:$0xf]  ;;  %v8344_v25 = vor.u32 %v9396_v1, %v8343_v20  ;;  %v8491_v1 = vld [vmem:[%s14051_s7 + $0x320] sm:$0xf] }
 0x3b5   :  { %5617 = vmatpush.bf16.msra.mxu2 %v8484_v21  ;;  %v9428_v21 = vld [vmem:[%s14051_s7 + $0x31c] sm:$0xf]  ;;  %v8180_v22 = vor.u32 %v9351_v57, %v8177_v51 }
 0x3b6   :  { %v9400_v51 = vld [vmem:[%s14051_s7 + $0x23c] sm:$0xf] }
 0x3b7   :  { %5606 = vmatpush.bf16.msra.mxu1 %v8204_v31  ;;  %v8539_v31 = vld [vmem:[%s14051_s7 + $0x388] sm:$0xf] }
 0x3b8   :  { %5631 = vmatpush.bf16.msra.mxu3 %v8680_v33  ;;  %v9491_v33 = vld [vmem:[%s14051_s7 + $0x514] sm:$0xf]  ;;  %v8540_v39 = vor.u32 %v9445_v32, %v8539_v31  ;;  %v8463_v32 = vld [vmem:[%s14051_s7 + $0x2e8] sm:$0xf] }
 0x3b9   :  { %5618 = vmatpush.bf16.msra.mxu2 %v8456_v37  ;;  %5585 = vmatmul.bf16.vlgmr.msrb.gmra.mxu0 %v13239_v62  ;;  %v8737_v37 = vld [vmem:[%s14051_s7 + $0x52c] sm:$0xf0] }
 0x3ba   :  { %8782 = vmatmul.msk.bf16.vlgmr.msrb.gmra.mxu1 %vm4200_vm0, %v13275_v18  ;;  %5655 = vmatpush.bf16.msrb.mxu0 %v8292_v38  ;;  %v8488_v38 = vor.u32 %v9428_v21, %v8485_v47  ;;  %v8211_v21 = vld [vmem:[%s14051_s7 + $0xf0] sm:$0xf]  ;;  %v9362_v47 = vld [vmem:[%s14051_s7 + $0x108] sm:$0xf0] }
 0x3bb   :  { %5607 = vmatpush.bf16.msra.mxu1 %v8176_v41  ;;  %v9421_v41 = vld [vmem:[%s14051_s7 + $0x2e4] sm:$0xf] }
 0x3bc   :  { %5632 = vmatpush.bf16.msra.mxu3 %v8652_v44  ;;  %v8740_v44 = vor.u32 %v9491_v33, %v8737_v37  ;;  %v8460_v52 = vor.u32 %v9421_v41, %v8457_v42  ;;  %v8212_v33 = vor.u32 %v9362_v47, %v8211_v21  ;;  %v8348_v41 = vor.u32 %v9393_v35, %v8345_v36  ;;  %v8435_v42 = vld [vmem:[%s14051_s7 + $0x2b0] sm:$0xf]  ;;  %v8521_v21 = vld [vmem:[%s14051_s7 + $0x374] sm:$0xf0]  ;;  %v8351_v47 = vld [vmem:[%s14051_s7 + $0x208] sm:$0xf] }
 0x3bd   :  { %5619 = vmatpush.bf16.msra.mxu2 %v8428_v53  ;;  %v9383_v53 = vld [vmem:[%s14051_s7 + $0x1b0] sm:$0xf0]  ;;  %v9373_v36 = vld [vmem:[%s14051_s7 + $0x164] sm:$0xf] }
 0x3be   :  { %5656 = vmatpush.bf16.msrb.mxu0 %v8264_v56  ;;  %v9337_v56 = vld [vmem:[%s14051_s7 + $0x44] sm:$0xf] }
 0x3bf   :  { %5608 = vmatpush.bf16.msra.mxu1 %v8148_v59  ;;  %5572 = vmatmul.bf16.vlgmr.msrb.gmra.mxu3 %v13237_v60  ;;  %v8296_v59 = vor.u32 %v9383_v53, %v8295_v50  ;;  %v8124_v0 = vor.u32 %v9337_v56, %v8121_v58  ;;  %v8317_v50 = vld [vmem:[%s14051_s7 + $0x1e4] sm:$0xf0]  ;;  %v8155_v53 = vld [vmem:[%s14051_s7 + $0x80] sm:$0xf]  ;;  %v8743_v56 = vld [vmem:[%s14051_s7 + $0x518] sm:$0xf] }
 0x3c0   :  { %5559 = vmatmul.bf16.vlgmr.msrb.gmra.mxu2 %v13267_v14  ;;  %5633 = vmatpush.bf16.msra.mxu3 %v8624_v4  ;;  %v8712_v4 = vor.u32 %v9484_v55, %v8709_v13  ;;  %v9348_v13 = vld [vmem:[%s14051_s7 + $0x98] sm:$0xf0]  ;;  %v9495_v58 = vld [vmem:[%s14051_s7 + $0x530] sm:$0xf0] }
 0x3c1   :  { %5620 = vmatpush.bf16.msra.mxu2 %v8400_v5  ;;  %v9376_v5 = vld [vmem:[%s14051_s7 + $0x178] sm:$0xf0] }
 0x3c2   :  { %5657 = vmatpush.bf16.msrb.mxu0 %v8236_v7  ;;  %v9330_v7 = vld [vmem:[%s14051_s7 + $0xc] sm:$0xf]  ;;  %v8268_v10 = vor.u32 %v9376_v5, %v8267_v2  ;;  %v8156_v2 = vor.u32 %v9348_v13, %v8155_v53  ;;  %v8744_v5 = vor.u32 %v9495_v58, %v8743_v56  ;;  %v9467_v53 = vld [vmem:[%s14051_s7 + $0x450] sm:$0xf0]  ;;  %v8241_v13 = vld [vmem:[%s14051_s7 + $0x144] sm:$0xf0] }
 0x3c3   :  { %5609 = vmatpush.bf16.msra.mxu1 %v8120_v9  ;;  %v8519_v9 = vld [vmem:[%s14051_s7 + $0x358] sm:$0xf]  ;;  %v8096_v12 = vor.u32 %v9330_v7, %v8093_v23  ;;  %v9341_v7 = vld [vmem:[%s14051_s7 + $0x60] sm:$0xf0]  ;;  %v8715_v23 = vld [vmem:[%s14051_s7 + $0x4e0] sm:$0xf] }
 0x3c4   :  { %5634 = vmatpush.bf16.msra.mxu3 %v8596_v26  ;;  %v9407_v26 = vld [vmem:[%s14051_s7 + $0x274] sm:$0xf]  ;;  %v8520_v16 = vor.u32 %v9439_v34, %v8519_v9  ;;  %v9442_v34 = vld [vmem:[%s14051_s7 + $0x38c] sm:$0xf] }
 0x3c5   :  { %5621 = vmatpush.bf16.msra.mxu2 %v8372_v63  ;;  %v8239_v63 = vld [vmem:[%s14051_s7 + $0x128] sm:$0xf]  ;;  %v8404_v20 = vor.u32 %v9407_v26, %v8401_v29  ;;  %v8379_v26 = vld [vmem:[%s14051_s7 + $0x240] sm:$0xf]  ;;  %v9404_v29 = vld [vmem:[%s14051_s7 + $0x258] sm:$0xf0] }
 0x3c6   :  { %5658 = vmatpush.bf16.msrb.mxu0 %v8208_v19  ;;  %v8653_v19 = vld [vmem:[%s14051_s7 + $0x484] sm:$0xf0]  ;;  %v8240_v57 = vor.u32 %v9369_v15, %v8239_v63  ;;  %v8128_v63 = vor.u32 %v9341_v7, %v8127_v6  ;;  %v9422_v58 = vld [vmem:[%s14051_s7 + $0x2ec] sm:$0xf]  ;;  %v9359_v6 = vld [vmem:[%s14051_s7 + $0xf4] sm:$0xf] }
 0x3c7   :  { %5610 = vmatpush.bf16.msra.mxu1 %v8092_v48  ;;  %v9432_v48 = vld [vmem:[%s14051_s7 + $0x338] sm:$0xf0] }
 0x3c8   :  { %5635 = vmatpush.bf16.msra.mxu3 %v8568_v54  ;;  %v8656_v54 = vor.u32 %v9470_v17, %v8653_v19  ;;  %v8492_v24 = vor.u32 %v9432_v48, %v8491_v1  ;;  %v9334_v19 = vld [vmem:[%s14051_s7 + $0x28] sm:$0xf0]  ;;  %v9481_v1 = vld [vmem:[%s14051_s7 + $0x4c0] sm:$0xf0]  ;;  %v8380_v48 = vor.u32 %v9404_v29, %v8379_v26  ;;  %v8575_v29 = vld [vmem:[%s14051_s7 + $0x3c8] sm:$0xf] }
 0x3c9   :  { %5622 = vmatpush.bf16.msra.mxu2 %v8344_v25  ;;  %8783 = vmatmul.msk.bf16.vlgmr.msra.gmra.mxu0 %vm4200_vm0, %v13275_v18  ;;  %v9463_v25 = vld [vmem:[%s14051_s7 + $0x434] sm:$0xf] }
 0x3ca   :  { %5611 = vmatmul.bf16.vlgmr.msra.gmra.mxu1 %v13267_v14  ;;  %5659 = vmatpush.bf16.msrb.mxu0 %v8180_v22  ;;  %v9425_v22 = vld [vmem:[%s14051_s7 + $0x300] sm:$0xf0]  ;;  %v8628_v37 = vor.u32 %v9463_v25, %v8625_v30 }
 0x3cb   :  { %5668 = vmatpush.bf16.msrb.mxu1 %v8516_v45  ;;  %v8373_v45 = vld [vmem:[%s14051_s7 + $0x254] sm:$0xf0] }
 0x3cc   :  { %5636 = vmatpush.bf16.msra.mxu3 %v8540_v39  ;;  %v8376_v31 = vor.u32 %v9400_v51, %v8373_v45  ;;  %v9456_v39 = vld [vmem:[%s14051_s7 + $0x3fc] sm:$0xf]  ;;  %v8297_v45 = vld [vmem:[%s14051_s7 + $0x1b4] sm:$0xf0] }
 0x3cd   :  { %5623 = vmatpush.bf16.msra.mxu2 %v8316_v40  ;;  %v8597_v40 = vld [vmem:[%s14051_s7 + $0x414] sm:$0xf0]  ;;  %v9380_v51 = vld [vmem:[%s14051_s7 + $0x19c] sm:$0xf] }
 0x3ce   :  { %5660 = vmatpush.bf16.msrb.mxu0 %v8152_v46  ;;  %v9386_v46 = vld [vmem:[%s14051_s7 + $0x1cc] sm:$0xf]  ;;  %v8600_v55 = vor.u32 %v9456_v39, %v8597_v40  ;;  %v9492_v40 = vld [vmem:[%s14051_s7 + $0x51c] sm:$0xf] }
 0x3cf   :  { %5669 = vmatpush.bf16.msrb.mxu1 %v8488_v38  ;;  %5637 = vmatmul.bf16.vlgmr.msra.gmra.mxu3 %v13239_v62  ;;  %v8464_v38 = vor.u32 %v9425_v22, %v8463_v32  ;;  %v8320_v3 = vor.u32 %v9386_v46, %v8317_v50  ;;  %v8659_v32 = vld [vmem:[%s14051_s7 + $0x470] sm:$0xf]  ;;  %v9474_v22 = vld [vmem:[%s14051_s7 + $0x488] sm:$0xf0] }
 0x3d0   :  { %5701 = vmatpush.bf16.msrb.mxu3 %v8768_v43  ;;  %5624 = vmatmul.bf16.vlgmr.msra.gmra.mxu2 %v13237_v60  ;;  %v9418_v43 = vld [vmem:[%s14051_s7 + $0x2c8] sm:$0xf0] }
 0x3d1   :  { %5681 = vmatpush.bf16.msrb.mxu2 %v8740_v44  ;;  %v8184_v44 = vor.u32 %v9355_v28, %v8183_v49  ;;  %v9429_v49 = vld [vmem:[%s14051_s7 + $0x324] sm:$0xf]  ;;  %v8493_v28 = vld [vmem:[%s14051_s7 + $0x33c] sm:$0xf0]  ;;  %v9390_v39 = vld [vmem:[%s14051_s7 + $0x1e8] sm:$0xf0] }
 0x3d2   :  { %5661 = vmatpush.bf16.msrb.mxu0 %v8124_v0  ;;  %v9411_v0 = vld [vmem:[%s14051_s7 + $0x290] sm:$0xf0]  ;;  %v8496_v46 = vor.u32 %v9429_v49, %v8493_v28 }
 0x3d3   :  { %5670 = vmatpush.bf16.msrb.mxu1 %v8460_v52  ;;  %v8436_v52 = vor.u32 %v9418_v43, %v8435_v42  ;;  %v8660_v42 = vor.u32 %v9474_v22, %v8659_v32  ;;  %v8773_v32 = vld [vmem:[%s14051_s7 + $0x56c] sm:$0xf0]  ;;  %v9464_v22 = vld [vmem:[%s14051_s7 + $0x43c] sm:$0xf] }
 0x3d4   :  { %5707 = vmatpush.bf16.msra.mxu3 %v8296_v59  ;;  %v9449_v59 = vld [vmem:[%s14051_s7 + $0x3c4] sm:$0xf] }
 0x3d5   :  { %5682 = vmatpush.bf16.msrb.mxu2 %v8712_v4  ;;  %v8407_v4 = vld [vmem:[%s14051_s7 + $0x278] sm:$0xf]  ;;  %v8572_v27 = vor.u32 %v9449_v59, %v8569_v61  ;;  %v9485_v59 = vld [vmem:[%s14051_s7 + $0x4e4] sm:$0xf]  ;;  %v8717_v61 = vld [vmem:[%s14051_s7 + $0x4fc] sm:$0xf0] }
 0x3d6   :  { %5662 = vmatpush.bf16.msrb.mxu0 %v8096_v12  ;;  %v8408_v9 = vor.u32 %v9411_v0, %v8407_v4  ;;  %v9502_v12 = vld [vmem:[%s14051_s7 + $0x568] sm:$0xf0]  ;;  %v8603_v0 = vld [vmem:[%s14051_s7 + $0x400] sm:$0xf]  ;;  %v8720_v7 = vor.u32 %v9485_v59, %v8717_v61  ;;  %v9387_v59 = vld [vmem:[%s14051_s7 + $0x1d4] sm:$0xf] }
 0x3d7   :  { %5671 = vmatpush.bf16.msrb.mxu1 %v8432_v8  ;;  %v9488_v8 = vld [vmem:[%s14051_s7 + $0x4f8] sm:$0xf0]  ;;  %v8325_v61 = vld [vmem:[%s14051_s7 + $0x1ec] sm:$0xf0] }
 0x3d8   :  { %5708 = vmatpush.bf16.msra.mxu3 %v8268_v10  ;;  %v8541_v10 = vld [vmem:[%s14051_s7 + $0x3a4] sm:$0xf0]  ;;  %v8716_v15 = vor.u32 %v9488_v8, %v8715_v23  ;;  %v9415_v23 = vld [vmem:[%s14051_s7 + $0x2b4] sm:$0xf]  ;;  %v8437_v8 = vld [vmem:[%s14051_s7 + $0x2cc] sm:$0xf0] }
 0x3d9   :  { %5683 = vmatpush.bf16.msrb.mxu2 %v8684_v11  ;;  %5663 = vmatmul.bf16.vlgmr.msrb.gmra.mxu0 %v13267_v14  ;;  %v8771_v11 = vld [vmem:[%s14051_s7 + $0x550] sm:$0xf]  ;;  %v8544_v17 = vor.u32 %v9442_v34, %v8541_v10  ;;  %v8689_v34 = vld [vmem:[%s14051_s7 + $0x4c4] sm:$0xf0] }
 0x3da   :  { %5720 = vmatpush.bf16.msra.mxu0 %v8520_v16  ;;  %v8099_v16 = vld [vmem:[%s14051_s7 + $0x10] sm:$0xf] }
 0x3db   :  { %5672 = vmatpush.bf16.msrb.mxu1 %v8404_v20  ;;  %v8687_v20 = vld [vmem:[%s14051_s7 + $0x4a8] sm:$0xf]  ;;  %v8100_v25 = vor.u32 %v9334_v19, %v8099_v16  ;;  %v8409_v19 = vld [vmem:[%s14051_s7 + $0x294] sm:$0xf0] }
 0x3dc   :  { %5709 = vmatpush.bf16.msra.mxu3 %v8240_v57  ;;  %v8772_v57 = vor.u32 %v9502_v12, %v8771_v11  ;;  %v8688_v30 = vor.u32 %v9481_v1, %v8687_v20  ;;  %v8440_v11 = vor.u32 %v9415_v23, %v8437_v8  ;;  %v9453_v12 = vld [vmem:[%s14051_s7 + $0x3e0] sm:$0xf0]  ;;  %v9471_v20 = vld [vmem:[%s14051_s7 + $0x474] sm:$0xf]  ;;  %v8661_v1 = vld [vmem:[%s14051_s7 + $0x48c] sm:$0xf0]  ;;  %v8328_v8 = vor.u32 %v9387_v59, %v8325_v61 }
 0x3dd   :  { %5684 = vmatpush.bf16.msrb.mxu2 %v8656_v54  ;;  %v9436_v54 = vld [vmem:[%s14051_s7 + $0x35c] sm:$0xf]  ;;  %v9405_v59 = vld [vmem:[%s14051_s7 + $0x260] sm:$0xf0]  ;;  %v8611_v61 = vld [vmem:[%s14051_s7 + $0x408] sm:$0xf] }
 0x3de   :  { %5721 = vmatpush.bf16.msra.mxu0 %v8492_v24  ;;  %v9397_v24 = vld [vmem:[%s14051_s7 + $0x220] sm:$0xf0] }
 0x3df   :  { %5673 = vmatpush.bf16.msrb.mxu1 %v8376_v31  ;;  %8784 = vmatmul.msk.bf16.vlgmr.msrb.gmra.mxu3 %vm4200_vm0, %v13275_v18  ;;  %v8300_v31 = vor.u32 %v9380_v51, %v8297_v45  ;;  %v8352_v35 = vor.u32 %v9397_v24, %v8351_v47  ;;  %v8547_v51 = vld [vmem:[%s14051_s7 + $0x390] sm:$0xf]  ;;  %v9446_v45 = vld [vmem:[%s14051_s7 + $0x3a8] sm:$0xf0]  ;;  %v8157_v47 = vld [vmem:[%s14051_s7 + $0x9c] sm:$0xf0] }
 0x3e0   :  { %5710 = vmatpush.bf16.msra.mxu3 %v8212_v33  ;;  %v8524_v33 = vor.u32 %v9436_v54, %v8521_v21  ;;  %v9345_v21 = vld [vmem:[%s14051_s7 + $0x84] sm:$0xf] }
 0x3e1   :  { %5685 = vmatpush.bf16.msrb.mxu2 %v8628_v37  ;;  %v8269_v37 = vld [vmem:[%s14051_s7 + $0x17c] sm:$0xf0]  ;;  %v9401_v24 = vld [vmem:[%s14051_s7 + $0x244] sm:$0xf] }
 0x3e2   :  { %5722 = vmatpush.bf16.msra.mxu0 %v8464_v38  ;;  %v8323_v38 = vld [vmem:[%s14051_s7 + $0x1d0] sm:$0xf]  ;;  %v8272_v43 = vor.u32 %v9373_v36, %v8269_v37  ;;  %v8160_v36 = vor.u32 %v9345_v21, %v8157_v47  ;;  %v8303_v37 = vld [vmem:[%s14051_s7 + $0x1a0] sm:$0xf]  ;;  %v9426_v47 = vld [vmem:[%s14051_s7 + $0x308] sm:$0xf0] }
 0x3e3   :  { %5674 = vmatpush.bf16.msrb.mxu1 %v8348_v41  ;;  %v8745_v41 = vld [vmem:[%s14051_s7 + $0x534] sm:$0xf0]  ;;  %v8324_v50 = vor.u32 %v9390_v39, %v8323_v38  ;;  %v9384_v38 = vld [vmem:[%s14051_s7 + $0x1b8] sm:$0xf0]  ;;  %v9338_v39 = vld [vmem:[%s14051_s7 + $0x4c] sm:$0xf] }
 0x3e4   :  { %5711 = vmatpush.bf16.msra.mxu3 %v8184_v44  ;;  %v8631_v44 = vld [vmem:[%s14051_s7 + $0x438] sm:$0xf]  ;;  %v8748_v56 = vor.u32 %v9492_v40, %v8745_v41  ;;  %v8129_v40 = vld [vmem:[%s14051_s7 + $0x64] sm:$0xf0]  ;;  %v8471_v21 = vld [vmem:[%s14051_s7 + $0x2f0] sm:$0xf] }
 0x3e5   :  { %5686 = vmatpush.bf16.msrb.mxu2 %v8600_v55  ;;  %v9366_v55 = vld [vmem:[%s14051_s7 + $0x12c] sm:$0xf] }
 0x3e6   :  { %5723 = vmatpush.bf16.msra.mxu0 %v8436_v52  ;;  %v8465_v52 = vld [vmem:[%s14051_s7 + $0x304] sm:$0xf0]  ;;  %v8244_v4 = vor.u32 %v9366_v55, %v8241_v13  ;;  %v9377_v13 = vld [vmem:[%s14051_s7 + $0x180] sm:$0xf0] }
 0x3e7   :  { %5675 = vmatpush.bf16.msrb.mxu1 %v8320_v3  ;;  %v8632_v3 = vor.u32 %v9467_v53, %v8631_v44  ;;  %v9457_v44 = vld [vmem:[%s14051_s7 + $0x404] sm:$0xf]  ;;  %v8132_v53 = vor.u32 %v9338_v39, %v8129_v40  ;;  %v8275_v55 = vld [vmem:[%s14051_s7 + $0x168] sm:$0xf] }
 0x3e8   :  { %5712 = vmatpush.bf16.msra.mxu3 %v8156_v2  ;;  %v8468_v2 = vor.u32 %v9422_v58, %v8465_v52  ;;  %v8101_v52 = vld [vmem:[%s14051_s7 + $0x2c] sm:$0xf0]  ;;  %v8163_v40 = vld [vmem:[%s14051_s7 + $0x88] sm:$0xf] }
 0x3e9   :  { %5687 = vmatpush.bf16.msrb.mxu2 %v8572_v27  ;;  %v8213_v27 = vld [vmem:[%s14051_s7 + $0x10c] sm:$0xf0] }
 0x3ea   :  { %5676 = vmatmul.bf16.vlgmr.msrb.gmra.mxu1 %v13237_v60  ;;  %5724 = vmatpush.bf16.msra.mxu0 %v8408_v9  ;;  %v9478_v9 = vld [vmem:[%s14051_s7 + $0x4ac] sm:$0xf]  ;;  %v8216_v26 = vor.u32 %v9359_v6, %v8213_v27  ;;  %v8577_v27 = vld [vmem:[%s14051_s7 + $0x3e4] sm:$0xf0] }
 0x3eb   :  { %5733 = vmatpush.bf16.msra.mxu1 %v8744_v5  ;;  %v9460_v5 = vld [vmem:[%s14051_s7 + $0x418] sm:$0xf0]  ;;  %v8692_v16 = vor.u32 %v9478_v9, %v8689_v34  ;;  %v9450_v6 = vld [vmem:[%s14051_s7 + $0x3cc] sm:$0xf]  ;;  %v8247_v34 = vld [vmem:[%s14051_s7 + $0x130] sm:$0xf] }
 0x3ec   :  { %5713 = vmatpush.bf16.msra.mxu3 %v8128_v63  ;;  %v8604_v10 = vor.u32 %v9460_v5, %v8603_v0  ;;  %v9352_v63 = vld [vmem:[%s14051_s7 + $0xbc] sm:$0xf] }
 0x3ed   :  { %5688 = vmatpush.bf16.msrb.mxu2 %v8544_v17  ;;  %v9408_v17 = vld [vmem:[%s14051_s7 + $0x27c] sm:$0xf] }
 0x3ee   :  { %5725 = vmatpush.bf16.msra.mxu0 %v8380_v48  ;;  %v8576_v48 = vor.u32 %v9453_v12, %v8575_v29  ;;  %v8412_v54 = vor.u32 %v9408_v17, %v8409_v19  ;;  %v9440_v0 = vld [vmem:[%s14051_s7 + $0x378] sm:$0xf0]  ;;  %v8580_v29 = vor.u32 %v9450_v6, %v8577_v27  ;;  %v9433_v12 = vld [vmem:[%s14051_s7 + $0x340] sm:$0xf0]  ;;  %v8549_v17 = vld [vmem:[%s14051_s7 + $0x3ac] sm:$0xf0] }
 0x3ef   :  { %5734 = vmatpush.bf16.msra.mxu1 %v8716_v15  ;;  %v8185_v15 = vld [vmem:[%s14051_s7 + $0xd4] sm:$0xf0]  ;;  %v9496_v5 = vld [vmem:[%s14051_s7 + $0x538] sm:$0xf0]  ;;  %v8359_v27 = vld [vmem:[%s14051_s7 + $0x210] sm:$0xf] }
 0x3f0   :  { %5689 = vmatmul.bf16.vlgmr.msrb.gmra.mxu2 %v13239_v62  ;;  %5714 = vmatpush.bf16.msra.mxu3 %v8100_v25  ;;  %v8664_v25 = vor.u32 %v9471_v20, %v8661_v1  ;;  %v8779_v20 = vld [vmem:[%s14051_s7 + $0x558] sm:$0xf]  ;;  %v9503_v1 = vld [vmem:[%s14051_s7 + $0x570] sm:$0xf0] }
 0x3f1   :  { %5753 = vmatpush.bf16.msra.mxu2 %v8772_v57  ;;  %v8188_v57 = vor.u32 %v9352_v63, %v8185_v15  ;;  %v8723_v63 = vld [vmem:[%s14051_s7 + $0x4e8] sm:$0xf]  ;;  %v9489_v15 = vld [vmem:[%s14051_s7 + $0x500] sm:$0xf0] }
 0x3f2   :  { %5726 = vmatpush.bf16.msra.mxu0 %v8352_v35  ;;  %v8548_v35 = vor.u32 %v9446_v45, %v8547_v51  ;;  %v9363_v51 = vld [vmem:[%s14051_s7 + $0x110] sm:$0xf0]  ;;  %v8724_v45 = vor.u32 %v9489_v15, %v8723_v63 }
 0x3f3   :  { %5735 = vmatpush.bf16.msra.mxu1 %v8688_v30  ;;  %5715 = vmatmul.bf16.vlgmr.msra.gmra.mxu3 %v13267_v14  ;;  %v8381_v30 = vld [vmem:[%s14051_s7 + $0x25c] sm:$0xf0] }
 0x3f4   :  { %5772 = vmatpush.bf16.msrb.mxu3 %v8524_v33  ;;  %v8633_v33 = vld [vmem:[%s14051_s7 + $0x454] sm:$0xf0]  ;;  %v8384_v49 = vor.u32 %v9401_v24, %v8381_v30  ;;  %v8695_v24 = vld [vmem:[%s14051_s7 + $0x4b0] sm:$0xf]  ;;  %v8780_v30 = vor.u32 %v9503_v1, %v8779_v20 }
 0x3f5   :  { %5759 = vmatpush.bf16.msrb.mxu2 %v8300_v31  ;;  %v9499_v31 = vld [vmem:[%s14051_s7 + $0x554] sm:$0xf]  ;;  %v8636_v41 = vor.u32 %v9464_v22, %v8633_v33  ;;  %v8191_v22 = vld [vmem:[%s14051_s7 + $0xc0] sm:$0xf]  ;;  %v9356_v33 = vld [vmem:[%s14051_s7 + $0xd8] sm:$0xf0] }
 0x3f6   :  { %5727 = vmatpush.bf16.msra.mxu0 %v8324_v50  ;;  %v8776_v28 = vor.u32 %v9499_v31, %v8773_v32  ;;  %v8304_v50 = vor.u32 %v9384_v38, %v8303_v37  ;;  %v8472_v32 = vor.u32 %v9426_v47, %v8471_v21  ;;  %v9419_v37 = vld [vmem:[%s14051_s7 + $0x2d0] sm:$0xf0]  ;;  %v8192_v38 = vor.u32 %v9356_v33, %v8191_v22 }
 0x3f7   :  { %5736 = vmatpush.bf16.msra.mxu1 %v8660_v42  ;;  %v9394_v42 = vld [vmem:[%s14051_s7 + $0x20c] sm:$0xf] }
 0x3f8   :  { %5773 = vmatpush.bf16.msrb.mxu3 %v8496_v46  ;;  %v8605_v46 = vld [vmem:[%s14051_s7 + $0x41c] sm:$0xf0] }
 0x3f9   :  { %5760 = vmatpush.bf16.msrb.mxu2 %v8272_v43  ;;  %5728 = vmatmul.bf16.vlgmr.msra.gmra.mxu0 %v13237_v60  ;;  %v8353_v43 = vld [vmem:[%s14051_s7 + $0x224] sm:$0xf0] }
 0x3fa   :  { %5785 = vmatpush.bf16.msrb.mxu0 %v8748_v56  ;;  %v9331_v56 = vld [vmem:[%s14051_s7 + $0x14] sm:$0xf]  ;;  %v8356_v58 = vor.u32 %v9394_v42, %v8353_v43  ;;  %v8415_v43 = vld [vmem:[%s14051_s7 + $0x280] sm:$0xf] }
 0x3fb   :  { %5737 = vmatpush.bf16.msra.mxu1 %v8632_v3  ;;  %v8608_v3 = vor.u32 %v9457_v44, %v8605_v46  ;;  %v8104_v23 = vor.u32 %v9331_v56, %v8101_v52  ;;  %v9412_v44 = vld [vmem:[%s14051_s7 + $0x298] sm:$0xf0]  ;;  %v8639_v46 = vld [vmem:[%s14051_s7 + $0x440] sm:$0xf]  ;;  %v9342_v56 = vld [vmem:[%s14051_s7 + $0x68] sm:$0xf0] }
 0x3fc   :  { %5774 = vmatpush.bf16.msrb.mxu3 %v8468_v2  ;;  %v8751_v2 = vld [vmem:[%s14051_s7 + $0x520] sm:$0xf]  ;;  %v8387_v52 = vld [vmem:[%s14051_s7 + $0x248] sm:$0xf] }
 0x3fd   :  { %5761 = vmatpush.bf16.msrb.mxu2 %v8244_v4  ;;  %v8527_v4 = vld [vmem:[%s14051_s7 + $0x360] sm:$0xf] }
 0x3fe   :  { %5786 = vmatpush.bf16.msrb.mxu0 %v8720_v7  ;;  %v8276_v7 = vor.u32 %v9377_v13, %v8275_v55  ;;  %v8528_v9 = vor.u32 %v9440_v0, %v8527_v4  ;;  %v8416_v55 = vor.u32 %v9412_v44, %v8415_v43  ;;  %v8135_v13 = vld [vmem:[%s14051_s7 + $0x50] sm:$0xf]  ;;  %v8388_v0 = vor.u32 %v9405_v59, %v8387_v52 }
 0x3ff   :  { %5738 = vmatpush.bf16.msra.mxu1 %v8604_v10  ;;  %v9370_v10 = vld [vmem:[%s14051_s7 + $0x148] sm:$0xf0]  ;;  %v8136_v4 = vor.u32 %v9342_v56, %v8135_v13 }
 0x400   :  { %5775 = vmatpush.bf16.msrb.mxu3 %v8440_v11  ;;  %8785 = vmatmul.msk.bf16.vlgmr.msra.gmra.mxu2 %vm4200_vm0, %v13275_v18  ;;  %v8499_v11 = vld [vmem:[%s14051_s7 + $0x328] sm:$0xf]  ;;  %v8248_v19 = vor.u32 %v9370_v10, %v8247_v34 }
 0x401   :  { %5762 = vmatpush.bf16.msrb.mxu2 %v8216_v26  ;;  %v8752_v26 = vor.u32 %v9496_v5, %v8751_v2  ;;  %v8107_v2 = vld [vmem:[%s14051_s7 + $0x18] sm:$0xf]  ;;  %v9335_v5 = vld [vmem:[%s14051_s7 + $0x30] sm:$0xf0] }
 0x402   :  { %5787 = vmatpush.bf16.msrb.mxu0 %v8692_v16  ;;  %v9443_v16 = vld [vmem:[%s14051_s7 + $0x394] sm:$0xf] }
 0x403   :  { %5739 = vmatpush.bf16.msra.mxu1 %v8576_v48  ;;  %v8500_v48 = vor.u32 %v9433_v12, %v8499_v11  ;;  %v8555_v11 = vld [vmem:[%s14051_s7 + $0x398] sm:$0xf]  ;;  %v9447_v12 = vld [vmem:[%s14051_s7 + $0x3b0] sm:$0xf0] }
 0x404   :  { %5776 = vmatpush.bf16.msrb.mxu3 %v8412_v54  ;;  %v8552_v54 = vor.u32 %v9443_v16, %v8549_v17  ;;  %v8556_v15 = vor.u32 %v9447_v12, %v8555_v11 }
 0x405   :  { %5763 = vmatpush.bf16.msrb.mxu2 %v8188_v57  ;;  %v8219_v57 = vld [vmem:[%s14051_s7 + $0xf8] sm:$0xf] }
 0x406   :  { %5788 = vmatpush.bf16.msrb.mxu0 %v8664_v25  ;;  %v9482_v25 = vld [vmem:[%s14051_s7 + $0x4c8] sm:$0xf0]  ;;  %v8220_v31 = vor.u32 %v9363_v51, %v8219_v57 }
 0x407   :  { %5740 = vmatpush.bf16.msra.mxu1 %v8548_v35  ;;  %v8696_v35 = vor.u32 %v9482_v25, %v8695_v24 }
 0x408   :  { %5777 = vmatpush.bf16.msrb.mxu3 %v8384_v49  ;;  %v8667_v49 = vld [vmem:[%s14051_s7 + $0x478] sm:$0xf] }
 0x409   :  { %5764 = vmatpush.bf16.msrb.mxu2 %v8160_v36  ;;  %v8443_v36 = vld [vmem:[%s14051_s7 + $0x2b8] sm:$0xf] }
 0x40a   :  { %5789 = vmatpush.bf16.msrb.mxu0 %v8636_v41  ;;  %5741 = vmatmul.bf16.vlgmr.msra.gmra.mxu1 %v13239_v62  ;;  %v8444_v39 = vor.u32 %v9419_v37, %v8443_v36  ;;  %v9349_v41 = vld [vmem:[%s14051_s7 + $0xa0] sm:$0xf0] }
 0x40b   :  { %5805 = vmatpush.bf16.msrb.mxu1 %v8776_v28  ;;  %v9475_v28 = vld [vmem:[%s14051_s7 + $0x490] sm:$0xf0] }
 0x40c   :  { %5778 = vmatpush.bf16.msrb.mxu3 %v8356_v58  ;;  %v8668_v42 = vor.u32 %v9475_v28, %v8667_v49 }
 0x40d   :  { %5765 = vmatpush.bf16.msrb.mxu2 %v8132_v53  ;;  %v8164_v53 = vor.u32 %v9349_v41, %v8163_v40 }
 0x40e   :  { %5790 = vmatpush.bf16.msrb.mxu0 %v8608_v3  ;;  %v9461_v3 = vld [vmem:[%s14051_s7 + $0x420] sm:$0xf0] }
 0x40f   :  { %5811 = vmatpush.bf16.msra.mxu1 %v8304_v50  ;;  %v9468_v50 = vld [vmem:[%s14051_s7 + $0x458] sm:$0xf0]  ;;  %v8612_v6 = vor.u32 %v9461_v3, %v8611_v61 }
 0x410   :  { %5779 = vmatpush.bf16.msrb.mxu3 %v8328_v8  ;;  %v8640_v58 = vor.u32 %v9468_v50, %v8639_v46  ;;  %v9454_v8 = vld [vmem:[%s14051_s7 + $0x3e8] sm:$0xf0] }
 0x411   :  { %5766 = vmatpush.bf16.msrb.mxu2 %v8104_v23  ;;  %v8583_v23 = vld [vmem:[%s14051_s7 + $0x3d0] sm:$0xf] }
 0x412   :  { %5791 = vmatpush.bf16.msrb.mxu0 %v8580_v29  ;;  %v8584_v10 = vor.u32 %v9454_v8, %v8583_v23  ;;  %v9391_v29 = vld [vmem:[%s14051_s7 + $0x1f0] sm:$0xf0] }
 0x413   :  { %5812 = vmatpush.bf16.msra.mxu1 %v8276_v7  ;;  %5780 = vmatmul.bf16.vlgmr.msrb.gmra.mxu3 %v13237_v60  ;;  %v9398_v7 = vld [vmem:[%s14051_s7 + $0x228] sm:$0xf0] }
 0x414   :  { %5837 = vmatpush.bf16.msra.mxu3 %v8752_v26  ;;  %5767 = vmatmul.bf16.vlgmr.msrb.gmra.mxu2 %v13267_v14  ;;  %v8360_v34 = vor.u32 %v9398_v7, %v8359_v27  ;;  %v8331_v26 = vld [vmem:[%s14051_s7 + $0x1d8] sm:$0xf] }
 0x415   :  { %5824 = vmatpush.bf16.msra.mxu2 %v8528_v9  ;;  %v8108_v9 = vor.u32 %v9335_v5, %v8107_v2  ;;  %v8332_v63 = vor.u32 %v9391_v29, %v8331_v26 }
 0x416   :  { %5792 = vmatpush.bf16.msrb.mxu0 %v8552_v54 }
 0x417   :  { %5813 = vmatpush.bf16.msra.mxu1 %v8248_v19  ;;  %v14021_v19 = vld [vmem:[%s14052_s8] sm:$0x7f] }
 0x418   :  { %5838 = vmatpush.bf16.msra.mxu3 %v8724_v45  ;;  %v4582_v1 = vperm.slane %v14021_v19, 0  ;;  %v4584_v46 = vperm.slane %v14021_v19, 2  ;;  %v4585_v56 = vperm.slane %v14021_v19, 3 }
 0x419   :  { %5825 = vmatpush.bf16.msra.mxu2 %v8500_v48  ;;  %5793 = vmatmul.bf16.vlgmr.msrb.gmra.mxu0 %v13239_v62 }
 0x41a   :  { %5857 = vmatpush.bf16.msra.mxu0 %v8780_v30  ;;  %8786 = vmatmul.msk.bf16.vlgmr.msrb.gmra.mxu1 %vm4200_vm0, %v13275_v18 }
 0x41b   :  { %5814 = vmatpush.bf16.msra.mxu1 %v8220_v31 }
 0x41c   :  { %5839 = vmatpush.bf16.msra.mxu3 %v8696_v35 }
 0x41d   :  { %5826 = vmatpush.bf16.msra.mxu2 %v8472_v32 }
 0x41f   :  { %5815 = vmatpush.bf16.msra.mxu1 %v8192_v38 }
 0x420   :  { %5840 = vmatpush.bf16.msra.mxu3 %v8668_v42  ;;  %v4583_v42 = vperm.slane %v14021_v19, 1 }
 0x421   :  { %5827 = vmatpush.bf16.msra.mxu2 %v8444_v39 }
 0x423   :  { %5816 = vmatpush.bf16.msra.mxu1 %v8164_v53 }
 0x424   :  { %5841 = vmatpush.bf16.msra.mxu3 %v8640_v58 }
 0x425   :  { %5828 = vmatpush.bf16.msra.mxu2 %v8416_v55 }
 0x426   :  { %v5521_v16 = vpop.f32.mrf.mxu0 }
 0x427   :  { %5817 = vmatpush.bf16.msra.mxu1 %v8136_v4  ;;  %v5534_v17 = vpop.f32.mrf.mxu1 }
 0x428   :  { %5842 = vmatpush.bf16.msra.mxu3 %v8612_v6 }
 0x429   :  { %5829 = vmatpush.bf16.msra.mxu2 %v8388_v0  ;;  %8787 = vmatmul.msk.bf16.vlgmr.msra.gmra.mxu0 %vm4200_vm0, %v13275_v18 }
 0x42b   :  { %5818 = vmatpush.bf16.msra.mxu1 %v8108_v9 }
 0x42c   :  { %5843 = vmatpush.bf16.msra.mxu3 %v8584_v10 }
 0x42d   :  { %5830 = vmatpush.bf16.msra.mxu2 %v8360_v34 }
 0x42e   :  { %5819 = vmatmul.bf16.vlgmr.msra.gmra.mxu1 %v13267_v14  ;;  %v5523_v20 = vpop.f32.mrf.mxu0 }
 0x42f   :  { %v5536_v18 = vpop.f32.mrf.mxu1 }
 0x430   :  { %5844 = vmatpush.bf16.msra.mxu3 %v8556_v15 }
 0x431   :  { %5831 = vmatpush.bf16.msra.mxu2 %v8332_v63 }
 0x432   :  { %v5508_v48 = vpop.f32.mrf.mxu3 }
 0x433   :  { %5845 = vmatmul.bf16.vlgmr.msra.gmra.mxu3 %v13239_v62  ;;  %v5509_v57 = vadd.f32 %v5508_v48, %v4582_v1  ;;  %v5547_v14 = vpop.f32.mrf.mxu2 }
 0x434   :  { %5832 = vmatmul.bf16.vlgmr.msra.gmra.mxu2 %v13237_v60 }
 0x435   :  { %v5522_v51 = vadd.f32 %v5521_v16, %v5509_v57 }
 0x436   :  { %v5586_v45 = vpop.f32.mrf.mxu0 }
 0x437   :  { %v5535_v60 = vadd.f32 %v5534_v17, %v5522_v51  ;;  %v5599_v62 = vpop.f32.mrf.mxu1 }
 0x439   :  { %v5548_v54 = vadd.f32 %v5547_v14, %v5535_v60 }
 0x43a   :  { %v5510_v21 = vpop.f32.mrf.mxu3 }
 0x43b   :  { %v5549_v47 = vpop.f32.mrf.mxu2 }
 0x43e   :  { %v5588_v24 = vpop.f32.mrf.mxu0 }
 0x43f   :  { %v5601_v25 = vpop.f32.mrf.mxu1  ;;  %v4586_v24 = vperm.slane %v14021_v19, 4 }
 0x442   :  { %v5573_v30 = vpop.f32.mrf.mxu3 }
 0x443   :  { %v5560_v31 = vpop.f32.mrf.mxu2 }
 0x444   :  { %v5561_v44 = vadd.f32 %v5560_v31, %v4583_v42 }
 0x446   :  { %v5651_v32 = vpop.f32.mrf.mxu0  ;;  %v5574_v53 = vadd.f32 %v5573_v30, %v5561_v44  ;;  %v4588_v30 = vperm.slane %v14021_v19, 6 }
 0x447   :  { %v5612_v22 = vpop.f32.mrf.mxu1 }
 0x448   :  { %v5613_v55 = vadd.f32 %v5612_v22, %v4584_v46  ;;  %v5587_v52 = vadd.f32 %v5586_v45, %v5574_v53 }
 0x44a   :  { %v5575_v33 = vpop.f32.mrf.mxu3  ;;  %v5600_v4 = vadd.f32 %v5599_v62, %v5587_v52  ;;  %v4587_v62 = vperm.slane %v14021_v19, 5 }
 0x44b   :  { %v5562_v35 = vpop.f32.mrf.mxu2 }
 0x44c   :  { %v5872_v27 = vrot.slane %v5600_v4, 6 }
 0x44e   :  { %v5653_v36 = vpop.f32.mrf.mxu0  ;;  %v5877_v10 = vsel %vm4307_vm1, %v5548_v54, %v5872_v27 }
 0x44f   :  { %v5614_v37 = vpop.f32.mrf.mxu1 }
 0x452   :  { %v5638_v49 = vpop.f32.mrf.mxu3 }
 0x453   :  { %v5625_v28 = vpop.f32.mrf.mxu2 }
 0x454   :  { %v5626_v13 = vadd.f32 %v5625_v28, %v5613_v55 }
 0x456   :  { %v5664_v38 = vpop.f32.mrf.mxu0  ;;  %v5639_v61 = vadd.f32 %v5638_v49, %v5626_v13 }
 0x457   :  { %v5665_v3 = vadd.f32 %v5664_v38, %v4585_v56 }
 0x458   :  { %v5652_v5 = vadd.f32 %v5651_v32, %v5639_v61 }
 0x45a   :  { %v5640_v39 = vpop.f32.mrf.mxu3  ;;  %v5873_v9 = vrot.slane %v5652_v5, 4 }
 0x45b   :  { %v5627_v40 = vpop.f32.mrf.mxu2 }
 0x45e   :  { %v5666_v41 = vpop.f32.mrf.mxu0 }
 0x462   :  { %v5703_v43 = vpop.f32.mrf.mxu3 }
 0x467   :  { %v5677_v50 = vpop.f32.mrf.mxu1 }
 0x468   :  { %v5678_v0 = vadd.f32 %v5677_v50, %v5665_v3 }
 0x46a   :  { %v5705_v58 = vpop.f32.mrf.mxu3 }
 0x46f   :  { %v5679_v59 = vpop.f32.mrf.mxu1 }
 0x473   :  { %v5690_v2 = vpop.f32.mrf.mxu2 }
 0x474   :  { %v5691_v6 = vadd.f32 %v5690_v2, %v5678_v0 }
 0x476   :  { %v5704_v7 = vadd.f32 %v5703_v43, %v5691_v6  ;;  %v5716_v23 = vpop.f32.mrf.mxu3  ;;  %v5729_v8 = vpop.f32.mrf.mxu0 }
 0x477   :  { %v5717_v32 = vadd.f32 %v5716_v23, %v4586_v24 }
 0x478   :  { %v5874_v34 = vrot.slane %v5704_v7, 2 }
 0x479   :  { %v5730_v36 = vadd.f32 %v5729_v8, %v5717_v32 }
 0x47a   :  { %v5879_v26 = vsel %vm5878_vm4, %v5873_v9, %v5874_v34 }
 0x47b   :  { %v5881_v29 = vsel %vm5880_vm5, %v5877_v10, %v5879_v26  ;;  %v5692_v11 = vpop.f32.mrf.mxu2 }
 0x47c   :  { %5886 = vst [vmem:[%s14054_s10] sm:$0xff] %v5881_v29 }
 0x47e   :  { %v5718_v12 = vpop.f32.mrf.mxu3  ;;  %v5731_v63 = vpop.f32.mrf.mxu0 }
 0x483   :  { %v5755_v15 = vpop.f32.mrf.mxu2 }
 0x487   :  { %v5742_v16 = vpop.f32.mrf.mxu1 }
 0x488   :  { %v5743_v39 = vadd.f32 %v5742_v16, %v5730_v36 }
 0x48a   :  { %v5756_v43 = vadd.f32 %v5755_v15, %v5743_v39 }
 0x48b   :  { %v5757_v17 = vpop.f32.mrf.mxu2 }
 0x48f   :  { %v5744_v20 = vpop.f32.mrf.mxu1 }
 0x496   :  { %v5794_v1 = vpop.f32.mrf.mxu0  ;;  %v5781_v48 = vpop.f32.mrf.mxu3 }
 0x497   :  { %v5768_v18 = vpop.f32.mrf.mxu2  ;;  %v5807_v57 = vpop.f32.mrf.mxu1 }
 0x498   :  { %v5769_v21 = vadd.f32 %v5768_v18, %v4587_v62 }
 0x49a   :  { %v5782_v25 = vadd.f32 %v5781_v48, %v5769_v21 }
 0x49c   :  { %v5795_v22 = vadd.f32 %v5794_v1, %v5782_v25 }
 0x49e   :  { %v5796_v51 = vpop.f32.mrf.mxu0  ;;  %v5783_v45 = vpop.f32.mrf.mxu3  ;;  %v5808_v37 = vadd.f32 %v5807_v57, %v5795_v22 }
 0x49f   :  { %v5770_v14 = vpop.f32.mrf.mxu2  ;;  %v5809_v60 = vpop.f32.mrf.mxu1 }
 0x4a0   :  { %v5875_v41 = vrot.slane %v5808_v37, 6 }
 0x4a2   :  { %v5882_v44 = vsel %vm4307_vm1, %v5756_v43, %v5875_v41 }
 0x4a6   :  { %v5859_v54 = vpop.f32.mrf.mxu0 }
 0x4ab   :  { %v5820_v47 = vpop.f32.mrf.mxu1 }
 0x4ac   :  { %v5821_v35 = vadd.f32 %v5820_v47, %v4588_v30 }
 0x4ae   :  { %v5861_v31 = vpop.f32.mrf.mxu0 }
 0x4b3   :  { %v5822_v33 = vpop.f32.mrf.mxu1 }
 0x4b6   :  { %v5846_v38 = vpop.f32.mrf.mxu3 }
 0x4b7   :  { %v5833_v49 = vpop.f32.mrf.mxu2 }
 0x4b8   :  { %v5834_v28 = vadd.f32 %v5833_v49, %v5821_v35 }
 0x4ba   :  { %v5847_v40 = vadd.f32 %v5846_v38, %v5834_v28 }
 0x4bc   :  { %v5860_v42 = vadd.f32 %v5859_v54, %v5847_v40 }
 0x4be   :  { %v5876_v19 = vrot.slane %v5860_v42, 4  ;;  %v5848_v53 = vpop.f32.mrf.mxu3 }
 0x4bf   :  { %v5835_v46 = vpop.f32.mrf.mxu2 }
 0x4c0   :  { %v5883_v50 = vsel %vm5880_vm5, %v5882_v44, %v5876_v19 }
 0x4c1   :  { %5891 = vst.msk [vmem:[%s14054_s10 + $0x8] sm:$0x3f] %vm5890_vm9, %v5883_v50 }
 0x4c2   :  { %9556 = dma.done.wait [#allocation3], 32  }
 0x4c3   :  { %9557 = vsyncadd [#allocation3], 4294967264 }
 0x4c4   :  { %5911 = vsyncpa [#allocation3], 1 }

</bundles_post_ra>
